<compile_context>
chip_gen: v5e
topology: v5e:2x2
jax: 0.10.0
libtpu: 0.0.40
codegen_flags: <defaults>
</compile_context>

<pallas_src>
import jax
import jax.numpy as jnp
from jax.experimental import pallas as pl
from jax.experimental.pallas import tpu as pltpu

EPS = 1e-5
H1, H2 = 2048, 512  # hidden sizes fixed by the module


def _round_up(v, m):
    return (v + m - 1) // m * m


def _bn_relu(h, gamma, beta):
    # Training-mode BatchNorm1d (batch stats, biased variance) folded into one
    # scale/shift, then ReLU.  Single pass over h: var = E[h^2] - E[h]^2.
    # The preceding Linear bias cancels exactly under batch-stat BN, so it is
    # never added upstream.
    mu = jnp.mean(h, axis=0, keepdims=True)
    var = jnp.mean(h * h, axis=0, keepdims=True) - mu * mu
    scale = gamma * jax.lax.rsqrt(var + EPS)          # rsqrt -> EUP slot
    shift = beta - mu * scale
    return jnp.maximum(h * scale + shift, 0.0)


def mlp_kernel(x_ref,                              # (nk, B, tk) f32, resident
               w1_ref,                             # (tk, H1)    bf16, streamed over K
               g1_ref, be1_ref,                    # (1, H1)     f32
               w2_ref,                             # (H1, H2)    bf16, resident
               g2_ref, be2_ref,                    # (1, H2)     f32
               w3_ref, b3_ref,                     # (1, H2), (1, 1) f32
               out_ref, e_ref,                     # (B, 1), (B, H2) f32
               acc_ref):                           # (B, H1) f32 scratch
    k = pl.program_id(0)
    nk = pl.num_programs(0)

    @pl.when(k == 0)
    def _():
        acc_ref[...] = jnp.zeros_like(acc_ref)

    # layer1 partial matmul: w1 is streamed over the contraction (K) grid axis;
    # x is resident, indexed along its leading axis and cast to bf16 on the VPU.
    x_tile = x_ref[k].astype(jnp.bfloat16)          # (B, tk)
    acc_ref[...] += jnp.dot(x_tile, w1_ref[...],
                            preferred_element_type=jnp.float32)

    @pl.when(k == nk - 1)
    def _():
        # layer1 epilogue: BN(2048) + ReLU (f32).  b1 cancels under batch-stat BN.
        h1 = _bn_relu(acc_ref[...], g1_ref[...], be1_ref[...])

        # layer2: Linear(2048, 512) (bf16 MXU, f32 acc) + BN(512) + ReLU.
        # b2 cancels under batch-stat BN.
        h2 = jnp.dot(h1.astype(jnp.bfloat16), w2_ref[...],
                     preferred_element_type=jnp.float32)
        h2 = _bn_relu(h2, g2_ref[...], be2_ref[...])

        # embedding output
        e_ref[...] = h2

        # layer3: Linear(512, 1) as a VPU multiply + lane reduction.
        out_ref[...] = jnp.sum(h2 * w3_ref[...], axis=-1,
                               keepdims=True) + b3_ref[...]


def init_params(key, dim):
    ks = jax.random.split(key, 6)

    def linear_init(kw, kb, fan_in, fan_out):
        bound = 1.0 / jnp.sqrt(fan_in)
        w = jax.random.uniform(kw, (fan_in, fan_out), jnp.float32, -bound, bound)
        b = jax.random.uniform(kb, (1, fan_out), jnp.float32, -bound, bound)
        return w, b

    w1, b1 = linear_init(ks[0], ks[1], dim, H1)
    w2, b2 = linear_init(ks[2], ks[3], H1, H2)
    w3, b3 = linear_init(ks[4], ks[5], H2, 1)

    # BatchNorm1d affine params at PyTorch init values.
    g1, be1 = jnp.ones((1, H1), jnp.float32), jnp.zeros((1, H1), jnp.float32)
    g2, be2 = jnp.ones((1, H2), jnp.float32), jnp.zeros((1, H2), jnp.float32)

    return dict(
        # big matmul weights stored in bf16, as (in, out) = torch W.T
        w1=w1.astype(jnp.bfloat16),
        w2=w2.astype(jnp.bfloat16),
        # layer3 kept as a (1, 512) f32 row (matches torch Linear(512,1).weight)
        w3=w3.reshape(1, H2),
        # b1/b2 are kept for module parity (and the reference) but are a no-op
        # in the kernel: batch-stat BatchNorm cancels the preceding bias.
        b1=b1, b2=b2, b3=b3.reshape(1, 1),
        g1=g1, be1=be1, g2=g2, be2=be2)


def mlp_forward(x, params, last=False, tk=1024):
    B, dim = x.shape
    tk = min(tk, dim)
    assert dim % tk == 0, "input dim must be divisible by the K tile"
    assert tk % 128 == 0, "K tile must be lane-aligned (multiple of 128)"
    nk = dim // tk

    # Resident layout for x: (nk, B, tk); one cheap wrapper-side reshuffle
    # (B*dim*4 bytes) instead of a per-step streamed DMA.
    x_res = x.reshape(B, nk, tk).transpose(1, 0, 2)

    in_specs = [
        pl.BlockSpec((nk, B, tk), lambda k: (0, 0, 0)),  # x  : resident
        pl.BlockSpec((tk, H1), lambda k: (k, 0)),        # w1 : streamed over K
        pl.BlockSpec((1, H1), lambda k: (0, 0)),         # g1
        pl.BlockSpec((1, H1), lambda k: (0, 0)),         # be1
        pl.BlockSpec((H1, H2), lambda k: (0, 0)),        # w2 : resident
        pl.BlockSpec((1, H2), lambda k: (0, 0)),         # g2
        pl.BlockSpec((1, H2), lambda k: (0, 0)),         # be2
        pl.BlockSpec((1, H2), lambda k: (0, 0)),         # w3 row
        pl.BlockSpec((1, 1), lambda k: (0, 0)),          # b3
    ]
    out_specs = (
        pl.BlockSpec((B, 1), lambda k: (0, 0)),          # out
        pl.BlockSpec((B, H2), lambda k: (0, 0)),         # e
    )

    # VMEM budget.  Constant-index (resident) blocks still get the default 2
    # pipeline buffers, and (1, N)/(1, 1) f32 blocks pad to (8, 128) tiles.
    Bp = _round_up(B, 8)
    vmem_bytes = (
        2 * tk * H1 * 2                               # streamed w1 tile (bf16), x2 buffers
        + 2 * Bp * dim * 4                            # resident x (f32), x2 buffers
        + 2 * H1 * H2 * 2                             # resident w2 (bf16), x2 buffers
        + Bp * H1 * 4                                 # f32 layer-1 accumulator scratch
        + 2 * (2 * 8 * _round_up(H1, 128) * 4         # g1/be1 padded, x2 buffers
               + 3 * 8 * _round_up(H2, 128) * 4       # g2/be2/w3 padded, x2 buffers
               + 8 * 128 * 4)                         # b3 padded
        + 2 * (Bp * 128 * 4 + Bp * H2 * 4)            # outputs (out padded, e), x2 buffers
        + 4 * Bp * H1 * 4 + 4 * Bp * H2 * 4           # epilogue temporaries headroom
        + (4 << 20)                                   # extra headroom
    )
    vmem_bytes = min(int(vmem_bytes), 64 << 20)       # stay under v7x physical VMEM

    out, e = pl.pallas_call(
        mlp_kernel,
        grid=(nk,),
        out_shape=(jax.ShapeDtypeStruct((B, 1), jnp.float32),
                   jax.ShapeDtypeStruct((B, H2), jnp.float32)),
        in_specs=in_specs,
        out_specs=out_specs,
        scratch_shapes=[pltpu.VMEM((B, H1), jnp.float32)],
        compiler_params=pltpu.CompilerParams(
            dimension_semantics=("arbitrary",),       # K is a reduction axis
            vmem_limit_bytes=vmem_bytes,
        ),
    )(x_res,
      params["w1"], params["g1"], params["be1"],
      params["w2"], params["g2"], params["be2"],
      params["w3"], params["b3"])

    if last:
        return out, e
    return out


def mlp_reference(x, params):
    # Pure-JAX reference following the same numerical recipe (bf16 matmul
    # operands upcast to f32, f32 accumulation / BN math), *including* the
    # Linear biases b1/b2 — verifying that they cancel under batch-stat BN.
    def bn_relu(h, g, b):
        mu = h.mean(0, keepdims=True)
        var = ((h - mu) ** 2).mean(0, keepdims=True)
        return jnp.maximum((h - mu) / jnp.sqrt(var + EPS) * g + b, 0.0)

    xf = x.astype(jnp.bfloat16).astype(jnp.float32)
    w1 = params["w1"].astype(jnp.float32)
    w2 = params["w2"].astype(jnp.float32)

    h1 = bn_relu(xf @ w1 + params["b1"], params["g1"], params["be1"])
    h1b = h1.astype(jnp.bfloat16).astype(jnp.float32)
    h2 = bn_relu(h1b @ w2 + params["b2"], params["g2"], params["be2"])
    out = (h2 * params["w3"]).sum(-1, keepdims=True) + params["b3"]
    return out, h2


if __name__ == "__main__":
    # Small demo shapes (module default is dim=4096 -> 2048 -> 512 -> 1).
    # dim=1024 with tk=512 exercises a 2-step K grid + accumulator epilogue.
    B, dim, tk = 8, 1024, 512
    key = jax.random.PRNGKey(0)
    kx, kp = jax.random.split(key)
    x = jax.random.normal(kx, (B, dim), jnp.float32)
    params = init_params(kp, dim)

    out, e = mlp_forward(x, params, last=True, tk=tk)
    out = jax.block_until_ready(out)
    e = jax.block_until_ready(e)

    ref_out, ref_e = mlp_reference(x, params)
    assert out.shape == (B, 1) and e.shape == (B, H2)
    assert jnp.allclose(out, ref_out, atol=2e-2, rtol=2e-2), (
        float(jnp.max(jnp.abs(out - ref_out))))
    assert jnp.allclose(e, ref_e, atol=2e-2, rtol=2e-2), (
        float(jnp.max(jnp.abs(e - ref_e))))

    print("KERNEL_OK")
</pallas_src>

<mosaic_0001>
module attributes {stable_mosaic.version = 11 : i64} {
  func.func @mlp_kernel(%arg0: i32, %arg1: memref<2x8x512xf32, #tpu.memory_space<vmem>>, %arg2: memref<512x2048xbf16, #tpu.memory_space<vmem>>, %arg3: memref<1x2048xf32, #tpu.memory_space<vmem>>, %arg4: memref<1x2048xf32, #tpu.memory_space<vmem>>, %arg5: memref<2048x512xbf16, #tpu.memory_space<vmem>>, %arg6: memref<1x512xf32, #tpu.memory_space<vmem>>, %arg7: memref<1x512xf32, #tpu.memory_space<vmem>>, %arg8: memref<1x512xf32, #tpu.memory_space<vmem>>, %arg9: memref<1x1xf32, #tpu.memory_space<vmem>>, %arg10: memref<8x1xf32, #tpu.memory_space<vmem>>, %arg11: memref<8x512xf32, #tpu.memory_space<vmem>>, %arg12: memref<8x2048xf32, #tpu.memory_space<vmem>>) attributes {dimension_semantics = [#tpu.dimension_semantics<arbitrary>], iteration_bounds = array<i64: 2>, scalar_prefetch = 0 : i64, scratch_operands = 1 : i64, tpu.core_type = #tpu.core_type<tc>, window_params = [{pipeline_mode = #tpu.pipeline_mode<synchronous>, transform_indices = @transform_0, window_bounds = array<i64: 2, 8, 512>}, {transform_indices = @transform_1, window_bounds = array<i64: 512, 2048>}, {pipeline_mode = #tpu.pipeline_mode<synchronous>, transform_indices = @transform_2, window_bounds = array<i64: 1, 2048>}, {pipeline_mode = #tpu.pipeline_mode<synchronous>, transform_indices = @transform_3, window_bounds = array<i64: 1, 2048>}, {pipeline_mode = #tpu.pipeline_mode<synchronous>, transform_indices = @transform_4, window_bounds = array<i64: 2048, 512>}, {pipeline_mode = #tpu.pipeline_mode<synchronous>, transform_indices = @transform_5, window_bounds = array<i64: 1, 512>}, {pipeline_mode = #tpu.pipeline_mode<synchronous>, transform_indices = @transform_6, window_bounds = array<i64: 1, 512>}, {pipeline_mode = #tpu.pipeline_mode<synchronous>, transform_indices = @transform_7, window_bounds = array<i64: 1, 512>}, {pipeline_mode = #tpu.pipeline_mode<synchronous>, transform_indices = @transform_8, window_bounds = array<i64: 1, 1>}, {pipeline_mode = #tpu.pipeline_mode<synchronous>, transform_indices = @transform_9, window_bounds = array<i64: 8, 1>}, {pipeline_mode = #tpu.pipeline_mode<synchronous>, transform_indices = @transform_10, window_bounds = array<i64: 8, 512>}]} {
    %c0_i32 = arith.constant 0 : i32
    %0 = arith.cmpi eq, %arg0, %c0_i32 : i32
    %1 = arith.extui %0 : i1 to i32
    %c0_i32_0 = arith.constant 0 : i32
    %2 = arith.cmpi ne, %1, %c0_i32_0 : i32
    scf.if %2 {
      %cst_9 = arith.constant 0.000000e+00 : f32
      %15 = vector.broadcast %cst_9 : f32 to vector<8x2048xf32>
      %c0_10 = arith.constant 0 : index
      %c0_11 = arith.constant 0 : index
      %16 = vector.load %arg12[%c0_10, %c0_11] : memref<8x2048xf32, #tpu.memory_space<vmem>>, vector<8x2048xf32>
      tpu.vector_store %arg12[%c0_10, %c0_11], %15 {strides = array<i32>} : memref<8x2048xf32, #tpu.memory_space<vmem>>, vector<8x2048xf32>,
    } else {
    }
    %3 = arith.index_cast %arg0 : i32 to index
    %c0 = arith.constant 0 : index
    %c0_1 = arith.constant 0 : index
    %4 = vector.load %arg1[%3, %c0, %c0_1] : memref<2x8x512xf32, #tpu.memory_space<vmem>>, vector<1x8x512xf32>
    %5 = vector.shape_cast %4 : vector<1x8x512xf32> to vector<8x512xf32>
    %6 = arith.truncf %5 : vector<8x512xf32> to vector<8x512xbf16>
    %c0_2 = arith.constant 0 : index
    %c0_3 = arith.constant 0 : index
    %7 = vector.load %arg12[%c0_2, %c0_3] : memref<8x2048xf32, #tpu.memory_space<vmem>>, vector<8x2048xf32>
    %c0_4 = arith.constant 0 : index
    %c0_5 = arith.constant 0 : index
    %8 = vector.load %arg2[%c0_4, %c0_5] : memref<512x2048xbf16, #tpu.memory_space<vmem>>, vector<512x2048xbf16>
    %cst = arith.constant dense<0.000000e+00> : vector<8x2048xf32>
    %9 = tpu.matmul %6, %8, %cst {dimension_numbers = #tpu.dot_dimension_numbers<[1], [0], [0], [1], [0, 0, 1, 1], [], []>} : vector<8x512xbf16>, vector<512x2048xbf16>, vector<8x2048xf32> -> vector<8x2048xf32>
    %10 = arith.addf %7, %9 : vector<8x2048xf32>
    %c0_6 = arith.constant 0 : index
    %c0_7 = arith.constant 0 : index
    %11 = vector.load %arg12[%c0_6, %c0_7] : memref<8x2048xf32, #tpu.memory_space<vmem>>, vector<8x2048xf32>
    tpu.vector_store %arg12[%c0_6, %c0_7], %10 {strides = array<i32>} : memref<8x2048xf32, #tpu.memory_space<vmem>>, vector<8x2048xf32>,
    %c1_i32 = arith.constant 1 : i32
    %12 = arith.cmpi eq, %arg0, %c1_i32 : i32
    %13 = arith.extui %12 : i1 to i32
    %c0_i32_8 = arith.constant 0 : i32
    %14 = arith.cmpi ne, %13, %c0_i32_8 : i32
    scf.if %14 {
      %c0_9 = arith.constant 0 : index
      %c0_10 = arith.constant 0 : index
      %15 = vector.load %arg12[%c0_9, %c0_10] : memref<8x2048xf32, #tpu.memory_space<vmem>>, vector<8x2048xf32>
      %c0_11 = arith.constant 0 : index
      %c0_12 = arith.constant 0 : index
      %16 = vector.load %arg3[%c0_11, %c0_12] : memref<1x2048xf32, #tpu.memory_space<vmem>>, vector<1x2048xf32>
      %c0_13 = arith.constant 0 : index
      %c0_14 = arith.constant 0 : index
      %17 = vector.load %arg4[%c0_13, %c0_14] : memref<1x2048xf32, #tpu.memory_space<vmem>>, vector<1x2048xf32>
      %cst_15 = arith.constant dense<0.000000e+00> : vector<2048xf32>
      %18 = vector.multi_reduction <add>, %15, %cst_15 [0] : vector<8x2048xf32> to vector<2048xf32>
      %19 = vector.shape_cast %18 : vector<2048xf32> to vector<1x2048xf32>
      %cst_16 = arith.constant 8.000000e+00 : f32
      %20 = vector.broadcast %cst_16 : f32 to vector<1x2048xf32>
      %21 = arith.divf %19, %20 : vector<1x2048xf32>
      %22 = arith.mulf %15, %15 : vector<8x2048xf32>
      %cst_17 = arith.constant dense<0.000000e+00> : vector<2048xf32>
      %23 = vector.multi_reduction <add>, %22, %cst_17 [0] : vector<8x2048xf32> to vector<2048xf32>
      %24 = vector.shape_cast %23 : vector<2048xf32> to vector<1x2048xf32>
      %cst_18 = arith.constant 8.000000e+00 : f32
      %25 = vector.broadcast %cst_18 : f32 to vector<1x2048xf32>
      %26 = arith.divf %24, %25 : vector<1x2048xf32>
      %27 = arith.mulf %21, %21 : vector<1x2048xf32>
      %28 = arith.subf %26, %27 : vector<1x2048xf32>
      %cst_19 = arith.constant 9.99999974E-6 : f32
      %29 = vector.broadcast %cst_19 : f32 to vector<1x2048xf32>
      %30 = arith.addf %28, %29 : vector<1x2048xf32>
      %31 = math.rsqrt %30 : vector<1x2048xf32>
      %32 = arith.mulf %16, %31 : vector<1x2048xf32>
      %33 = arith.mulf %21, %32 : vector<1x2048xf32>
      %34 = arith.subf %17, %33 : vector<1x2048xf32>
      %35 = vector.broadcast %32 : vector<1x2048xf32> to vector<8x2048xf32>
      %36 = arith.mulf %15, %35 : vector<8x2048xf32>
      %37 = vector.broadcast %34 : vector<1x2048xf32> to vector<8x2048xf32>
      %38 = arith.addf %36, %37 : vector<8x2048xf32>
      %cst_20 = arith.constant 0.000000e+00 : f32
      %39 = vector.broadcast %cst_20 : f32 to vector<8x2048xf32>
      %40 = arith.maximumf %38, %39 : vector<8x2048xf32>
      %41 = arith.truncf %40 : vector<8x2048xf32> to vector<8x2048xbf16>
      %c0_21 = arith.constant 0 : index
      %c0_22 = arith.constant 0 : index
      %42 = vector.load %arg5[%c0_21, %c0_22] : memref<2048x512xbf16, #tpu.memory_space<vmem>>, vector<2048x512xbf16>
      %cst_23 = arith.constant dense<0.000000e+00> : vector<8x512xf32>
      %43 = tpu.matmul %41, %42, %cst_23 {dimension_numbers = #tpu.dot_dimension_numbers<[1], [0], [0], [1], [0, 0, 1, 1], [], []>} : vector<8x2048xbf16>, vector<2048x512xbf16>, vector<8x512xf32> -> vector<8x512xf32>
      %c0_24 = arith.constant 0 : index
      %c0_25 = arith.constant 0 : index
      %44 = vector.load %arg6[%c0_24, %c0_25] : memref<1x512xf32, #tpu.memory_space<vmem>>, vector<1x512xf32>
      %c0_26 = arith.constant 0 : index
      %c0_27 = arith.constant 0 : index
      %45 = vector.load %arg7[%c0_26, %c0_27] : memref<1x512xf32, #tpu.memory_space<vmem>>, vector<1x512xf32>
      %cst_28 = arith.constant dense<0.000000e+00> : vector<512xf32>
      %46 = vector.multi_reduction <add>, %43, %cst_28 [0] : vector<8x512xf32> to vector<512xf32>
      %47 = vector.shape_cast %46 : vector<512xf32> to vector<1x512xf32>
      %cst_29 = arith.constant 8.000000e+00 : f32
      %48 = vector.broadcast %cst_29 : f32 to vector<1x512xf32>
      %49 = arith.divf %47, %48 : vector<1x512xf32>
      %50 = arith.mulf %43, %43 : vector<8x512xf32>
      %cst_30 = arith.constant dense<0.000000e+00> : vector<512xf32>
      %51 = vector.multi_reduction <add>, %50, %cst_30 [0] : vector<8x512xf32> to vector<512xf32>
      %52 = vector.shape_cast %51 : vector<512xf32> to vector<1x512xf32>
      %cst_31 = arith.constant 8.000000e+00 : f32
      %53 = vector.broadcast %cst_31 : f32 to vector<1x512xf32>
      %54 = arith.divf %52, %53 : vector<1x512xf32>
      %55 = arith.mulf %49, %49 : vector<1x512xf32>
      %56 = arith.subf %54, %55 : vector<1x512xf32>
      %cst_32 = arith.constant 9.99999974E-6 : f32
      %57 = vector.broadcast %cst_32 : f32 to vector<1x512xf32>
      %58 = arith.addf %56, %57 : vector<1x512xf32>
      %59 = math.rsqrt %58 : vector<1x512xf32>
      %60 = arith.mulf %44, %59 : vector<1x512xf32>
      %61 = arith.mulf %49, %60 : vector<1x512xf32>
      %62 = arith.subf %45, %61 : vector<1x512xf32>
      %63 = vector.broadcast %60 : vector<1x512xf32> to vector<8x512xf32>
      %64 = arith.mulf %43, %63 : vector<8x512xf32>
      %65 = vector.broadcast %62 : vector<1x512xf32> to vector<8x512xf32>
      %66 = arith.addf %64, %65 : vector<8x512xf32>
      %cst_33 = arith.constant 0.000000e+00 : f32
      %67 = vector.broadcast %cst_33 : f32 to vector<8x512xf32>
      %68 = arith.maximumf %66, %67 : vector<8x512xf32>
      %c0_34 = arith.constant 0 : index
      %c0_35 = arith.constant 0 : index
      %69 = vector.load %arg11[%c0_34, %c0_35] : memref<8x512xf32, #tpu.memory_space<vmem>>, vector<8x512xf32>
      tpu.vector_store %arg11[%c0_34, %c0_35], %68 {strides = array<i32>} : memref<8x512xf32, #tpu.memory_space<vmem>>, vector<8x512xf32>,
      %c0_36 = arith.constant 0 : index
      %c0_37 = arith.constant 0 : index
      %70 = vector.load %arg8[%c0_36, %c0_37] : memref<1x512xf32, #tpu.memory_space<vmem>>, vector<1x512xf32>
      %71 = vector.broadcast %70 : vector<1x512xf32> to vector<8x512xf32>
      %72 = arith.mulf %68, %71 : vector<8x512xf32>
      %cst_38 = arith.constant dense<0.000000e+00> : vector<8xf32>
      %73 = vector.multi_reduction <add>, %72, %cst_38 [1] : vector<8x512xf32> to vector<8xf32>
      %74 = vector.shape_cast %73 : vector<8xf32> to vector<8x1xf32>
      %c0_39 = arith.constant 0 : index
      %c0_40 = arith.constant 0 : index
      %75 = vector.load %arg9[%c0_39, %c0_40] : memref<1x1xf32, #tpu.memory_space<vmem>>, vector<1x1xf32>
      %76 = vector.broadcast %75 : vector<1x1xf32> to vector<8x1xf32>
      %77 = arith.addf %74, %76 : vector<8x1xf32>
      %c0_41 = arith.constant 0 : index
      %c0_42 = arith.constant 0 : index
      %78 = vector.load %arg10[%c0_41, %c0_42] : memref<8x1xf32, #tpu.memory_space<vmem>>, vector<8x1xf32>
      tpu.vector_store %arg10[%c0_41, %c0_42], %77 {strides = array<i32>} : memref<8x1xf32, #tpu.memory_space<vmem>>, vector<8x1xf32>,
    } else {
    }
    return
  }
  func.func @transform_0(%arg0: i32) -> (i32, i32, i32) {
    %c0_i32 = arith.constant 0 : i32
    %c0_i32_0 = arith.constant 0 : i32
    %c0_i32_1 = arith.constant 0 : i32
    %c0_i32_2 = arith.constant 0 : i32
    return %c0_i32, %c0_i32_0, %c0_i32_1 : i32, i32, i32
  }
  func.func @transform_1(%arg0: i32) -> (i32, i32) {
    %c0_i32 = arith.constant 0 : i32
    %c0_i32_0 = arith.constant 0 : i32
    return %arg0, %c0_i32 : i32, i32
  }
  func.func @transform_2(%arg0: i32) -> (i32, i32) {
    %c0_i32 = arith.constant 0 : i32
    %c0_i32_0 = arith.constant 0 : i32
    %c0_i32_1 = arith.constant 0 : i32
    return %c0_i32, %c0_i32_0 : i32, i32
  }
  func.func @transform_3(%arg0: i32) -> (i32, i32) {
    %c0_i32 = arith.constant 0 : i32
    %c0_i32_0 = arith.constant 0 : i32
    %c0_i32_1 = arith.constant 0 : i32
    return %c0_i32, %c0_i32_0 : i32, i32
  }
  func.func @transform_4(%arg0: i32) -> (i32, i32) {
    %c0_i32 = arith.constant 0 : i32
    %c0_i32_0 = arith.constant 0 : i32
    %c0_i32_1 = arith.constant 0 : i32
    return %c0_i32, %c0_i32_0 : i32, i32
  }
  func.func @transform_5(%arg0: i32) -> (i32, i32) {
    %c0_i32 = arith.constant 0 : i32
    %c0_i32_0 = arith.constant 0 : i32
    %c0_i32_1 = arith.constant 0 : i32
    return %c0_i32, %c0_i32_0 : i32, i32
  }
  func.func @transform_6(%arg0: i32) -> (i32, i32) {
    %c0_i32 = arith.constant 0 : i32
    %c0_i32_0 = arith.constant 0 : i32
    %c0_i32_1 = arith.constant 0 : i32
    return %c0_i32, %c0_i32_0 : i32, i32
  }
  func.func @transform_7(%arg0: i32) -> (i32, i32) {
    %c0_i32 = arith.constant 0 : i32
    %c0_i32_0 = arith.constant 0 : i32
    %c0_i32_1 = arith.constant 0 : i32
    return %c0_i32, %c0_i32_0 : i32, i32
  }
  func.func @transform_8(%arg0: i32) -> (i32, i32) {
    %c0_i32 = arith.constant 0 : i32
    %c0_i32_0 = arith.constant 0 : i32
    %c0_i32_1 = arith.constant 0 : i32
    return %c0_i32, %c0_i32_0 : i32, i32
  }
  func.func @transform_9(%arg0: i32) -> (i32, i32) {
    %c0_i32 = arith.constant 0 : i32
    %c0_i32_0 = arith.constant 0 : i32
    %c0_i32_1 = arith.constant 0 : i32
    return %c0_i32, %c0_i32_0 : i32, i32
  }
  func.func @transform_10(%arg0: i32) -> (i32, i32) {
    %c0_i32 = arith.constant 0 : i32
    %c0_i32_0 = arith.constant 0 : i32
    %c0_i32_1 = arith.constant 0 : i32
    return %c0_i32, %c0_i32_0 : i32, i32
  }
}

</mosaic_0001>

<bundles_post_ra>
// kernel: tpu_custom_call.1
= control target key start
LH: loop header
LB: loop body
LE: loop exit
PB: predicated region body
PF: predicated region fallthrough
CT: control target
= control target key end

     0   :  { %s17727_s0 = inlined_call_operand.hbm [shape: f32[2,8,512], index: 0, kind: input, shape index: {}]   ;;  %s17728_s1 = inlined_call_operand.hbm [shape: bf16[1024,2048], index: 1, kind: input, shape index: {}]   ;;  %s17729_s2 = inlined_call_operand.hbm [shape: f32[1,2048], index: 2, kind: input, shape index: {}]   ;;  %s17730_s3 = inlined_call_operand.hbm [shape: f32[1,2048], index: 3, kind: input, shape index: {}]   ;;  %s17731_s4 = inlined_call_operand.hbm [shape: bf16[2048,512], index: 4, kind: input, shape index: {}]   ;;  %s17732_s5 = inlined_call_operand.hbm [shape: f32[1,512], index: 5, kind: input, shape index: {}]   ;;  %s17733_s6 = inlined_call_operand.hbm [shape: f32[1,512], index: 6, kind: input, shape index: {}]   ;;  %s17734_s7 = inlined_call_operand.hbm [shape: f32[1,512], index: 7, kind: input, shape index: {}]   ;;  %s17735_s8 = inlined_call_operand.<no memory space> [shape: f32[1,1], index: 8, kind: input, shape index: {}]   ;;  %s17736_s9 = inlined_call_operand.vmem [shape: f32[8,1], index: 9, kind: output, shape index: {0}]   ;;  %s17737_s10 = inlined_call_operand.hbm [shape: f32[8,512], index: 10, kind: output, shape index: {1}]  }
   0x1   :  { %17771 = sst [smem:[#allocation48_spill]] %s17727_s0  ;;  %v16_v0 = vstv %s17735_s8 }
   0x2   :  { %17 = vst [vmem:[#allocation3] sm:$0x1] %v16_v0 }
   0x3   :  { %18 = vsyncpa [#allocation5], 0 }
   0x4   :  { %19 = vsyncpa [#allocation8], 0 }
   0x5   :  { %21 = vsyncpa [#allocation8 + $0x1], 0 }
   0x6   :  { %22 = vsyncpa [#allocation11], 0 }
   0x7   :  { %23 = vsyncpa [#allocation14], 0 }
   0x8   :  { %24 = vsyncpa [#allocation17], 0 }
   0x9   :  { %25 = vsyncpa [#allocation6], 0  ;;  %s15159_s15 = smov 0   ;;  %s15161_s16 = smov 0  }
   0xa   :  { %s15163_s17 = smov 0   ;;  %s15165_s18 = smov 0  }
   0xb LB: > { %s298_s20 = sshll.u32 %s17729_s2, 4  ;;  %s15183_s21 = sadd.s32 4294967295, %s15083_s18   ;;  %s15083_s18 = sphi %s15165_s18, %s17889_s18   ;;  %s15079_s17 = sphi %s15163_s17, %s17888_s17   ;;  %s15075_s16 = sphi %s15161_s16, %s17887_s16   ;;  %s15071_s15 = sphi %s15159_s15, %s17886_s15   ;;  %s299_s20 = int_to_ptr.hbm [resolvable:$true] %s298_s20 }
   0xc   : > { %p9432_p0 = scmp.ge.s32.totalorder %s15083_s18, 1  ;;  %p73_p1 = scmp.eq.s32.totalorder %s15183_s21, 0 }
   0xd   : > { %p272_p2 = scmp.lt.s32.totalorder %s15083_s18, 3  ;;  %p9433_p3 = scmp.ne.s32.totalorder %s15183_s21, 0 }
   0xe   : > { %s15085_s23 = smov [#allocation9]   ;;  %s310_s27 = sshll.u32 %s17730_s3, 4  ;;  %s311_s27 = int_to_ptr.hbm [resolvable:$true] %s310_s27 }
   0xf   : > { %p15189_p4 = pnand %p9432_p0, %p272_p2  ;;  %s300_s24 = sshll.u32 %s15085_s23, 4  ;;  %s301_s24 = int_to_ptr.vmem [resolvable:$true] %s300_s24 }
  0x10   : > { %s15086_s29 = smov [#allocation10]   ;;  %s336_s13 = sshll.u32 %s17732_s5, 4  ;;  %s337_s13 = int_to_ptr.hbm [resolvable:$true] %s336_s13 }
  0x11   : > { %p14619_p5 = pneg %p15189_p4  ;;  %s312_s30 = sshll.u32 %s15086_s29, 4  ;;  %s313_s30 = int_to_ptr.vmem [resolvable:$true] %s312_s30 }
  0x12   : > { %s17774_s0 = sld [smem:[#allocation48_spill]]  ;;  %s15087_s23 = smov [#allocation13]  }
  0x13   : > { %p15200_p6 = pnand %p14619_p5, %p73_p1  ;;  %s338_s25 = sshll.u32 %s15087_s23, 4  ;;  %s339_s25 = int_to_ptr.vmem [resolvable:$true] %s338_s25 }
  0x14   : > { %s15088_s26 = smov [#allocation4]   ;;  %s15089_s11 = smov 512  }
  0x15   : > { %14625 = dma.hbm_to_vmem [thread:$0]  (!%p15200_p6), %s299_s20, 256, %s301_s24, [#allocation8]  }
  0x16   : > { %14628 = dma.hbm_to_vmem [thread:$0]  (!%p15200_p6), %s311_s27, 256, %s313_s30, [#allocation11]  }
  0x17   : > { %14634 = dma.hbm_to_vmem [thread:$0]  (!%p15200_p6), %s337_s13, 64, %s339_s25, [#allocation14]  }
  0x18   : > { %s283_s19 = sshll.u32 %s17774_s0, 4  ;;  %s285_s29 = sshll.u32 %s15088_s26, 4  ;;  %s284_s19 = int_to_ptr.hbm [resolvable:$true] %s283_s19  ;;  %s286_s29 = int_to_ptr.vmem [resolvable:$true] %s285_s29 }
  0x19   : > { %s15090_s12 = smov 32   ;;  %s321_s27 = sshll.u32 %s17731_s4, 4  ;;  %s322_s27 = int_to_ptr.hbm [resolvable:$true] %s321_s27 }
  0x1a   : > { %14622 = dma.hbm_to_vmem [thread:$0]  (!%p15200_p6), %s284_s19, 1024, %s286_s29, [#allocation5], %s15089_s11, %s15089_s11, %s15090_s12  }
  0x1b   : > { %s15091_s30 = smov [#allocation12]   ;;  %s348_s13 = sshll.u32 %s17733_s6, 4  ;;  %s349_s13 = int_to_ptr.hbm [resolvable:$true] %s348_s13 }
  0x1c   : > { %s323_s14 = sshll.u32 %s15091_s30, 4  ;;  %s15092_s25 = smov 256   ;;  %s324_s14 = int_to_ptr.vmem [resolvable:$true] %s323_s14 }
  0x1d   : > { %s15093_s26 = smov 16   ;;  %s15094_s19 = smov [#allocation15]  }
  0x1e   : > { %14631 = dma.hbm_to_vmem [thread:$0]  (!%p15200_p6), %s322_s27, 65536, %s324_s14, [#allocation11], %s15092_s25, %s15092_s25, %s15093_s26  }
  0x1f   : > { %s350_s29 = sshll.u32 %s15094_s19, 4  ;;  %s360_s20 = sshll.u32 %s17734_s7, 4  ;;  %s351_s29 = int_to_ptr.vmem [resolvable:$true] %s350_s29  ;;  %s361_s20 = int_to_ptr.hbm [resolvable:$true] %s360_s20 }
  0x20   : > { %14637 = dma.hbm_to_vmem [thread:$0]  (!%p15200_p6), %s349_s13, 64, %s351_s29, [#allocation14]  }
  0x21   : > { %s15095_s24 = smov [#allocation16]   ;;  %s15234_s30 = sadd.s32 1, %s15083_s18  }
  0x22   : > { %s362_s27 = sshll.u32 %s15095_s24, 4  ;;  %s56_s14 = ssub.s32 %s15083_s18, %s15234_s30  ;;  %s363_s27 = int_to_ptr.vmem [resolvable:$true] %s362_s27 }
  0x23   : > { %14640 = dma.hbm_to_vmem [thread:$0]  (!%p15200_p6), %s361_s20, 64, %s363_s27, [#allocation17]  }
  0x24   : > { %s59_s8 = sadd.s32 1, %s15079_s17  ;;  %p57_p7 = scmp.eq.s32.totalorder %s56_s14, 0 }
  0x25   : > { %p66_p8 = scmp.ne.s32.totalorder %s15079_s17, %s15075_s16  ;;  %p67_p9 = scmp.eq.s32.totalorder %s15083_s18, 0 }
  0x26   : > { %p72_p10 = scmp.ne.s32.totalorder %s15075_s16, %s15071_s15  ;;  %p14652_p13 = scmp.lt.s32.totalorder %s15083_s18, 2 }
  0x27   : > { %s15245_s23 = scalar_select %p57_p7, %s15079_s17, %s59_s8  }
  0x28   : > { %p15247_p11 = por %p67_p9, %p66_p8  ;;  %p15253_p12 = por %p73_p1, %p72_p10 }
  0x29   : > { %s376_s25 = sand.u32 1, %s15083_s18   ;;  %s378_s26 = sand.u32 1, %s15079_s17  }
  0x2a   : > { %s9441_s19 = sshll.u32 %s378_s26, 12  ;;  %s13559_s29 = sshll.u32 %s15083_s18, 12 }
  0x2b   : > { %s386_s15 = scalar_lea.hbm %s17728_s1, %s13559_s29  ;;  %s380_s24 = scalar_lea.vmem [#allocation7], %s9441_s19 }
  0x2c   : > { %s387_s20 = sshll.u32 %s386_s15, 4  ;;  %s389_s27 = sshll.u32 %s380_s24, 4  ;;  %s388_s20 = int_to_ptr.hbm [resolvable:$true] %s387_s20  ;;  %s390_s27 = int_to_ptr.vmem [resolvable:$true] %s389_s27 }
  0x2d   : > { %p15266_p0 = pnand %p14652_p13, %p15247_p11  ;;  %s377_s8 = scalar_lea.sflag [#allocation8], %s376_s25 }
  0x2e   : > { %s14967_s0 = sshra.s32 %s388_s20, 4  ;;  %s14974_s29 = scalar_lea.hbm %s17728_s1, 8192  ;;  %s14968_s0 = int_to_ptr.hbm [resolvable:$true] %s14967_s0 }
  0x2f   : > { %s14969_s26 = scalar_lea.hbm %s14968_s0, 4096  ;;  %p14971_p5 = pneg %p15266_p0 }
  0x30   : > { %p14970_p2 = scmp.ne.s32.totalorder %s14968_s0, %s14969_s26  ;;  %p14975_p8 = scmp.lt.s32.totalorder %s14968_s0, %s17728_s1 }
  0x31   : > { %p14976_p9 = scmp.lt.s32.totalorder %s14974_s29, %s14969_s26 }
  0x32   : > { %p14972_p6 = pnand %p14971_p5, %p14970_p2 }
  0x33   : > { %p14977_p10 = por %p14976_p9, %p14975_p8 }
  0x34   : > { %p14973_p7 = pneg %p14972_p6 }
  0x36   : > { %p14978_p11 = pnand %p14977_p10, %p14973_p7 }
  0x38   : > { %14981 = shalt.err (!%p14978_p11)
}
  0x39   : > { %s15096_s25 = smov 1024   ;;  %s15097_s12 = smov 64  }
  0x3a   : > { %14644 = dma.hbm_to_vmem [thread:$0]  (!%p15266_p0), %s388_s20, 65536, %s390_s27, %s377_s8, %s15096_s25, %s15096_s25, %s15097_s12  }
  0x3b   : > { %401 = sbr.rel (%p15189_p4) target bundleno = 1751 (0x6d7), region = 56 }
  0x40   : > { %15042 = dma.done.wait (%p73_p1), [#allocation5], 1024  }
  0x41   : > { %15044 = vsyncadd (%p73_p1), [#allocation5], 4294966272  ;;  %s408_s0 = sand.u32 1, %s15183_s21   ;;  %s410_s15 = sand.u32 1, %s15075_s16  }
  0x42   : > { %s9447_s24 = sshll.u32 %s410_s15, 12  ;;  %s409_s26 = scalar_lea.sflag [#allocation8], %s408_s0 }
  0x43   : > { %s15288_s18 = scalar_lea.vmem [#allocation7], %s9447_s24 }
  0x44   : > { %15046 = dma.done.wait (%p15253_p12), %s409_s26, 65536  }
  0x45   : > { %15048 = vsyncadd (%p15253_p12), %s409_s26, 4294901760 }
  0x46   : > { %15050 = dma.done.wait (%p73_p1), [#allocation8], 256  }
  0x47   : > { %15052 = vsyncadd (%p73_p1), [#allocation8], 4294967040 }
  0x48   : > { %15054 = dma.done.wait (%p73_p1), [#allocation11], 65792  }
  0x49   : > { %15056 = vsyncadd (%p73_p1), [#allocation11], 4294901504 }
  0x4a   : > { %15058 = dma.done.wait (%p73_p1), [#allocation14], 128  }
  0x4b   : > { %15060 = vsyncadd (%p73_p1), [#allocation14], 4294967168 }
  0x4c   : > { %15062 = dma.done.wait (%p73_p1), [#allocation17], 64  }
  0x4d   : > { %15064 = vsyncadd (%p73_p1), [#allocation17], 4294967232  ;;  %479 = sbr.rel (%p9433_p3) target bundleno = 99 (0x63), region = 92 }
  0x52   : > { %v15098_v1 = vmov 0.0  }
  0x53   : > { %480 = vst [vmem:[#allocation2 + $0x30] sm:$0xff] %v15098_v1 }
  0x54   : > { %481 = vst [vmem:[#allocation2] sm:$0xff] %v15098_v1 }
  0x55   : > { %482 = vst [vmem:[#allocation2 + $0x58] sm:$0xff] %v15098_v1 }
  0x56   : > { %483 = vst [vmem:[#allocation2 + $0x18] sm:$0xff] %v15098_v1 }
  0x57   : > { %484 = vst [vmem:[#allocation2 + $0x50] sm:$0xff] %v15098_v1 }
  0x58   : > { %485 = vst [vmem:[#allocation2 + $0x68] sm:$0xff] %v15098_v1 }
  0x59   : > { %486 = vst [vmem:[#allocation2 + $0x8] sm:$0xff] %v15098_v1 }
  0x5a   : > { %487 = vst [vmem:[#allocation2 + $0x48] sm:$0xff] %v15098_v1 }
  0x5b   : > { %488 = vst [vmem:[#allocation2 + $0x40] sm:$0xff] %v15098_v1 }
  0x5c   : > { %489 = vst [vmem:[#allocation2 + $0x20] sm:$0xff] %v15098_v1 }
  0x5d   : > { %490 = vst [vmem:[#allocation2 + $0x10] sm:$0xff] %v15098_v1 }
  0x5e   : > { %491 = vst [vmem:[#allocation2 + $0x38] sm:$0xff] %v15098_v1 }
  0x5f   : > { %492 = vst [vmem:[#allocation2 + $0x60] sm:$0xff] %v15098_v1 }
  0x60   : > { %493 = vst [vmem:[#allocation2 + $0x70] sm:$0xff] %v15098_v1 }
  0x61   : > { %494 = vst [vmem:[#allocation2 + $0x78] sm:$0xff] %v15098_v1 }
  0x62   : > { %495 = vst [vmem:[#allocation2 + $0x28] sm:$0xff] %v15098_v1 }
  0x63 PF: > { %v9907_v2 = vld [vmem:[%s15288_s18 + $0x380] sm:$0xf]  ;;  %s13560_s22 = sshll.u32 %s15183_s21, 5  ;;  %p11505_p1 = scmp.ne.s32.totalorder %s15183_s21, 1 }
  0x64   : > { %v13681_v3 = vld [vmem:[%s15288_s18 + $0x3bc] sm:$0xf0]  ;;  %s498_s28 = scalar_lea.vmem [#allocation4], %s13560_s22 }
  0x65   : > { %v10419_v4 = vld [vmem:[%s15288_s18 + $0x780] sm:$0xf]  ;;  %v9908_v5 = vor.u32 %v13681_v3, %v9907_v2 }
  0x66   : > { %v13809_v6 = vld [vmem:[%s15288_s18 + $0x7bc] sm:$0xf0] }
  0x67   : > { %v10931_v7 = vld [vmem:[%s15288_s18 + $0xb80] sm:$0xf]  ;;  %v10420_v9 = vor.u32 %v13809_v6, %v10419_v4  ;;  %3595 = vmatpush.bf16.msra.mxu0 %v9908_v5 }
  0x68   : > { %v13937_v8 = vld [vmem:[%s15288_s18 + $0xbbc] sm:$0xf0] }
  0x69   : > { %v10932_v10 = vor.u32 %v13937_v8, %v10931_v7  ;;  %v11443_v11 = vld [vmem:[%s15288_s18 + $0xf80] sm:$0xf]  ;;  %3608 = vmatpush.bf16.msra.mxu1 %v10420_v9 }
  0x6a   : > { %v14065_v12 = vld [vmem:[%s15288_s18 + $0xfbc] sm:$0xf0] }
  0x6b   : > { %v9843_v13 = vld [vmem:[%s15288_s18 + $0x300] sm:$0xf]  ;;  %v11444_v14 = vor.u32 %v14065_v12, %v11443_v11  ;;  %3621 = vmatpush.bf16.msra.mxu2 %v10932_v10 }
  0x6c   : > { %v13665_v15 = vld [vmem:[%s15288_s18 + $0x33c] sm:$0xf0] }
  0x6d   : > { %v10355_v16 = vld [vmem:[%s15288_s18 + $0x700] sm:$0xf]  ;;  %v9844_v18 = vor.u32 %v13665_v15, %v9843_v13  ;;  %3634 = vmatpush.bf16.msra.mxu3 %v11444_v14 }
  0x6e   : > { %v13793_v17 = vld [vmem:[%s15288_s18 + $0x73c] sm:$0xf0] }
  0x6f   : > { %v10356_v19 = vor.u32 %v13793_v17, %v10355_v16  ;;  %v10867_v20 = vld [vmem:[%s15288_s18 + $0xb00] sm:$0xf]  ;;  %3596 = vmatpush.bf16.msra.mxu0 %v9844_v18 }
  0x70   : > { %v13921_v21 = vld [vmem:[%s15288_s18 + $0xb3c] sm:$0xf0] }
  0x71   : > { %v11379_v22 = vld [vmem:[%s15288_s18 + $0xf00] sm:$0xf]  ;;  %v10868_v23 = vor.u32 %v13921_v21, %v10867_v20  ;;  %3609 = vmatpush.bf16.msra.mxu1 %v10356_v19 }
  0x72   : > { %v14049_v24 = vld [vmem:[%s15288_s18 + $0xf3c] sm:$0xf0] }
  0x73   : > { %v9779_v25 = vld [vmem:[%s15288_s18 + $0x280] sm:$0xf]  ;;  %v11380_v27 = vor.u32 %v14049_v24, %v11379_v22  ;;  %3622 = vmatpush.bf16.msra.mxu2 %v10868_v23 }
  0x74   : > { %v13649_v26 = vld [vmem:[%s15288_s18 + $0x2bc] sm:$0xf0] }
  0x75   : > { %v10291_v28 = vld [vmem:[%s15288_s18 + $0x680] sm:$0xf]  ;;  %v9780_v31 = vor.u32 %v13649_v26, %v9779_v25  ;;  %3635 = vmatpush.bf16.msra.mxu3 %v11380_v27 }
  0x76   : > { %v13777_v29 = vld [vmem:[%s15288_s18 + $0x6bc] sm:$0xf0] }
  0x77   : > { %v10803_v30 = vld [vmem:[%s15288_s18 + $0xa80] sm:$0xf]  ;;  %v10292_v35 = vor.u32 %v13777_v29, %v10291_v28  ;;  %3597 = vmatpush.bf16.msra.mxu0 %v9780_v31  ;;  %v9909_v31 = vld [vmem:[%s15288_s18 + $0x3c0] sm:$0xf0] }
  0x78   : > { %v13905_v32 = vld [vmem:[%s15288_s18 + $0xabc] sm:$0xf0] }
  0x79   : > { %v11315_v33 = vld [vmem:[%s15288_s18 + $0xe80] sm:$0xf]  ;;  %v10804_v36 = vor.u32 %v13905_v32, %v10803_v30  ;;  %3610 = vmatpush.bf16.msra.mxu1 %v10292_v35  ;;  %v13673_v30 = vld [vmem:[%s15288_s18 + $0x384] sm:$0xf] }
  0x7a   : > { %v14033_v34 = vld [vmem:[%s15288_s18 + $0xebc] sm:$0xf0]  ;;  %v13801_v32 = vld [vmem:[%s15288_s18 + $0x784] sm:$0xf] }
  0x7b   : > { %v9715_v37 = vld [vmem:[%s15288_s18 + $0x200] sm:$0xf]  ;;  %v11316_v40 = vor.u32 %v14033_v34, %v11315_v33  ;;  %3623 = vmatpush.bf16.msra.mxu2 %v10804_v36  ;;  %v10421_v34 = vld [vmem:[%s15288_s18 + $0x7c0] sm:$0xf0] }
  0x7c   : > { %v13633_v38 = vld [vmem:[%s15288_s18 + $0x23c] sm:$0xf0]  ;;  %v13929_v35 = vld [vmem:[%s15288_s18 + $0xb84] sm:$0xf] }
  0x7d   : > { %v10227_v39 = vld [vmem:[%s15288_s18 + $0x600] sm:$0xf]  ;;  %v9716_v46 = vor.u32 %v13633_v38, %v9715_v37  ;;  %3636 = vmatpush.bf16.msra.mxu3 %v11316_v40  ;;  %v10933_v36 = vld [vmem:[%s15288_s18 + $0xbc0] sm:$0xf0] }
  0x7e   : > { %v13761_v41 = vld [vmem:[%s15288_s18 + $0x63c] sm:$0xf0]  ;;  %v11445_v40 = vld [vmem:[%s15288_s18 + $0xfc0] sm:$0xf0] }
  0x7f   : > { %v10739_v42 = vld [vmem:[%s15288_s18 + $0xa00] sm:$0xf]  ;;  %v10228_v47 = vor.u32 %v13761_v41, %v10227_v39  ;;  %3598 = vmatpush.bf16.msra.mxu0 %v9716_v46  ;;  %v14057_v39 = vld [vmem:[%s15288_s18 + $0xf84] sm:$0xf] }
  0x80   : > { %v13889_v43 = vld [vmem:[%s15288_s18 + $0xa3c] sm:$0xf0]  ;;  %v9845_v46 = vld [vmem:[%s15288_s18 + $0x340] sm:$0xf0] }
  0x81   : > { %v11251_v44 = vld [vmem:[%s15288_s18 + $0xe00] sm:$0xf]  ;;  %v10740_v48 = vor.u32 %v13889_v43, %v10739_v42  ;;  %3611 = vmatpush.bf16.msra.mxu1 %v10228_v47  ;;  %v9912_v42 = vor.u32 %v13673_v30, %v9909_v31  ;;  %v10424_v43 = vor.u32 %v13801_v32, %v10421_v34  ;;  %v13785_v47 = vld [vmem:[%s15288_s18 + $0x704] sm:$0xf] }
  0x82   : > { %v14017_v45 = vld [vmem:[%s15288_s18 + $0xe3c] sm:$0xf0]  ;;  %v13865_v30 = vld [vmem:[%s15288_s18 + $0x984] sm:$0xf] }
  0x83   : > { %v9651_v49 = vld [vmem:[%s15288_s18 + $0x180] sm:$0xf]  ;;  %v11252_v52 = vor.u32 %v14017_v45, %v11251_v44  ;;  %3624 = vmatpush.bf16.msra.mxu2 %v10740_v48  ;;  %v10936_v44 = vor.u32 %v13929_v35, %v10933_v36  ;;  %v13657_v45 = vld [vmem:[%s15288_s18 + $0x304] sm:$0xf]  ;;  %v11448_v48 = vor.u32 %v14057_v39, %v11445_v40 }
  0x84   : > { %v13617_v50 = vld [vmem:[%s15288_s18 + $0x1bc] sm:$0xf0]  ;;  %v10677_v31 = vld [vmem:[%s15288_s18 + $0x9c0] sm:$0xf0] }
  0x85   : > { %v10163_v51 = vld [vmem:[%s15288_s18 + $0x580] sm:$0xf]  ;;  %v9652_v58 = vor.u32 %v13617_v50, %v9651_v49  ;;  %3637 = vmatpush.bf16.msra.mxu3 %v11252_v52  ;;  %v10357_v49 = vld [vmem:[%s15288_s18 + $0x740] sm:$0xf0]  ;;  %v10680_v36 = vor.u32 %v13865_v30, %v10677_v31  ;;  %v10875_v30 = vld [vmem:[%s15288_s18 + $0xb08] sm:$0xf] }
  0x86   : > { %v13745_v53 = vld [vmem:[%s15288_s18 + $0x5bc] sm:$0xf0]  ;;  %v13913_v50 = vld [vmem:[%s15288_s18 + $0xb04] sm:$0xf]  ;;  %v13922_v31 = vld [vmem:[%s15288_s18 + $0xb44] sm:$0xf0] }
  0x87   : > { %v10675_v54 = vld [vmem:[%s15288_s18 + $0x980] sm:$0xf]  ;;  %v10164_v59 = vor.u32 %v13745_v53, %v10163_v51  ;;  %3599 = vmatpush.bf16.msra.mxu0 %v9652_v58  ;;  %v10869_v51 = vld [vmem:[%s15288_s18 + $0xb40] sm:$0xf0] }
  0x88   : > { %v13873_v55 = vld [vmem:[%s15288_s18 + $0x9bc] sm:$0xf0]  ;;  %v14041_v52 = vld [vmem:[%s15288_s18 + $0xf04] sm:$0xf] }
  0x89   : > { %v11187_v56 = vld [vmem:[%s15288_s18 + $0xd80] sm:$0xf]  ;;  %v10676_v60 = vor.u32 %v13873_v55, %v10675_v54  ;;  %3612 = vmatpush.bf16.msra.mxu1 %v10164_v59  ;;  %v11381_v53 = vld [vmem:[%s15288_s18 + $0xf40] sm:$0xf0]  ;;  %v9848_v54 = vor.u32 %v13657_v45, %v9845_v46  ;;  %v10360_v55 = vor.u32 %v13785_v47, %v10357_v49 }
  0x8a   : > { %v14001_v57 = vld [vmem:[%s15288_s18 + $0xdbc] sm:$0xf0]  ;;  %v9781_v58 = vld [vmem:[%s15288_s18 + $0x2c0] sm:$0xf0] }
  0x8b   : > { %v9587_v61 = vld [vmem:[%s15288_s18 + $0x100] sm:$0xf]  ;;  %v11188_v0 = vor.u32 %v14001_v57, %v11187_v56  ;;  %3625 = vmatpush.bf16.msra.mxu2 %v10676_v60  ;;  %v10872_v56 = vor.u32 %v13913_v50, %v10869_v51  ;;  %v13641_v57 = vld [vmem:[%s15288_s18 + $0x284] sm:$0xf]  ;;  %v11384_v60 = vor.u32 %v14041_v52, %v11381_v53 }
  0x8c   : > { %v13601_v62 = vld [vmem:[%s15288_s18 + $0x13c] sm:$0xf0]  ;;  %v13769_v59 = vld [vmem:[%s15288_s18 + $0x684] sm:$0xf] }
  0x8d   : > { %v10099_v63 = vld [vmem:[%s15288_s18 + $0x500] sm:$0xf]  ;;  %v9588_v6 = vor.u32 %v13601_v62, %v9587_v61  ;;  %3638 = vmatpush.bf16.msra.mxu3 %v11188_v0  ;;  %v10293_v61 = vld [vmem:[%s15288_s18 + $0x6c0] sm:$0xf0] }
  0x8e   : > { %v13729_v1 = vld [vmem:[%s15288_s18 + $0x53c] sm:$0xf0]  ;;  %v13897_v62 = vld [vmem:[%s15288_s18 + $0xa84] sm:$0xf] }
  0x8f   : > { %v10611_v2 = vld [vmem:[%s15288_s18 + $0x900] sm:$0xf]  ;;  %v10100_v7 = vor.u32 %v13729_v1, %v10099_v63  ;;  %3600 = vmatpush.bf16.msra.mxu0 %v9588_v6  ;;  %v10805_v63 = vld [vmem:[%s15288_s18 + $0xac0] sm:$0xf0]  ;;  %v10296_v6 = vor.u32 %v13769_v59, %v10293_v61 }
  0x90   : > { %v13857_v3 = vld [vmem:[%s15288_s18 + $0x93c] sm:$0xf0]  ;;  %v14025_v0 = vld [vmem:[%s15288_s18 + $0xe84] sm:$0xf] }
  0x91   : > { %v11123_v4 = vld [vmem:[%s15288_s18 + $0xd00] sm:$0xf]  ;;  %v10612_v8 = vor.u32 %v13857_v3, %v10611_v2  ;;  %3613 = vmatpush.bf16.msra.mxu1 %v10100_v7  ;;  %v11317_v1 = vld [vmem:[%s15288_s18 + $0xec0] sm:$0xf0]  ;;  %v9784_v3 = vor.u32 %v13641_v57, %v9781_v58  ;;  %v10808_v7 = vor.u32 %v13897_v62, %v10805_v63 }
  0x92   : > { %v13985_v5 = vld [vmem:[%s15288_s18 + $0xd3c] sm:$0xf0]  ;;  %v13625_v2 = vld [vmem:[%s15288_s18 + $0x204] sm:$0xf] }
  0x93   : > { %v9523_v9 = vld [vmem:[%s15288_s18 + $0x80] sm:$0xf]  ;;  %v11124_v12 = vor.u32 %v13985_v5, %v11123_v4  ;;  %3626 = vmatpush.bf16.msra.mxu2 %v10612_v8  ;;  %v9717_v4 = vld [vmem:[%s15288_s18 + $0x240] sm:$0xf0] }
  0x94   : > { %v13585_v10 = vld [vmem:[%s15288_s18 + $0xbc] sm:$0xf0]  ;;  %v13753_v5 = vld [vmem:[%s15288_s18 + $0x604] sm:$0xf] }
  0x95   : > { %v10035_v11 = vld [vmem:[%s15288_s18 + $0x480] sm:$0xf]  ;;  %v9524_v18 = vor.u32 %v13585_v10, %v9523_v9  ;;  %3639 = vmatpush.bf16.msra.mxu3 %v11124_v12  ;;  %v10229_v8 = vld [vmem:[%s15288_s18 + $0x640] sm:$0xf0]  ;;  %v11320_v10 = vor.u32 %v14025_v0, %v11317_v1  ;;  %v501_v12 = vld [vmem:[%s498_s28 + $0x10] sm:$0xff] }
  0x96   : > { %v13713_v13 = vld [vmem:[%s15288_s18 + $0x4bc] sm:$0xf0]  ;;  %v13881_v9 = vld [vmem:[%s15288_s18 + $0xa04] sm:$0xf] }
  0x97   : > { %v10547_v14 = vld [vmem:[%s15288_s18 + $0x880] sm:$0xf]  ;;  %v10036_v21 = vor.u32 %v13713_v13, %v10035_v11  ;;  %3601 = vmatpush.bf16.msra.mxu0 %v9524_v18  ;;  %v10741_v11 = vld [vmem:[%s15288_s18 + $0xa40] sm:$0xf0]  ;;  %v502_v13 = vld [vmem:[%s498_s28 + $0x18] sm:$0xff]  ;;  %v9720_v18 = vor.u32 %v13625_v2, %v9717_v4 }
  0x98   : > { %v13841_v15 = vld [vmem:[%s15288_s18 + $0x8bc] sm:$0xf0]  ;;  %v13993_v32 = vld [vmem:[%s15288_s18 + $0xd84] sm:$0xf] }
  0x99   : > { %v11059_v16 = vld [vmem:[%s15288_s18 + $0xc80] sm:$0xf]  ;;  %v10548_v22 = vor.u32 %v13841_v15, %v10547_v14  ;;  %3614 = vmatpush.bf16.msra.mxu1 %v10036_v21  ;;  %v14009_v14 = vld [vmem:[%s15288_s18 + $0xe04] sm:$0xf] }
  0x9a   : > { %v13969_v17 = vld [vmem:[%s15288_s18 + $0xcbc] sm:$0xf0]  ;;  %v11253_v15 = vld [vmem:[%s15288_s18 + $0xe40] sm:$0xf0] }
  0x9b   : > { %v9459_v19 = vld [vmem:[%s15288_s18] sm:$0xf]  ;;  %v11060_v26 = vor.u32 %v13969_v17, %v11059_v16  ;;  %3627 = vmatpush.bf16.msra.mxu2 %v10548_v22  ;;  %v15409_v16 = vpack.c.bf16 %v501_v12, %v501_v12  ;;  %v15411_v17 = vpack.c.bf16 %v502_v13, %v502_v13  ;;  %v500_v21 = vld [vmem:[%s498_s28 + $0x8] sm:$0xff]  ;;  %v10744_v22 = vor.u32 %v13881_v9, %v10741_v11 }
  0x9c   : > { %v13569_v20 = vld [vmem:[%s15288_s18 + $0x3c] sm:$0xf0]  ;;  %v13721_v39 = vld [vmem:[%s15288_s18 + $0x504] sm:$0xf]  ;;  %v10939_v11 = vld [vmem:[%s15288_s18 + $0xb88] sm:$0xf] }
  0x9d   : > { %v9971_v23 = vld [vmem:[%s15288_s18 + $0x400] sm:$0xf]  ;;  %v9460_v33 = vor.u32 %v13569_v20, %v9459_v19  ;;  %3640 = vmatpush.bf16.msra.mxu3 %v11060_v26  ;;  %v10232_v19 = vor.u32 %v13753_v5, %v10229_v8  ;;  %v11125_v45 = vld [vmem:[%s15288_s18 + $0xd40] sm:$0xf0]  ;;  %v10427_v8 = vld [vmem:[%s15288_s18 + $0x788] sm:$0xf] }
  0x9e   : > { %v13697_v24 = vld [vmem:[%s15288_s18 + $0x43c] sm:$0xf0]  ;;  %v13577_v49 = vld [vmem:[%s15288_s18 + $0x84] sm:$0xf]  ;;  %v13938_v12 = vld [vmem:[%s15288_s18 + $0xbc4] sm:$0xf0] }
  0x9f   : > { %v10483_v25 = vld [vmem:[%s15288_s18 + $0x800] sm:$0xf]  ;;  %v9972_v37 = vor.u32 %v13697_v24, %v9971_v23  ;;  %3602 = vmatpush.bf16.msra.mxu0 %v9460_v33  ;;  %v13609_v23 = vld [vmem:[%s15288_s18 + $0x184] sm:$0xf] }
  0xa0   : > { %v13825_v27 = vld [vmem:[%s15288_s18 + $0x83c] sm:$0xf0]  ;;  %v9653_v24 = vld [vmem:[%s15288_s18 + $0x1c0] sm:$0xf0] }
  0xa1   : > { %v10995_v28 = vld [vmem:[%s15288_s18 + $0xc00] sm:$0xf]  ;;  %v10484_v38 = vor.u32 %v13825_v27, %v10483_v25  ;;  %3615 = vmatpush.bf16.msra.mxu1 %v9972_v37  ;;  %v13737_v25 = vld [vmem:[%s15288_s18 + $0x584] sm:$0xf]  ;;  %v15418_v27 = vpack.c.bf16 %v500_v21, %v500_v21  ;;  %v9656_v34 = vor.u32 %v13609_v23, %v9653_v24  ;;  %v9851_v23 = vld [vmem:[%s15288_s18 + $0x308] sm:$0xf] }
  0xa2   : > { %v13953_v29 = vld [vmem:[%s15288_s18 + $0xc3c] sm:$0xf0]  ;;  %v11189_v33 = vld [vmem:[%s15288_s18 + $0xdc0] sm:$0xf0]  ;;  %v13666_v24 = vld [vmem:[%s15288_s18 + $0x344] sm:$0xf0] }
  0xa3   : > { %v10996_v41 = vor.u32 %v13953_v29, %v10995_v28  ;;  %3628 = vmatpush.bf16.msra.mxu2 %v10484_v38  ;;  %3647 = vmatpush.bf16.msrb.mxu0 %v9912_v42  ;;  %v499_v20 = vld [vmem:[%s498_s28] sm:$0xff]  ;;  %v11256_v28 = vor.u32 %v14009_v14, %v11253_v15  ;;  %v11192_v40 = vor.u32 %v13993_v32, %v11189_v33  ;;  %v11451_v15 = vld [vmem:[%s15288_s18 + $0xf88] sm:$0xf] }
  0xa4   : > { %v15416_v26 = vpack.c.bf16 %v499_v20, %v499_v20  ;;  %v10165_v29 = vld [vmem:[%s15288_s18 + $0x5c0] sm:$0xf0]  ;;  %3616 = vmatmul.bf16.vlgmr.msra.gmra.mxu1 %v15418_v27  ;;  %v11387_v32 = vld [vmem:[%s15288_s18 + $0xf08] sm:$0xf] }
  0xa5   : > { %3641 = vmatpush.bf16.msra.mxu3 %v10996_v41  ;;  %3660 = vmatpush.bf16.msrb.mxu1 %v10424_v43  ;;  %v10168_v35 = vor.u32 %v13737_v25, %v10165_v29  ;;  %v13593_v37 = vld [vmem:[%s15288_s18 + $0x104] sm:$0xf]  ;;  %v10363_v25 = vld [vmem:[%s15288_s18 + $0x708] sm:$0xf] }
  0xa6   : > { %3629 = vmatmul.bf16.vlgmr.msra.gmra.mxu2 %v15409_v16  ;;  %3603 = vmatmul.bf16.vlgmr.msra.gmra.mxu0 %v15416_v26  ;;  %v9589_v38 = vld [vmem:[%s15288_s18 + $0x140] sm:$0xf0]  ;;  %v13794_v29 = vld [vmem:[%s15288_s18 + $0x744] sm:$0xf0] }
  0xa7   : > { %3673 = vmatpush.bf16.msrb.mxu2 %v10936_v44  ;;  %3648 = vmatpush.bf16.msrb.mxu0 %v9848_v54  ;;  %v10101_v41 = vld [vmem:[%s15288_s18 + $0x540] sm:$0xf0]  ;;  %v9592_v46 = vor.u32 %v13593_v37, %v9589_v38  ;;  %v14050_v33 = vld [vmem:[%s15288_s18 + $0xf44] sm:$0xf0] }
  0xa8   : > { %3642 = vmatmul.bf16.vlgmr.msra.gmra.mxu3 %v15411_v17  ;;  %v13849_v42 = vld [vmem:[%s15288_s18 + $0x904] sm:$0xf]  ;;  %v10104_v47 = vor.u32 %v13721_v39, %v10101_v41  ;;  %v9787_v37 = vld [vmem:[%s15288_s18 + $0x288] sm:$0xf] }
  0xa9   : > { %3686 = vmatpush.bf16.msrb.mxu3 %v11448_v48  ;;  %3661 = vmatpush.bf16.msrb.mxu1 %v10360_v55  ;;  %v10613_v43 = vld [vmem:[%s15288_s18 + $0x940] sm:$0xf0]  ;;  %v13650_v38 = vld [vmem:[%s15288_s18 + $0x2c4] sm:$0xf0] }
  0xaa   : > { %v13977_v44 = vld [vmem:[%s15288_s18 + $0xd04] sm:$0xf]  ;;  %v10616_v48 = vor.u32 %v13849_v42, %v10613_v43  ;;  %v10299_v39 = vld [vmem:[%s15288_s18 + $0x688] sm:$0xf] }
  0xab   : > { %3674 = vmatpush.bf16.msrb.mxu2 %v10872_v56  ;;  %3649 = vmatpush.bf16.msrb.mxu0 %v9784_v3  ;;  %v9525_v50 = vld [vmem:[%s15288_s18 + $0xc0] sm:$0xf0]  ;;  %v11128_v52 = vor.u32 %v13977_v44, %v11125_v45  ;;  %v13778_v41 = vld [vmem:[%s15288_s18 + $0x6c4] sm:$0xf0] }
  0xac   : > { %v13705_v51 = vld [vmem:[%s15288_s18 + $0x484] sm:$0xf]  ;;  %v9528_v58 = vor.u32 %v13577_v49, %v9525_v50  ;;  %v10811_v42 = vld [vmem:[%s15288_s18 + $0xa88] sm:$0xf] }
  0xad   : > { %3687 = vmatpush.bf16.msrb.mxu3 %v11384_v60  ;;  %3662 = vmatpush.bf16.msrb.mxu1 %v10296_v6  ;;  %v10037_v53 = vld [vmem:[%s15288_s18 + $0x4c0] sm:$0xf0]  ;;  %v9915_v6 = vld [vmem:[%s15288_s18 + $0x388] sm:$0xf] }
  0xae   : > { %v13833_v54 = vld [vmem:[%s15288_s18 + $0x884] sm:$0xf]  ;;  %v10040_v61 = vor.u32 %v13705_v51, %v10037_v53  ;;  %v13906_v43 = vld [vmem:[%s15288_s18 + $0xac4] sm:$0xf0] }
  0xaf   : > { %3675 = vmatpush.bf16.msrb.mxu2 %v10808_v7  ;;  %3650 = vmatpush.bf16.msrb.mxu0 %v9720_v18  ;;  %v10549_v55 = vld [vmem:[%s15288_s18 + $0x8c0] sm:$0xf0]  ;;  %v13682_v7 = vld [vmem:[%s15288_s18 + $0x3c4] sm:$0xf0] }
  0xb0   : > { %v13961_v56 = vld [vmem:[%s15288_s18 + $0xc84] sm:$0xf]  ;;  %v10552_v62 = vor.u32 %v13833_v54, %v10549_v55  ;;  %v14066_v18 = vld [vmem:[%s15288_s18 + $0xfc4] sm:$0xf0]  ;;  %v9916_v20 = vor.u32 %v13682_v7, %v9915_v6 }
  0xb1   : > { %3688 = vmatpush.bf16.msrb.mxu3 %v11320_v10  ;;  %3663 = vmatpush.bf16.msrb.mxu1 %v10232_v19  ;;  %v11061_v57 = vld [vmem:[%s15288_s18 + $0xcc0] sm:$0xf0]  ;;  %v13810_v10 = vld [vmem:[%s15288_s18 + $0x7c4] sm:$0xf0] }
  0xb2   : > { %v13561_v59 = vld [vmem:[%s15288_s18 + $0x4] sm:$0xf]  ;;  %v11064_v2 = vor.u32 %v13961_v56, %v11061_v57  ;;  %v10428_v21 = vor.u32 %v13810_v10, %v10427_v8  ;;  %v11323_v44 = vld [vmem:[%s15288_s18 + $0xe88] sm:$0xf] }
  0xb3   : > { %3676 = vmatpush.bf16.msrb.mxu2 %v10744_v22  ;;  %3651 = vmatpush.bf16.msrb.mxu0 %v9656_v34  ;;  %v9461_v60 = vld [vmem:[%s15288_s18 + $0x40] sm:$0xf0]  ;;  %v10940_v22 = vor.u32 %v13938_v12, %v10939_v11  ;;  %v9852_v34 = vor.u32 %v13666_v24, %v9851_v23  ;;  %v14034_v45 = vld [vmem:[%s15288_s18 + $0xec4] sm:$0xf0] }
  0xb4   : > { %v13689_v63 = vld [vmem:[%s15288_s18 + $0x404] sm:$0xf]  ;;  %v9464_v9 = vor.u32 %v13561_v59, %v9461_v60  ;;  %v9723_v49 = vld [vmem:[%s15288_s18 + $0x208] sm:$0xf] }
  0xb5   : > { %3689 = vmatpush.bf16.msrb.mxu3 %v11256_v28  ;;  %3664 = vmatpush.bf16.msrb.mxu1 %v10168_v35  ;;  %v9973_v0 = vld [vmem:[%s15288_s18 + $0x440] sm:$0xf0]  ;;  %v11452_v28 = vor.u32 %v14066_v18, %v11451_v15  ;;  %v10364_v35 = vor.u32 %v13794_v29, %v10363_v25  ;;  %v13634_v50 = vld [vmem:[%s15288_s18 + $0x244] sm:$0xf0] }
  0xb6   : > { %v13817_v1 = vld [vmem:[%s15288_s18 + $0x804] sm:$0xf]  ;;  %v9976_v13 = vor.u32 %v13689_v63, %v9973_v0  ;;  %v10235_v51 = vld [vmem:[%s15288_s18 + $0x608] sm:$0xf] }
  0xb7   : > { %3677 = vmatpush.bf16.msrb.mxu2 %v10680_v36  ;;  %3652 = vmatpush.bf16.msrb.mxu0 %v9592_v46  ;;  %v10485_v3 = vld [vmem:[%s15288_s18 + $0x840] sm:$0xf0]  ;;  %v10876_v36 = vor.u32 %v13922_v31, %v10875_v30  ;;  %v9788_v46 = vor.u32 %v13650_v38, %v9787_v37  ;;  %v13762_v53 = vld [vmem:[%s15288_s18 + $0x644] sm:$0xf0] }
  0xb8   : > { %v13945_v4 = vld [vmem:[%s15288_s18 + $0xc04] sm:$0xf]  ;;  %v10488_v14 = vor.u32 %v13817_v1, %v10485_v3  ;;  %v10747_v54 = vld [vmem:[%s15288_s18 + $0xa08] sm:$0xf]  ;;  %v10236_v59 = vor.u32 %v13762_v53, %v10235_v51  ;;  %v13930_v51 = vld [vmem:[%s15288_s18 + $0xb8c] sm:$0xf] }
  0xb9   : > { %3690 = vmatpush.bf16.msrb.mxu3 %v11192_v40  ;;  %3665 = vmatpush.bf16.msrb.mxu1 %v10104_v47  ;;  %v10997_v5 = vld [vmem:[%s15288_s18 + $0xc40] sm:$0xf0]  ;;  %v11388_v40 = vor.u32 %v14050_v33, %v11387_v32  ;;  %v10300_v47 = vor.u32 %v13778_v41, %v10299_v39  ;;  %v13890_v55 = vld [vmem:[%s15288_s18 + $0xa44] sm:$0xf0] }
  0xba   : > { %v11000_v19 = vor.u32 %v13945_v4, %v10997_v5  ;;  %v11259_v56 = vld [vmem:[%s15288_s18 + $0xe08] sm:$0xf]  ;;  %v10748_v60 = vor.u32 %v13890_v55, %v10747_v54  ;;  %v14058_v55 = vld [vmem:[%s15288_s18 + $0xf8c] sm:$0xf] }
  0xbb   : > { %3678 = vmatpush.bf16.msrb.mxu2 %v10616_v48  ;;  %3653 = vmatpush.bf16.msrb.mxu0 %v9528_v58  ;;  %v10812_v48 = vor.u32 %v13906_v43, %v10811_v42  ;;  %v14018_v57 = vld [vmem:[%s15288_s18 + $0xe44] sm:$0xf0]  ;;  %v9724_v58 = vor.u32 %v13634_v50, %v9723_v49  ;;  %v10429_v50 = vld [vmem:[%s15288_s18 + $0x7c8] sm:$0xf0] }
  0xbc   : > { %v10171_v63 = vld [vmem:[%s15288_s18 + $0x588] sm:$0xf]  ;;  %v11260_v0 = vor.u32 %v14018_v57, %v11259_v56  ;;  %v11453_v56 = vld [vmem:[%s15288_s18 + $0xfc8] sm:$0xf0] }
  0xbd   : > { %3691 = vmatpush.bf16.msrb.mxu3 %v11128_v52  ;;  %3666 = vmatpush.bf16.msrb.mxu1 %v10040_v61  ;;  %v11324_v52 = vor.u32 %v14034_v45, %v11323_v44  ;;  %v9659_v61 = vld [vmem:[%s15288_s18 + $0x188] sm:$0xf] }
  0xbe   : > { %v13746_v1 = vld [vmem:[%s15288_s18 + $0x5c4] sm:$0xf0] }
  0xbf   : > { %3679 = vmatpush.bf16.msrb.mxu2 %v10552_v62  ;;  %3654 = vmatpush.bf16.msrb.mxu0 %v9464_v9  ;;  %v13618_v62 = vld [vmem:[%s15288_s18 + $0x1c4] sm:$0xf0]  ;;  %v10172_v7 = vor.u32 %v13746_v1, %v10171_v63  ;;  %v13786_v63 = vld [vmem:[%s15288_s18 + $0x70c] sm:$0xf] }
  0xc0   : > { %v13874_v3 = vld [vmem:[%s15288_s18 + $0x9c4] sm:$0xf0]  ;;  %v9660_v6 = vor.u32 %v13618_v62, %v9659_v61  ;;  %v13658_v61 = vld [vmem:[%s15288_s18 + $0x30c] sm:$0xf] }
  0xc1   : > { %3692 = vmatpush.bf16.msrb.mxu3 %v11064_v2  ;;  %3667 = vmatpush.bf16.msrb.mxu1 %v9976_v13  ;;  %v10683_v2 = vld [vmem:[%s15288_s18 + $0x988] sm:$0xf]  ;;  %v9853_v62 = vld [vmem:[%s15288_s18 + $0x348] sm:$0xf0] }
  0xc2   : > { %3655 = vmatmul.bf16.vlgmr.msrb.gmra.mxu0 %v15416_v26  ;;  %v11195_v4 = vld [vmem:[%s15288_s18 + $0xd88] sm:$0xf]  ;;  %v10684_v8 = vor.u32 %v13874_v3, %v10683_v2  ;;  %v10365_v1 = vld [vmem:[%s15288_s18 + $0x748] sm:$0xf0] }
  0xc3   : > { %3680 = vmatpush.bf16.msrb.mxu2 %v10488_v14  ;;  %3699 = vmatpush.bf16.msra.mxu0 %v9916_v20  ;;  %v14002_v5 = vld [vmem:[%s15288_s18 + $0xdc4] sm:$0xf0]  ;;  %v13914_v2 = vld [vmem:[%s15288_s18 + $0xb0c] sm:$0xf] }
  0xc4   : > { %3668 = vmatmul.bf16.vlgmr.msrb.gmra.mxu1 %v15418_v27  ;;  %v9595_v9 = vld [vmem:[%s15288_s18 + $0x108] sm:$0xf]  ;;  %v11196_v12 = vor.u32 %v14002_v5, %v11195_v4  ;;  %v10877_v3 = vld [vmem:[%s15288_s18 + $0xb48] sm:$0xf0] }
  0xc5   : > { %3693 = vmatpush.bf16.msrb.mxu3 %v11000_v19  ;;  %3712 = vmatpush.bf16.msra.mxu1 %v10428_v21  ;;  %v13602_v10 = vld [vmem:[%s15288_s18 + $0x144] sm:$0xf0]  ;;  %v14042_v4 = vld [vmem:[%s15288_s18 + $0xf0c] sm:$0xf] }
  0xc6   : > { %3681 = vmatmul.bf16.vlgmr.msrb.gmra.mxu2 %v15409_v16  ;;  %v10107_v11 = vld [vmem:[%s15288_s18 + $0x508] sm:$0xf]  ;;  %v9596_v20 = vor.u32 %v13602_v10, %v9595_v9  ;;  %v11389_v5 = vld [vmem:[%s15288_s18 + $0xf48] sm:$0xf0] }
  0xc7   : > { %3725 = vmatpush.bf16.msra.mxu2 %v10940_v22  ;;  %3700 = vmatpush.bf16.msra.mxu0 %v9852_v34  ;;  %v13730_v13 = vld [vmem:[%s15288_s18 + $0x544] sm:$0xf0]  ;;  %v13642_v9 = vld [vmem:[%s15288_s18 + $0x28c] sm:$0xf] }
  0xc8   : > { %3694 = vmatmul.bf16.vlgmr.msrb.gmra.mxu3 %v15411_v17  ;;  %v10619_v14 = vld [vmem:[%s15288_s18 + $0x908] sm:$0xf]  ;;  %v10108_v21 = vor.u32 %v13730_v13, %v10107_v11  ;;  %v9789_v10 = vld [vmem:[%s15288_s18 + $0x2c8] sm:$0xf0] }
  0xc9   : > { %3738 = vmatpush.bf16.msra.mxu3 %v11452_v28  ;;  %3713 = vmatpush.bf16.msra.mxu1 %v10364_v35  ;;  %v13858_v15 = vld [vmem:[%s15288_s18 + $0x944] sm:$0xf0]  ;;  %v13770_v11 = vld [vmem:[%s15288_s18 + $0x68c] sm:$0xf] }
  0xca   : > { %v11131_v18 = vld [vmem:[%s15288_s18 + $0xd08] sm:$0xf]  ;;  %v10620_v22 = vor.u32 %v13858_v15, %v10619_v14  ;;  %v10301_v13 = vld [vmem:[%s15288_s18 + $0x6c8] sm:$0xf0] }
  0xcb   : > { %3726 = vmatpush.bf16.msra.mxu2 %v10876_v36  ;;  %3701 = vmatpush.bf16.msra.mxu0 %v9788_v46  ;;  %v13986_v19 = vld [vmem:[%s15288_s18 + $0xd44] sm:$0xf0]  ;;  %v13674_v46 = vld [vmem:[%s15288_s18 + $0x38c] sm:$0xf] }
  0xcc   : > { %v9531_v23 = vld [vmem:[%s15288_s18 + $0x88] sm:$0xf]  ;;  %v11132_v28 = vor.u32 %v13986_v19, %v11131_v18  ;;  %v13898_v14 = vld [vmem:[%s15288_s18 + $0xa8c] sm:$0xf] }
  0xcd   : > { %3739 = vmatpush.bf16.msra.mxu3 %v11388_v40  ;;  %3714 = vmatpush.bf16.msra.mxu1 %v10300_v47  ;;  %v13586_v24 = vld [vmem:[%s15288_s18 + $0xc4] sm:$0xf0]  ;;  %v9917_v47 = vld [vmem:[%s15288_s18 + $0x3c8] sm:$0xf0] }
  0xce   : > { %v10043_v25 = vld [vmem:[%s15288_s18 + $0x488] sm:$0xf]  ;;  %v9532_v34 = vor.u32 %v13586_v24, %v9531_v23  ;;  %v10813_v15 = vld [vmem:[%s15288_s18 + $0xac8] sm:$0xf0] }
  0xcf   : > { %3727 = vmatpush.bf16.msra.mxu2 %v10812_v48  ;;  %3702 = vmatpush.bf16.msra.mxu0 %v9724_v58  ;;  %v13714_v29 = vld [vmem:[%s15288_s18 + $0x4c4] sm:$0xf0]  ;;  %v13802_v48 = vld [vmem:[%s15288_s18 + $0x78c] sm:$0xf]  ;;  %v9920_v58 = vor.u32 %v13674_v46, %v9917_v47 }
  0xd0   : > { %v10555_v30 = vld [vmem:[%s15288_s18 + $0x888] sm:$0xf]  ;;  %v10044_v37 = vor.u32 %v13714_v29, %v10043_v25  ;;  %v14026_v18 = vld [vmem:[%s15288_s18 + $0xe8c] sm:$0xf] }
  0xd1   : > { %3740 = vmatpush.bf16.msra.mxu3 %v11324_v52  ;;  %3715 = vmatpush.bf16.msra.mxu1 %v10236_v59  ;;  %v13842_v31 = vld [vmem:[%s15288_s18 + $0x8c4] sm:$0xf0]  ;;  %v10941_v52 = vld [vmem:[%s15288_s18 + $0xbc8] sm:$0xf0]  ;;  %v10432_v59 = vor.u32 %v13802_v48, %v10429_v50 }
  0xd2   : > { %v11067_v32 = vld [vmem:[%s15288_s18 + $0xc88] sm:$0xf]  ;;  %v10556_v38 = vor.u32 %v13842_v31, %v10555_v30  ;;  %v11325_v19 = vld [vmem:[%s15288_s18 + $0xec8] sm:$0xf0] }
  0xd3   : > { %3728 = vmatpush.bf16.msra.mxu2 %v10748_v60  ;;  %3703 = vmatpush.bf16.msra.mxu0 %v9660_v6  ;;  %v13970_v33 = vld [vmem:[%s15288_s18 + $0xcc4] sm:$0xf0]  ;;  %v10944_v60 = vor.u32 %v13930_v51, %v10941_v52  ;;  %v9856_v6 = vor.u32 %v13658_v61, %v9853_v62  ;;  %v13626_v23 = vld [vmem:[%s15288_s18 + $0x20c] sm:$0xf] }
  0xd4   : > { %v9467_v35 = vld [vmem:[%s15288_s18 + $0x8] sm:$0xf]  ;;  %v11068_v42 = vor.u32 %v13970_v33, %v11067_v32  ;;  %v9725_v24 = vld [vmem:[%s15288_s18 + $0x248] sm:$0xf0] }
  0xd5   : > { %3741 = vmatpush.bf16.msra.mxu3 %v11260_v0  ;;  %3716 = vmatpush.bf16.msra.mxu1 %v10172_v7  ;;  %v13570_v36 = vld [vmem:[%s15288_s18 + $0x44] sm:$0xf0]  ;;  %v11456_v0 = vor.u32 %v14058_v55, %v11453_v56  ;;  %v10368_v7 = vor.u32 %v13786_v63, %v10365_v1  ;;  %v13754_v25 = vld [vmem:[%s15288_s18 + $0x60c] sm:$0xf] }
  0xd6   : > { %v9979_v39 = vld [vmem:[%s15288_s18 + $0x408] sm:$0xf]  ;;  %v9468_v49 = vor.u32 %v13570_v36, %v9467_v35  ;;  %v10237_v29 = vld [vmem:[%s15288_s18 + $0x648] sm:$0xf0] }
  0xd7   : > { %3729 = vmatpush.bf16.msra.mxu2 %v10684_v8  ;;  %3704 = vmatpush.bf16.msra.mxu0 %v9596_v20  ;;  %v13698_v40 = vld [vmem:[%s15288_s18 + $0x444] sm:$0xf0]  ;;  %v10880_v8 = vor.u32 %v13914_v2, %v10877_v3  ;;  %v9792_v20 = vor.u32 %v13642_v9, %v9789_v10  ;;  %v13882_v30 = vld [vmem:[%s15288_s18 + $0xa0c] sm:$0xf]  ;;  %v10240_v35 = vor.u32 %v13754_v25, %v10237_v29  ;;  %v10947_v25 = vld [vmem:[%s15288_s18 + $0xb90] sm:$0xf] }
  0xd8   : > { %v10491_v41 = vld [vmem:[%s15288_s18 + $0x808] sm:$0xf]  ;;  %v9980_v53 = vor.u32 %v13698_v40, %v9979_v39  ;;  %v10749_v31 = vld [vmem:[%s15288_s18 + $0xa48] sm:$0xf0] }
  0xd9   : > { %3742 = vmatpush.bf16.msra.mxu3 %v11196_v12  ;;  %3717 = vmatpush.bf16.msra.mxu1 %v10108_v21  ;;  %v13826_v43 = vld [vmem:[%s15288_s18 + $0x844] sm:$0xf0]  ;;  %v11392_v12 = vor.u32 %v14042_v4, %v11389_v5  ;;  %v10304_v21 = vor.u32 %v13770_v11, %v10301_v13  ;;  %v14010_v32 = vld [vmem:[%s15288_s18 + $0xe0c] sm:$0xf]  ;;  %v10752_v36 = vor.u32 %v13882_v30, %v10749_v31  ;;  %v11459_v31 = vld [vmem:[%s15288_s18 + $0xf90] sm:$0xf] }
  0xda   : > { %v11003_v44 = vld [vmem:[%s15288_s18 + $0xc08] sm:$0xf]  ;;  %v10492_v54 = vor.u32 %v13826_v43, %v10491_v41  ;;  %v11261_v33 = vld [vmem:[%s15288_s18 + $0xe48] sm:$0xf0] }
  0xdb   : > { %3730 = vmatpush.bf16.msra.mxu2 %v10620_v22  ;;  %v13954_v45 = vld [vmem:[%s15288_s18 + $0xc44] sm:$0xf0]  ;;  %3705 = vmatpush.bf16.msra.mxu0 %v9532_v34  ;;  %v10816_v22 = vor.u32 %v13898_v14, %v10813_v15  ;;  %v9728_v34 = vor.u32 %v13626_v23, %v9725_v24  ;;  %v13738_v39 = vld [vmem:[%s15288_s18 + $0x58c] sm:$0xf]  ;;  %v11264_v40 = vor.u32 %v14010_v32, %v11261_v33  ;;  %v13811_v24 = vld [vmem:[%s15288_s18 + $0x7cc] sm:$0xf0] }
  0xdc   : > { %v11004_v57 = vor.u32 %v13954_v45, %v11003_v44  ;;  %v10173_v41 = vld [vmem:[%s15288_s18 + $0x5c8] sm:$0xf0]  ;;  %v14067_v32 = vld [vmem:[%s15288_s18 + $0xfcc] sm:$0xf0] }
  0xdd   : > { %3743 = vmatpush.bf16.msra.mxu3 %v11132_v28  ;;  %3718 = vmatpush.bf16.msra.mxu1 %v10044_v37  ;;  %v11328_v28 = vor.u32 %v14026_v18, %v11325_v19  ;;  %v13610_v37 = vld [vmem:[%s15288_s18 + $0x18c] sm:$0xf]  ;;  %v10176_v47 = vor.u32 %v13738_v39, %v10173_v41  ;;  %v10371_v39 = vld [vmem:[%s15288_s18 + $0x710] sm:$0xf] }
  0xde   : > { %v10685_v43 = vld [vmem:[%s15288_s18 + $0x9c8] sm:$0xf0]  ;;  %v13795_v41 = vld [vmem:[%s15288_s18 + $0x74c] sm:$0xf0] }
  0xdf   : > { %3731 = vmatpush.bf16.msra.mxu2 %v10556_v38  ;;  %3706 = vmatpush.bf16.msra.mxu0 %v9468_v49  ;;  %v9661_v38 = vld [vmem:[%s15288_s18 + $0x1c8] sm:$0xf0] }
  0xe0   : > { %v13994_v44 = vld [vmem:[%s15288_s18 + $0xd8c] sm:$0xf]  ;;  %v9664_v46 = vor.u32 %v13610_v37, %v9661_v38  ;;  %v9859_v37 = vld [vmem:[%s15288_s18 + $0x310] sm:$0xf] }
  0xe1   : > { %3744 = vmatpush.bf16.msra.mxu3 %v11068_v42  ;;  %3719 = vmatpush.bf16.msra.mxu1 %v9980_v53  ;;  %v13866_v42 = vld [vmem:[%s15288_s18 + $0x98c] sm:$0xf]  ;;  %v13667_v38 = vld [vmem:[%s15288_s18 + $0x34c] sm:$0xf0] }
  0xe2   : > { %3707 = vmatmul.bf16.vlgmr.msra.gmra.mxu0 %v15416_v26  ;;  %v11197_v45 = vld [vmem:[%s15288_s18 + $0xdc8] sm:$0xf0]  ;;  %v10688_v48 = vor.u32 %v13866_v42, %v10685_v43  ;;  %v10883_v42 = vld [vmem:[%s15288_s18 + $0xb10] sm:$0xf] }
  0xe3   : > { %3732 = vmatpush.bf16.msra.mxu2 %v10492_v54  ;;  %3751 = vmatpush.bf16.msrb.mxu0 %v9920_v58  ;;  %v13594_v49 = vld [vmem:[%s15288_s18 + $0x10c] sm:$0xf]  ;;  %v11200_v52 = vor.u32 %v13994_v44, %v11197_v45  ;;  %v13923_v43 = vld [vmem:[%s15288_s18 + $0xb4c] sm:$0xf0] }
  0xe4   : > { %3720 = vmatmul.bf16.vlgmr.msra.gmra.mxu1 %v15418_v27  ;;  %v9597_v50 = vld [vmem:[%s15288_s18 + $0x148] sm:$0xf0]  ;;  %v11395_v44 = vld [vmem:[%s15288_s18 + $0xf10] sm:$0xf] }
  0xe5   : > { %3745 = vmatpush.bf16.msra.mxu3 %v11004_v57  ;;  %3764 = vmatpush.bf16.msrb.mxu1 %v10432_v59  ;;  %v13722_v51 = vld [vmem:[%s15288_s18 + $0x50c] sm:$0xf]  ;;  %v9600_v58 = vor.u32 %v13594_v49, %v9597_v50  ;;  %v14051_v45 = vld [vmem:[%s15288_s18 + $0xf4c] sm:$0xf0] }
  0xe6   : > { %3733 = vmatmul.bf16.vlgmr.msra.gmra.mxu2 %v15409_v16  ;;  %v10109_v53 = vld [vmem:[%s15288_s18 + $0x548] sm:$0xf0]  ;;  %v9795_v49 = vld [vmem:[%s15288_s18 + $0x290] sm:$0xf] }
  0xe7   : > { %3777 = vmatpush.bf16.msrb.mxu2 %v10944_v60  ;;  %3752 = vmatpush.bf16.msrb.mxu0 %v9856_v6  ;;  %v13850_v54 = vld [vmem:[%s15288_s18 + $0x90c] sm:$0xf]  ;;  %v10112_v59 = vor.u32 %v13722_v51, %v10109_v53  ;;  %v13651_v50 = vld [vmem:[%s15288_s18 + $0x2cc] sm:$0xf0] }
  0xe8   : > { %3746 = vmatmul.bf16.vlgmr.msra.gmra.mxu3 %v15411_v17  ;;  %v10621_v55 = vld [vmem:[%s15288_s18 + $0x948] sm:$0xf0]  ;;  %v10307_v51 = vld [vmem:[%s15288_s18 + $0x690] sm:$0xf] }
  0xe9   : > { %3790 = vmatpush.bf16.msrb.mxu3 %v11456_v0  ;;  %3765 = vmatpush.bf16.msrb.mxu1 %v10368_v7  ;;  %v13978_v56 = vld [vmem:[%s15288_s18 + $0xd0c] sm:$0xf]  ;;  %v10624_v60 = vor.u32 %v13850_v54, %v10621_v55  ;;  %v13779_v53 = vld [vmem:[%s15288_s18 + $0x6cc] sm:$0xf0] }
  0xea   : > { %v11133_v57 = vld [vmem:[%s15288_s18 + $0xd48] sm:$0xf0]  ;;  %v10819_v54 = vld [vmem:[%s15288_s18 + $0xa90] sm:$0xf] }
  0xeb   : > { %3778 = vmatpush.bf16.msrb.mxu2 %v10880_v8  ;;  %3753 = vmatpush.bf16.msrb.mxu0 %v9792_v20  ;;  %v13578_v61 = vld [vmem:[%s15288_s18 + $0x8c] sm:$0xf]  ;;  %v11136_v0 = vor.u32 %v13978_v56, %v11133_v57  ;;  %v9923_v20 = vld [vmem:[%s15288_s18 + $0x390] sm:$0xf] }
  0xec   : > { %v9533_v62 = vld [vmem:[%s15288_s18 + $0xc8] sm:$0xf0]  ;;  %v13907_v55 = vld [vmem:[%s15288_s18 + $0xacc] sm:$0xf0] }
  0xed   : > { %3791 = vmatpush.bf16.msrb.mxu3 %v11392_v12  ;;  %3766 = vmatpush.bf16.msrb.mxu1 %v10304_v21  ;;  %v13706_v63 = vld [vmem:[%s15288_s18 + $0x48c] sm:$0xf]  ;;  %v9536_v6 = vor.u32 %v13578_v61, %v9533_v62  ;;  %v13683_v21 = vld [vmem:[%s15288_s18 + $0x3cc] sm:$0xf0] }
  0xee   : > { %v10045_v1 = vld [vmem:[%s15288_s18 + $0x4c8] sm:$0xf0]  ;;  %v11331_v56 = vld [vmem:[%s15288_s18 + $0xe90] sm:$0xf] }
  0xef   : > { %3779 = vmatpush.bf16.msrb.mxu2 %v10816_v22  ;;  %3754 = vmatpush.bf16.msrb.mxu0 %v9728_v34  ;;  %v13834_v2 = vld [vmem:[%s15288_s18 + $0x88c] sm:$0xf]  ;;  %v10048_v9 = vor.u32 %v13706_v63, %v10045_v1  ;;  %v10435_v22 = vld [vmem:[%s15288_s18 + $0x790] sm:$0xf]  ;;  %v9924_v34 = vor.u32 %v13683_v21, %v9923_v20 }
  0xf0   : > { %v10557_v3 = vld [vmem:[%s15288_s18 + $0x8c8] sm:$0xf0]  ;;  %v14035_v57 = vld [vmem:[%s15288_s18 + $0xecc] sm:$0xf0] }
  0xf1   : > { %3792 = vmatpush.bf16.msrb.mxu3 %v11328_v28  ;;  %3767 = vmatpush.bf16.msrb.mxu1 %v10240_v35  ;;  %v13962_v4 = vld [vmem:[%s15288_s18 + $0xc8c] sm:$0xf]  ;;  %v10560_v10 = vor.u32 %v13834_v2, %v10557_v3  ;;  %v13939_v28 = vld [vmem:[%s15288_s18 + $0xbcc] sm:$0xf0]  ;;  %v10436_v35 = vor.u32 %v13811_v24, %v10435_v22 }
  0xf2   : > { %v11069_v5 = vld [vmem:[%s15288_s18 + $0xcc8] sm:$0xf0]  ;;  %v9731_v61 = vld [vmem:[%s15288_s18 + $0x210] sm:$0xf] }
  0xf3   : > { %3780 = vmatpush.bf16.msrb.mxu2 %v10752_v36  ;;  %3755 = vmatpush.bf16.msrb.mxu0 %v9664_v46  ;;  %v13562_v7 = vld [vmem:[%s15288_s18 + $0xc] sm:$0xf]  ;;  %v11072_v14 = vor.u32 %v13962_v4, %v11069_v5  ;;  %v10948_v36 = vor.u32 %v13939_v28, %v10947_v25  ;;  %v9860_v46 = vor.u32 %v13667_v38, %v9859_v37  ;;  %v13635_v62 = vld [vmem:[%s15288_s18 + $0x24c] sm:$0xf0] }
  0xf4   : > { %v9469_v8 = vld [vmem:[%s15288_s18 + $0x48] sm:$0xf0]  ;;  %v10243_v63 = vld [vmem:[%s15288_s18 + $0x610] sm:$0xf] }
  0xf5   : > { %3793 = vmatpush.bf16.msrb.mxu3 %v11264_v40  ;;  %3768 = vmatpush.bf16.msrb.mxu1 %v10176_v47  ;;  %v13690_v11 = vld [vmem:[%s15288_s18 + $0x40c] sm:$0xf]  ;;  %v9472_v23 = vor.u32 %v13562_v7, %v9469_v8  ;;  %v11460_v40 = vor.u32 %v14067_v32, %v11459_v31  ;;  %v10372_v47 = vor.u32 %v13795_v41, %v10371_v39  ;;  %v13763_v1 = vld [vmem:[%s15288_s18 + $0x64c] sm:$0xf0] }
  0xf6   : > { %v9981_v12 = vld [vmem:[%s15288_s18 + $0x448] sm:$0xf0]  ;;  %v10755_v2 = vld [vmem:[%s15288_s18 + $0xa10] sm:$0xf]  ;;  %v10244_v7 = vor.u32 %v13763_v1, %v10243_v63  ;;  %v13931_v63 = vld [vmem:[%s15288_s18 + $0xb94] sm:$0xf] }
  0xf7   : > { %3781 = vmatpush.bf16.msrb.mxu2 %v10688_v48  ;;  %3756 = vmatpush.bf16.msrb.mxu0 %v9600_v58  ;;  %v13818_v13 = vld [vmem:[%s15288_s18 + $0x80c] sm:$0xf]  ;;  %v9984_v29 = vor.u32 %v13690_v11, %v9981_v12  ;;  %v10884_v48 = vor.u32 %v13923_v43, %v10883_v42  ;;  %v9796_v58 = vor.u32 %v13651_v50, %v9795_v49  ;;  %v13891_v3 = vld [vmem:[%s15288_s18 + $0xa4c] sm:$0xf0] }
  0xf8   : > { %v10493_v15 = vld [vmem:[%s15288_s18 + $0x848] sm:$0xf0]  ;;  %v11267_v4 = vld [vmem:[%s15288_s18 + $0xe10] sm:$0xf]  ;;  %v10756_v8 = vor.u32 %v13891_v3, %v10755_v2  ;;  %v14059_v3 = vld [vmem:[%s15288_s18 + $0xf94] sm:$0xf] }
  0xf9   : > { %3794 = vmatpush.bf16.msrb.mxu3 %v11200_v52  ;;  %3769 = vmatpush.bf16.msrb.mxu1 %v10112_v59  ;;  %v13946_v18 = vld [vmem:[%s15288_s18 + $0xc0c] sm:$0xf]  ;;  %v10496_v30 = vor.u32 %v13818_v13, %v10493_v15  ;;  %v11396_v52 = vor.u32 %v14051_v45, %v11395_v44  ;;  %v10308_v59 = vor.u32 %v13779_v53, %v10307_v51  ;;  %v14019_v5 = vld [vmem:[%s15288_s18 + $0xe4c] sm:$0xf0] }
  0xfa   : > { %v11005_v19 = vld [vmem:[%s15288_s18 + $0xc48] sm:$0xf0]  ;;  %v10179_v11 = vld [vmem:[%s15288_s18 + $0x590] sm:$0xf]  ;;  %v11268_v12 = vor.u32 %v14019_v5, %v11267_v4  ;;  %v11461_v4 = vld [vmem:[%s15288_s18 + $0xfd0] sm:$0xf0] }
  0xfb   : > { %3782 = vmatpush.bf16.msrb.mxu2 %v10624_v60  ;;  %3757 = vmatpush.bf16.msrb.mxu0 %v9536_v6  ;;  %v11008_v33 = vor.u32 %v13946_v18, %v11005_v19  ;;  %v10820_v60 = vor.u32 %v13907_v55, %v10819_v54  ;;  %v9732_v6 = vor.u32 %v13635_v62, %v9731_v61  ;;  %v13747_v13 = vld [vmem:[%s15288_s18 + $0x5cc] sm:$0xf0]  ;;  %v10437_v62 = vld [vmem:[%s15288_s18 + $0x7d0] sm:$0xf0] }
  0xfc   : > { %v13875_v15 = vld [vmem:[%s15288_s18 + $0x9cc] sm:$0xf0]  ;;  %v10180_v21 = vor.u32 %v13747_v13, %v10179_v11  ;;  %v13787_v11 = vld [vmem:[%s15288_s18 + $0x714] sm:$0xf] }
  0xfd   : > { %3795 = vmatpush.bf16.msrb.mxu3 %v11136_v0  ;;  %3770 = vmatpush.bf16.msrb.mxu1 %v10048_v9  ;;  %v11332_v0 = vor.u32 %v14035_v57, %v11331_v56  ;;  %v9667_v9 = vld [vmem:[%s15288_s18 + $0x190] sm:$0xf]  ;;  %v10373_v13 = vld [vmem:[%s15288_s18 + $0x750] sm:$0xf0] }
  0xfe   : > { %v11203_v18 = vld [vmem:[%s15288_s18 + $0xd90] sm:$0xf] }
  0xff   : > { %3783 = vmatpush.bf16.msrb.mxu2 %v10560_v10  ;;  %3758 = vmatpush.bf16.msrb.mxu0 %v9472_v23  ;;  %v13619_v10 = vld [vmem:[%s15288_s18 + $0x1cc] sm:$0xf0] }
 0x100   : > { %v14003_v19 = vld [vmem:[%s15288_s18 + $0xdcc] sm:$0xf0]  ;;  %v9668_v20 = vor.u32 %v13619_v10, %v9667_v9  ;;  %v13659_v9 = vld [vmem:[%s15288_s18 + $0x314] sm:$0xf] }
 0x101   : > { %3796 = vmatpush.bf16.msrb.mxu3 %v11072_v14  ;;  %3771 = vmatpush.bf16.msrb.mxu1 %v9984_v29  ;;  %v10691_v14 = vld [vmem:[%s15288_s18 + $0x990] sm:$0xf]  ;;  %v11204_v28 = vor.u32 %v14003_v19, %v11203_v18  ;;  %v9861_v10 = vld [vmem:[%s15288_s18 + $0x350] sm:$0xf0] }
 0x102   : > { %3759 = vmatmul.bf16.vlgmr.msrb.gmra.mxu0 %v15416_v26  ;;  %v10692_v22 = vor.u32 %v13875_v15, %v10691_v14  ;;  %v9603_v23 = vld [vmem:[%s15288_s18 + $0x110] sm:$0xf]  ;;  %v13915_v14 = vld [vmem:[%s15288_s18 + $0xb14] sm:$0xf] }
 0x103   : > { %3784 = vmatpush.bf16.msrb.mxu2 %v10496_v30  ;;  %3803 = vmatpush.bf16.msra.mxu0 %v9924_v34  ;;  %v13603_v24 = vld [vmem:[%s15288_s18 + $0x14c] sm:$0xf0]  ;;  %v10885_v15 = vld [vmem:[%s15288_s18 + $0xb50] sm:$0xf0] }
 0x104   : > { %3772 = vmatmul.bf16.vlgmr.msrb.gmra.mxu1 %v15418_v27  ;;  %v10115_v25 = vld [vmem:[%s15288_s18 + $0x510] sm:$0xf]  ;;  %v9604_v34 = vor.u32 %v13603_v24, %v9603_v23  ;;  %v14043_v18 = vld [vmem:[%s15288_s18 + $0xf14] sm:$0xf] }
 0x105   : > { %3797 = vmatpush.bf16.msrb.mxu3 %v11008_v33  ;;  %3816 = vmatpush.bf16.msra.mxu1 %v10436_v35  ;;  %v13731_v29 = vld [vmem:[%s15288_s18 + $0x54c] sm:$0xf0]  ;;  %v11397_v19 = vld [vmem:[%s15288_s18 + $0xf50] sm:$0xf0] }
 0x106   : > { %3785 = vmatmul.bf16.vlgmr.msrb.gmra.mxu2 %v15409_v16  ;;  %v10627_v30 = vld [vmem:[%s15288_s18 + $0x910] sm:$0xf]  ;;  %v10116_v35 = vor.u32 %v13731_v29, %v10115_v25  ;;  %v13643_v23 = vld [vmem:[%s15288_s18 + $0x294] sm:$0xf] }
 0x107   : > { %3829 = vmatpush.bf16.msra.mxu2 %v10948_v36  ;;  %3804 = vmatpush.bf16.msra.mxu0 %v9860_v46  ;;  %v13859_v31 = vld [vmem:[%s15288_s18 + $0x94c] sm:$0xf0]  ;;  %v9797_v24 = vld [vmem:[%s15288_s18 + $0x2d0] sm:$0xf0] }
 0x108   : > { %3798 = vmatmul.bf16.vlgmr.msrb.gmra.mxu3 %v15411_v17  ;;  %v11139_v32 = vld [vmem:[%s15288_s18 + $0xd10] sm:$0xf]  ;;  %v10628_v36 = vor.u32 %v13859_v31, %v10627_v30  ;;  %v13771_v25 = vld [vmem:[%s15288_s18 + $0x694] sm:$0xf] }
 0x109   : > { %3842 = vmatpush.bf16.msra.mxu3 %v11460_v40  ;;  %3817 = vmatpush.bf16.msra.mxu1 %v10372_v47  ;;  %v13987_v33 = vld [vmem:[%s15288_s18 + $0xd4c] sm:$0xf0]  ;;  %v10309_v29 = vld [vmem:[%s15288_s18 + $0x6d0] sm:$0xf0] }
 0x10a   : > { %v9539_v37 = vld [vmem:[%s15288_s18 + $0x90] sm:$0xf]  ;;  %v11140_v40 = vor.u32 %v13987_v33, %v11139_v32  ;;  %v13899_v30 = vld [vmem:[%s15288_s18 + $0xa94] sm:$0xf] }
 0x10b   : > { %3830 = vmatpush.bf16.msra.mxu2 %v10884_v48  ;;  %3805 = vmatpush.bf16.msra.mxu0 %v9796_v58  ;;  %v13587_v38 = vld [vmem:[%s15288_s18 + $0xcc] sm:$0xf0]  ;;  %v13675_v58 = vld [vmem:[%s15288_s18 + $0x394] sm:$0xf] }
 0x10c   : > { %v10051_v39 = vld [vmem:[%s15288_s18 + $0x490] sm:$0xf]  ;;  %v9540_v46 = vor.u32 %v13587_v38, %v9539_v37  ;;  %v10821_v31 = vld [vmem:[%s15288_s18 + $0xad0] sm:$0xf0] }
 0x10d   : > { %3843 = vmatpush.bf16.msra.mxu3 %v11396_v52  ;;  %3818 = vmatpush.bf16.msra.mxu1 %v10308_v59  ;;  %v13715_v41 = vld [vmem:[%s15288_s18 + $0x4cc] sm:$0xf0]  ;;  %v9925_v59 = vld [vmem:[%s15288_s18 + $0x3d0] sm:$0xf0] }
 0x10e   : > { %v10563_v42 = vld [vmem:[%s15288_s18 + $0x890] sm:$0xf]  ;;  %v10052_v49 = vor.u32 %v13715_v41, %v10051_v39  ;;  %v14027_v32 = vld [vmem:[%s15288_s18 + $0xe94] sm:$0xf] }
 0x10f   : > { %3831 = vmatpush.bf16.msra.mxu2 %v10820_v60  ;;  %3806 = vmatpush.bf16.msra.mxu0 %v9732_v6  ;;  %v13843_v43 = vld [vmem:[%s15288_s18 + $0x8cc] sm:$0xf0]  ;;  %v13803_v60 = vld [vmem:[%s15288_s18 + $0x794] sm:$0xf]  ;;  %v9928_v6 = vor.u32 %v13675_v58, %v9925_v59 }
 0x110   : > { %v11075_v44 = vld [vmem:[%s15288_s18 + $0xc90] sm:$0xf]  ;;  %v10564_v50 = vor.u32 %v13843_v43, %v10563_v42  ;;  %v11333_v33 = vld [vmem:[%s15288_s18 + $0xed0] sm:$0xf0] }
 0x111   : > { %3844 = vmatpush.bf16.msra.mxu3 %v11332_v0  ;;  %3819 = vmatpush.bf16.msra.mxu1 %v10244_v7  ;;  %v13971_v45 = vld [vmem:[%s15288_s18 + $0xccc] sm:$0xf0]  ;;  %v10949_v0 = vld [vmem:[%s15288_s18 + $0xbd0] sm:$0xf0]  ;;  %v10440_v7 = vor.u32 %v13803_v60, %v10437_v62 }
 0x112   : > { %v9475_v47 = vld [vmem:[%s15288_s18 + $0x10] sm:$0xf]  ;;  %v11076_v54 = vor.u32 %v13971_v45, %v11075_v44  ;;  %v13627_v37 = vld [vmem:[%s15288_s18 + $0x214] sm:$0xf] }
 0x113   : > { %3832 = vmatpush.bf16.msra.mxu2 %v10756_v8  ;;  %3807 = vmatpush.bf16.msra.mxu0 %v9668_v20  ;;  %v13571_v48 = vld [vmem:[%s15288_s18 + $0x4c] sm:$0xf0]  ;;  %v10952_v8 = vor.u32 %v13931_v63, %v10949_v0  ;;  %v9864_v20 = vor.u32 %v13659_v9, %v9861_v10  ;;  %v9733_v38 = vld [vmem:[%s15288_s18 + $0x250] sm:$0xf0] }
 0x114   : > { %v9987_v51 = vld [vmem:[%s15288_s18 + $0x410] sm:$0xf]  ;;  %v9476_v61 = vor.u32 %v13571_v48, %v9475_v47  ;;  %v13755_v39 = vld [vmem:[%s15288_s18 + $0x614] sm:$0xf] }
 0x115   : > { %3845 = vmatpush.bf16.msra.mxu3 %v11268_v12  ;;  %3820 = vmatpush.bf16.msra.mxu1 %v10180_v21  ;;  %v13699_v52 = vld [vmem:[%s15288_s18 + $0x44c] sm:$0xf0]  ;;  %v11464_v12 = vor.u32 %v14059_v3, %v11461_v4  ;;  %v10376_v21 = vor.u32 %v13787_v11, %v10373_v13  ;;  %v10245_v41 = vld [vmem:[%s15288_s18 + $0x650] sm:$0xf0] }
 0x116   : > { %v10499_v53 = vld [vmem:[%s15288_s18 + $0x810] sm:$0xf]  ;;  %v9988_v1 = vor.u32 %v13699_v52, %v9987_v51  ;;  %v13883_v42 = vld [vmem:[%s15288_s18 + $0xa14] sm:$0xf]  ;;  %v10248_v47 = vor.u32 %v13755_v39, %v10245_v41  ;;  %v13684_v41 = vld [vmem:[%s15288_s18 + $0x3d4] sm:$0xf0] }
 0x117   : > { %3833 = vmatpush.bf16.msra.mxu2 %v10692_v22  ;;  %3808 = vmatpush.bf16.msra.mxu0 %v9604_v34  ;;  %v13827_v55 = vld [vmem:[%s15288_s18 + $0x84c] sm:$0xf0]  ;;  %v10888_v22 = vor.u32 %v13915_v14, %v10885_v15  ;;  %v9800_v34 = vor.u32 %v13643_v23, %v9797_v24  ;;  %v10757_v43 = vld [vmem:[%s15288_s18 + $0xa50] sm:$0xf0] }
 0x118   : > { %v11011_v56 = vld [vmem:[%s15288_s18 + $0xc10] sm:$0xf]  ;;  %v10500_v2 = vor.u32 %v13827_v55, %v10499_v53  ;;  %v14011_v44 = vld [vmem:[%s15288_s18 + $0xe14] sm:$0xf]  ;;  %v10760_v48 = vor.u32 %v13883_v42, %v10757_v43  ;;  %v10443_v42 = vld [vmem:[%s15288_s18 + $0x798] sm:$0xf] }
 0x119   : > { %3846 = vmatpush.bf16.msra.mxu3 %v11204_v28  ;;  %3821 = vmatpush.bf16.msra.mxu1 %v10116_v35  ;;  %v13955_v57 = vld [vmem:[%s15288_s18 + $0xc4c] sm:$0xf0]  ;;  %v11400_v28 = vor.u32 %v14043_v18, %v11397_v19  ;;  %v10312_v35 = vor.u32 %v13771_v25, %v10309_v29  ;;  %v11269_v45 = vld [vmem:[%s15288_s18 + $0xe50] sm:$0xf0] }
 0x11a   : > { %v11012_v5 = vor.u32 %v13955_v57, %v11011_v56  ;;  %v13739_v51 = vld [vmem:[%s15288_s18 + $0x594] sm:$0xf]  ;;  %v11272_v52 = vor.u32 %v14011_v44, %v11269_v45  ;;  %v13812_v45 = vld [vmem:[%s15288_s18 + $0x7d4] sm:$0xf0] }
 0x11b   : > { %3834 = vmatpush.bf16.msra.mxu2 %v10628_v36  ;;  %3809 = vmatpush.bf16.msra.mxu0 %v9540_v46  ;;  %v10824_v36 = vor.u32 %v13899_v30, %v10821_v31  ;;  %v9736_v46 = vor.u32 %v13627_v37, %v9733_v38  ;;  %v10181_v53 = vld [vmem:[%s15288_s18 + $0x5d0] sm:$0xf0]  ;;  %v9931_v38 = vld [vmem:[%s15288_s18 + $0x398] sm:$0xf] }
 0x11c   : > { %v10693_v55 = vld [vmem:[%s15288_s18 + $0x9d0] sm:$0xf0]  ;;  %v10184_v59 = vor.u32 %v13739_v51, %v10181_v53  ;;  %v14068_v53 = vld [vmem:[%s15288_s18 + $0xfd4] sm:$0xf0] }
 0x11d   : > { %3847 = vmatpush.bf16.msra.mxu3 %v11140_v40  ;;  %3822 = vmatpush.bf16.msra.mxu1 %v10052_v49  ;;  %v11336_v40 = vor.u32 %v14027_v32, %v11333_v33  ;;  %v13611_v49 = vld [vmem:[%s15288_s18 + $0x194] sm:$0xf] }
 0x11e   : > { %v13995_v56 = vld [vmem:[%s15288_s18 + $0xd94] sm:$0xf] }
 0x11f   : > { %3835 = vmatpush.bf16.msra.mxu2 %v10564_v50  ;;  %3810 = vmatpush.bf16.msra.mxu0 %v9476_v61  ;;  %v9669_v50 = vld [vmem:[%s15288_s18 + $0x1d0] sm:$0xf0] }
 0x120   : > { %v11205_v57 = vld [vmem:[%s15288_s18 + $0xdd0] sm:$0xf0]  ;;  %v9672_v58 = vor.u32 %v13611_v49, %v9669_v50 }
 0x121   : > { %3848 = vmatpush.bf16.msra.mxu3 %v11076_v54  ;;  %3823 = vmatpush.bf16.msra.mxu1 %v9988_v1  ;;  %v13867_v54 = vld [vmem:[%s15288_s18 + $0x994] sm:$0xf]  ;;  %v11208_v0 = vor.u32 %v13995_v56, %v11205_v57  ;;  %v3617_v13 = vpop.f32.mrf.mxu1  ;;  %v9932_v56 = vor.u32 %v13684_v41, %v9931_v38  ;;  %v9867_v57 = vld [vmem:[%s15288_s18 + $0x318] sm:$0xf] }
 0x122   : > { %3811 = vmatmul.bf16.vlgmr.msra.gmra.mxu0 %v15416_v26  ;;  %v10696_v60 = vor.u32 %v13867_v54, %v10693_v55  ;;  %v13595_v61 = vld [vmem:[%s15288_s18 + $0x114] sm:$0xf]  ;;  %v10187_v41 = vld [vmem:[%s15288_s18 + $0x598] sm:$0xf] }
 0x123   : > { %3836 = vmatpush.bf16.msra.mxu2 %v10500_v2  ;;  %3855 = vmatpush.bf16.msrb.mxu0 %v9928_v6  ;;  %v9605_v62 = vld [vmem:[%s15288_s18 + $0x150] sm:$0xf0] }
 0x124   : > { %3824 = vmatmul.bf16.vlgmr.msra.gmra.mxu1 %v15418_v27  ;;  %v13723_v63 = vld [vmem:[%s15288_s18 + $0x514] sm:$0xf]  ;;  %v9608_v6 = vor.u32 %v13595_v61, %v9605_v62  ;;  %v13668_v61 = vld [vmem:[%s15288_s18 + $0x354] sm:$0xf0] }
 0x125   : > { %3849 = vmatpush.bf16.msra.mxu3 %v11012_v5  ;;  %3868 = vmatpush.bf16.msrb.mxu1 %v10440_v7  ;;  %v10117_v1 = vld [vmem:[%s15288_s18 + $0x550] sm:$0xf0]  ;;  %v3604_v7 = vpop.f32.mrf.mxu0  ;;  %v10379_v62 = vld [vmem:[%s15288_s18 + $0x718] sm:$0xf] }
 0x126   : > { %3837 = vmatmul.bf16.vlgmr.msra.gmra.mxu2 %v15409_v16  ;;  %v13851_v2 = vld [vmem:[%s15288_s18 + $0x914] sm:$0xf] }
 0x127   : > { %3881 = vmatpush.bf16.msrb.mxu2 %v10952_v8  ;;  %3856 = vmatpush.bf16.msrb.mxu0 %v9864_v20  ;;  %v10629_v3 = vld [vmem:[%s15288_s18 + $0x950] sm:$0xf0]  ;;  %v10120_v8 = vor.u32 %v13723_v63, %v10117_v1  ;;  %v3618_v20 = vadd.f32 %v3617_v13, %v3604_v7  ;;  %v13796_v63 = vld [vmem:[%s15288_s18 + $0x754] sm:$0xf0] }
 0x128   : > { %3850 = vmatmul.bf16.vlgmr.msra.gmra.mxu3 %v15411_v17  ;;  %v13979_v4 = vld [vmem:[%s15288_s18 + $0xd14] sm:$0xf]  ;;  %v10632_v9 = vor.u32 %v13851_v2, %v10629_v3  ;;  %v10891_v1 = vld [vmem:[%s15288_s18 + $0xb18] sm:$0xf] }
 0x129   : > { %3894 = vmatpush.bf16.msrb.mxu3 %v11464_v12  ;;  %3869 = vmatpush.bf16.msrb.mxu1 %v10376_v21  ;;  %v11141_v5 = vld [vmem:[%s15288_s18 + $0xd50] sm:$0xf0]  ;;  %v3619_v54 = vpop.f32.mrf.mxu1  ;;  %v13924_v2 = vld [vmem:[%s15288_s18 + $0xb54] sm:$0xf0] }
 0x12a   : > { %v13579_v10 = vld [vmem:[%s15288_s18 + $0x94] sm:$0xf]  ;;  %v11144_v14 = vor.u32 %v13979_v4, %v11141_v5  ;;  %v11403_v3 = vld [vmem:[%s15288_s18 + $0xf18] sm:$0xf] }
 0x12b   : > { %3882 = vmatpush.bf16.msrb.mxu2 %v10888_v22  ;;  %3857 = vmatpush.bf16.msrb.mxu0 %v9800_v34  ;;  %v9541_v11 = vld [vmem:[%s15288_s18 + $0xd0] sm:$0xf0]  ;;  %v3630_v34 = vpop.f32.mrf.mxu2  ;;  %v14052_v4 = vld [vmem:[%s15288_s18 + $0xf54] sm:$0xf0] }
 0x12c   : > { %v13707_v12 = vld [vmem:[%s15288_s18 + $0x494] sm:$0xf]  ;;  %v9544_v23 = vor.u32 %v13579_v10, %v9541_v11  ;;  %v3631_v39 = vadd.f32 %v3630_v34, %v3618_v20  ;;  %v9803_v10 = vld [vmem:[%s15288_s18 + $0x298] sm:$0xf]  ;;  %v11404_v13 = vor.u32 %v14052_v4, %v11403_v3 }
 0x12d   : > { %3895 = vmatpush.bf16.msrb.mxu3 %v11400_v28  ;;  %3870 = vmatpush.bf16.msrb.mxu1 %v10312_v35  ;;  %v10053_v15 = vld [vmem:[%s15288_s18 + $0x4d0] sm:$0xf0]  ;;  %v3606_v49 = vpop.f32.mrf.mxu0  ;;  %v13652_v11 = vld [vmem:[%s15288_s18 + $0x2d4] sm:$0xf0] }
 0x12e   : > { %v13835_v18 = vld [vmem:[%s15288_s18 + $0x894] sm:$0xf]  ;;  %v10056_v29 = vor.u32 %v13707_v12, %v10053_v15  ;;  %v10315_v12 = vld [vmem:[%s15288_s18 + $0x698] sm:$0xf] }
 0x12f   : > { %3883 = vmatpush.bf16.msrb.mxu2 %v10824_v36  ;;  %3858 = vmatpush.bf16.msrb.mxu0 %v9736_v46  ;;  %v10565_v19 = vld [vmem:[%s15288_s18 + $0x8d0] sm:$0xf0]  ;;  %v10955_v46 = vld [vmem:[%s15288_s18 + $0xb98] sm:$0xf] }
 0x130   : > { %v13963_v21 = vld [vmem:[%s15288_s18 + $0xc94] sm:$0xf]  ;;  %v10568_v30 = vor.u32 %v13835_v18, %v10565_v19  ;;  %v10827_v15 = vld [vmem:[%s15288_s18 + $0xa98] sm:$0xf] }
 0x131   : > { %3896 = vmatpush.bf16.msrb.mxu3 %v11336_v40  ;;  %3871 = vmatpush.bf16.msrb.mxu1 %v10248_v47  ;;  %v11077_v22 = vld [vmem:[%s15288_s18 + $0xcd0] sm:$0xf0]  ;;  %v3643_v40 = vpop.f32.mrf.mxu3  ;;  %v13940_v47 = vld [vmem:[%s15288_s18 + $0xbd4] sm:$0xf0] }
 0x132   : > { %v13563_v24 = vld [vmem:[%s15288_s18 + $0x14] sm:$0xf]  ;;  %v11080_v35 = vor.u32 %v13963_v21, %v11077_v22  ;;  %v13908_v18 = vld [vmem:[%s15288_s18 + $0xad4] sm:$0xf0]  ;;  %v9804_v21 = vor.u32 %v13652_v11, %v9803_v10 }
 0x133   : > { %3884 = vmatpush.bf16.msrb.mxu2 %v10760_v48  ;;  %3859 = vmatpush.bf16.msrb.mxu0 %v9672_v58  ;;  %v9477_v25 = vld [vmem:[%s15288_s18 + $0x50] sm:$0xf0]  ;;  %v3644_v48 = vadd.f32 %v3643_v40, %v3631_v39  ;;  %v3632_v5 = vpop.f32.mrf.mxu2  ;;  %v11339_v19 = vld [vmem:[%s15288_s18 + $0xe98] sm:$0xf] }
 0x134   : > { %v13691_v28 = vld [vmem:[%s15288_s18 + $0x414] sm:$0xf]  ;;  %v9480_v44 = vor.u32 %v13563_v24, %v9477_v25  ;;  %v14036_v20 = vld [vmem:[%s15288_s18 + $0xed4] sm:$0xf0] }
 0x135   : > { %3897 = vmatpush.bf16.msrb.mxu3 %v11272_v52  ;;  %3872 = vmatpush.bf16.msrb.mxu1 %v10184_v59  ;;  %v9989_v31 = vld [vmem:[%s15288_s18 + $0x450] sm:$0xf0]  ;;  %v11467_v52 = vld [vmem:[%s15288_s18 + $0xf98] sm:$0xf]  ;;  %v10444_v59 = vor.u32 %v13812_v45, %v10443_v42 }
 0x136   : > { %v13819_v32 = vld [vmem:[%s15288_s18 + $0x814] sm:$0xf]  ;;  %v9992_v50 = vor.u32 %v13691_v28, %v9989_v31  ;;  %v9739_v24 = vld [vmem:[%s15288_s18 + $0x218] sm:$0xf] }
 0x137   : > { %3885 = vmatpush.bf16.msrb.mxu2 %v10696_v60  ;;  %3860 = vmatpush.bf16.msrb.mxu0 %v9608_v6  ;;  %v10501_v33 = vld [vmem:[%s15288_s18 + $0x850] sm:$0xf0]  ;;  %v10956_v60 = vor.u32 %v13940_v47, %v10955_v46  ;;  %v9868_v6 = vor.u32 %v13668_v61, %v9867_v57  ;;  %v13636_v25 = vld [vmem:[%s15288_s18 + $0x254] sm:$0xf0] }
 0x138   : > { %v13947_v36 = vld [vmem:[%s15288_s18 + $0xc14] sm:$0xf]  ;;  %v10504_v51 = vor.u32 %v13819_v32, %v10501_v33  ;;  %v10251_v28 = vld [vmem:[%s15288_s18 + $0x618] sm:$0xf] }
 0x139   : > { %3898 = vmatpush.bf16.msrb.mxu3 %v11208_v0  ;;  %3873 = vmatpush.bf16.msrb.mxu1 %v10120_v8  ;;  %v11013_v37 = vld [vmem:[%s15288_s18 + $0xc50] sm:$0xf0]  ;;  %v11468_v0 = vor.u32 %v14068_v53, %v11467_v52  ;;  %v3645_v7 = vpop.f32.mrf.mxu3  ;;  %v10380_v8 = vor.u32 %v13796_v63, %v10379_v62  ;;  %v10763_v31 = vld [vmem:[%s15288_s18 + $0xa18] sm:$0xf] }
 0x13a   : > { %v507_v43 = vld [vmem:[#allocation2 + $0x30] sm:$0xff]  ;;  %v11016_v55 = vor.u32 %v13947_v36, %v11013_v37  ;;  %v13892_v32 = vld [vmem:[%s15288_s18 + $0xa54] sm:$0xf0] }
 0x13b   : > { %3886 = vmatpush.bf16.msrb.mxu2 %v10632_v9  ;;  %3861 = vmatpush.bf16.msrb.mxu0 %v9544_v23  ;;  %v4427_v58 = vadd.f32 %v3644_v48, %v507_v43  ;;  %v10892_v9 = vor.u32 %v13924_v2, %v10891_v1  ;;  %v10828_v23 = vor.u32 %v13908_v18, %v10827_v15  ;;  %v11275_v33 = vld [vmem:[%s15288_s18 + $0xe18] sm:$0xf]  ;;  %v508_v1 = vld [vmem:[#allocation2] sm:$0xff] }
 0x13c   : > { %v14020_v34 = vld [vmem:[%s15288_s18 + $0xe54] sm:$0xf0]  ;;  %v10764_v38 = vor.u32 %v13892_v32, %v10763_v31 }
 0x13d   : > { %3899 = vmatpush.bf16.msrb.mxu3 %v11144_v14  ;;  %3874 = vmatpush.bf16.msrb.mxu1 %v10056_v29  ;;  %4443 = vst [vmem:[#allocation2 + $0x30] sm:$0xff] %v4427_v58  ;;  %v13780_v14 = vld [vmem:[%s15288_s18 + $0x6d4] sm:$0xf0]  ;;  %v11340_v29 = vor.u32 %v14036_v20, %v11339_v19  ;;  %v11276_v43 = vor.u32 %v14020_v34, %v11275_v33 }
 0x13e   : > { %v10316_v22 = vor.u32 %v13780_v14, %v10315_v12  ;;  %v9675_v39 = vld [vmem:[%s15288_s18 + $0x198] sm:$0xf] }
 0x13f   : > { %3887 = vmatpush.bf16.msrb.mxu2 %v10568_v30  ;;  %3862 = vmatpush.bf16.msrb.mxu0 %v9480_v44  ;;  %v13764_v30 = vld [vmem:[%s15288_s18 + $0x654] sm:$0xf0]  ;;  %v3656_v36 = vpop.f32.mrf.mxu0 }
 0x140   : > { %v10252_v37 = vor.u32 %v13764_v30, %v10251_v28  ;;  %v13620_v40 = vld [vmem:[%s15288_s18 + $0x1d4] sm:$0xf0] }
 0x141   : > { %3900 = vmatpush.bf16.msrb.mxu3 %v11080_v35  ;;  %3875 = vmatpush.bf16.msrb.mxu1 %v9992_v50  ;;  %v9740_v35 = vor.u32 %v13636_v25, %v9739_v24  ;;  %v3669_v42 = vpop.f32.mrf.mxu1  ;;  %v13748_v44 = vld [vmem:[%s15288_s18 + $0x5d4] sm:$0xf0]  ;;  %v9676_v50 = vor.u32 %v13620_v40, %v9675_v39  ;;  %v10445_v40 = vld [vmem:[%s15288_s18 + $0x7d8] sm:$0xf0] }
 0x142   : > { %3863 = vmatmul.bf16.vlgmr.msrb.gmra.mxu0 %v15416_v26  ;;  %v10699_v45 = vld [vmem:[%s15288_s18 + $0x998] sm:$0xf]  ;;  %v3670_v47 = vadd.f32 %v3669_v42, %v3656_v36  ;;  %v13676_v36 = vld [vmem:[%s15288_s18 + $0x39c] sm:$0xf] }
 0x143   : > { %3888 = vmatpush.bf16.msrb.mxu2 %v10504_v51  ;;  %3907 = vmatpush.bf16.msra.mxu0 %v9932_v56  ;;  %v13876_v46 = vld [vmem:[%s15288_s18 + $0x9d4] sm:$0xf0]  ;;  %v10188_v51 = vor.u32 %v13748_v44, %v10187_v41  ;;  %v13932_v41 = vld [vmem:[%s15288_s18 + $0xb9c] sm:$0xf] }
 0x144   : > { %3876 = vmatmul.bf16.vlgmr.msrb.gmra.mxu1 %v15418_v27  ;;  %v11211_v48 = vld [vmem:[%s15288_s18 + $0xd98] sm:$0xf]  ;;  %v10700_v52 = vor.u32 %v13876_v46, %v10699_v45  ;;  %v10957_v42 = vld [vmem:[%s15288_s18 + $0xbd8] sm:$0xf0] }
 0x145   : > { %3901 = vmatpush.bf16.msrb.mxu3 %v11016_v55  ;;  %3920 = vmatpush.bf16.msra.mxu1 %v10444_v59  ;;  %v14004_v49 = vld [vmem:[%s15288_s18 + $0xdd4] sm:$0xf0]  ;;  %v14060_v45 = vld [vmem:[%s15288_s18 + $0xf9c] sm:$0xf] }
 0x146   : > { %3889 = vmatmul.bf16.vlgmr.msrb.gmra.mxu2 %v15409_v16  ;;  %v9611_v53 = vld [vmem:[%s15288_s18 + $0x118] sm:$0xf]  ;;  %v11212_v57 = vor.u32 %v14004_v49, %v11211_v48  ;;  %v11469_v46 = vld [vmem:[%s15288_s18 + $0xfd8] sm:$0xf0] }
 0x147   : > { %3933 = vmatpush.bf16.msra.mxu2 %v10956_v60  ;;  %3908 = vmatpush.bf16.msra.mxu0 %v9868_v6  ;;  %v13604_v54 = vld [vmem:[%s15288_s18 + $0x154] sm:$0xf0]  ;;  %v3658_v4 = vpop.f32.mrf.mxu0 }
 0x148   : > { %3902 = vmatmul.bf16.vlgmr.msrb.gmra.mxu3 %v15411_v17  ;;  %v10123_v55 = vld [vmem:[%s15288_s18 + $0x518] sm:$0xf]  ;;  %v9612_v2 = vor.u32 %v13604_v54, %v9611_v53  ;;  %v13788_v53 = vld [vmem:[%s15288_s18 + $0x71c] sm:$0xf]  ;;  %v11472_v54 = vor.u32 %v14060_v45, %v11469_v46 }
 0x149   : > { %3946 = vmatpush.bf16.msra.mxu3 %v11468_v0  ;;  %3921 = vmatpush.bf16.msra.mxu1 %v10380_v8  ;;  %v3682_v56 = vpop.f32.mrf.mxu2  ;;  %v13732_v58 = vld [vmem:[%s15288_s18 + $0x554] sm:$0xf0]  ;;  %v3671_v10 = vpop.f32.mrf.mxu1  ;;  %v13900_v4 = vld [vmem:[%s15288_s18 + $0xa9c] sm:$0xf] }
 0x14a   : > { %v10635_v59 = vld [vmem:[%s15288_s18 + $0x918] sm:$0xf]  ;;  %v3683_v61 = vadd.f32 %v3682_v56, %v3670_v47  ;;  %v10124_v5 = vor.u32 %v13732_v58, %v10123_v55  ;;  %v10381_v55 = vld [vmem:[%s15288_s18 + $0x758] sm:$0xf0] }
 0x14b   : > { %3934 = vmatpush.bf16.msra.mxu2 %v10892_v9  ;;  %3909 = vmatpush.bf16.msra.mxu0 %v9804_v21  ;;  %v13860_v60 = vld [vmem:[%s15288_s18 + $0x954] sm:$0xf0]  ;;  %v3695_v62 = vpop.f32.mrf.mxu3  ;;  %v13916_v56 = vld [vmem:[%s15288_s18 + $0xb1c] sm:$0xf] }
 0x14c   : > { %v11147_v63 = vld [vmem:[%s15288_s18 + $0xd18] sm:$0xf]  ;;  %v3696_v3 = vadd.f32 %v3695_v62, %v3683_v61  ;;  %v10636_v6 = vor.u32 %v13860_v60, %v10635_v59  ;;  %v14044_v58 = vld [vmem:[%s15288_s18 + $0xf1c] sm:$0xf]  ;;  %v10384_v61 = vor.u32 %v13788_v53, %v10381_v55 }
 0x14d   : > { %3947 = vmatpush.bf16.msra.mxu3 %v11404_v13  ;;  %3922 = vmatpush.bf16.msra.mxu1 %v10316_v22  ;;  %v13988_v0 = vld [vmem:[%s15288_s18 + $0xd54] sm:$0xf0]  ;;  %v11405_v59 = vld [vmem:[%s15288_s18 + $0xf58] sm:$0xf0] }
 0x14e   : > { %v9547_v7 = vld [vmem:[%s15288_s18 + $0x98] sm:$0xf]  ;;  %v11148_v11 = vor.u32 %v13988_v0, %v11147_v63  ;;  %v4428_v15 = vadd.f32 %v3696_v3, %v508_v1  ;;  %v13644_v63 = vld [vmem:[%s15288_s18 + $0x29c] sm:$0xf] }
 0x14f   : > { %3935 = vmatpush.bf16.msra.mxu2 %v10828_v23  ;;  %3910 = vmatpush.bf16.msra.mxu0 %v9740_v35  ;;  %v13588_v8 = vld [vmem:[%s15288_s18 + $0xd4] sm:$0xf0]  ;;  %v9805_v0 = vld [vmem:[%s15288_s18 + $0x2d8] sm:$0xf0] }
 0x150   : > { %v10059_v9 = vld [vmem:[%s15288_s18 + $0x498] sm:$0xf]  ;;  %v9548_v20 = vor.u32 %v13588_v8, %v9547_v7  ;;  %4444 = vst [vmem:[#allocation2] sm:$0xff] %v4428_v15  ;;  %v13772_v1 = vld [vmem:[%s15288_s18 + $0x69c] sm:$0xf]  ;;  %v9808_v8 = vor.u32 %v13644_v63, %v9805_v0 }
 0x151   : > { %3948 = vmatpush.bf16.msra.mxu3 %v11340_v29  ;;  %3923 = vmatpush.bf16.msra.mxu1 %v10252_v37  ;;  %v13716_v12 = vld [vmem:[%s15288_s18 + $0x4d4] sm:$0xf0]  ;;  %v3684_v30 = vpop.f32.mrf.mxu2  ;;  %v9933_v37 = vld [vmem:[%s15288_s18 + $0x3d8] sm:$0xf0] }
 0x152   : > { %v10571_v13 = vld [vmem:[%s15288_s18 + $0x898] sm:$0xf]  ;;  %v10060_v23 = vor.u32 %v13716_v12, %v10059_v9  ;;  %v9936_v48 = vor.u32 %v13676_v36, %v9933_v37  ;;  %v10317_v3 = vld [vmem:[%s15288_s18 + $0x6d8] sm:$0xf0] }
 0x153   : > { %3936 = vmatpush.bf16.msra.mxu2 %v10764_v38  ;;  %3911 = vmatpush.bf16.msra.mxu0 %v9676_v50  ;;  %v13844_v14 = vld [vmem:[%s15288_s18 + $0x8d4] sm:$0xf0]  ;;  %v3697_v35 = vpop.f32.mrf.mxu3  ;;  %v13804_v38 = vld [vmem:[%s15288_s18 + $0x79c] sm:$0xf]  ;;  %v10960_v50 = vor.u32 %v13932_v41, %v10957_v42  ;;  %v10320_v9 = vor.u32 %v13772_v1, %v10317_v3 }
 0x154   : > { %v11083_v18 = vld [vmem:[%s15288_s18 + $0xc98] sm:$0xf]  ;;  %v10572_v24 = vor.u32 %v13844_v14, %v10571_v13  ;;  %v10448_v49 = vor.u32 %v13804_v38, %v10445_v40  ;;  %v11341_v7 = vld [vmem:[%s15288_s18 + $0xed8] sm:$0xf0] }
 0x155   : > { %3949 = vmatpush.bf16.msra.mxu3 %v11276_v43  ;;  %3924 = vmatpush.bf16.msra.mxu1 %v10188_v51  ;;  %v13972_v19 = vld [vmem:[%s15288_s18 + $0xcd4] sm:$0xf0]  ;;  %v13660_v51 = vld [vmem:[%s15288_s18 + $0x31c] sm:$0xf] }
 0x156   : > { %v9483_v21 = vld [vmem:[%s15288_s18 + $0x18] sm:$0xf]  ;;  %v11084_v31 = vor.u32 %v13972_v19, %v11083_v18  ;;  %v9741_v12 = vld [vmem:[%s15288_s18 + $0x258] sm:$0xf0] }
 0x157   : > { %3937 = vmatpush.bf16.msra.mxu2 %v10700_v52  ;;  %3912 = vmatpush.bf16.msra.mxu0 %v9612_v2  ;;  %v13572_v22 = vld [vmem:[%s15288_s18 + $0x54] sm:$0xf0]  ;;  %v9869_v52 = vld [vmem:[%s15288_s18 + $0x358] sm:$0xf0]  ;;  %v11408_v2 = vor.u32 %v14044_v58, %v11405_v59 }
 0x158   : > { %v9995_v25 = vld [vmem:[%s15288_s18 + $0x418] sm:$0xf]  ;;  %v9484_v39 = vor.u32 %v13572_v22, %v9483_v21  ;;  %v9872_v60 = vor.u32 %v13660_v51, %v9869_v52  ;;  %v13756_v13 = vld [vmem:[%s15288_s18 + $0x61c] sm:$0xf] }
 0x159   : > { %3950 = vmatpush.bf16.msra.mxu3 %v11212_v57  ;;  %3925 = vmatpush.bf16.msra.mxu1 %v10124_v5  ;;  %v13700_v28 = vld [vmem:[%s15288_s18 + $0x454] sm:$0xf0]  ;;  %v10893_v57 = vld [vmem:[%s15288_s18 + $0xb58] sm:$0xf0] }
 0x15a   : > { %v10507_v29 = vld [vmem:[%s15288_s18 + $0x818] sm:$0xf]  ;;  %v9996_v43 = vor.u32 %v13700_v28, %v9995_v25  ;;  %v10896_v62 = vor.u32 %v13916_v56, %v10893_v57  ;;  %v10829_v5 = vld [vmem:[%s15288_s18 + $0xad8] sm:$0xf0] }
 0x15b   : > { %3938 = vmatpush.bf16.msra.mxu2 %v10636_v6  ;;  %v13828_v32 = vld [vmem:[%s15288_s18 + $0x854] sm:$0xf0]  ;;  %3913 = vmatpush.bf16.msra.mxu0 %v9548_v20  ;;  %v14028_v6 = vld [vmem:[%s15288_s18 + $0xe9c] sm:$0xf]  ;;  %v10832_v10 = vor.u32 %v13900_v4, %v10829_v5 }
 0x15c   : > { %v11019_v33 = vld [vmem:[%s15288_s18 + $0xc18] sm:$0xf]  ;;  %v10508_v44 = vor.u32 %v13828_v32, %v10507_v29  ;;  %v11344_v14 = vor.u32 %v14028_v6, %v11341_v7  ;;  %v10253_v15 = vld [vmem:[%s15288_s18 + $0x658] sm:$0xf0] }
 0x15d   : > { %3951 = vmatpush.bf16.msra.mxu3 %v11148_v11  ;;  %v13956_v34 = vld [vmem:[%s15288_s18 + $0xc54] sm:$0xf0]  ;;  %3926 = vmatpush.bf16.msra.mxu1 %v10060_v23  ;;  %v13628_v11 = vld [vmem:[%s15288_s18 + $0x21c] sm:$0xf] }
 0x15e   : > { %v11020_v47 = vor.u32 %v13956_v34, %v11019_v33  ;;  %v13884_v18 = vld [vmem:[%s15288_s18 + $0xa1c] sm:$0xf]  ;;  %v9744_v22 = vor.u32 %v13628_v11, %v9741_v12 }
 0x15f   : > { %3939 = vmatpush.bf16.msra.mxu2 %v10572_v24  ;;  %3914 = vmatpush.bf16.msra.mxu0 %v9484_v39  ;;  %v10765_v19 = vld [vmem:[%s15288_s18 + $0xa58] sm:$0xf0]  ;;  %v3708_v23 = vpop.f32.mrf.mxu0  ;;  %v10256_v24 = vor.u32 %v13756_v13, %v10253_v15 }
 0x160   : > { %v14012_v20 = vld [vmem:[%s15288_s18 + $0xe1c] sm:$0xf]  ;;  %v10768_v25 = vor.u32 %v13884_v18, %v10765_v19 }
 0x161   : > { %3952 = vmatpush.bf16.msra.mxu3 %v11084_v31  ;;  %3927 = vmatpush.bf16.msra.mxu1 %v9996_v43  ;;  %v11277_v21 = vld [vmem:[%s15288_s18 + $0xe58] sm:$0xf0]  ;;  %v3721_v31 = vpop.f32.mrf.mxu1 }
 0x162   : > { %3915 = vmatmul.bf16.vlgmr.msra.gmra.mxu0 %v15416_v26  ;;  %v13612_v28 = vld [vmem:[%s15288_s18 + $0x19c] sm:$0xf]  ;;  %v11280_v32 = vor.u32 %v14012_v20, %v11277_v21  ;;  %v3722_v36 = vadd.f32 %v3721_v31, %v3708_v23  ;;  %v9939_v23 = vld [vmem:[%s15288_s18 + $0x3a0] sm:$0xf] }
 0x163   : > { %3940 = vmatpush.bf16.msra.mxu2 %v10508_v44  ;;  %3959 = vmatpush.bf16.msrb.mxu0 %v9936_v48  ;;  %v9677_v29 = vld [vmem:[%s15288_s18 + $0x1d8] sm:$0xf0]  ;;  %v13941_v31 = vld [vmem:[%s15288_s18 + $0xbdc] sm:$0xf0] }
 0x164   : > { %3928 = vmatmul.bf16.vlgmr.msra.gmra.mxu1 %v15418_v27  ;;  %v13740_v30 = vld [vmem:[%s15288_s18 + $0x59c] sm:$0xf]  ;;  %v9680_v39 = vor.u32 %v13612_v28, %v9677_v29  ;;  %v13813_v29 = vld [vmem:[%s15288_s18 + $0x7dc] sm:$0xf0] }
 0x165   : > { %3953 = vmatpush.bf16.msra.mxu3 %v11020_v47  ;;  %3972 = vmatpush.bf16.msrb.mxu1 %v10448_v49  ;;  %v10189_v33 = vld [vmem:[%s15288_s18 + $0x5d8] sm:$0xf0] }
 0x166   : > { %3941 = vmatmul.bf16.vlgmr.msra.gmra.mxu2 %v15409_v16  ;;  %v13868_v34 = vld [vmem:[%s15288_s18 + $0x99c] sm:$0xf]  ;;  %v10192_v40 = vor.u32 %v13740_v30, %v10189_v33  ;;  %v10963_v30 = vld [vmem:[%s15288_s18 + $0xba0] sm:$0xf] }
 0x167   : > { %3985 = vmatpush.bf16.msrb.mxu2 %v10960_v50  ;;  %3960 = vmatpush.bf16.msrb.mxu0 %v9872_v60  ;;  %v10701_v35 = vld [vmem:[%s15288_s18 + $0x9d8] sm:$0xf0]  ;;  %v3710_v57 = vpop.f32.mrf.mxu0 }
 0x168   : > { %3954 = vmatmul.bf16.vlgmr.msra.gmra.mxu3 %v15411_v17  ;;  %v13996_v37 = vld [vmem:[%s15288_s18 + $0xd9c] sm:$0xf]  ;;  %v10704_v41 = vor.u32 %v13868_v34, %v10701_v35  ;;  %v11475_v34 = vld [vmem:[%s15288_s18 + $0xfa0] sm:$0xf] }
 0x169   : > { %3998 = vmatpush.bf16.msrb.mxu3 %v11472_v54  ;;  %3973 = vmatpush.bf16.msrb.mxu1 %v10384_v61  ;;  %v11213_v38 = vld [vmem:[%s15288_s18 + $0xdd8] sm:$0xf0]  ;;  %v3734_v45 = vpop.f32.mrf.mxu2  ;;  %v3723_v63 = vpop.f32.mrf.mxu1  ;;  %v14069_v35 = vld [vmem:[%s15288_s18 + $0xfdc] sm:$0xf0] }
 0x16a   : > { %v13596_v42 = vld [vmem:[%s15288_s18 + $0x11c] sm:$0xf]  ;;  %v11216_v46 = vor.u32 %v13996_v37, %v11213_v38  ;;  %v3735_v50 = vadd.f32 %v3734_v45, %v3722_v36  ;;  %v10899_v45 = vld [vmem:[%s15288_s18 + $0xb20] sm:$0xf] }
 0x16b   : > { %3986 = vmatpush.bf16.msrb.mxu2 %v10896_v62  ;;  %3961 = vmatpush.bf16.msrb.mxu0 %v9808_v8  ;;  %v9613_v43 = vld [vmem:[%s15288_s18 + $0x158] sm:$0xf0]  ;;  %v3747_v51 = vpop.f32.mrf.mxu3  ;;  %v10835_v57 = vld [vmem:[%s15288_s18 + $0xaa0] sm:$0xf] }
 0x16c   : > { %v13724_v44 = vld [vmem:[%s15288_s18 + $0x51c] sm:$0xf]  ;;  %v9616_v55 = vor.u32 %v13596_v42, %v9613_v43  ;;  %v3748_v56 = vadd.f32 %v3747_v51, %v3735_v50  ;;  %v10387_v42 = vld [vmem:[%s15288_s18 + $0x720] sm:$0xf]  ;;  %v11476_v43 = vor.u32 %v14069_v35, %v11475_v34 }
 0x16d   : > { %3999 = vmatpush.bf16.msrb.mxu3 %v11408_v2  ;;  %3974 = vmatpush.bf16.msrb.mxu1 %v10320_v9  ;;  %v10125_v47 = vld [vmem:[%s15288_s18 + $0x558] sm:$0xf0] }
 0x16e   : > { %v13852_v48 = vld [vmem:[%s15288_s18 + $0x91c] sm:$0xf]  ;;  %v10128_v58 = vor.u32 %v13724_v44, %v10125_v47  ;;  %v13797_v44 = vld [vmem:[%s15288_s18 + $0x75c] sm:$0xf0] }
 0x16f   : > { %3987 = vmatpush.bf16.msrb.mxu2 %v10832_v10  ;;  %3962 = vmatpush.bf16.msrb.mxu0 %v9744_v22  ;;  %v10637_v49 = vld [vmem:[%s15288_s18 + $0x958] sm:$0xf0]  ;;  %v11411_v47 = vld [vmem:[%s15288_s18 + $0xf20] sm:$0xf]  ;;  %v10388_v50 = vor.u32 %v13797_v44, %v10387_v42 }
 0x170   : > { %v13980_v52 = vld [vmem:[%s15288_s18 + $0xd1c] sm:$0xf]  ;;  %v10640_v59 = vor.u32 %v13852_v48, %v10637_v49  ;;  %v14053_v48 = vld [vmem:[%s15288_s18 + $0xf5c] sm:$0xf0] }
 0x171   : > { %4000 = vmatpush.bf16.msrb.mxu3 %v11344_v14  ;;  %3975 = vmatpush.bf16.msrb.mxu1 %v10256_v24  ;;  %v11149_v53 = vld [vmem:[%s15288_s18 + $0xd58] sm:$0xf0]  ;;  %v3736_v15 = vpop.f32.mrf.mxu2  ;;  %v13685_v24 = vld [vmem:[%s15288_s18 + $0x3dc] sm:$0xf0] }
 0x172   : > { %v509_v54 = vld [vmem:[#allocation2 + $0x58] sm:$0xff]  ;;  %v11152_v0 = vor.u32 %v13980_v52, %v11149_v53  ;;  %v9940_v37 = vor.u32 %v13685_v24, %v9939_v23  ;;  %v9811_v52 = vld [vmem:[%s15288_s18 + $0x2a0] sm:$0xf] }
 0x173   : > { %3988 = vmatpush.bf16.msrb.mxu2 %v10768_v25  ;;  %3963 = vmatpush.bf16.msrb.mxu0 %v9680_v39  ;;  %v13580_v60 = vld [vmem:[%s15288_s18 + $0x9c] sm:$0xf]  ;;  %v4429_v4 = vadd.f32 %v3748_v56, %v509_v54  ;;  %v3749_v22 = vpop.f32.mrf.mxu3  ;;  %v10451_v25 = vld [vmem:[%s15288_s18 + $0x7a0] sm:$0xf]  ;;  %v10964_v39 = vor.u32 %v13941_v31, %v10963_v30 }
 0x174   : > { %v9549_v61 = vld [vmem:[%s15288_s18 + $0xd8] sm:$0xf0]  ;;  %v10452_v38 = vor.u32 %v13813_v29, %v10451_v25  ;;  %v13653_v53 = vld [vmem:[%s15288_s18 + $0x2dc] sm:$0xf0] }
 0x175   : > { %4001 = vmatpush.bf16.msrb.mxu3 %v11280_v32  ;;  %3976 = vmatpush.bf16.msrb.mxu1 %v10192_v40  ;;  %v13708_v62 = vld [vmem:[%s15288_s18 + $0x49c] sm:$0xf]  ;;  %v9552_v7 = vor.u32 %v13580_v60, %v9549_v61  ;;  %4445 = vst [vmem:[#allocation2 + $0x58] sm:$0xff] %v4429_v4  ;;  %v9875_v40 = vld [vmem:[%s15288_s18 + $0x320] sm:$0xf]  ;;  %v9812_v61 = vor.u32 %v13653_v53, %v9811_v52 }
 0x176   : > { %v10061_v1 = vld [vmem:[%s15288_s18 + $0x4d8] sm:$0xf0]  ;;  %v10323_v54 = vld [vmem:[%s15288_s18 + $0x6a0] sm:$0xf] }
 0x177   : > { %3989 = vmatpush.bf16.msrb.mxu2 %v10704_v41  ;;  %v13836_v2 = vld [vmem:[%s15288_s18 + $0x89c] sm:$0xf]  ;;  %3964 = vmatpush.bf16.msrb.mxu0 %v9616_v55  ;;  %v10064_v10 = vor.u32 %v13708_v62, %v10061_v1  ;;  %v13669_v41 = vld [vmem:[%s15288_s18 + $0x35c] sm:$0xf0]  ;;  %v11412_v55 = vor.u32 %v14053_v48, %v11411_v47 }
 0x178   : > { %v10573_v3 = vld [vmem:[%s15288_s18 + $0x8d8] sm:$0xf0]  ;;  %v9876_v49 = vor.u32 %v13669_v41, %v9875_v40  ;;  %v13781_v56 = vld [vmem:[%s15288_s18 + $0x6dc] sm:$0xf0] }
 0x179   : > { %4002 = vmatpush.bf16.msrb.mxu3 %v11216_v46  ;;  %v13964_v5 = vld [vmem:[%s15288_s18 + $0xc9c] sm:$0xf]  ;;  %3977 = vmatpush.bf16.msrb.mxu1 %v10128_v58  ;;  %v10576_v11 = vor.u32 %v13836_v2, %v10573_v3  ;;  %v13925_v46 = vld [vmem:[%s15288_s18 + $0xb5c] sm:$0xf0]  ;;  %v10324_v62 = vor.u32 %v13781_v56, %v10323_v54 }
 0x17a   : > { %v11085_v6 = vld [vmem:[%s15288_s18 + $0xcd8] sm:$0xf0]  ;;  %v10900_v51 = vor.u32 %v13925_v46, %v10899_v45  ;;  %v13909_v58 = vld [vmem:[%s15288_s18 + $0xadc] sm:$0xf0] }
 0x17b   : > { %v13564_v8 = vld [vmem:[%s15288_s18 + $0x1c] sm:$0xf]  ;;  %3990 = vmatpush.bf16.msrb.mxu2 %v10640_v59  ;;  %v11088_v18 = vor.u32 %v13964_v5, %v11085_v6  ;;  %3965 = vmatpush.bf16.msrb.mxu0 %v9552_v7  ;;  %v11347_v59 = vld [vmem:[%s15288_s18 + $0xea0] sm:$0xf]  ;;  %v10836_v63 = vor.u32 %v13909_v58, %v10835_v57 }
 0x17c   : > { %v9485_v9 = vld [vmem:[%s15288_s18 + $0x58] sm:$0xf0]  ;;  %v14037_v60 = vld [vmem:[%s15288_s18 + $0xedc] sm:$0xf0] }
 0x17d   : > { %v13692_v12 = vld [vmem:[%s15288_s18 + $0x41c] sm:$0xf]  ;;  %4003 = vmatpush.bf16.msrb.mxu3 %v11152_v0  ;;  %v9488_v28 = vor.u32 %v13564_v8, %v9485_v9  ;;  %3978 = vmatpush.bf16.msrb.mxu1 %v10064_v10  ;;  %v9747_v0 = vld [vmem:[%s15288_s18 + $0x220] sm:$0xf]  ;;  %v11348_v3 = vor.u32 %v14037_v60, %v11347_v59 }
 0x17e   : > { %v9997_v13 = vld [vmem:[%s15288_s18 + $0x458] sm:$0xf0]  ;;  %v13637_v1 = vld [vmem:[%s15288_s18 + $0x25c] sm:$0xf0] }
 0x17f   : > { %v13820_v14 = vld [vmem:[%s15288_s18 + $0x81c] sm:$0xf]  ;;  %3991 = vmatpush.bf16.msrb.mxu2 %v10576_v11  ;;  %v10000_v32 = vor.u32 %v13692_v12, %v9997_v13  ;;  %3966 = vmatpush.bf16.msrb.mxu0 %v9488_v28  ;;  %v10259_v2 = vld [vmem:[%s15288_s18 + $0x620] sm:$0xf]  ;;  %v9748_v9 = vor.u32 %v13637_v1, %v9747_v0  ;;  %v3760_v10 = vpop.f32.mrf.mxu0 }
 0x180   : > { %v10509_v19 = vld [vmem:[%s15288_s18 + $0x858] sm:$0xf0]  ;;  %v13765_v4 = vld [vmem:[%s15288_s18 + $0x65c] sm:$0xf0] }
 0x181   : > { %v13948_v20 = vld [vmem:[%s15288_s18 + $0xc1c] sm:$0xf]  ;;  %v10512_v33 = vor.u32 %v13820_v14, %v10509_v19  ;;  %4004 = vmatpush.bf16.msrb.mxu3 %v11088_v18  ;;  %3979 = vmatpush.bf16.msrb.mxu1 %v10000_v32  ;;  %v10771_v5 = vld [vmem:[%s15288_s18 + $0xa20] sm:$0xf]  ;;  %v10260_v11 = vor.u32 %v13765_v4, %v10259_v2  ;;  %v3773_v18 = vpop.f32.mrf.mxu1 }
 0x182   : > { %v11021_v21 = vld [vmem:[%s15288_s18 + $0xc58] sm:$0xf0]  ;;  %3967 = vmatmul.bf16.vlgmr.msrb.gmra.mxu0 %v15416_v26  ;;  %v13893_v6 = vld [vmem:[%s15288_s18 + $0xa5c] sm:$0xf0]  ;;  %v3774_v23 = vadd.f32 %v3773_v18, %v3760_v10  ;;  %v13677_v10 = vld [vmem:[%s15288_s18 + $0x3a4] sm:$0xf] }
 0x183   : > { %v11024_v36 = vor.u32 %v13948_v20, %v11021_v21  ;;  %3992 = vmatpush.bf16.msrb.mxu2 %v10512_v33  ;;  %4011 = vmatpush.bf16.msra.mxu0 %v9940_v37  ;;  %v11283_v7 = vld [vmem:[%s15288_s18 + $0xe20] sm:$0xf]  ;;  %v10772_v12 = vor.u32 %v13893_v6, %v10771_v5  ;;  %v10965_v18 = vld [vmem:[%s15288_s18 + $0xbe0] sm:$0xf0] }
 0x184   : > { %3980 = vmatmul.bf16.vlgmr.msrb.gmra.mxu1 %v15418_v27  ;;  %v14021_v8 = vld [vmem:[%s15288_s18 + $0xe5c] sm:$0xf0] }
 0x185   : > { %4005 = vmatpush.bf16.msrb.mxu3 %v11024_v36  ;;  %4024 = vmatpush.bf16.msra.mxu1 %v10452_v38  ;;  %v9683_v13 = vld [vmem:[%s15288_s18 + $0x1a0] sm:$0xf]  ;;  %v11284_v19 = vor.u32 %v14021_v8, %v11283_v7 }
 0x186   : > { %3993 = vmatmul.bf16.vlgmr.msrb.gmra.mxu2 %v15409_v16  ;;  %v13621_v14 = vld [vmem:[%s15288_s18 + $0x1dc] sm:$0xf0] }
 0x187   : > { %4037 = vmatpush.bf16.msra.mxu2 %v10964_v39  ;;  %4012 = vmatpush.bf16.msra.mxu0 %v9876_v49  ;;  %v10195_v15 = vld [vmem:[%s15288_s18 + $0x5a0] sm:$0xf]  ;;  %v9684_v28 = vor.u32 %v13621_v14, %v9683_v13  ;;  %v3762_v46 = vpop.f32.mrf.mxu0  ;;  %v10453_v14 = vld [vmem:[%s15288_s18 + $0x7e0] sm:$0xf0] }
 0x188   : > { %4006 = vmatmul.bf16.vlgmr.msrb.gmra.mxu3 %v15411_v17  ;;  %v13749_v20 = vld [vmem:[%s15288_s18 + $0x5dc] sm:$0xf0]  ;;  %v13901_v46 = vld [vmem:[%s15288_s18 + $0xaa4] sm:$0xf] }
 0x189   : > { %4050 = vmatpush.bf16.msra.mxu3 %v11476_v43  ;;  %4025 = vmatpush.bf16.msra.mxu1 %v10388_v50  ;;  %v10707_v21 = vld [vmem:[%s15288_s18 + $0x9a0] sm:$0xf]  ;;  %v10196_v29 = vor.u32 %v13749_v20, %v10195_v15  ;;  %v3786_v34 = vpop.f32.mrf.mxu2  ;;  %v510_v43 = vld [vmem:[#allocation2 + $0x18] sm:$0xff]  ;;  %v3775_v52 = vpop.f32.mrf.mxu1  ;;  %v13933_v15 = vld [vmem:[%s15288_s18 + $0xba4] sm:$0xf] }
 0x18a   : > { %v13877_v22 = vld [vmem:[%s15288_s18 + $0x9dc] sm:$0xf0]  ;;  %v3787_v39 = vadd.f32 %v3786_v34, %v3774_v23  ;;  %v13917_v34 = vld [vmem:[%s15288_s18 + $0xb24] sm:$0xf] }
 0x18b   : > { %4038 = vmatpush.bf16.msra.mxu2 %v10900_v51  ;;  %4013 = vmatpush.bf16.msra.mxu0 %v9812_v61  ;;  %v11219_v24 = vld [vmem:[%s15288_s18 + $0xda0] sm:$0xf]  ;;  %v10708_v30 = vor.u32 %v13877_v22, %v10707_v21  ;;  %v3799_v40 = vpop.f32.mrf.mxu3  ;;  %v14061_v21 = vld [vmem:[%s15288_s18 + $0xfa4] sm:$0xf] }
 0x18c   : > { %v14005_v25 = vld [vmem:[%s15288_s18 + $0xddc] sm:$0xf0]  ;;  %v3800_v45 = vadd.f32 %v3799_v40, %v3787_v39  ;;  %v11477_v22 = vld [vmem:[%s15288_s18 + $0xfe0] sm:$0xf0] }
 0x18d   : > { %4051 = vmatpush.bf16.msra.mxu3 %v11412_v55  ;;  %4026 = vmatpush.bf16.msra.mxu1 %v10324_v62  ;;  %v9619_v31 = vld [vmem:[%s15288_s18 + $0x120] sm:$0xf]  ;;  %v11220_v35 = vor.u32 %v14005_v25, %v11219_v24 }
 0x18e   : > { %v13605_v32 = vld [vmem:[%s15288_s18 + $0x15c] sm:$0xf0]  ;;  %v4430_v57 = vadd.f32 %v3800_v45, %v510_v43  ;;  %v13773_v43 = vld [vmem:[%s15288_s18 + $0x6a4] sm:$0xf] }
 0x18f   : > { %4039 = vmatpush.bf16.msra.mxu2 %v10836_v63  ;;  %4014 = vmatpush.bf16.msra.mxu0 %v9748_v9  ;;  %v10131_v33 = vld [vmem:[%s15288_s18 + $0x520] sm:$0xf]  ;;  %v9620_v44 = vor.u32 %v13605_v32, %v9619_v31  ;;  %v13789_v31 = vld [vmem:[%s15288_s18 + $0x724] sm:$0xf]  ;;  %v11480_v32 = vor.u32 %v14061_v21, %v11477_v22 }
 0x190   : > { %v13733_v36 = vld [vmem:[%s15288_s18 + $0x55c] sm:$0xf0]  ;;  %4446 = vst [vmem:[#allocation2 + $0x18] sm:$0xff] %v4430_v57  ;;  %v10325_v45 = vld [vmem:[%s15288_s18 + $0x6e0] sm:$0xf0] }
 0x191   : > { %4052 = vmatpush.bf16.msra.mxu3 %v11348_v3  ;;  %4027 = vmatpush.bf16.msra.mxu1 %v10260_v11  ;;  %v10643_v37 = vld [vmem:[%s15288_s18 + $0x920] sm:$0xf]  ;;  %v10132_v47 = vor.u32 %v13733_v36, %v10131_v33  ;;  %v3788_v4 = vpop.f32.mrf.mxu2  ;;  %v9941_v11 = vld [vmem:[%s15288_s18 + $0x3e0] sm:$0xf0] }
 0x192   : > { %v13861_v38 = vld [vmem:[%s15288_s18 + $0x95c] sm:$0xf0]  ;;  %v9944_v24 = vor.u32 %v13677_v10, %v9941_v11  ;;  %v10389_v33 = vld [vmem:[%s15288_s18 + $0x760] sm:$0xf0] }
 0x193   : > { %4040 = vmatpush.bf16.msra.mxu2 %v10772_v12  ;;  %v11155_v41 = vld [vmem:[%s15288_s18 + $0xd20] sm:$0xf]  ;;  %4015 = vmatpush.bf16.msra.mxu0 %v9684_v28  ;;  %v10644_v48 = vor.u32 %v13861_v38, %v10643_v37  ;;  %v3801_v9 = vpop.f32.mrf.mxu3  ;;  %v13805_v12 = vld [vmem:[%s15288_s18 + $0x7a4] sm:$0xf]  ;;  %v10968_v28 = vor.u32 %v13933_v15, %v10965_v18  ;;  %v10392_v39 = vor.u32 %v13789_v31, %v10389_v33 }
 0x194   : > { %v13989_v42 = vld [vmem:[%s15288_s18 + $0xd5c] sm:$0xf0]  ;;  %v10456_v25 = vor.u32 %v13805_v12, %v10453_v14  ;;  %v14045_v36 = vld [vmem:[%s15288_s18 + $0xf24] sm:$0xf] }
 0x195   : > { %4053 = vmatpush.bf16.msra.mxu3 %v11284_v19  ;;  %4028 = vmatpush.bf16.msra.mxu1 %v10196_v29  ;;  %v9555_v49 = vld [vmem:[%s15288_s18 + $0xa0] sm:$0xf]  ;;  %v11156_v53 = vor.u32 %v13989_v42, %v11155_v41  ;;  %v13661_v29 = vld [vmem:[%s15288_s18 + $0x324] sm:$0xf] }
 0x196   : > { %v13589_v50 = vld [vmem:[%s15288_s18 + $0xdc] sm:$0xf0]  ;;  %v11413_v37 = vld [vmem:[%s15288_s18 + $0xf60] sm:$0xf0] }
 0x197   : > { %4041 = vmatpush.bf16.msra.mxu2 %v10708_v30  ;;  %v10067_v51 = vld [vmem:[%s15288_s18 + $0x4a0] sm:$0xf]  ;;  %4016 = vmatpush.bf16.msra.mxu0 %v9620_v44  ;;  %v9556_v60 = vor.u32 %v13589_v50, %v9555_v49  ;;  %v9877_v30 = vld [vmem:[%s15288_s18 + $0x360] sm:$0xf0]  ;;  %v11416_v44 = vor.u32 %v14045_v36, %v11413_v37 }
 0x198   : > { %v13717_v54 = vld [vmem:[%s15288_s18 + $0x4dc] sm:$0xf0]  ;;  %v9880_v38 = vor.u32 %v13661_v29, %v9877_v30  ;;  %v13645_v41 = vld [vmem:[%s15288_s18 + $0x2a4] sm:$0xf] }
 0x199   : > { %4054 = vmatpush.bf16.msra.mxu3 %v11220_v35  ;;  %v10579_v55 = vld [vmem:[%s15288_s18 + $0x8a0] sm:$0xf]  ;;  %4029 = vmatpush.bf16.msra.mxu1 %v10132_v47  ;;  %v10068_v63 = vor.u32 %v13717_v54, %v10067_v51  ;;  %v10901_v35 = vld [vmem:[%s15288_s18 + $0xb60] sm:$0xf0]  ;;  %v10328_v51 = vor.u32 %v13773_v43, %v10325_v45 }
 0x19a   : > { %v13845_v56 = vld [vmem:[%s15288_s18 + $0x8dc] sm:$0xf0]  ;;  %v10904_v40 = vor.u32 %v13917_v34, %v10901_v35  ;;  %v9813_v42 = vld [vmem:[%s15288_s18 + $0x2e0] sm:$0xf0] }
 0x19b   : > { %v11091_v58 = vld [vmem:[%s15288_s18 + $0xca0] sm:$0xf]  ;;  %4042 = vmatpush.bf16.msra.mxu2 %v10644_v48  ;;  %v10580_v0 = vor.u32 %v13845_v56, %v10579_v55  ;;  %4017 = vmatpush.bf16.msra.mxu0 %v9556_v60  ;;  %v10837_v47 = vld [vmem:[%s15288_s18 + $0xae0] sm:$0xf0]  ;;  %v9816_v50 = vor.u32 %v13645_v41, %v9813_v42 }
 0x19c   : > { %v13973_v59 = vld [vmem:[%s15288_s18 + $0xcdc] sm:$0xf0]  ;;  %v14029_v48 = vld [vmem:[%s15288_s18 + $0xea4] sm:$0xf]  ;;  %v10840_v52 = vor.u32 %v13901_v46, %v10837_v47 }
 0x19d   : > { %v9491_v61 = vld [vmem:[%s15288_s18 + $0x20] sm:$0xf]  ;;  %4055 = vmatpush.bf16.msra.mxu3 %v11156_v53  ;;  %v11092_v5 = vor.u32 %v13973_v59, %v11091_v58  ;;  %4030 = vmatpush.bf16.msra.mxu1 %v10068_v63  ;;  %v11349_v49 = vld [vmem:[%s15288_s18 + $0xee0] sm:$0xf0] }
 0x19e   : > { %v13573_v62 = vld [vmem:[%s15288_s18 + $0x5c] sm:$0xf0]  ;;  %v13629_v53 = vld [vmem:[%s15288_s18 + $0x224] sm:$0xf]  ;;  %v11352_v56 = vor.u32 %v14029_v48, %v11349_v49 }
 0x19f   : > { %v10003_v1 = vld [vmem:[%s15288_s18 + $0x420] sm:$0xf]  ;;  %v9492_v13 = vor.u32 %v13573_v62, %v9491_v61  ;;  %4043 = vmatpush.bf16.msra.mxu2 %v10580_v0  ;;  %v9749_v54 = vld [vmem:[%s15288_s18 + $0x260] sm:$0xf0]  ;;  %v3812_v63 = vpop.f32.mrf.mxu0 }
 0x1a0   : > { %v13701_v2 = vld [vmem:[%s15288_s18 + $0x45c] sm:$0xf0]  ;;  %v13757_v55 = vld [vmem:[%s15288_s18 + $0x624] sm:$0xf]  ;;  %v9752_v62 = vor.u32 %v13629_v53, %v9749_v54 }
 0x1a1   : > { %v10515_v3 = vld [vmem:[%s15288_s18 + $0x820] sm:$0xf]  ;;  %v10004_v19 = vor.u32 %v13701_v2, %v10003_v1  ;;  %4056 = vmatpush.bf16.msra.mxu3 %v11092_v5  ;;  %4018 = vmatpush.bf16.msra.mxu0 %v9492_v13  ;;  %v10261_v57 = vld [vmem:[%s15288_s18 + $0x660] sm:$0xf0]  ;;  %v3825_v5 = vpop.f32.mrf.mxu1 }
 0x1a2   : > { %v13829_v6 = vld [vmem:[%s15288_s18 + $0x85c] sm:$0xf0]  ;;  %v13885_v58 = vld [vmem:[%s15288_s18 + $0xa24] sm:$0xf]  ;;  %v10264_v0 = vor.u32 %v13757_v55, %v10261_v57  ;;  %v3826_v10 = vadd.f32 %v3825_v5, %v3812_v63  ;;  %v9947_v63 = vld [vmem:[%s15288_s18 + $0x3a8] sm:$0xf] }
 0x1a3   : > { %v11027_v7 = vld [vmem:[%s15288_s18 + $0xc20] sm:$0xf]  ;;  %v10516_v20 = vor.u32 %v13829_v6, %v10515_v3  ;;  %4031 = vmatpush.bf16.msra.mxu1 %v10004_v19  ;;  %v10773_v59 = vld [vmem:[%s15288_s18 + $0xa60] sm:$0xf0]  ;;  %v13942_v5 = vld [vmem:[%s15288_s18 + $0xbe4] sm:$0xf0] }
 0x1a4   : > { %v13957_v8 = vld [vmem:[%s15288_s18 + $0xc5c] sm:$0xf0]  ;;  %4019 = vmatmul.bf16.vlgmr.msra.gmra.mxu0 %v15416_v26  ;;  %v14013_v60 = vld [vmem:[%s15288_s18 + $0xe24] sm:$0xf]  ;;  %v10776_v1 = vor.u32 %v13885_v58, %v10773_v59 }
 0x1a5   : > { %v11028_v23 = vor.u32 %v13957_v8, %v11027_v7  ;;  %4044 = vmatpush.bf16.msra.mxu2 %v10516_v20  ;;  %4063 = vmatpush.bf16.msrb.mxu0 %v9944_v24  ;;  %v11285_v61 = vld [vmem:[%s15288_s18 + $0xe60] sm:$0xf0] }
 0x1a6   : > { %4032 = vmatmul.bf16.vlgmr.msra.gmra.mxu1 %v15418_v27  ;;  %v13613_v2 = vld [vmem:[%s15288_s18 + $0x1a4] sm:$0xf]  ;;  %v11288_v6 = vor.u32 %v14013_v60, %v11285_v61 }
 0x1a7   : > { %4057 = vmatpush.bf16.msra.mxu3 %v11028_v23  ;;  %4076 = vmatpush.bf16.msrb.mxu1 %v10456_v25  ;;  %v9685_v3 = vld [vmem:[%s15288_s18 + $0x1e0] sm:$0xf0]  ;;  %v3814_v35 = vpop.f32.mrf.mxu0 }
 0x1a8   : > { %4045 = vmatmul.bf16.vlgmr.msra.gmra.mxu2 %v15409_v16  ;;  %v13741_v4 = vld [vmem:[%s15288_s18 + $0x5a4] sm:$0xf]  ;;  %v9688_v13 = vor.u32 %v13613_v2, %v9685_v3  ;;  %v13814_v3 = vld [vmem:[%s15288_s18 + $0x7e4] sm:$0xf0] }
 0x1a9   : > { %4089 = vmatpush.bf16.msrb.mxu2 %v10968_v28  ;;  %4064 = vmatpush.bf16.msrb.mxu0 %v9880_v38  ;;  %v10197_v7 = vld [vmem:[%s15288_s18 + $0x5e0] sm:$0xf0]  ;;  %v3838_v21 = vpop.f32.mrf.mxu2  ;;  %v3827_v41 = vpop.f32.mrf.mxu1  ;;  %v10843_v35 = vld [vmem:[%s15288_s18 + $0xaa8] sm:$0xf] }
 0x1aa   : > { %4058 = vmatmul.bf16.vlgmr.msra.gmra.mxu3 %v15411_v17  ;;  %v13869_v8 = vld [vmem:[%s15288_s18 + $0x9a4] sm:$0xf]  ;;  %v10200_v14 = vor.u32 %v13741_v4, %v10197_v7  ;;  %v3839_v28 = vadd.f32 %v3838_v21, %v3826_v10  ;;  %v10971_v4 = vld [vmem:[%s15288_s18 + $0xba8] sm:$0xf] }
 0x1ab   : > { %4102 = vmatpush.bf16.msrb.mxu3 %v11480_v32  ;;  %4077 = vmatpush.bf16.msrb.mxu1 %v10392_v39  ;;  %v10709_v9 = vld [vmem:[%s15288_s18 + $0x9e0] sm:$0xf0]  ;;  %v3851_v29 = vpop.f32.mrf.mxu3  ;;  %v511_v32 = vld [vmem:[#allocation2 + $0x50] sm:$0xff]  ;;  %v10907_v21 = vld [vmem:[%s15288_s18 + $0xb28] sm:$0xf] }
 0x1ac   : > { %v13997_v11 = vld [vmem:[%s15288_s18 + $0xda4] sm:$0xf]  ;;  %v10712_v15 = vor.u32 %v13869_v8, %v10709_v9  ;;  %v3852_v34 = vadd.f32 %v3851_v29, %v3839_v28  ;;  %v11483_v8 = vld [vmem:[%s15288_s18 + $0xfa8] sm:$0xf] }
 0x1ad   : > { %4090 = vmatpush.bf16.msrb.mxu2 %v10904_v40  ;;  %4065 = vmatpush.bf16.msrb.mxu0 %v9816_v50  ;;  %v11221_v12 = vld [vmem:[%s15288_s18 + $0xde0] sm:$0xf0]  ;;  %v14070_v9 = vld [vmem:[%s15288_s18 + $0xfe4] sm:$0xf0] }
 0x1ae   : > { %v13597_v18 = vld [vmem:[%s15288_s18 + $0x124] sm:$0xf]  ;;  %v11224_v22 = vor.u32 %v13997_v11, %v11221_v12  ;;  %v4431_v46 = vadd.f32 %v3852_v34, %v511_v32  ;;  %v10331_v32 = vld [vmem:[%s15288_s18 + $0x6a8] sm:$0xf] }
 0x1af   : > { %4103 = vmatpush.bf16.msrb.mxu3 %v11416_v44  ;;  %4078 = vmatpush.bf16.msrb.mxu1 %v10328_v51  ;;  %v9621_v19 = vld [vmem:[%s15288_s18 + $0x160] sm:$0xf0]  ;;  %v13782_v34 = vld [vmem:[%s15288_s18 + $0x6e4] sm:$0xf0] }
 0x1b0   : > { %v13725_v20 = vld [vmem:[%s15288_s18 + $0x524] sm:$0xf]  ;;  %v9624_v33 = vor.u32 %v13597_v18, %v9621_v19  ;;  %4447 = vst [vmem:[#allocation2 + $0x50] sm:$0xff] %v4431_v46  ;;  %v10395_v18 = vld [vmem:[%s15288_s18 + $0x728] sm:$0xf]  ;;  %v11484_v19 = vor.u32 %v14070_v9, %v11483_v8 }
 0x1b1   : > { %4091 = vmatpush.bf16.msrb.mxu2 %v10840_v52  ;;  %4066 = vmatpush.bf16.msrb.mxu0 %v9752_v62  ;;  %v10133_v23 = vld [vmem:[%s15288_s18 + $0x560] sm:$0xf0]  ;;  %v3840_v57 = vpop.f32.mrf.mxu2  ;;  %v13766_v46 = vld [vmem:[%s15288_s18 + $0x664] sm:$0xf0] }
 0x1b2   : > { %v13853_v24 = vld [vmem:[%s15288_s18 + $0x924] sm:$0xf]  ;;  %v10136_v36 = vor.u32 %v13725_v20, %v10133_v23  ;;  %v13798_v20 = vld [vmem:[%s15288_s18 + $0x764] sm:$0xf0] }
 0x1b3   : > { %4104 = vmatpush.bf16.msrb.mxu3 %v11352_v56  ;;  %4079 = vmatpush.bf16.msrb.mxu1 %v10264_v0  ;;  %v10645_v25 = vld [vmem:[%s15288_s18 + $0x960] sm:$0xf0]  ;;  %v3853_v62 = vpop.f32.mrf.mxu3  ;;  %v13686_v0 = vld [vmem:[%s15288_s18 + $0x3e4] sm:$0xf0]  ;;  %v10396_v28 = vor.u32 %v13798_v20, %v10395_v18 }
 0x1b4   : > { %v13981_v30 = vld [vmem:[%s15288_s18 + $0xd24] sm:$0xf]  ;;  %v10648_v37 = vor.u32 %v13853_v24, %v10645_v25  ;;  %v9948_v11 = vor.u32 %v13686_v0, %v9947_v63  ;;  %v11419_v23 = vld [vmem:[%s15288_s18 + $0xf28] sm:$0xf] }
 0x1b5   : > { %4092 = vmatpush.bf16.msrb.mxu2 %v10776_v1  ;;  %v11157_v31 = vld [vmem:[%s15288_s18 + $0xd60] sm:$0xf0]  ;;  %4067 = vmatpush.bf16.msrb.mxu0 %v9688_v13  ;;  %v10459_v1 = vld [vmem:[%s15288_s18 + $0x7a8] sm:$0xf]  ;;  %v10972_v13 = vor.u32 %v13942_v5, %v10971_v4 }
 0x1b6   : > { %v13581_v38 = vld [vmem:[%s15288_s18 + $0xa4] sm:$0xf]  ;;  %v11160_v42 = vor.u32 %v13981_v30, %v11157_v31  ;;  %v10460_v12 = vor.u32 %v13814_v3, %v10459_v1  ;;  %v14054_v24 = vld [vmem:[%s15288_s18 + $0xf64] sm:$0xf0] }
 0x1b7   : > { %4105 = vmatpush.bf16.msrb.mxu3 %v11288_v6  ;;  %4080 = vmatpush.bf16.msrb.mxu1 %v10200_v14  ;;  %v9557_v39 = vld [vmem:[%s15288_s18 + $0xe0] sm:$0xf0]  ;;  %v9883_v14 = vld [vmem:[%s15288_s18 + $0x328] sm:$0xf] }
 0x1b8   : > { %v13709_v40 = vld [vmem:[%s15288_s18 + $0x4a4] sm:$0xf]  ;;  %v9560_v49 = vor.u32 %v13581_v38, %v9557_v39  ;;  %v9819_v30 = vld [vmem:[%s15288_s18 + $0x2a8] sm:$0xf] }
 0x1b9   : > { %4093 = vmatpush.bf16.msrb.mxu2 %v10712_v15  ;;  %v10069_v43 = vld [vmem:[%s15288_s18 + $0x4e0] sm:$0xf0]  ;;  %4068 = vmatpush.bf16.msrb.mxu0 %v9624_v33  ;;  %v13670_v15 = vld [vmem:[%s15288_s18 + $0x364] sm:$0xf0]  ;;  %v11420_v33 = vor.u32 %v14054_v24, %v11419_v23 }
 0x1ba   : > { %v13837_v44 = vld [vmem:[%s15288_s18 + $0x8a4] sm:$0xf]  ;;  %v10072_v52 = vor.u32 %v13709_v40, %v10069_v43  ;;  %v9884_v25 = vor.u32 %v13670_v15, %v9883_v14  ;;  %v13654_v31 = vld [vmem:[%s15288_s18 + $0x2e4] sm:$0xf0]  ;;  %v10332_v40 = vor.u32 %v13782_v34, %v10331_v32 }
 0x1bb   : > { %4106 = vmatpush.bf16.msrb.mxu3 %v11224_v22  ;;  %v10581_v45 = vld [vmem:[%s15288_s18 + $0x8e0] sm:$0xf0]  ;;  %4081 = vmatpush.bf16.msrb.mxu1 %v10136_v36  ;;  %v13926_v22 = vld [vmem:[%s15288_s18 + $0xb64] sm:$0xf0]  ;;  %v9820_v39 = vor.u32 %v13654_v31, %v9819_v30 }
 0x1bc   : > { %v13965_v47 = vld [vmem:[%s15288_s18 + $0xca4] sm:$0xf]  ;;  %v10584_v53 = vor.u32 %v13837_v44, %v10581_v45  ;;  %v10908_v29 = vor.u32 %v13926_v22, %v10907_v21  ;;  %v13910_v36 = vld [vmem:[%s15288_s18 + $0xae4] sm:$0xf0] }
 0x1bd   : > { %v11093_v48 = vld [vmem:[%s15288_s18 + $0xce0] sm:$0xf0]  ;;  %4094 = vmatpush.bf16.msrb.mxu2 %v10648_v37  ;;  %4069 = vmatpush.bf16.msrb.mxu0 %v9560_v49  ;;  %v11355_v37 = vld [vmem:[%s15288_s18 + $0xea8] sm:$0xf]  ;;  %v10844_v41 = vor.u32 %v13910_v36, %v10843_v35 }
 0x1be   : > { %v13565_v50 = vld [vmem:[%s15288_s18 + $0x24] sm:$0xf]  ;;  %v11096_v58 = vor.u32 %v13965_v47, %v11093_v48  ;;  %v14038_v38 = vld [vmem:[%s15288_s18 + $0xee4] sm:$0xf0] }
 0x1bf   : > { %v9493_v51 = vld [vmem:[%s15288_s18 + $0x60] sm:$0xf0]  ;;  %4107 = vmatpush.bf16.msrb.mxu3 %v11160_v42  ;;  %4082 = vmatpush.bf16.msrb.mxu1 %v10072_v52  ;;  %v9755_v42 = vld [vmem:[%s15288_s18 + $0x228] sm:$0xf]  ;;  %v11356_v45 = vor.u32 %v14038_v38, %v11355_v37  ;;  %v3864_v52 = vpop.f32.mrf.mxu0 }
 0x1c0   : > { %v13693_v54 = vld [vmem:[%s15288_s18 + $0x424] sm:$0xf]  ;;  %v9496_v2 = vor.u32 %v13565_v50, %v9493_v51  ;;  %v13638_v43 = vld [vmem:[%s15288_s18 + $0x264] sm:$0xf0] }
 0x1c1   : > { %v10005_v55 = vld [vmem:[%s15288_s18 + $0x460] sm:$0xf0]  ;;  %4095 = vmatpush.bf16.msrb.mxu2 %v10584_v53  ;;  %v10267_v44 = vld [vmem:[%s15288_s18 + $0x628] sm:$0xf]  ;;  %v9756_v51 = vor.u32 %v13638_v43, %v9755_v42 }
 0x1c2   : > { %v13821_v56 = vld [vmem:[%s15288_s18 + $0x824] sm:$0xf]  ;;  %v10008_v6 = vor.u32 %v13693_v54, %v10005_v55  ;;  %4070 = vmatpush.bf16.msrb.mxu0 %v9496_v2  ;;  %v10779_v47 = vld [vmem:[%s15288_s18 + $0xa28] sm:$0xf]  ;;  %v10268_v53 = vor.u32 %v13766_v46, %v10267_v44 }
 0x1c3   : > { %v10517_v59 = vld [vmem:[%s15288_s18 + $0x860] sm:$0xf0]  ;;  %4108 = vmatpush.bf16.msrb.mxu3 %v11096_v58  ;;  %v13894_v48 = vld [vmem:[%s15288_s18 + $0xa64] sm:$0xf0]  ;;  %v3877_v58 = vpop.f32.mrf.mxu1 }
 0x1c4   : > { %v13949_v60 = vld [vmem:[%s15288_s18 + $0xc24] sm:$0xf]  ;;  %v10520_v7 = vor.u32 %v13821_v56, %v10517_v59  ;;  %4083 = vmatpush.bf16.msrb.mxu1 %v10008_v6  ;;  %v11291_v49 = vld [vmem:[%s15288_s18 + $0xe28] sm:$0xf]  ;;  %v10780_v54 = vor.u32 %v13894_v48, %v10779_v47  ;;  %v3878_v63 = vadd.f32 %v3877_v58, %v3864_v52  ;;  %v13678_v52 = vld [vmem:[%s15288_s18 + $0x3ac] sm:$0xf] }
 0x1c5   : > { %v11029_v61 = vld [vmem:[%s15288_s18 + $0xc60] sm:$0xf0]  ;;  %4071 = vmatmul.bf16.vlgmr.msrb.gmra.mxu0 %v15416_v26  ;;  %v14022_v50 = vld [vmem:[%s15288_s18 + $0xe64] sm:$0xf0]  ;;  %v10973_v58 = vld [vmem:[%s15288_s18 + $0xbe8] sm:$0xf0] }
 0x1c6   : > { %v11032_v10 = vor.u32 %v13949_v60, %v11029_v61  ;;  %4096 = vmatpush.bf16.msrb.mxu2 %v10520_v7  ;;  %4115 = vmatpush.bf16.msra.mxu0 %v9948_v11  ;;  %v9691_v55 = vld [vmem:[%s15288_s18 + $0x1a8] sm:$0xf]  ;;  %v11292_v59 = vor.u32 %v14022_v50, %v11291_v49 }
 0x1c7   : > { %4084 = vmatmul.bf16.vlgmr.msrb.gmra.mxu1 %v15418_v27  ;;  %v13622_v56 = vld [vmem:[%s15288_s18 + $0x1e4] sm:$0xf0]  ;;  %v3866_v22 = vpop.f32.mrf.mxu0 }
 0x1c8   : > { %4109 = vmatpush.bf16.msrb.mxu3 %v11032_v10  ;;  %4128 = vmatpush.bf16.msra.mxu1 %v10460_v12  ;;  %v10203_v57 = vld [vmem:[%s15288_s18 + $0x5a8] sm:$0xf]  ;;  %v9692_v2 = vor.u32 %v13622_v56, %v9691_v55  ;;  %v10461_v56 = vld [vmem:[%s15288_s18 + $0x7e8] sm:$0xf0] }
 0x1c9   : > { %4097 = vmatmul.bf16.vlgmr.msrb.gmra.mxu2 %v15409_v16  ;;  %v13750_v60 = vld [vmem:[%s15288_s18 + $0x5e4] sm:$0xf0]  ;;  %v3890_v8 = vpop.f32.mrf.mxu2  ;;  %v13902_v22 = vld [vmem:[%s15288_s18 + $0xaac] sm:$0xf] }
 0x1ca   : > { %4141 = vmatpush.bf16.msra.mxu2 %v10972_v13  ;;  %4116 = vmatpush.bf16.msra.mxu0 %v9884_v25  ;;  %v10715_v61 = vld [vmem:[%s15288_s18 + $0x9a8] sm:$0xf]  ;;  %v10204_v3 = vor.u32 %v13750_v60, %v10203_v57  ;;  %v3891_v13 = vadd.f32 %v3890_v8, %v3878_v63  ;;  %v13934_v57 = vld [vmem:[%s15288_s18 + $0xbac] sm:$0xf] }
 0x1cb   : > { %4110 = vmatmul.bf16.vlgmr.msrb.gmra.mxu3 %v15411_v17  ;;  %v13878_v62 = vld [vmem:[%s15288_s18 + $0x9e4] sm:$0xf0]  ;;  %v3903_v14 = vpop.f32.mrf.mxu3  ;;  %v3879_v30 = vpop.f32.mrf.mxu1  ;;  %v13918_v8 = vld [vmem:[%s15288_s18 + $0xb2c] sm:$0xf] }
 0x1cc   : > { %4154 = vmatpush.bf16.msra.mxu3 %v11484_v19  ;;  %4129 = vmatpush.bf16.msra.mxu1 %v10396_v28  ;;  %v11227_v0 = vld [vmem:[%s15288_s18 + $0xda8] sm:$0xf]  ;;  %v10716_v4 = vor.u32 %v13878_v62, %v10715_v61  ;;  %v3904_v21 = vadd.f32 %v3903_v14, %v3891_v13  ;;  %v14062_v61 = vld [vmem:[%s15288_s18 + $0xfac] sm:$0xf] }
 0x1cd   : > { %v14006_v1 = vld [vmem:[%s15288_s18 + $0xde4] sm:$0xf0]  ;;  %v11485_v62 = vld [vmem:[%s15288_s18 + $0xfe8] sm:$0xf0] }
 0x1ce   : > { %4142 = vmatpush.bf16.msra.mxu2 %v10908_v29  ;;  %4117 = vmatpush.bf16.msra.mxu0 %v9820_v39  ;;  %v9627_v5 = vld [vmem:[%s15288_s18 + $0x128] sm:$0xf]  ;;  %v11228_v9 = vor.u32 %v14006_v1, %v11227_v0 }
 0x1cf   : > { %v13606_v6 = vld [vmem:[%s15288_s18 + $0x164] sm:$0xf0] }
 0x1d0   : > { %4155 = vmatpush.bf16.msra.mxu3 %v11420_v33  ;;  %4130 = vmatpush.bf16.msra.mxu1 %v10332_v40  ;;  %v10139_v7 = vld [vmem:[%s15288_s18 + $0x528] sm:$0xf]  ;;  %v9628_v20 = vor.u32 %v13606_v6, %v9627_v5  ;;  %v13790_v5 = vld [vmem:[%s15288_s18 + $0x72c] sm:$0xf]  ;;  %v11488_v6 = vor.u32 %v14062_v61, %v11485_v62 }
 0x1d1   : > { %v13734_v10 = vld [vmem:[%s15288_s18 + $0x564] sm:$0xf0]  ;;  %v3892_v46 = vpop.f32.mrf.mxu2 }
 0x1d2   : > { %4143 = vmatpush.bf16.msra.mxu2 %v10844_v41  ;;  %4118 = vmatpush.bf16.msra.mxu0 %v9756_v51  ;;  %v10651_v11 = vld [vmem:[%s15288_s18 + $0x928] sm:$0xf]  ;;  %v10140_v23 = vor.u32 %v13734_v10, %v10139_v7  ;;  %v10397_v7 = vld [vmem:[%s15288_s18 + $0x768] sm:$0xf0] }
 0x1d3   : > { %v13862_v12 = vld [vmem:[%s15288_s18 + $0x964] sm:$0xf0]  ;;  %v3905_v51 = vpop.f32.mrf.mxu3  ;;  %v14046_v10 = vld [vmem:[%s15288_s18 + $0xf2c] sm:$0xf]  ;;  %v10400_v13 = vor.u32 %v13790_v5, %v10397_v7 }
 0x1d4   : > { %4156 = vmatpush.bf16.msra.mxu3 %v11356_v45  ;;  %4131 = vmatpush.bf16.msra.mxu1 %v10268_v53  ;;  %v11163_v15 = vld [vmem:[%s15288_s18 + $0xd28] sm:$0xf]  ;;  %v10652_v24 = vor.u32 %v13862_v12, %v10651_v11  ;;  %v9949_v53 = vld [vmem:[%s15288_s18 + $0x3e8] sm:$0xf0] }
 0x1d5   : > { %v13990_v18 = vld [vmem:[%s15288_s18 + $0xd64] sm:$0xf0]  ;;  %v9952_v0 = vor.u32 %v13678_v52, %v9949_v53  ;;  %v11421_v11 = vld [vmem:[%s15288_s18 + $0xf68] sm:$0xf0] }
 0x1d6   : > { %4144 = vmatpush.bf16.msra.mxu2 %v10780_v54  ;;  %v512_v19 = vld [vmem:[#allocation2 + $0x68] sm:$0xff]  ;;  %4119 = vmatpush.bf16.msra.mxu0 %v9692_v2  ;;  %v11164_v31 = vor.u32 %v13990_v18, %v11163_v15  ;;  %v10976_v2 = vor.u32 %v13934_v57, %v10973_v58 }
 0x1d7   : > { %v9563_v25 = vld [vmem:[%s15288_s18 + $0xa8] sm:$0xf]  ;;  %v4432_v35 = vadd.f32 %v3904_v21, %v512_v19  ;;  %v13806_v54 = vld [vmem:[%s15288_s18 + $0x7ac] sm:$0xf] }
 0x1d8   : > { %4157 = vmatpush.bf16.msra.mxu3 %v11292_v59  ;;  %4132 = vmatpush.bf16.msra.mxu1 %v10204_v3  ;;  %v13590_v28 = vld [vmem:[%s15288_s18 + $0xe4] sm:$0xf0]  ;;  %v10464_v1 = vor.u32 %v13806_v54, %v10461_v56  ;;  %v13662_v3 = vld [vmem:[%s15288_s18 + $0x32c] sm:$0xf] }
 0x1d9   : > { %v10075_v29 = vld [vmem:[%s15288_s18 + $0x4a8] sm:$0xf]  ;;  %v9564_v38 = vor.u32 %v13590_v28, %v9563_v25  ;;  %4448 = vst [vmem:[#allocation2 + $0x68] sm:$0xff] %v4432_v35  ;;  %v13646_v15 = vld [vmem:[%s15288_s18 + $0x2ac] sm:$0xf] }
 0x1da   : > { %4145 = vmatpush.bf16.msra.mxu2 %v10716_v4  ;;  %v13718_v32 = vld [vmem:[%s15288_s18 + $0x4e4] sm:$0xf0]  ;;  %4120 = vmatpush.bf16.msra.mxu0 %v9628_v20  ;;  %v9885_v4 = vld [vmem:[%s15288_s18 + $0x368] sm:$0xf0]  ;;  %v11424_v20 = vor.u32 %v14046_v10, %v11421_v11 }
 0x1db   : > { %v10587_v33 = vld [vmem:[%s15288_s18 + $0x8a8] sm:$0xf]  ;;  %v10076_v41 = vor.u32 %v13718_v32, %v10075_v29  ;;  %v9888_v12 = vor.u32 %v13662_v3, %v9885_v4  ;;  %v9821_v18 = vld [vmem:[%s15288_s18 + $0x2e8] sm:$0xf0] }
 0x1dc   : > { %4158 = vmatpush.bf16.msra.mxu3 %v11228_v9  ;;  %v13846_v34 = vld [vmem:[%s15288_s18 + $0x8e4] sm:$0xf0]  ;;  %4133 = vmatpush.bf16.msra.mxu1 %v10140_v23  ;;  %v10909_v9 = vld [vmem:[%s15288_s18 + $0xb68] sm:$0xf0]  ;;  %v9824_v28 = vor.u32 %v13646_v15, %v9821_v18 }
 0x1dd   : > { %v11099_v36 = vld [vmem:[%s15288_s18 + $0xca8] sm:$0xf]  ;;  %v10588_v42 = vor.u32 %v13846_v34, %v10587_v33  ;;  %v10912_v14 = vor.u32 %v13918_v8, %v10909_v9  ;;  %v13774_v19 = vld [vmem:[%s15288_s18 + $0x6ac] sm:$0xf] }
 0x1de   : > { %v13974_v37 = vld [vmem:[%s15288_s18 + $0xce4] sm:$0xf0]  ;;  %4146 = vmatpush.bf16.msra.mxu2 %v10652_v24  ;;  %4121 = vmatpush.bf16.msra.mxu0 %v9564_v38  ;;  %v10333_v21 = vld [vmem:[%s15288_s18 + $0x6e8] sm:$0xf0] }
 0x1df   : > { %v9499_v39 = vld [vmem:[%s15288_s18 + $0x28] sm:$0xf]  ;;  %v11100_v47 = vor.u32 %v13974_v37, %v11099_v36  ;;  %v10845_v23 = vld [vmem:[%s15288_s18 + $0xae8] sm:$0xf0]  ;;  %v10336_v29 = vor.u32 %v13774_v19, %v10333_v21 }
 0x1e0   : > { %v13574_v40 = vld [vmem:[%s15288_s18 + $0x64] sm:$0xf0]  ;;  %4159 = vmatpush.bf16.msra.mxu3 %v11164_v31  ;;  %4134 = vmatpush.bf16.msra.mxu1 %v10076_v41  ;;  %v14030_v24 = vld [vmem:[%s15288_s18 + $0xeac] sm:$0xf]  ;;  %v10848_v30 = vor.u32 %v13902_v22, %v10845_v23  ;;  %v3916_v41 = vpop.f32.mrf.mxu0 }
 0x1e1   : > { %v10011_v43 = vld [vmem:[%s15288_s18 + $0x428] sm:$0xf]  ;;  %v9500_v55 = vor.u32 %v13574_v40, %v9499_v39  ;;  %v11357_v25 = vld [vmem:[%s15288_s18 + $0xee8] sm:$0xf0] }
 0x1e2   : > { %v13702_v44 = vld [vmem:[%s15288_s18 + $0x464] sm:$0xf0]  ;;  %4147 = vmatpush.bf16.msra.mxu2 %v10588_v42  ;;  %v13630_v31 = vld [vmem:[%s15288_s18 + $0x22c] sm:$0xf]  ;;  %v11360_v34 = vor.u32 %v14030_v24, %v11357_v25 }
 0x1e3   : > { %v10523_v45 = vld [vmem:[%s15288_s18 + $0x828] sm:$0xf]  ;;  %v10012_v59 = vor.u32 %v13702_v44, %v10011_v43  ;;  %4122 = vmatpush.bf16.msra.mxu0 %v9500_v55  ;;  %v9757_v32 = vld [vmem:[%s15288_s18 + $0x268] sm:$0xf0] }
 0x1e4   : > { %v13830_v48 = vld [vmem:[%s15288_s18 + $0x864] sm:$0xf0]  ;;  %4160 = vmatpush.bf16.msra.mxu3 %v11100_v47  ;;  %v13758_v33 = vld [vmem:[%s15288_s18 + $0x62c] sm:$0xf]  ;;  %v9760_v40 = vor.u32 %v13630_v31, %v9757_v32  ;;  %v3929_v47 = vpop.f32.mrf.mxu1 }
 0x1e5   : > { %v11035_v49 = vld [vmem:[%s15288_s18 + $0xc28] sm:$0xf]  ;;  %v10524_v60 = vor.u32 %v13830_v48, %v10523_v45  ;;  %4135 = vmatpush.bf16.msra.mxu1 %v10012_v59  ;;  %v10269_v35 = vld [vmem:[%s15288_s18 + $0x668] sm:$0xf0]  ;;  %v3930_v52 = vadd.f32 %v3929_v47, %v3916_v41  ;;  %v9955_v41 = vld [vmem:[%s15288_s18 + $0x3b0] sm:$0xf] }
 0x1e6   : > { %v13958_v50 = vld [vmem:[%s15288_s18 + $0xc64] sm:$0xf0]  ;;  %4123 = vmatmul.bf16.vlgmr.msra.gmra.mxu0 %v15416_v26  ;;  %v13886_v36 = vld [vmem:[%s15288_s18 + $0xa2c] sm:$0xf]  ;;  %v10272_v42 = vor.u32 %v13758_v33, %v10269_v35  ;;  %v13943_v47 = vld [vmem:[%s15288_s18 + $0xbec] sm:$0xf0] }
 0x1e7   : > { %v11036_v63 = vor.u32 %v13958_v50, %v11035_v49  ;;  %4148 = vmatpush.bf16.msra.mxu2 %v10524_v60  ;;  %4167 = vmatpush.bf16.msrb.mxu0 %v9952_v0  ;;  %v10781_v37 = vld [vmem:[%s15288_s18 + $0xa68] sm:$0xf0] }
 0x1e8   : > { %4136 = vmatmul.bf16.vlgmr.msra.gmra.mxu1 %v15418_v27  ;;  %v14014_v38 = vld [vmem:[%s15288_s18 + $0xe2c] sm:$0xf]  ;;  %v10784_v43 = vor.u32 %v13886_v36, %v10781_v37  ;;  %v3918_v9 = vpop.f32.mrf.mxu0 }
 0x1e9   : > { %4161 = vmatpush.bf16.msra.mxu3 %v11036_v63  ;;  %4180 = vmatpush.bf16.msrb.mxu1 %v10464_v1  ;;  %v11293_v39 = vld [vmem:[%s15288_s18 + $0xe68] sm:$0xf0]  ;;  %v3942_v61 = vpop.f32.mrf.mxu2  ;;  %v10851_v9 = vld [vmem:[%s15288_s18 + $0xab0] sm:$0xf] }
 0x1ea   : > { %4149 = vmatmul.bf16.vlgmr.msra.gmra.mxu2 %v15409_v16  ;;  %v13614_v44 = vld [vmem:[%s15288_s18 + $0x1ac] sm:$0xf]  ;;  %v11296_v48 = vor.u32 %v14014_v38, %v11293_v39 }
 0x1eb   : > { %4193 = vmatpush.bf16.msrb.mxu2 %v10976_v2  ;;  %4168 = vmatpush.bf16.msrb.mxu0 %v9888_v12  ;;  %v9693_v45 = vld [vmem:[%s15288_s18 + $0x1e8] sm:$0xf0]  ;;  %v3943_v2 = vadd.f32 %v3942_v61, %v3930_v52  ;;  %v3955_v3 = vpop.f32.mrf.mxu3  ;;  %v10915_v61 = vld [vmem:[%s15288_s18 + $0xb30] sm:$0xf] }
 0x1ec   : > { %4162 = vmatmul.bf16.vlgmr.msra.gmra.mxu3 %v15411_v17  ;;  %v13742_v46 = vld [vmem:[%s15288_s18 + $0x5ac] sm:$0xf]  ;;  %v9696_v55 = vor.u32 %v13614_v44, %v9693_v45  ;;  %v3931_v15 = vpop.f32.mrf.mxu1  ;;  %v13815_v45 = vld [vmem:[%s15288_s18 + $0x7ec] sm:$0xf0] }
 0x1ed   : > { %4206 = vmatpush.bf16.msrb.mxu3 %v11488_v6  ;;  %4181 = vmatpush.bf16.msrb.mxu1 %v10400_v13  ;;  %v10205_v49 = vld [vmem:[%s15288_s18 + $0x5e8] sm:$0xf0]  ;;  %v3956_v8 = vadd.f32 %v3955_v3, %v3943_v2 }
 0x1ee   : > { %v13870_v50 = vld [vmem:[%s15288_s18 + $0x9ac] sm:$0xf]  ;;  %v10208_v56 = vor.u32 %v13742_v46, %v10205_v49  ;;  %v10979_v46 = vld [vmem:[%s15288_s18 + $0xbb0] sm:$0xf] }
 0x1ef   : > { %4194 = vmatpush.bf16.msrb.mxu2 %v10912_v14  ;;  %4169 = vmatpush.bf16.msrb.mxu0 %v9824_v28  ;;  %v10717_v51 = vld [vmem:[%s15288_s18 + $0x9e8] sm:$0xf0] }
 0x1f0   : > { %v13998_v53 = vld [vmem:[%s15288_s18 + $0xdac] sm:$0xf]  ;;  %v10720_v57 = vor.u32 %v13870_v50, %v10717_v51  ;;  %v11491_v50 = vld [vmem:[%s15288_s18 + $0xfb0] sm:$0xf] }
 0x1f1   : > { %4207 = vmatpush.bf16.msrb.mxu3 %v11424_v20  ;;  %4182 = vmatpush.bf16.msrb.mxu1 %v10336_v29  ;;  %v11229_v54 = vld [vmem:[%s15288_s18 + $0xde8] sm:$0xf0]  ;;  %v3944_v35 = vpop.f32.mrf.mxu2  ;;  %v14071_v51 = vld [vmem:[%s15288_s18 + $0xfec] sm:$0xf0] }
 0x1f2   : > { %v13598_v58 = vld [vmem:[%s15288_s18 + $0x12c] sm:$0xf]  ;;  %v11232_v62 = vor.u32 %v13998_v53, %v11229_v54  ;;  %v10211_v35 = vld [vmem:[%s15288_s18 + $0x5b0] sm:$0xf] }
 0x1f3   : > { %4195 = vmatpush.bf16.msrb.mxu2 %v10848_v30  ;;  %4170 = vmatpush.bf16.msrb.mxu0 %v9760_v40  ;;  %v9629_v59 = vld [vmem:[%s15288_s18 + $0x168] sm:$0xf0]  ;;  %v3957_v40 = vpop.f32.mrf.mxu3 }
 0x1f4   : > { %v13726_v60 = vld [vmem:[%s15288_s18 + $0x52c] sm:$0xf]  ;;  %v9632_v7 = vor.u32 %v13598_v58, %v9629_v59  ;;  %v10403_v58 = vld [vmem:[%s15288_s18 + $0x730] sm:$0xf]  ;;  %v11492_v59 = vor.u32 %v14071_v51, %v11491_v50 }
 0x1f5   : > { %4208 = vmatpush.bf16.msrb.mxu3 %v11360_v34  ;;  %4183 = vmatpush.bf16.msrb.mxu1 %v10272_v42  ;;  %v10141_v63 = vld [vmem:[%s15288_s18 + $0x568] sm:$0xf0]  ;;  %v13687_v42 = vld [vmem:[%s15288_s18 + $0x3ec] sm:$0xf0] }
 0x1f6   : > { %v13854_v0 = vld [vmem:[%s15288_s18 + $0x92c] sm:$0xf]  ;;  %v10144_v10 = vor.u32 %v13726_v60, %v10141_v63  ;;  %v9956_v53 = vor.u32 %v13687_v42, %v9955_v41  ;;  %v13799_v60 = vld [vmem:[%s15288_s18 + $0x76c] sm:$0xf0] }
 0x1f7   : > { %4196 = vmatpush.bf16.msrb.mxu2 %v10784_v43  ;;  %v10653_v1 = vld [vmem:[%s15288_s18 + $0x968] sm:$0xf0]  ;;  %4171 = vmatpush.bf16.msrb.mxu0 %v9696_v55  ;;  %v10467_v43 = vld [vmem:[%s15288_s18 + $0x7b0] sm:$0xf]  ;;  %v10980_v55 = vor.u32 %v13943_v47, %v10979_v46  ;;  %v10404_v2 = vor.u32 %v13799_v60, %v10403_v58 }
 0x1f8   : > { %v13982_v4 = vld [vmem:[%s15288_s18 + $0xd2c] sm:$0xf]  ;;  %v10656_v11 = vor.u32 %v13854_v0, %v10653_v1  ;;  %v10468_v54 = vor.u32 %v13815_v45, %v10467_v43  ;;  %v11427_v63 = vld [vmem:[%s15288_s18 + $0xf30] sm:$0xf] }
 0x1f9   : > { %4209 = vmatpush.bf16.msrb.mxu3 %v11296_v48  ;;  %v11165_v5 = vld [vmem:[%s15288_s18 + $0xd68] sm:$0xf0]  ;;  %4184 = vmatpush.bf16.msrb.mxu1 %v10208_v56  ;;  %v9891_v56 = vld [vmem:[%s15288_s18 + $0x330] sm:$0xf] }
 0x1fa   : > { %v513_v6 = vld [vmem:[#allocation2 + $0x8] sm:$0xff]  ;;  %v11168_v18 = vor.u32 %v13982_v4, %v11165_v5  ;;  %v14055_v0 = vld [vmem:[%s15288_s18 + $0xf6c] sm:$0xf0] }
 0x1fb   : > { %4197 = vmatpush.bf16.msrb.mxu2 %v10720_v57  ;;  %v13582_v12 = vld [vmem:[%s15288_s18 + $0xac] sm:$0xf]  ;;  %v4433_v22 = vadd.f32 %v3956_v8, %v513_v6  ;;  %4172 = vmatpush.bf16.msrb.mxu0 %v9632_v7  ;;  %v13671_v57 = vld [vmem:[%s15288_s18 + $0x36c] sm:$0xf0]  ;;  %v11428_v7 = vor.u32 %v14055_v0, %v11427_v63 }
 0x1fc   : > { %v9565_v13 = vld [vmem:[%s15288_s18 + $0xe8] sm:$0xf0]  ;;  %v9892_v1 = vor.u32 %v13671_v57, %v9891_v56  ;;  %v9827_v4 = vld [vmem:[%s15288_s18 + $0x2b0] sm:$0xf] }
 0x1fd   : > { %v13710_v14 = vld [vmem:[%s15288_s18 + $0x4ac] sm:$0xf]  ;;  %4210 = vmatpush.bf16.msrb.mxu3 %v11232_v62  ;;  %v9568_v25 = vor.u32 %v13582_v12, %v9565_v13  ;;  %4449 = vst [vmem:[#allocation2 + $0x8] sm:$0xff] %v4433_v22  ;;  %4185 = vmatpush.bf16.msrb.mxu1 %v10144_v10  ;;  %v13927_v62 = vld [vmem:[%s15288_s18 + $0xb6c] sm:$0xf0] }
 0x1fe   : > { %v10077_v19 = vld [vmem:[%s15288_s18 + $0x4e8] sm:$0xf0]  ;;  %v10916_v3 = vor.u32 %v13927_v62, %v10915_v61  ;;  %v13655_v5 = vld [vmem:[%s15288_s18 + $0x2ec] sm:$0xf0] }
 0x1ff   : > { %v13838_v20 = vld [vmem:[%s15288_s18 + $0x8ac] sm:$0xf]  ;;  %4198 = vmatpush.bf16.msrb.mxu2 %v10656_v11  ;;  %v10080_v30 = vor.u32 %v13710_v14, %v10077_v19  ;;  %4173 = vmatpush.bf16.msrb.mxu0 %v9568_v25  ;;  %v10339_v6 = vld [vmem:[%s15288_s18 + $0x6b0] sm:$0xf]  ;;  %v9828_v13 = vor.u32 %v13655_v5, %v9827_v4 }
 0x200   : > { %v10589_v21 = vld [vmem:[%s15288_s18 + $0x8e8] sm:$0xf0]  ;;  %v13783_v8 = vld [vmem:[%s15288_s18 + $0x6ec] sm:$0xf0] }
 0x201   : > { %v13966_v23 = vld [vmem:[%s15288_s18 + $0xcac] sm:$0xf]  ;;  %v10592_v31 = vor.u32 %v13838_v20, %v10589_v21  ;;  %4211 = vmatpush.bf16.msrb.mxu3 %v11168_v18  ;;  %4186 = vmatpush.bf16.msrb.mxu1 %v10080_v30  ;;  %v13911_v10 = vld [vmem:[%s15288_s18 + $0xaec] sm:$0xf0]  ;;  %v10340_v14 = vor.u32 %v13783_v8, %v10339_v6  ;;  %v3968_v30 = vpop.f32.mrf.mxu0 }
 0x202   : > { %v11101_v24 = vld [vmem:[%s15288_s18 + $0xce8] sm:$0xf0]  ;;  %v11363_v11 = vld [vmem:[%s15288_s18 + $0xeb0] sm:$0xf]  ;;  %v10852_v15 = vor.u32 %v13911_v10, %v10851_v9 }
 0x203   : > { %v13566_v28 = vld [vmem:[%s15288_s18 + $0x2c] sm:$0xf]  ;;  %v11104_v36 = vor.u32 %v13966_v23, %v11101_v24  ;;  %4199 = vmatpush.bf16.msrb.mxu2 %v10592_v31  ;;  %v14039_v12 = vld [vmem:[%s15288_s18 + $0xeec] sm:$0xf0] }
 0x204   : > { %v9501_v29 = vld [vmem:[%s15288_s18 + $0x68] sm:$0xf0]  ;;  %v9763_v18 = vld [vmem:[%s15288_s18 + $0x230] sm:$0xf]  ;;  %v11364_v21 = vor.u32 %v14039_v12, %v11363_v11 }
 0x205   : > { %v13694_v32 = vld [vmem:[%s15288_s18 + $0x42c] sm:$0xf]  ;;  %v9504_v44 = vor.u32 %v13566_v28, %v9501_v29  ;;  %4212 = vmatpush.bf16.msrb.mxu3 %v11104_v36  ;;  %v13639_v19 = vld [vmem:[%s15288_s18 + $0x26c] sm:$0xf0]  ;;  %v3981_v36 = vpop.f32.mrf.mxu1 }
 0x206   : > { %v10013_v33 = vld [vmem:[%s15288_s18 + $0x468] sm:$0xf0]  ;;  %v10275_v20 = vld [vmem:[%s15288_s18 + $0x630] sm:$0xf]  ;;  %v9764_v29 = vor.u32 %v13639_v19, %v9763_v18  ;;  %v3982_v41 = vadd.f32 %v3981_v36, %v3968_v30  ;;  %v13679_v30 = vld [vmem:[%s15288_s18 + $0x3b4] sm:$0xf] }
 0x207   : > { %v13822_v34 = vld [vmem:[%s15288_s18 + $0x82c] sm:$0xf]  ;;  %v10016_v48 = vor.u32 %v13694_v32, %v10013_v33  ;;  %4174 = vmatpush.bf16.msrb.mxu0 %v9504_v44  ;;  %v13767_v22 = vld [vmem:[%s15288_s18 + $0x66c] sm:$0xf0]  ;;  %v10981_v36 = vld [vmem:[%s15288_s18 + $0xbf0] sm:$0xf0] }
 0x208   : > { %v10525_v37 = vld [vmem:[%s15288_s18 + $0x868] sm:$0xf0]  ;;  %v10787_v23 = vld [vmem:[%s15288_s18 + $0xa30] sm:$0xf]  ;;  %v10276_v31 = vor.u32 %v13767_v22, %v10275_v20 }
 0x209   : > { %v13950_v38 = vld [vmem:[%s15288_s18 + $0xc2c] sm:$0xf]  ;;  %v10528_v49 = vor.u32 %v13822_v34, %v10525_v37  ;;  %4187 = vmatpush.bf16.msrb.mxu1 %v10016_v48  ;;  %v13895_v24 = vld [vmem:[%s15288_s18 + $0xa6c] sm:$0xf0]  ;;  %v3994_v50 = vpop.f32.mrf.mxu2  ;;  %v3970_v62 = vpop.f32.mrf.mxu0 }
 0x20a   : > { %v11037_v39 = vld [vmem:[%s15288_s18 + $0xc68] sm:$0xf0]  ;;  %4175 = vmatmul.bf16.vlgmr.msrb.gmra.mxu0 %v15416_v26  ;;  %v11299_v25 = vld [vmem:[%s15288_s18 + $0xe30] sm:$0xf]  ;;  %v10788_v32 = vor.u32 %v13895_v24, %v10787_v23  ;;  %v13903_v62 = vld [vmem:[%s15288_s18 + $0xab4] sm:$0xf] }
 0x20b   : > { %v11040_v52 = vor.u32 %v13950_v38, %v11037_v39  ;;  %4200 = vmatpush.bf16.msrb.mxu2 %v10528_v49  ;;  %4219 = vmatpush.bf16.msra.mxu0 %v9956_v53  ;;  %v14023_v28 = vld [vmem:[%s15288_s18 + $0xe6c] sm:$0xf0]  ;;  %v4007_v56 = vpop.f32.mrf.mxu3 }
 0x20c   : > { %4188 = vmatmul.bf16.vlgmr.msrb.gmra.mxu1 %v15418_v27  ;;  %v9699_v33 = vld [vmem:[%s15288_s18 + $0x1b0] sm:$0xf]  ;;  %v11300_v37 = vor.u32 %v14023_v28, %v11299_v25 }
 0x20d   : > { %4213 = vmatpush.bf16.msrb.mxu3 %v11040_v52  ;;  %4232 = vmatpush.bf16.msra.mxu1 %v10468_v54  ;;  %v13623_v34 = vld [vmem:[%s15288_s18 + $0x1ec] sm:$0xf0]  ;;  %v3983_v4 = vpop.f32.mrf.mxu1 }
 0x20e   : > { %4201 = vmatmul.bf16.vlgmr.msrb.gmra.mxu2 %v15409_v16  ;;  %v13751_v38 = vld [vmem:[%s15288_s18 + $0x5ec] sm:$0xf0]  ;;  %v9700_v44 = vor.u32 %v13623_v34, %v9699_v33  ;;  %v10469_v34 = vld [vmem:[%s15288_s18 + $0x7f0] sm:$0xf0] }
 0x20f   : > { %4245 = vmatpush.bf16.msra.mxu2 %v10980_v55  ;;  %4220 = vmatpush.bf16.msra.mxu0 %v9892_v1  ;;  %v10723_v39 = vld [vmem:[%s15288_s18 + $0x9b0] sm:$0xf]  ;;  %v10212_v45 = vor.u32 %v13751_v38, %v10211_v35  ;;  %v3995_v55 = vadd.f32 %v3994_v50, %v3982_v41  ;;  %v13935_v35 = vld [vmem:[%s15288_s18 + $0xbb4] sm:$0xf] }
 0x210   : > { %4214 = vmatmul.bf16.vlgmr.msrb.gmra.mxu3 %v15411_v17  ;;  %v13879_v40 = vld [vmem:[%s15288_s18 + $0x9ec] sm:$0xf0]  ;;  %v13919_v50 = vld [vmem:[%s15288_s18 + $0xb34] sm:$0xf] }
 0x211   : > { %4258 = vmatpush.bf16.msra.mxu3 %v11492_v59  ;;  %4233 = vmatpush.bf16.msra.mxu1 %v10404_v2  ;;  %v11235_v42 = vld [vmem:[%s15288_s18 + $0xdb0] sm:$0xf]  ;;  %v10724_v46 = vor.u32 %v13879_v40, %v10723_v39  ;;  %v514_v59 = vld [vmem:[#allocation2 + $0x48] sm:$0xff]  ;;  %v4008_v61 = vadd.f32 %v4007_v56, %v3995_v55  ;;  %v3996_v22 = vpop.f32.mrf.mxu2  ;;  %v14063_v39 = vld [vmem:[%s15288_s18 + $0xfb4] sm:$0xf] }
 0x212   : > { %v14007_v43 = vld [vmem:[%s15288_s18 + $0xdec] sm:$0xf0]  ;;  %v11493_v40 = vld [vmem:[%s15288_s18 + $0xff0] sm:$0xf0] }
 0x213   : > { %4246 = vmatpush.bf16.msra.mxu2 %v10916_v3  ;;  %4221 = vmatpush.bf16.msra.mxu0 %v9828_v13  ;;  %v9635_v47 = vld [vmem:[%s15288_s18 + $0x130] sm:$0xf]  ;;  %v11236_v51 = vor.u32 %v14007_v43, %v11235_v42  ;;  %v4434_v9 = vadd.f32 %v4008_v61, %v514_v59  ;;  %v13775_v59 = vld [vmem:[%s15288_s18 + $0x6b4] sm:$0xf] }
 0x214   : > { %v13607_v48 = vld [vmem:[%s15288_s18 + $0x16c] sm:$0xf0]  ;;  %v10341_v61 = vld [vmem:[%s15288_s18 + $0x6f0] sm:$0xf0] }
 0x215   : > { %4259 = vmatpush.bf16.msra.mxu3 %v11428_v7  ;;  %4234 = vmatpush.bf16.msra.mxu1 %v10340_v14  ;;  %v10147_v49 = vld [vmem:[%s15288_s18 + $0x530] sm:$0xf]  ;;  %v9636_v60 = vor.u32 %v13607_v48, %v9635_v47  ;;  %4450 = vst [vmem:[#allocation2 + $0x48] sm:$0xff] %v4434_v9  ;;  %v13791_v47 = vld [vmem:[%s15288_s18 + $0x734] sm:$0xf]  ;;  %v11496_v48 = vor.u32 %v14063_v39, %v11493_v40 }
 0x216   : > { %v13735_v52 = vld [vmem:[%s15288_s18 + $0x56c] sm:$0xf0]  ;;  %v10277_v9 = vld [vmem:[%s15288_s18 + $0x670] sm:$0xf0] }
 0x217   : > { %4247 = vmatpush.bf16.msra.mxu2 %v10852_v15  ;;  %4222 = vmatpush.bf16.msra.mxu0 %v9764_v29  ;;  %v10659_v53 = vld [vmem:[%s15288_s18 + $0x930] sm:$0xf]  ;;  %v10148_v63 = vor.u32 %v13735_v52, %v10147_v49  ;;  %v4009_v29 = vpop.f32.mrf.mxu3  ;;  %v10405_v49 = vld [vmem:[%s15288_s18 + $0x770] sm:$0xf0] }
 0x218   : > { %v13863_v54 = vld [vmem:[%s15288_s18 + $0x96c] sm:$0xf0]  ;;  %v14047_v52 = vld [vmem:[%s15288_s18 + $0xf34] sm:$0xf]  ;;  %v10408_v55 = vor.u32 %v13791_v47, %v10405_v49 }
 0x219   : > { %4260 = vmatpush.bf16.msra.mxu3 %v11364_v21  ;;  %4235 = vmatpush.bf16.msra.mxu1 %v10276_v31  ;;  %v11171_v57 = vld [vmem:[%s15288_s18 + $0xd30] sm:$0xf]  ;;  %v10660_v0 = vor.u32 %v13863_v54, %v10659_v53  ;;  %v9957_v31 = vld [vmem:[%s15288_s18 + $0x3f0] sm:$0xf0] }
 0x21a   : > { %v13991_v58 = vld [vmem:[%s15288_s18 + $0xd6c] sm:$0xf0]  ;;  %v9960_v42 = vor.u32 %v13679_v30, %v9957_v31  ;;  %v11429_v53 = vld [vmem:[%s15288_s18 + $0xf70] sm:$0xf0] }
 0x21b   : > { %4248 = vmatpush.bf16.msra.mxu2 %v10788_v32  ;;  %4223 = vmatpush.bf16.msra.mxu0 %v9700_v44  ;;  %v9571_v1 = vld [vmem:[%s15288_s18 + $0xb0] sm:$0xf]  ;;  %v11172_v5 = vor.u32 %v13991_v58, %v11171_v57  ;;  %v13807_v32 = vld [vmem:[%s15288_s18 + $0x7b4] sm:$0xf]  ;;  %v10984_v44 = vor.u32 %v13935_v35, %v10981_v36 }
 0x21c   : > { %v13591_v2 = vld [vmem:[%s15288_s18 + $0xec] sm:$0xf0]  ;;  %v10472_v43 = vor.u32 %v13807_v32, %v10469_v34  ;;  %v13647_v57 = vld [vmem:[%s15288_s18 + $0x2b4] sm:$0xf] }
 0x21d   : > { %4261 = vmatpush.bf16.msra.mxu3 %v11300_v37  ;;  %4236 = vmatpush.bf16.msra.mxu1 %v10212_v45  ;;  %v10083_v3 = vld [vmem:[%s15288_s18 + $0x4b0] sm:$0xf]  ;;  %v9572_v12 = vor.u32 %v13591_v2, %v9571_v1  ;;  %v13663_v45 = vld [vmem:[%s15288_s18 + $0x334] sm:$0xf] }
 0x21e   : > { %v13719_v6 = vld [vmem:[%s15288_s18 + $0x4ec] sm:$0xf0]  ;;  %v9829_v58 = vld [vmem:[%s15288_s18 + $0x2f0] sm:$0xf0] }
 0x21f   : > { %4249 = vmatpush.bf16.msra.mxu2 %v10724_v46  ;;  %v10595_v7 = vld [vmem:[%s15288_s18 + $0x8b0] sm:$0xf]  ;;  %4224 = vmatpush.bf16.msra.mxu0 %v9636_v60  ;;  %v10084_v15 = vor.u32 %v13719_v6, %v10083_v3  ;;  %v9893_v46 = vld [vmem:[%s15288_s18 + $0x370] sm:$0xf0]  ;;  %v11432_v60 = vor.u32 %v14047_v52, %v11429_v53  ;;  %v9832_v2 = vor.u32 %v13647_v57, %v9829_v58 }
 0x220   : > { %v13847_v8 = vld [vmem:[%s15288_s18 + $0x8ec] sm:$0xf0]  ;;  %v9896_v54 = vor.u32 %v13663_v45, %v9893_v46  ;;  %v11365_v1 = vld [vmem:[%s15288_s18 + $0xef0] sm:$0xf0]  ;;  %v10344_v3 = vor.u32 %v13775_v59, %v10341_v61 }
 0x221   : > { %4262 = vmatpush.bf16.msra.mxu3 %v11236_v51  ;;  %v11107_v10 = vld [vmem:[%s15288_s18 + $0xcb0] sm:$0xf]  ;;  %4237 = vmatpush.bf16.msra.mxu1 %v10148_v63  ;;  %v10596_v18 = vor.u32 %v13847_v8, %v10595_v7  ;;  %v10917_v51 = vld [vmem:[%s15288_s18 + $0xb70] sm:$0xf0] }
 0x222   : > { %v13975_v11 = vld [vmem:[%s15288_s18 + $0xcec] sm:$0xf0]  ;;  %v10920_v56 = vor.u32 %v13919_v50, %v10917_v51  ;;  %v10853_v63 = vld [vmem:[%s15288_s18 + $0xaf0] sm:$0xf0] }
 0x223   : > { %v9507_v13 = vld [vmem:[%s15288_s18 + $0x30] sm:$0xf]  ;;  %4250 = vmatpush.bf16.msra.mxu2 %v10660_v0  ;;  %v11108_v23 = vor.u32 %v13975_v11, %v11107_v10  ;;  %4225 = vmatpush.bf16.msra.mxu0 %v9572_v12  ;;  %v14031_v0 = vld [vmem:[%s15288_s18 + $0xeb4] sm:$0xf]  ;;  %v10856_v4 = vor.u32 %v13903_v62, %v10853_v63 }
 0x224   : > { %v13575_v14 = vld [vmem:[%s15288_s18 + $0x6c] sm:$0xf0]  ;;  %v9765_v6 = vld [vmem:[%s15288_s18 + $0x270] sm:$0xf0]  ;;  %v11368_v8 = vor.u32 %v14031_v0, %v11365_v1 }
 0x225   : > { %v10019_v19 = vld [vmem:[%s15288_s18 + $0x430] sm:$0xf]  ;;  %4263 = vmatpush.bf16.msra.mxu3 %v11172_v5  ;;  %v9508_v33 = vor.u32 %v13575_v14, %v9507_v13  ;;  %4238 = vmatpush.bf16.msra.mxu1 %v10084_v15  ;;  %v13631_v5 = vld [vmem:[%s15288_s18 + $0x234] sm:$0xf]  ;;  %v4020_v15 = vpop.f32.mrf.mxu0 }
 0x226   : > { %v13703_v20 = vld [vmem:[%s15288_s18 + $0x46c] sm:$0xf0]  ;;  %v13759_v7 = vld [vmem:[%s15288_s18 + $0x634] sm:$0xf]  ;;  %v9768_v14 = vor.u32 %v13631_v5, %v9765_v6 }
 0x227   : > { %v10531_v21 = vld [vmem:[%s15288_s18 + $0x830] sm:$0xf]  ;;  %4251 = vmatpush.bf16.msra.mxu2 %v10596_v18  ;;  %v10020_v37 = vor.u32 %v13703_v20, %v10019_v19  ;;  %4226 = vmatpush.bf16.msra.mxu0 %v9508_v33  ;;  %v13887_v10 = vld [vmem:[%s15288_s18 + $0xa34] sm:$0xf]  ;;  %v10280_v18 = vor.u32 %v13759_v7, %v10277_v9 }
 0x228   : > { %v13831_v24 = vld [vmem:[%s15288_s18 + $0x86c] sm:$0xf0]  ;;  %v10789_v11 = vld [vmem:[%s15288_s18 + $0xa70] sm:$0xf0] }
 0x229   : > { %v11043_v25 = vld [vmem:[%s15288_s18 + $0xc30] sm:$0xf]  ;;  %v10532_v38 = vor.u32 %v13831_v24, %v10531_v21  ;;  %4264 = vmatpush.bf16.msra.mxu3 %v11108_v23  ;;  %4239 = vmatpush.bf16.msra.mxu1 %v10020_v37  ;;  %v14015_v12 = vld [vmem:[%s15288_s18 + $0xe34] sm:$0xf]  ;;  %v10792_v19 = vor.u32 %v13887_v10, %v10789_v11  ;;  %v4033_v23 = vpop.f32.mrf.mxu1 }
 0x22a   : > { %v13959_v28 = vld [vmem:[%s15288_s18 + $0xc6c] sm:$0xf0]  ;;  %4227 = vmatmul.bf16.vlgmr.msra.gmra.mxu0 %v15416_v26  ;;  %v11301_v13 = vld [vmem:[%s15288_s18 + $0xe70] sm:$0xf0]  ;;  %v4034_v30 = vadd.f32 %v4033_v23, %v4020_v15  ;;  %v9963_v15 = vld [vmem:[%s15288_s18 + $0x3b8] sm:$0xf] }
 0x22b   : > { %v11044_v41 = vor.u32 %v13959_v28, %v11043_v25  ;;  %4252 = vmatpush.bf16.msra.mxu2 %v10532_v38  ;;  %4271 = vmatpush.bf16.msrb.mxu0 %v9960_v42  ;;  %v13615_v20 = vld [vmem:[%s15288_s18 + $0x1b4] sm:$0xf]  ;;  %v11304_v24 = vor.u32 %v14015_v12, %v11301_v13  ;;  %v4046_v39 = vpop.f32.mrf.mxu2  ;;  %v13944_v23 = vld [vmem:[%s15288_s18 + $0xbf4] sm:$0xf0] }
 0x22c   : > { %4240 = vmatmul.bf16.vlgmr.msra.gmra.mxu1 %v15418_v27  ;;  %v9701_v21 = vld [vmem:[%s15288_s18 + $0x1f0] sm:$0xf0] }
 0x22d   : > { %4265 = vmatpush.bf16.msra.mxu3 %v11044_v41  ;;  %4284 = vmatpush.bf16.msrb.mxu1 %v10472_v43  ;;  %v13743_v22 = vld [vmem:[%s15288_s18 + $0x5b4] sm:$0xf]  ;;  %v9704_v33 = vor.u32 %v13615_v20, %v9701_v21  ;;  %v4059_v45 = vpop.f32.mrf.mxu3  ;;  %v4022_v51 = vpop.f32.mrf.mxu0  ;;  %v13816_v21 = vld [vmem:[%s15288_s18 + $0x7f4] sm:$0xf0] }
 0x22e   : > { %4253 = vmatmul.bf16.vlgmr.msra.gmra.mxu2 %v15409_v16  ;;  %v10213_v25 = vld [vmem:[%s15288_s18 + $0x5f0] sm:$0xf0]  ;;  %v10859_v51 = vld [vmem:[%s15288_s18 + $0xab8] sm:$0xf] }
 0x22f   : > { %4297 = vmatpush.bf16.msrb.mxu2 %v10984_v44  ;;  %4272 = vmatpush.bf16.msrb.mxu0 %v9896_v54  ;;  %v13871_v28 = vld [vmem:[%s15288_s18 + $0x9b4] sm:$0xf]  ;;  %v10216_v34 = vor.u32 %v13743_v22, %v10213_v25  ;;  %v4047_v44 = vadd.f32 %v4046_v39, %v4034_v30  ;;  %v10987_v22 = vld [vmem:[%s15288_s18 + $0xbb8] sm:$0xf] }
 0x230   : > { %4266 = vmatmul.bf16.vlgmr.msra.gmra.mxu3 %v15411_v17  ;;  %v10725_v29 = vld [vmem:[%s15288_s18 + $0x9f0] sm:$0xf0]  ;;  %v10923_v39 = vld [vmem:[%s15288_s18 + $0xb38] sm:$0xf] }
 0x231   : > { %4310 = vmatpush.bf16.msrb.mxu3 %v11496_v48  ;;  %4285 = vmatpush.bf16.msrb.mxu1 %v10408_v55  ;;  %v13999_v31 = vld [vmem:[%s15288_s18 + $0xdb4] sm:$0xf]  ;;  %v10728_v35 = vor.u32 %v13871_v28, %v10725_v29  ;;  %v515_v48 = vld [vmem:[#allocation2 + $0x40] sm:$0xff]  ;;  %v4060_v50 = vadd.f32 %v4059_v45, %v4047_v44  ;;  %v4035_v57 = vpop.f32.mrf.mxu1  ;;  %v11499_v28 = vld [vmem:[%s15288_s18 + $0xfb8] sm:$0xf] }
 0x232   : > { %v11237_v32 = vld [vmem:[%s15288_s18 + $0xdf0] sm:$0xf0]  ;;  %v14072_v29 = vld [vmem:[%s15288_s18 + $0xff4] sm:$0xf0] }
 0x233   : > { %4298 = vmatpush.bf16.msrb.mxu2 %v10920_v56  ;;  %4273 = vmatpush.bf16.msrb.mxu0 %v9832_v2  ;;  %v13599_v36 = vld [vmem:[%s15288_s18 + $0x134] sm:$0xf]  ;;  %v11240_v40 = vor.u32 %v13999_v31, %v11237_v32  ;;  %v4435_v62 = vadd.f32 %v4060_v50, %v515_v48  ;;  %v4048_v9 = vpop.f32.mrf.mxu2  ;;  %v10347_v48 = vld [vmem:[%s15288_s18 + $0x6b8] sm:$0xf] }
 0x234   : > { %v9637_v37 = vld [vmem:[%s15288_s18 + $0x170] sm:$0xf0]  ;;  %v13784_v50 = vld [vmem:[%s15288_s18 + $0x6f4] sm:$0xf0] }
 0x235   : > { %4311 = vmatpush.bf16.msrb.mxu3 %v11432_v60  ;;  %4286 = vmatpush.bf16.msrb.mxu1 %v10344_v3  ;;  %v13727_v38 = vld [vmem:[%s15288_s18 + $0x534] sm:$0xf]  ;;  %v9640_v49 = vor.u32 %v13599_v36, %v9637_v37  ;;  %4451 = vst [vmem:[#allocation2 + $0x40] sm:$0xff] %v4435_v62  ;;  %v10411_v36 = vld [vmem:[%s15288_s18 + $0x738] sm:$0xf]  ;;  %v11500_v37 = vor.u32 %v14072_v29, %v11499_v28 }
 0x236   : > { %v10149_v41 = vld [vmem:[%s15288_s18 + $0x570] sm:$0xf0]  ;;  %v13768_v62 = vld [vmem:[%s15288_s18 + $0x674] sm:$0xf0] }
 0x237   : > { %4299 = vmatpush.bf16.msrb.mxu2 %v10856_v4  ;;  %4274 = vmatpush.bf16.msrb.mxu0 %v9768_v14  ;;  %v13855_v42 = vld [vmem:[%s15288_s18 + $0x934] sm:$0xf]  ;;  %v10152_v52 = vor.u32 %v13727_v38, %v10149_v41  ;;  %v4061_v14 = vpop.f32.mrf.mxu3  ;;  %v13800_v38 = vld [vmem:[%s15288_s18 + $0x774] sm:$0xf0] }
 0x238   : > { %v10661_v43 = vld [vmem:[%s15288_s18 + $0x970] sm:$0xf0]  ;;  %v11435_v41 = vld [vmem:[%s15288_s18 + $0xf38] sm:$0xf]  ;;  %v10412_v44 = vor.u32 %v13800_v38, %v10411_v36 }
 0x239   : > { %4312 = vmatpush.bf16.msrb.mxu3 %v11368_v8  ;;  %4287 = vmatpush.bf16.msrb.mxu1 %v10280_v18  ;;  %v13983_v46 = vld [vmem:[%s15288_s18 + $0xd34] sm:$0xf]  ;;  %v10664_v53 = vor.u32 %v13855_v42, %v10661_v43  ;;  %v13688_v18 = vld [vmem:[%s15288_s18 + $0x3f4] sm:$0xf0] }
 0x23a   : > { %v11173_v47 = vld [vmem:[%s15288_s18 + $0xd70] sm:$0xf0]  ;;  %v9964_v31 = vor.u32 %v13688_v18, %v9963_v15  ;;  %v14056_v42 = vld [vmem:[%s15288_s18 + $0xf74] sm:$0xf0] }
 0x23b   : > { %4300 = vmatpush.bf16.msrb.mxu2 %v10792_v19  ;;  %4275 = vmatpush.bf16.msrb.mxu0 %v9704_v33  ;;  %v13583_v54 = vld [vmem:[%s15288_s18 + $0xb4] sm:$0xf]  ;;  %v11176_v58 = vor.u32 %v13983_v46, %v11173_v47  ;;  %v10475_v19 = vld [vmem:[%s15288_s18 + $0x7b8] sm:$0xf]  ;;  %v10988_v33 = vor.u32 %v13944_v23, %v10987_v22 }
 0x23c   : > { %v9573_v55 = vld [vmem:[%s15288_s18 + $0xf0] sm:$0xf0]  ;;  %v10476_v32 = vor.u32 %v13816_v21, %v10475_v19  ;;  %v9835_v46 = vld [vmem:[%s15288_s18 + $0x2b8] sm:$0xf] }
 0x23d   : > { %4313 = vmatpush.bf16.msrb.mxu3 %v11304_v24  ;;  %4288 = vmatpush.bf16.msrb.mxu1 %v10216_v34  ;;  %v13711_v56 = vld [vmem:[%s15288_s18 + $0x4b4] sm:$0xf]  ;;  %v9576_v1 = vor.u32 %v13583_v54, %v9573_v55  ;;  %v9899_v34 = vld [vmem:[%s15288_s18 + $0x338] sm:$0xf] }
 0x23e   : > { %v10085_v59 = vld [vmem:[%s15288_s18 + $0x4f0] sm:$0xf0]  ;;  %v13656_v47 = vld [vmem:[%s15288_s18 + $0x2f4] sm:$0xf0] }
 0x23f   : > { %4301 = vmatpush.bf16.msrb.mxu2 %v10728_v35  ;;  %v13839_v60 = vld [vmem:[%s15288_s18 + $0x8b4] sm:$0xf]  ;;  %4276 = vmatpush.bf16.msrb.mxu0 %v9640_v49  ;;  %v10088_v4 = vor.u32 %v13711_v56, %v10085_v59  ;;  %v13672_v35 = vld [vmem:[%s15288_s18 + $0x374] sm:$0xf0]  ;;  %v11436_v49 = vor.u32 %v14056_v42, %v11435_v41  ;;  %v9836_v55 = vor.u32 %v13656_v47, %v9835_v46 }
 0x240   : > { %v10597_v61 = vld [vmem:[%s15288_s18 + $0x8f0] sm:$0xf0]  ;;  %v9900_v43 = vor.u32 %v13672_v35, %v9899_v34  ;;  %v14040_v54 = vld [vmem:[%s15288_s18 + $0xef4] sm:$0xf0]  ;;  %v10348_v56 = vor.u32 %v13784_v50, %v10347_v48 }
 0x241   : > { %4314 = vmatpush.bf16.msrb.mxu3 %v11240_v40  ;;  %v13967_v63 = vld [vmem:[%s15288_s18 + $0xcb4] sm:$0xf]  ;;  %4289 = vmatpush.bf16.msrb.mxu1 %v10152_v52  ;;  %v10600_v5 = vor.u32 %v13839_v60, %v10597_v61  ;;  %v13928_v40 = vld [vmem:[%s15288_s18 + $0xb74] sm:$0xf0] }
 0x242   : > { %v11109_v0 = vld [vmem:[%s15288_s18 + $0xcf0] sm:$0xf0]  ;;  %v10924_v45 = vor.u32 %v13928_v40, %v10923_v39  ;;  %v13912_v52 = vld [vmem:[%s15288_s18 + $0xaf4] sm:$0xf0] }
 0x243   : > { %v13567_v2 = vld [vmem:[%s15288_s18 + $0x34] sm:$0xf]  ;;  %4302 = vmatpush.bf16.msrb.mxu2 %v10664_v53  ;;  %v11112_v10 = vor.u32 %v13967_v63, %v11109_v0  ;;  %4277 = vmatpush.bf16.msrb.mxu0 %v9576_v1  ;;  %v11371_v53 = vld [vmem:[%s15288_s18 + $0xeb8] sm:$0xf]  ;;  %v10860_v57 = vor.u32 %v13912_v52, %v10859_v51 }
 0x244   : > { %v9509_v3 = vld [vmem:[%s15288_s18 + $0x70] sm:$0xf0]  ;;  %v13640_v59 = vld [vmem:[%s15288_s18 + $0x274] sm:$0xf0]  ;;  %v11372_v61 = vor.u32 %v14040_v54, %v11371_v53 }
 0x245   : > { %v13695_v6 = vld [vmem:[%s15288_s18 + $0x434] sm:$0xf]  ;;  %4315 = vmatpush.bf16.msrb.mxu3 %v11176_v58  ;;  %v9512_v20 = vor.u32 %v13567_v2, %v9509_v3  ;;  %4290 = vmatpush.bf16.msrb.mxu1 %v10088_v4  ;;  %v9771_v58 = vld [vmem:[%s15288_s18 + $0x238] sm:$0xf]  ;;  %v4072_v4 = vpop.f32.mrf.mxu0 }
 0x246   : > { %v10021_v7 = vld [vmem:[%s15288_s18 + $0x470] sm:$0xf0]  ;;  %v10283_v60 = vld [vmem:[%s15288_s18 + $0x638] sm:$0xf]  ;;  %v9772_v3 = vor.u32 %v13640_v59, %v9771_v58 }
 0x247   : > { %v13823_v8 = vld [vmem:[%s15288_s18 + $0x834] sm:$0xf]  ;;  %4303 = vmatpush.bf16.msrb.mxu2 %v10600_v5  ;;  %v10024_v24 = vor.u32 %v13695_v6, %v10021_v7  ;;  %4278 = vmatpush.bf16.msrb.mxu0 %v9512_v20  ;;  %v10795_v63 = vld [vmem:[%s15288_s18 + $0xa38] sm:$0xf]  ;;  %v10284_v5 = vor.u32 %v13768_v62, %v10283_v60 }
 0x248   : > { %v10533_v11 = vld [vmem:[%s15288_s18 + $0x870] sm:$0xf0]  ;;  %v13896_v0 = vld [vmem:[%s15288_s18 + $0xa74] sm:$0xf0] }
 0x249   : > { %v13951_v12 = vld [vmem:[%s15288_s18 + $0xc34] sm:$0xf]  ;;  %v10536_v25 = vor.u32 %v13823_v8, %v10533_v11  ;;  %4316 = vmatpush.bf16.msrb.mxu3 %v11112_v10  ;;  %4291 = vmatpush.bf16.msrb.mxu1 %v10024_v24  ;;  %v11307_v1 = vld [vmem:[%s15288_s18 + $0xe38] sm:$0xf]  ;;  %v10796_v6 = vor.u32 %v13896_v0, %v10795_v63  ;;  %v4085_v10 = vpop.f32.mrf.mxu1 }
 0x24a   : > { %v11045_v13 = vld [vmem:[%s15288_s18 + $0xc70] sm:$0xf0]  ;;  %4279 = vmatmul.bf16.vlgmr.msrb.gmra.mxu0 %v15416_v26  ;;  %v14024_v2 = vld [vmem:[%s15288_s18 + $0xe74] sm:$0xf0]  ;;  %v4086_v15 = vadd.f32 %v4085_v10, %v4072_v4  ;;  %v13680_v4 = vld [vmem:[%s15288_s18 + $0x3bc] sm:$0xf] }
 0x24b   : > { %v11048_v30 = vor.u32 %v13951_v12, %v11045_v13  ;;  %4304 = vmatpush.bf16.msrb.mxu2 %v10536_v25  ;;  %4323 = vmatpush.bf16.msra.mxu0 %v9964_v31  ;;  %v9707_v7 = vld [vmem:[%s15288_s18 + $0x1b8] sm:$0xf]  ;;  %v11308_v11 = vor.u32 %v14024_v2, %v11307_v1  ;;  %v10989_v10 = vld [vmem:[%s15288_s18 + $0xbf8] sm:$0xf0] }
 0x24c   : > { %4292 = vmatmul.bf16.vlgmr.msrb.gmra.mxu1 %v15418_v27  ;;  %v13624_v8 = vld [vmem:[%s15288_s18 + $0x1f4] sm:$0xf0]  ;;  %v4098_v28 = vpop.f32.mrf.mxu2 }
 0x24d   : > { %4317 = vmatpush.bf16.msrb.mxu3 %v11048_v30  ;;  %4336 = vmatpush.bf16.msra.mxu1 %v10476_v32  ;;  %v10219_v9 = vld [vmem:[%s15288_s18 + $0x5b8] sm:$0xf]  ;;  %v9708_v20 = vor.u32 %v13624_v8, %v9707_v7  ;;  %v4074_v40 = vpop.f32.mrf.mxu0  ;;  %v10477_v8 = vld [vmem:[%s15288_s18 + $0x7f8] sm:$0xf0] }
 0x24e   : > { %4305 = vmatmul.bf16.vlgmr.msrb.gmra.mxu2 %v15409_v16  ;;  %v13752_v12 = vld [vmem:[%s15288_s18 + $0x5f4] sm:$0xf0]  ;;  %v4111_v34 = vpop.f32.mrf.mxu3  ;;  %v13904_v40 = vld [vmem:[%s15288_s18 + $0xabc] sm:$0xf] }
 0x24f   : > { %4349 = vmatpush.bf16.msra.mxu2 %v10988_v33  ;;  %4324 = vmatpush.bf16.msra.mxu0 %v9900_v43  ;;  %v10731_v13 = vld [vmem:[%s15288_s18 + $0x9b8] sm:$0xf]  ;;  %v10220_v21 = vor.u32 %v13752_v12, %v10219_v9  ;;  %v4099_v33 = vadd.f32 %v4098_v28, %v4086_v15  ;;  %v13936_v9 = vld [vmem:[%s15288_s18 + $0xbbc] sm:$0xf] }
 0x250   : > { %4318 = vmatmul.bf16.vlgmr.msrb.gmra.mxu3 %v15411_v17  ;;  %v13880_v14 = vld [vmem:[%s15288_s18 + $0x9f4] sm:$0xf0]  ;;  %v13920_v28 = vld [vmem:[%s15288_s18 + $0xb3c] sm:$0xf] }
 0x251   : > { %4362 = vmatpush.bf16.msra.mxu3 %v11500_v37  ;;  %4337 = vmatpush.bf16.msra.mxu1 %v10412_v44  ;;  %v11243_v18 = vld [vmem:[%s15288_s18 + $0xdb8] sm:$0xf]  ;;  %v10732_v22 = vor.u32 %v13880_v14, %v10731_v13  ;;  %v516_v37 = vld [vmem:[#allocation2 + $0x20] sm:$0xff]  ;;  %v4112_v39 = vadd.f32 %v4111_v34, %v4099_v33  ;;  %v4087_v46 = vpop.f32.mrf.mxu1 }
 0x252   : > { %v14008_v19 = vld [vmem:[%s15288_s18 + $0xdf4] sm:$0xf0]  ;;  %v14064_v13 = vld [vmem:[%s15288_s18 + $0xfbc] sm:$0xf] }
 0x253   : > { %4350 = vmatpush.bf16.msra.mxu2 %v10924_v45  ;;  %4325 = vmatpush.bf16.msra.mxu0 %v9836_v55  ;;  %v9643_v23 = vld [vmem:[%s15288_s18 + $0x138] sm:$0xf]  ;;  %v11244_v29 = vor.u32 %v14008_v19, %v11243_v18  ;;  %v4436_v51 = vadd.f32 %v4112_v39, %v516_v37  ;;  %v11501_v14 = vld [vmem:[%s15288_s18 + $0xff8] sm:$0xf0] }
 0x254   : > { %v13608_v24 = vld [vmem:[%s15288_s18 + $0x174] sm:$0xf0]  ;;  %v4100_v62 = vpop.f32.mrf.mxu2  ;;  %v13776_v37 = vld [vmem:[%s15288_s18 + $0x6bc] sm:$0xf] }
 0x255   : > { %4363 = vmatpush.bf16.msra.mxu3 %v11436_v49  ;;  %4338 = vmatpush.bf16.msra.mxu1 %v10348_v56  ;;  %v10155_v25 = vld [vmem:[%s15288_s18 + $0x538] sm:$0xf]  ;;  %v9644_v38 = vor.u32 %v13608_v24, %v9643_v23  ;;  %4452 = vst [vmem:[#allocation2 + $0x20] sm:$0xff] %v4436_v51  ;;  %v13792_v23 = vld [vmem:[%s15288_s18 + $0x73c] sm:$0xf]  ;;  %v11504_v24 = vor.u32 %v14064_v13, %v11501_v14 }
 0x256   : > { %v13736_v30 = vld [vmem:[%s15288_s18 + $0x574] sm:$0xf0]  ;;  %v10349_v39 = vld [vmem:[%s15288_s18 + $0x6f8] sm:$0xf0] }
 0x257   : > { %4351 = vmatpush.bf16.msra.mxu2 %v10860_v57  ;;  %4326 = vmatpush.bf16.msra.mxu0 %v9772_v3  ;;  %v10667_v31 = vld [vmem:[%s15288_s18 + $0x938] sm:$0xf]  ;;  %v10156_v41 = vor.u32 %v13736_v30, %v10155_v25  ;;  %v4113_v3 = vpop.f32.mrf.mxu3  ;;  %v10413_v25 = vld [vmem:[%s15288_s18 + $0x778] sm:$0xf0] }
 0x258   : > { %v13864_v32 = vld [vmem:[%s15288_s18 + $0x974] sm:$0xf0]  ;;  %v14048_v30 = vld [vmem:[%s15288_s18 + $0xf3c] sm:$0xf]  ;;  %v10416_v33 = vor.u32 %v13792_v23, %v10413_v25 }
 0x259   : > { %4364 = vmatpush.bf16.msra.mxu3 %v11372_v61  ;;  %4339 = vmatpush.bf16.msra.mxu1 %v10284_v5  ;;  %v11179_v35 = vld [vmem:[%s15288_s18 + $0xd38] sm:$0xf]  ;;  %v10668_v42 = vor.u32 %v13864_v32, %v10667_v31  ;;  %v9965_v5 = vld [vmem:[%s15288_s18 + $0x3f8] sm:$0xf0] }
 0x25a   : > { %v13992_v36 = vld [vmem:[%s15288_s18 + $0xd74] sm:$0xf0]  ;;  %v9968_v18 = vor.u32 %v13680_v4, %v9965_v5  ;;  %v11437_v31 = vld [vmem:[%s15288_s18 + $0xf78] sm:$0xf0] }
 0x25b   : > { %4352 = vmatpush.bf16.msra.mxu2 %v10796_v6  ;;  %4327 = vmatpush.bf16.msra.mxu0 %v9708_v20  ;;  %v9579_v43 = vld [vmem:[%s15288_s18 + $0xb8] sm:$0xf]  ;;  %v11180_v47 = vor.u32 %v13992_v36, %v11179_v35  ;;  %v13808_v6 = vld [vmem:[%s15288_s18 + $0x7bc] sm:$0xf]  ;;  %v10992_v20 = vor.u32 %v13936_v9, %v10989_v10 }
 0x25c   : > { %v13592_v44 = vld [vmem:[%s15288_s18 + $0xf4] sm:$0xf0]  ;;  %v10480_v19 = vor.u32 %v13808_v6, %v10477_v8  ;;  %v13648_v35 = vld [vmem:[%s15288_s18 + $0x2bc] sm:$0xf] }
 0x25d   : > { %4365 = vmatpush.bf16.msra.mxu3 %v11308_v11  ;;  %4340 = vmatpush.bf16.msra.mxu1 %v10220_v21  ;;  %v10091_v45 = vld [vmem:[%s15288_s18 + $0x4b8] sm:$0xf]  ;;  %v9580_v54 = vor.u32 %v13592_v44, %v9579_v43  ;;  %v13664_v21 = vld [vmem:[%s15288_s18 + $0x33c] sm:$0xf] }
 0x25e   : > { %v13720_v48 = vld [vmem:[%s15288_s18 + $0x4f4] sm:$0xf0]  ;;  %v9837_v36 = vld [vmem:[%s15288_s18 + $0x2f8] sm:$0xf0] }
 0x25f   : > { %4353 = vmatpush.bf16.msra.mxu2 %v10732_v22  ;;  %v10603_v49 = vld [vmem:[%s15288_s18 + $0x8b8] sm:$0xf]  ;;  %4328 = vmatpush.bf16.msra.mxu0 %v9644_v38  ;;  %v10092_v57 = vor.u32 %v13720_v48, %v10091_v45  ;;  %v9901_v22 = vld [vmem:[%s15288_s18 + $0x378] sm:$0xf0]  ;;  %v11440_v38 = vor.u32 %v14048_v30, %v11437_v31  ;;  %v9840_v44 = vor.u32 %v13648_v35, %v9837_v36 }
 0x260   : > { %v13848_v50 = vld [vmem:[%s15288_s18 + $0x8f4] sm:$0xf0]  ;;  %v9904_v32 = vor.u32 %v13664_v21, %v9901_v22  ;;  %v11373_v43 = vld [vmem:[%s15288_s18 + $0xef8] sm:$0xf0]  ;;  %v10352_v45 = vor.u32 %v13776_v37, %v10349_v39 }
 0x261   : > { %4366 = vmatpush.bf16.msra.mxu3 %v11244_v29  ;;  %v11115_v52 = vld [vmem:[%s15288_s18 + $0xcb8] sm:$0xf]  ;;  %4341 = vmatpush.bf16.msra.mxu1 %v10156_v41  ;;  %v10604_v58 = vor.u32 %v13848_v50, %v10603_v49  ;;  %v10925_v29 = vld [vmem:[%s15288_s18 + $0xb78] sm:$0xf0] }
 0x262   : > { %v13976_v53 = vld [vmem:[%s15288_s18 + $0xcf4] sm:$0xf0]  ;;  %v10928_v34 = vor.u32 %v13920_v28, %v10925_v29  ;;  %v10861_v41 = vld [vmem:[%s15288_s18 + $0xaf8] sm:$0xf0] }
 0x263   : > { %v9515_v55 = vld [vmem:[%s15288_s18 + $0x38] sm:$0xf]  ;;  %4354 = vmatpush.bf16.msra.mxu2 %v10668_v42  ;;  %v11116_v63 = vor.u32 %v13976_v53, %v11115_v52  ;;  %4329 = vmatpush.bf16.msra.mxu0 %v9580_v54  ;;  %v14032_v42 = vld [vmem:[%s15288_s18 + $0xebc] sm:$0xf]  ;;  %v10864_v46 = vor.u32 %v13904_v40, %v10861_v41 }
 0x264   : > { %v13576_v56 = vld [vmem:[%s15288_s18 + $0x74] sm:$0xf0]  ;;  %v9773_v48 = vld [vmem:[%s15288_s18 + $0x278] sm:$0xf0]  ;;  %v11376_v50 = vor.u32 %v14032_v42, %v11373_v43 }
 0x265   : > { %v10027_v59 = vld [vmem:[%s15288_s18 + $0x438] sm:$0xf]  ;;  %4367 = vmatpush.bf16.msra.mxu3 %v11180_v47  ;;  %v9516_v7 = vor.u32 %v13576_v56, %v9515_v55  ;;  %4342 = vmatpush.bf16.msra.mxu1 %v10092_v57  ;;  %v13632_v47 = vld [vmem:[%s15288_s18 + $0x23c] sm:$0xf]  ;;  %v4124_v57 = vpop.f32.mrf.mxu0 }
 0x266   : > { %v13704_v60 = vld [vmem:[%s15288_s18 + $0x474] sm:$0xf0]  ;;  %v13760_v49 = vld [vmem:[%s15288_s18 + $0x63c] sm:$0xf]  ;;  %v9776_v56 = vor.u32 %v13632_v47, %v9773_v48 }
 0x267   : > { %v10539_v61 = vld [vmem:[%s15288_s18 + $0x838] sm:$0xf]  ;;  %4355 = vmatpush.bf16.msra.mxu2 %v10604_v58  ;;  %v10028_v11 = vor.u32 %v13704_v60, %v10027_v59  ;;  %4330 = vmatpush.bf16.msra.mxu0 %v9516_v7  ;;  %v10285_v51 = vld [vmem:[%s15288_s18 + $0x678] sm:$0xf0] }
 0x268   : > { %v13832_v0 = vld [vmem:[%s15288_s18 + $0x874] sm:$0xf0]  ;;  %v13888_v52 = vld [vmem:[%s15288_s18 + $0xa3c] sm:$0xf]  ;;  %v10288_v58 = vor.u32 %v13760_v49, %v10285_v51 }
 0x269   : > { %v11051_v1 = vld [vmem:[%s15288_s18 + $0xc38] sm:$0xf]  ;;  %v10540_v12 = vor.u32 %v13832_v0, %v10539_v61  ;;  %4368 = vmatpush.bf16.msra.mxu3 %v11116_v63  ;;  %4343 = vmatpush.bf16.msra.mxu1 %v10028_v11  ;;  %v10797_v53 = vld [vmem:[%s15288_s18 + $0xa78] sm:$0xf0]  ;;  %v4137_v63 = vpop.f32.mrf.mxu1 }
 0x26a   : > { %v13960_v2 = vld [vmem:[%s15288_s18 + $0xc74] sm:$0xf0]  ;;  %4331 = vmatmul.bf16.vlgmr.msra.gmra.mxu0 %v15416_v26  ;;  %v14016_v54 = vld [vmem:[%s15288_s18 + $0xe3c] sm:$0xf]  ;;  %v10800_v59 = vor.u32 %v13888_v52, %v10797_v53  ;;  %v4138_v4 = vadd.f32 %v4137_v63, %v4124_v57 }
 0x26b   : > { %v11052_v15 = vor.u32 %v13960_v2, %v11051_v1  ;;  %4356 = vmatpush.bf16.msra.mxu2 %v10540_v12  ;;  %4375 = vmatpush.bf16.msrb.mxu0 %v9968_v18  ;;  %v11309_v55 = vld [vmem:[%s15288_s18 + $0xe78] sm:$0xf0] }
 0x26c   : > { %4344 = vmatmul.bf16.vlgmr.msra.gmra.mxu1 %v15418_v27  ;;  %v13616_v60 = vld [vmem:[%s15288_s18 + $0x1bc] sm:$0xf]  ;;  %v11312_v0 = vor.u32 %v14016_v54, %v11309_v55 }
 0x26d   : > { %4369 = vmatpush.bf16.msra.mxu3 %v11052_v15  ;;  %4388 = vmatpush.bf16.msrb.mxu1 %v10480_v19  ;;  %v9709_v61 = vld [vmem:[%s15288_s18 + $0x1f8] sm:$0xf0]  ;;  %v4150_v13 = vpop.f32.mrf.mxu2  ;;  %v4126_v29 = vpop.f32.mrf.mxu0 }
 0x26e   : > { %4357 = vmatmul.bf16.vlgmr.msra.gmra.mxu2 %v15409_v16  ;;  %v13744_v62 = vld [vmem:[%s15288_s18 + $0x5bc] sm:$0xf]  ;;  %v9712_v7 = vor.u32 %v13616_v60, %v9709_v61  ;;  %v520_v29 = vld [vmem:[#allocation2 + $0x70] sm:$0xff] }
 0x26f   : > { %4401 = vmatpush.bf16.msrb.mxu2 %v10992_v20  ;;  %4376 = vmatpush.bf16.msrb.mxu0 %v9904_v32  ;;  %v10221_v1 = vld [vmem:[%s15288_s18 + $0x5f8] sm:$0xf0]  ;;  %v4151_v20 = vadd.f32 %v4150_v13, %v4138_v4  ;;  %v4163_v21 = vpop.f32.mrf.mxu3 }
 0x270   : > { %4370 = vmatmul.bf16.vlgmr.msra.gmra.mxu3 %v15411_v17  ;;  %v13872_v2 = vld [vmem:[%s15288_s18 + $0x9bc] sm:$0xf]  ;;  %v10224_v8 = vor.u32 %v13744_v62, %v10221_v1 }
 0x271   : > { %4414 = vmatpush.bf16.msrb.mxu3 %v11504_v24  ;;  %4389 = vmatpush.bf16.msrb.mxu1 %v10416_v33  ;;  %v10733_v3 = vld [vmem:[%s15288_s18 + $0x9f8] sm:$0xf0]  ;;  %v517_v24 = vld [vmem:[#allocation2 + $0x10] sm:$0xff]  ;;  %v4164_v28 = vadd.f32 %v4163_v21, %v4151_v20  ;;  %v4139_v35 = vpop.f32.mrf.mxu1 }
 0x272   : > { %v14000_v5 = vld [vmem:[%s15288_s18 + $0xdbc] sm:$0xf]  ;;  %v10736_v9 = vor.u32 %v13872_v2, %v10733_v3 }
 0x273   : > { %4402 = vmatpush.bf16.msrb.mxu2 %v10928_v34  ;;  %4377 = vmatpush.bf16.msrb.mxu0 %v9840_v44  ;;  %v11245_v6 = vld [vmem:[%s15288_s18 + $0xdf8] sm:$0xf0]  ;;  %v4437_v40 = vadd.f32 %v4164_v28, %v517_v24 }
 0x274   : > { %v13600_v10 = vld [vmem:[%s15288_s18 + $0x13c] sm:$0xf]  ;;  %v11248_v14 = vor.u32 %v14000_v5, %v11245_v6 }
 0x275   : > { %4415 = vmatpush.bf16.msrb.mxu3 %v11440_v38  ;;  %4390 = vmatpush.bf16.msrb.mxu1 %v10352_v45  ;;  %v9645_v11 = vld [vmem:[%s15288_s18 + $0x178] sm:$0xf0]  ;;  %4453 = vst [vmem:[#allocation2 + $0x10] sm:$0xff] %v4437_v40  ;;  %v4152_v49 = vpop.f32.mrf.mxu2 }
 0x276   : > { %v13728_v12 = vld [vmem:[%s15288_s18 + $0x53c] sm:$0xf]  ;;  %v9648_v25 = vor.u32 %v13600_v10, %v9645_v11 }
 0x277   : > { %4403 = vmatpush.bf16.msrb.mxu2 %v10864_v46  ;;  %4378 = vmatpush.bf16.msrb.mxu0 %v9776_v56  ;;  %v10157_v15 = vld [vmem:[%s15288_s18 + $0x578] sm:$0xf0]  ;;  %v4165_v54 = vpop.f32.mrf.mxu3 }
 0x278   : > { %v13856_v18 = vld [vmem:[%s15288_s18 + $0x93c] sm:$0xf]  ;;  %v10160_v30 = vor.u32 %v13728_v12, %v10157_v15 }
 0x279   : > { %4416 = vmatpush.bf16.msrb.mxu3 %v11376_v50  ;;  %4391 = vmatpush.bf16.msrb.mxu1 %v10288_v58  ;;  %v10669_v19 = vld [vmem:[%s15288_s18 + $0x978] sm:$0xf0] }
 0x27a   : > { %v13984_v22 = vld [vmem:[%s15288_s18 + $0xd3c] sm:$0xf]  ;;  %v10672_v31 = vor.u32 %v13856_v18, %v10669_v19 }
 0x27b   : > { %4404 = vmatpush.bf16.msrb.mxu2 %v10800_v59  ;;  %v11181_v23 = vld [vmem:[%s15288_s18 + $0xd78] sm:$0xf0]  ;;  %4379 = vmatpush.bf16.msrb.mxu0 %v9712_v7 }
 0x27c   : > { %v13584_v32 = vld [vmem:[%s15288_s18 + $0xbc] sm:$0xf]  ;;  %v11184_v36 = vor.u32 %v13984_v22, %v11181_v23 }
 0x27d   : > { %4417 = vmatpush.bf16.msrb.mxu3 %v11312_v0  ;;  %4392 = vmatpush.bf16.msrb.mxu1 %v10224_v8  ;;  %v9581_v33 = vld [vmem:[%s15288_s18 + $0xf8] sm:$0xf0] }
 0x27e   : > { %v13712_v34 = vld [vmem:[%s15288_s18 + $0x4bc] sm:$0xf]  ;;  %v9584_v43 = vor.u32 %v13584_v32, %v9581_v33 }
 0x27f   : > { %4405 = vmatpush.bf16.msrb.mxu2 %v10736_v9  ;;  %v10093_v37 = vld [vmem:[%s15288_s18 + $0x4f8] sm:$0xf0]  ;;  %4380 = vmatpush.bf16.msrb.mxu0 %v9648_v25 }
 0x280   : > { %v13840_v38 = vld [vmem:[%s15288_s18 + $0x8bc] sm:$0xf]  ;;  %v10096_v44 = vor.u32 %v13712_v34, %v10093_v37 }
 0x281   : > { %4418 = vmatpush.bf16.msrb.mxu3 %v11248_v14  ;;  %v10605_v39 = vld [vmem:[%s15288_s18 + $0x8f8] sm:$0xf0]  ;;  %4393 = vmatpush.bf16.msrb.mxu1 %v10160_v30 }
 0x282   : > { %v13968_v41 = vld [vmem:[%s15288_s18 + $0xcbc] sm:$0xf]  ;;  %v10608_v45 = vor.u32 %v13840_v38, %v10605_v39 }
 0x283   : > { %v11117_v42 = vld [vmem:[%s15288_s18 + $0xcf8] sm:$0xf0]  ;;  %4406 = vmatpush.bf16.msrb.mxu2 %v10672_v31  ;;  %4381 = vmatpush.bf16.msrb.mxu0 %v9584_v43 }
 0x284   : > { %v13568_v46 = vld [vmem:[%s15288_s18 + $0x3c] sm:$0xf]  ;;  %v11120_v50 = vor.u32 %v13968_v41, %v11117_v42 }
 0x285   : > { %v9517_v47 = vld [vmem:[%s15288_s18 + $0x78] sm:$0xf0]  ;;  %4419 = vmatpush.bf16.msrb.mxu3 %v11184_v36  ;;  %4394 = vmatpush.bf16.msrb.mxu1 %v10096_v44 }
 0x286   : > { %v13696_v48 = vld [vmem:[%s15288_s18 + $0x43c] sm:$0xf]  ;;  %v9520_v57 = vor.u32 %v13568_v46, %v9517_v47 }
 0x287   : > { %v10029_v51 = vld [vmem:[%s15288_s18 + $0x478] sm:$0xf0]  ;;  %4407 = vmatpush.bf16.msrb.mxu2 %v10608_v45  ;;  %v4176_v61 = vpop.f32.mrf.mxu0 }
 0x288   : > { %v13824_v52 = vld [vmem:[%s15288_s18 + $0x83c] sm:$0xf]  ;;  %v10032_v58 = vor.u32 %v13696_v48, %v10029_v51  ;;  %4382 = vmatpush.bf16.msrb.mxu0 %v9520_v57 }
 0x289   : > { %v10541_v53 = vld [vmem:[%s15288_s18 + $0x878] sm:$0xf0]  ;;  %4420 = vmatpush.bf16.msrb.mxu3 %v11120_v50  ;;  %v4189_v62 = vpop.f32.mrf.mxu1 }
 0x28a   : > { %v13952_v55 = vld [vmem:[%s15288_s18 + $0xc3c] sm:$0xf]  ;;  %v10544_v59 = vor.u32 %v13824_v52, %v10541_v53  ;;  %4395 = vmatpush.bf16.msrb.mxu1 %v10032_v58  ;;  %v4190_v63 = vadd.f32 %v4189_v62, %v4176_v61 }
 0x28b   : > { %v11053_v56 = vld [vmem:[%s15288_s18 + $0xc78] sm:$0xf0]  ;;  %4383 = vmatmul.bf16.vlgmr.msrb.gmra.mxu0 %v15416_v26 }
 0x28c   : > { %v11056_v60 = vor.u32 %v13952_v55, %v11053_v56  ;;  %4408 = vmatpush.bf16.msrb.mxu2 %v10544_v59  ;;  %v518_v3 = vld [vmem:[#allocation2 + $0x38] sm:$0xff]  ;;  %v519_v12 = vld [vmem:[#allocation2 + $0x60] sm:$0xff]  ;;  %v522_v56 = vld [vmem:[#allocation2 + $0x28] sm:$0xff] }
 0x28d   : > { %4396 = vmatmul.bf16.vlgmr.msrb.gmra.mxu1 %v15418_v27  ;;  %v521_v42 = vld [vmem:[#allocation2 + $0x78] sm:$0xff] }
 0x28e   : > { %4421 = vmatpush.bf16.msrb.mxu3 %v11056_v60 }
 0x28f   : > { %4409 = vmatmul.bf16.vlgmr.msrb.gmra.mxu2 %v15409_v16  ;;  %v4178_v5 = vpop.f32.mrf.mxu0 }
 0x291   : > { %4422 = vmatmul.bf16.vlgmr.msrb.gmra.mxu3 %v15411_v17  ;;  %v4202_v0 = vpop.f32.mrf.mxu2  ;;  %v4191_v6 = vpop.f32.mrf.mxu1 }
 0x292   : > { %v4203_v1 = vadd.f32 %v4202_v0, %v4190_v63 }
 0x293   : > { %v4215_v2 = vpop.f32.mrf.mxu3 }
 0x294   : > { %v4216_v4 = vadd.f32 %v4215_v2, %v4203_v1 }
 0x296   : > { %v4438_v7 = vadd.f32 %v4216_v4, %v518_v3 }
 0x298   : > { %4454 = vst [vmem:[#allocation2 + $0x38] sm:$0xff] %v4438_v7 }
 0x299   : > { %v4204_v8 = vpop.f32.mrf.mxu2 }
 0x29b   : > { %v4217_v26 = vpop.f32.mrf.mxu3 }
 0x2a7   : > { %v4228_v9 = vpop.f32.mrf.mxu0 }
 0x2a9   : > { %v4241_v27 = vpop.f32.mrf.mxu1 }
 0x2aa   : > { %v4242_v10 = vadd.f32 %v4241_v27, %v4228_v9 }
 0x2af   : > { %v4230_v14 = vpop.f32.mrf.mxu0 }
 0x2b1   : > { %v4254_v16 = vpop.f32.mrf.mxu2  ;;  %v4243_v15 = vpop.f32.mrf.mxu1 }
 0x2b2   : > { %v4255_v11 = vadd.f32 %v4254_v16, %v4242_v10 }
 0x2b3   : > { %v4267_v17 = vpop.f32.mrf.mxu3 }
 0x2b4   : > { %v4268_v13 = vadd.f32 %v4267_v17, %v4255_v11 }
 0x2b6   : > { %v4439_v18 = vadd.f32 %v4268_v13, %v519_v12 }
 0x2b8   : > { %4455 = vst [vmem:[#allocation2 + $0x60] sm:$0xff] %v4439_v18 }
 0x2b9   : > { %v4256_v19 = vpop.f32.mrf.mxu2 }
 0x2bb   : > { %v4269_v20 = vpop.f32.mrf.mxu3 }
 0x2c7   : > { %v4280_v21 = vpop.f32.mrf.mxu0 }
 0x2c9   : > { %v4293_v22 = vpop.f32.mrf.mxu1 }
 0x2ca   : > { %v4294_v23 = vadd.f32 %v4293_v22, %v4280_v21 }
 0x2cf   : > { %v4282_v31 = vpop.f32.mrf.mxu0 }
 0x2d1   : > { %v4306_v24 = vpop.f32.mrf.mxu2  ;;  %v4295_v32 = vpop.f32.mrf.mxu1 }
 0x2d2   : > { %v4307_v25 = vadd.f32 %v4306_v24, %v4294_v23 }
 0x2d3   : > { %v4319_v28 = vpop.f32.mrf.mxu3 }
 0x2d4   : > { %v4320_v30 = vadd.f32 %v4319_v28, %v4307_v25 }
 0x2d6   : > { %v4440_v33 = vadd.f32 %v4320_v30, %v520_v29 }
 0x2d8   : > { %4456 = vst [vmem:[#allocation2 + $0x70] sm:$0xff] %v4440_v33 }
 0x2d9   : > { %v4308_v34 = vpop.f32.mrf.mxu2 }
 0x2db   : > { %v4321_v35 = vpop.f32.mrf.mxu3 }
 0x2e7   : > { %v4332_v36 = vpop.f32.mrf.mxu0 }
 0x2e9   : > { %v4345_v37 = vpop.f32.mrf.mxu1 }
 0x2ea   : > { %v4346_v38 = vadd.f32 %v4345_v37, %v4332_v36 }
 0x2ef   : > { %v4334_v44 = vpop.f32.mrf.mxu0 }
 0x2f1   : > { %v4358_v39 = vpop.f32.mrf.mxu2  ;;  %v4347_v45 = vpop.f32.mrf.mxu1 }
 0x2f2   : > { %v4359_v40 = vadd.f32 %v4358_v39, %v4346_v38 }
 0x2f3   : > { %v4371_v41 = vpop.f32.mrf.mxu3 }
 0x2f4   : > { %v4372_v43 = vadd.f32 %v4371_v41, %v4359_v40 }
 0x2f6   : > { %v4441_v46 = vadd.f32 %v4372_v43, %v521_v42 }
 0x2f8   : > { %4457 = vst [vmem:[#allocation2 + $0x78] sm:$0xff] %v4441_v46 }
 0x2f9   : > { %v4360_v47 = vpop.f32.mrf.mxu2 }
 0x2fb   : > { %v4373_v48 = vpop.f32.mrf.mxu3 }
 0x308   : > { %v4384_v49 = vpop.f32.mrf.mxu0 }
 0x30a   : > { %v4397_v50 = vpop.f32.mrf.mxu1 }
 0x30b   : > { %v4398_v51 = vadd.f32 %v4397_v50, %v4384_v49 }
 0x310   : > { %v4386_v55 = vpop.f32.mrf.mxu0 }
 0x312   : > { %v4410_v52 = vpop.f32.mrf.mxu2  ;;  %v4399_v57 = vpop.f32.mrf.mxu1 }
 0x313   : > { %v4411_v53 = vadd.f32 %v4410_v52, %v4398_v51 }
 0x314   : > { %v4423_v54 = vpop.f32.mrf.mxu3 }
 0x315   : > { %v4424_v58 = vadd.f32 %v4423_v54, %v4411_v53 }
 0x317   : > { %v4442_v59 = vadd.f32 %v4424_v58, %v522_v56 }
 0x318   : > { %4462 = sbr.rel (%p11505_p1) target bundleno = 1746 (0x6d2), region = 96 }
 0x319   : > { %4458 = vst [vmem:[#allocation2 + $0x28] sm:$0xff] %v4442_v59 }
 0x31a   : > { %v4412_v60 = vpop.f32.mrf.mxu2 }
 0x31c   : > { %v4425_v61 = vpop.f32.mrf.mxu3 }
 0x31d   : > { %v11620_v62 = vld [vmem:[#allocation12 + $0xe0] sm:$0xf]  ;;  %v14103_v63 = vld [vmem:[#allocation12 + $0xec] sm:$0xf0] }
 0x31e   : > { %v11748_v0 = vld [vmem:[#allocation12 + $0x1e0] sm:$0xf]  ;;  %v11621_v1 = vor.u32 %v14103_v63, %v11620_v62  ;;  %v14135_v2 = vld [vmem:[#allocation12 + $0x1ec] sm:$0xf0] }
 0x31f   : > { %v11876_v3 = vld [vmem:[#allocation12 + $0x2e0] sm:$0xf]  ;;  %v14167_v4 = vld [vmem:[#allocation12 + $0x2ec] sm:$0xf0]  ;;  %v11749_v5 = vor.u32 %v14135_v2, %v11748_v0 }
 0x320   : > { %v11877_v6 = vor.u32 %v14167_v4, %v11876_v3  ;;  %v12004_v7 = vld [vmem:[#allocation12 + $0x3e0] sm:$0xf]  ;;  %v14199_v8 = vld [vmem:[#allocation12 + $0x3ec] sm:$0xf0]  ;;  %8261 = vmatpush.bf16.msra.mxu0 %v11621_v1 }
 0x321   : > { %v11604_v26 = vld [vmem:[#allocation12 + $0xc0] sm:$0xf]  ;;  %v12005_v9 = vor.u32 %v14199_v8, %v12004_v7  ;;  %v14099_v27 = vld [vmem:[#allocation12 + $0xcc] sm:$0xf0]  ;;  %8274 = vmatpush.bf16.msra.mxu1 %v11749_v5 }
 0x322   : > { %v11732_v10 = vld [vmem:[#allocation12 + $0x1c0] sm:$0xf]  ;;  %v14131_v16 = vld [vmem:[#allocation12 + $0x1cc] sm:$0xf0]  ;;  %8287 = vmatpush.bf16.msra.mxu2 %v11877_v6  ;;  %v11605_v11 = vor.u32 %v14099_v27, %v11604_v26 }
 0x323   : > { %v11733_v17 = vor.u32 %v14131_v16, %v11732_v10  ;;  %v11860_v12 = vld [vmem:[#allocation12 + $0x2c0] sm:$0xf]  ;;  %v14163_v13 = vld [vmem:[#allocation12 + $0x2cc] sm:$0xf0]  ;;  %8300 = vmatpush.bf16.msra.mxu3 %v12005_v9 }
 0x324   : > { %v11988_v14 = vld [vmem:[#allocation12 + $0x3c0] sm:$0xf]  ;;  %v11861_v15 = vor.u32 %v14163_v13, %v11860_v12  ;;  %v14195_v18 = vld [vmem:[#allocation12 + $0x3cc] sm:$0xf0]  ;;  %8262 = vmatpush.bf16.msra.mxu0 %v11605_v11 }
 0x325   : > { %v11588_v19 = vld [vmem:[#allocation12 + $0xa0] sm:$0xf]  ;;  %v14095_v20 = vld [vmem:[#allocation12 + $0xac] sm:$0xf0]  ;;  %v11989_v21 = vor.u32 %v14195_v18, %v11988_v14  ;;  %8275 = vmatpush.bf16.msra.mxu1 %v11733_v17 }
 0x326   : > { %v11716_v22 = vld [vmem:[#allocation12 + $0x1a0] sm:$0xf]  ;;  %v14127_v23 = vld [vmem:[#allocation12 + $0x1ac] sm:$0xf0]  ;;  %v11589_v25 = vor.u32 %v14095_v20, %v11588_v19  ;;  %8288 = vmatpush.bf16.msra.mxu2 %v11861_v15 }
 0x327   : > { %v11844_v24 = vld [vmem:[#allocation12 + $0x2a0] sm:$0xf]  ;;  %v14159_v28 = vld [vmem:[#allocation12 + $0x2ac] sm:$0xf0]  ;;  %v11717_v31 = vor.u32 %v14127_v23, %v11716_v22  ;;  %8301 = vmatpush.bf16.msra.mxu3 %v11989_v21 }
 0x328   : > { %v11972_v29 = vld [vmem:[#allocation12 + $0x3a0] sm:$0xf]  ;;  %v14191_v30 = vld [vmem:[#allocation12 + $0x3ac] sm:$0xf0]  ;;  %v11845_v32 = vor.u32 %v14159_v28, %v11844_v24  ;;  %8263 = vmatpush.bf16.msra.mxu0 %v11589_v25 }
 0x329   : > { %v11572_v33 = vld [vmem:[#allocation12 + $0x80] sm:$0xf]  ;;  %v14091_v34 = vld [vmem:[#allocation12 + $0x8c] sm:$0xf0]  ;;  %v11973_v36 = vor.u32 %v14191_v30, %v11972_v29  ;;  %8276 = vmatpush.bf16.msra.mxu1 %v11717_v31 }
 0x32a   : > { %v11700_v35 = vld [vmem:[#allocation12 + $0x180] sm:$0xf]  ;;  %v14123_v37 = vld [vmem:[#allocation12 + $0x18c] sm:$0xf0]  ;;  %v11573_v42 = vor.u32 %v14091_v34, %v11572_v33  ;;  %8289 = vmatpush.bf16.msra.mxu2 %v11845_v32 }
 0x32b   : > { %v11828_v38 = vld [vmem:[#allocation12 + $0x280] sm:$0xf]  ;;  %v14155_v39 = vld [vmem:[#allocation12 + $0x28c] sm:$0xf0]  ;;  %v11701_v43 = vor.u32 %v14123_v37, %v11700_v35  ;;  %8302 = vmatpush.bf16.msra.mxu3 %v11973_v36 }
 0x32c   : > { %v11956_v40 = vld [vmem:[#allocation12 + $0x380] sm:$0xf]  ;;  %v14187_v41 = vld [vmem:[#allocation12 + $0x38c] sm:$0xf0]  ;;  %v11829_v44 = vor.u32 %v14155_v39, %v11828_v38  ;;  %8264 = vmatpush.bf16.msra.mxu0 %v11573_v42 }
 0x32d   : > { %v11556_v45 = vld [vmem:[#allocation12 + $0x60] sm:$0xf]  ;;  %v14087_v46 = vld [vmem:[#allocation12 + $0x6c] sm:$0xf0]  ;;  %v11957_v48 = vor.u32 %v14187_v41, %v11956_v40  ;;  %8277 = vmatpush.bf16.msra.mxu1 %v11701_v43 }
 0x32e   : > { %v11684_v47 = vld [vmem:[#allocation12 + $0x160] sm:$0xf]  ;;  %v14119_v49 = vld [vmem:[#allocation12 + $0x16c] sm:$0xf0]  ;;  %v11557_v54 = vor.u32 %v14087_v46, %v11556_v45  ;;  %8290 = vmatpush.bf16.msra.mxu2 %v11829_v44 }
 0x32f   : > { %v11812_v50 = vld [vmem:[#allocation12 + $0x260] sm:$0xf]  ;;  %v14151_v51 = vld [vmem:[#allocation12 + $0x26c] sm:$0xf0]  ;;  %v11685_v55 = vor.u32 %v14119_v49, %v11684_v47  ;;  %8303 = vmatpush.bf16.msra.mxu3 %v11957_v48 }
 0x330   : > { %v11940_v52 = vld [vmem:[#allocation12 + $0x360] sm:$0xf]  ;;  %v14183_v53 = vld [vmem:[#allocation12 + $0x36c] sm:$0xf0]  ;;  %v11813_v56 = vor.u32 %v14151_v51, %v11812_v50  ;;  %8265 = vmatpush.bf16.msra.mxu0 %v11557_v54 }
 0x331   : > { %v11540_v57 = vld [vmem:[#allocation12 + $0x40] sm:$0xf]  ;;  %v14083_v58 = vld [vmem:[#allocation12 + $0x4c] sm:$0xf0]  ;;  %v11941_v60 = vor.u32 %v14183_v53, %v11940_v52  ;;  %8278 = vmatpush.bf16.msra.mxu1 %v11685_v55 }
 0x332   : > { %v11668_v59 = vld [vmem:[#allocation12 + $0x140] sm:$0xf]  ;;  %v14115_v61 = vld [vmem:[#allocation12 + $0x14c] sm:$0xf0]  ;;  %v11541_v2 = vor.u32 %v14083_v58, %v11540_v57  ;;  %8291 = vmatpush.bf16.msra.mxu2 %v11813_v56 }
 0x333   : > { %v11796_v62 = vld [vmem:[#allocation12 + $0x240] sm:$0xf]  ;;  %v14147_v63 = vld [vmem:[#allocation12 + $0x24c] sm:$0xf0]  ;;  %v11669_v3 = vor.u32 %v14115_v61, %v11668_v59  ;;  %8304 = vmatpush.bf16.msra.mxu3 %v11941_v60 }
 0x334   : > { %v11924_v0 = vld [vmem:[#allocation12 + $0x340] sm:$0xf]  ;;  %v14179_v1 = vld [vmem:[#allocation12 + $0x34c] sm:$0xf0]  ;;  %v11797_v4 = vor.u32 %v14147_v63, %v11796_v62  ;;  %8266 = vmatpush.bf16.msra.mxu0 %v11541_v2 }
 0x335   : > { %v11524_v5 = vld [vmem:[#allocation12 + $0x20] sm:$0xf]  ;;  %v14079_v6 = vld [vmem:[#allocation12 + $0x2c] sm:$0xf0]  ;;  %v11925_v8 = vor.u32 %v14179_v1, %v11924_v0  ;;  %8279 = vmatpush.bf16.msra.mxu1 %v11669_v3 }
 0x336   : > { %v11652_v7 = vld [vmem:[#allocation12 + $0x120] sm:$0xf]  ;;  %v14111_v26 = vld [vmem:[#allocation12 + $0x12c] sm:$0xf0]  ;;  %v11525_v11 = vor.u32 %v14079_v6, %v11524_v5  ;;  %8292 = vmatpush.bf16.msra.mxu2 %v11797_v4 }
 0x337   : > { %v11780_v9 = vld [vmem:[#allocation12 + $0x220] sm:$0xf]  ;;  %v14143_v27 = vld [vmem:[#allocation12 + $0x22c] sm:$0xf0]  ;;  %v11653_v13 = vor.u32 %v14111_v26, %v11652_v7  ;;  %8305 = vmatpush.bf16.msra.mxu3 %v11925_v8 }
 0x338   : > { %v11908_v10 = vld [vmem:[#allocation12 + $0x320] sm:$0xf]  ;;  %v14175_v16 = vld [vmem:[#allocation12 + $0x32c] sm:$0xf0]  ;;  %v11781_v14 = vor.u32 %v14143_v27, %v11780_v9  ;;  %8267 = vmatpush.bf16.msra.mxu0 %v11525_v11 }
 0x339   : > { %v11508_v17 = vld [vmem:[#allocation12] sm:$0xf]  ;;  %v14075_v12 = vld [vmem:[#allocation12 + $0xc] sm:$0xf0]  ;;  %v11909_v20 = vor.u32 %v14175_v16, %v11908_v10  ;;  %8280 = vmatpush.bf16.msra.mxu1 %v11653_v13 }
 0x33a   : > { %v11636_v15 = vld [vmem:[#allocation12 + $0x100] sm:$0xf]  ;;  %v14107_v18 = vld [vmem:[#allocation12 + $0x10c] sm:$0xf0]  ;;  %v11509_v29 = vor.u32 %v14075_v12, %v11508_v17  ;;  %8293 = vmatpush.bf16.msra.mxu2 %v11781_v14 }
 0x33b   : > { %v11764_v19 = vld [vmem:[#allocation12 + $0x200] sm:$0xf]  ;;  %v14139_v21 = vld [vmem:[#allocation12 + $0x20c] sm:$0xf0]  ;;  %v11637_v33 = vor.u32 %v14107_v18, %v11636_v15  ;;  %8306 = vmatpush.bf16.msra.mxu3 %v11909_v20 }
 0x33c   : > { %v11892_v22 = vld [vmem:[#allocation12 + $0x300] sm:$0xf]  ;;  %v14171_v23 = vld [vmem:[#allocation12 + $0x30c] sm:$0xf0]  ;;  %v11765_v34 = vor.u32 %v14139_v21, %v11764_v19  ;;  %8268 = vmatpush.bf16.msra.mxu0 %v11509_v29 }
 0x33d   : > { %v12132_v24 = vld [vmem:[#allocation12 + $0x4e0] sm:$0xf]  ;;  %v14231_v25 = vld [vmem:[#allocation12 + $0x4ec] sm:$0xf0]  ;;  %v11893_v37 = vor.u32 %v14171_v23, %v11892_v22  ;;  %8281 = vmatpush.bf16.msra.mxu1 %v11637_v33 }
 0x33e   : > { %v12260_v28 = vld [vmem:[#allocation12 + $0x5e0] sm:$0xf]  ;;  %v14263_v30 = vld [vmem:[#allocation12 + $0x5ec] sm:$0xf0]  ;;  %v12133_v38 = vor.u32 %v14231_v25, %v12132_v24  ;;  %8294 = vmatpush.bf16.msra.mxu2 %v11765_v34 }
 0x33f   : > { %v12388_v31 = vld [vmem:[#allocation12 + $0x6e0] sm:$0xf]  ;;  %v14295_v32 = vld [vmem:[#allocation12 + $0x6ec] sm:$0xf0]  ;;  %v12261_v39 = vor.u32 %v14263_v30, %v12260_v28  ;;  %8307 = vmatpush.bf16.msra.mxu3 %v11893_v37  ;;  %v16474_v37 = vld [vmem:[#allocation2 + $0x18] sm:$0xff] }
 0x340   : > { %v12516_v35 = vld [vmem:[#allocation12 + $0x7e0] sm:$0xf]  ;;  %v14327_v36 = vld [vmem:[#allocation12 + $0x7ec] sm:$0xf0]  ;;  %v12389_v40 = vor.u32 %v14295_v32, %v12388_v31  ;;  %8313 = vmatpush.bf16.msrb.mxu0 %v12133_v38 }
 0x341   : > { %v12116_v41 = vld [vmem:[#allocation12 + $0x4c0] sm:$0xf]  ;;  %v14227_v42 = vld [vmem:[#allocation12 + $0x4cc] sm:$0xf0]  ;;  %v12517_v44 = vor.u32 %v14327_v36, %v12516_v35  ;;  %8326 = vmatpush.bf16.msrb.mxu1 %v12261_v39  ;;  %v16472_v36 = vld [vmem:[#allocation2 + $0x58] sm:$0xff] }
 0x342   : > { %v12244_v43 = vld [vmem:[#allocation12 + $0x5c0] sm:$0xf]  ;;  %v14259_v45 = vld [vmem:[#allocation12 + $0x5cc] sm:$0xf0]  ;;  %v12117_v51 = vor.u32 %v14227_v42, %v12116_v41  ;;  %8339 = vmatpush.bf16.msrb.mxu2 %v12389_v40 }
 0x343   : > { %v12372_v46 = vld [vmem:[#allocation12 + $0x6c0] sm:$0xf]  ;;  %v14291_v47 = vld [vmem:[#allocation12 + $0x6cc] sm:$0xf0]  ;;  %v12245_v55 = vor.u32 %v14259_v45, %v12244_v43  ;;  %8352 = vmatpush.bf16.msrb.mxu3 %v12517_v44  ;;  %v16489_v45 = vld [vmem:[#allocation2 + $0x68] sm:$0xff] }
 0x344   : > { %v12500_v48 = vld [vmem:[#allocation12 + $0x7c0] sm:$0xf]  ;;  %v14323_v49 = vld [vmem:[#allocation12 + $0x7cc] sm:$0xf0]  ;;  %v12373_v56 = vor.u32 %v14291_v47, %v12372_v46  ;;  %8314 = vmatpush.bf16.msrb.mxu0 %v12117_v51  ;;  %v16491_v46 = vld [vmem:[#allocation2 + $0x8] sm:$0xff] }
 0x345   : > { %v12100_v50 = vld [vmem:[#allocation12 + $0x4a0] sm:$0xf]  ;;  %v14223_v52 = vld [vmem:[#allocation12 + $0x4ac] sm:$0xf0]  ;;  %v12501_v60 = vor.u32 %v14323_v49, %v12500_v48  ;;  %8327 = vmatpush.bf16.msrb.mxu1 %v12245_v55  ;;  %v4495_v48 = vrot.slane %v16472_v36, 4  ;;  %v4501_v49 = vrot.slane %v16474_v37, 4 }
 0x346   : > { %v12228_v53 = vld [vmem:[#allocation12 + $0x5a0] sm:$0xf]  ;;  %v14255_v54 = vld [vmem:[#allocation12 + $0x5ac] sm:$0xf0]  ;;  %v12101_v6 = vor.u32 %v14223_v52, %v12100_v50  ;;  %8340 = vmatpush.bf16.msrb.mxu2 %v12373_v56 }
 0x347   : > { %v12356_v57 = vld [vmem:[#allocation12 + $0x6a0] sm:$0xf]  ;;  %v14287_v58 = vld [vmem:[#allocation12 + $0x6ac] sm:$0xf0]  ;;  %v12229_v9 = vor.u32 %v14255_v54, %v12228_v53  ;;  %8353 = vmatpush.bf16.msrb.mxu3 %v12501_v60  ;;  %v16504_v54 = vld [vmem:[#allocation2 + $0x48] sm:$0xff] }
 0x348   : > { %v12484_v59 = vld [vmem:[#allocation12 + $0x7a0] sm:$0xf]  ;;  %v14319_v61 = vld [vmem:[#allocation12 + $0x7ac] sm:$0xf0]  ;;  %v12357_v27 = vor.u32 %v14287_v58, %v12356_v57  ;;  %8315 = vmatpush.bf16.msrb.mxu0 %v12101_v6  ;;  %v4513_v57 = vrot.slane %v16489_v45, 4  ;;  %v4519_v58 = vrot.slane %v16491_v46, 4 }
 0x349   : > { %v12084_v62 = vld [vmem:[#allocation12 + $0x480] sm:$0xf]  ;;  %v14219_v63 = vld [vmem:[#allocation12 + $0x48c] sm:$0xf0]  ;;  %v12485_v17 = vor.u32 %v14319_v61, %v12484_v59  ;;  %8328 = vmatpush.bf16.msrb.mxu1 %v12229_v9 }
 0x34a   : > { %v16410_v0 = vld [vmem:[#allocation12 + $0x580] sm:$0xf]  ;;  %v16412_v1 = vld [vmem:[#allocation12 + $0x58c] sm:$0xf0]  ;;  %v12085_v15 = vor.u32 %v14219_v63, %v12084_v62  ;;  %8341 = vmatpush.bf16.msrb.mxu2 %v12357_v27  ;;  %v4496_v62 = vadd.f32 %v4495_v48, %v16472_v36  ;;  %v4502_v63 = vadd.f32 %v4501_v49, %v16474_v37  ;;  %v4520_v6 = vadd.f32 %v4519_v58, %v16491_v46 }
 0x34b   : > { %v16414_v2 = vld [vmem:[#allocation12 + $0x680] sm:$0xf]  ;;  %v16416_v3 = vld [vmem:[#allocation12 + $0x68c] sm:$0xf0]  ;;  %v12213_v21 = vor.u32 %v16412_v1, %v16410_v0  ;;  %8354 = vmatpush.bf16.msrb.mxu3 %v12485_v17  ;;  %v4525_v0 = vrot.slane %v16504_v54, 4 }
 0x34c   : > { %v16418_v4 = vld [vmem:[#allocation12 + $0x780] sm:$0xf]  ;;  %v16420_v5 = vld [vmem:[#allocation12 + $0x78c] sm:$0xf0]  ;;  %v12341_v22 = vor.u32 %v16416_v3, %v16414_v2  ;;  %8316 = vmatpush.bf16.msrb.mxu0 %v12085_v15  ;;  %v4497_v9 = vrot.slane %v4496_v62, 2 }
 0x34d   : > { %v16422_v7 = vld [vmem:[#allocation12 + $0x460] sm:$0xf]  ;;  %v16424_v8 = vld [vmem:[#allocation12 + $0x46c] sm:$0xf0]  ;;  %v12469_v23 = vor.u32 %v16420_v5, %v16418_v4  ;;  %8329 = vmatpush.bf16.msrb.mxu1 %v12213_v21  ;;  %v4514_v5 = vadd.f32 %v4513_v57, %v16489_v45  ;;  %v4526_v27 = vadd.f32 %v4525_v0, %v16504_v54 }
 0x34e   : > { %v16426_v26 = vld [vmem:[#allocation12 + $0x560] sm:$0xf]  ;;  %v16428_v10 = vld [vmem:[#allocation12 + $0x56c] sm:$0xf0]  ;;  %v12069_v24 = vor.u32 %v16424_v8, %v16422_v7  ;;  %8342 = vmatpush.bf16.msrb.mxu2 %v12341_v22  ;;  %v4503_v22 = vrot.slane %v4502_v63, 2 }
 0x34f   : > { %v16430_v16 = vld [vmem:[#allocation12 + $0x660] sm:$0xf]  ;;  %v16432_v11 = vld [vmem:[#allocation12 + $0x66c] sm:$0xf0]  ;;  %v12197_v29 = vor.u32 %v16428_v10, %v16426_v26  ;;  %8355 = vmatpush.bf16.msrb.mxu3 %v12469_v23  ;;  %v15099_v10 = vmov 8.0  }
 0x350   : > { %v16434_v12 = vld [vmem:[#allocation12 + $0x760] sm:$0xf]  ;;  %v16436_v13 = vld [vmem:[#allocation12 + $0x76c] sm:$0xf0]  ;;  %v12325_v30 = vor.u32 %v16432_v11, %v16430_v16  ;;  %14711 = vrcp.f32 %v15099_v10  ;;  %8317 = vmatpush.bf16.msrb.mxu0 %v12069_v24 }
 0x351   : > { %v16438_v14 = vld [vmem:[#allocation12 + $0x440] sm:$0xf]  ;;  %v16440_v18 = vld [vmem:[#allocation12 + $0x44c] sm:$0xf0]  ;;  %v12453_v31 = vor.u32 %v16436_v13, %v16434_v12  ;;  %8330 = vmatpush.bf16.msrb.mxu1 %v12197_v29 }
 0x352   : > { %v16442_v19 = vld [vmem:[#allocation12 + $0x540] sm:$0xf]  ;;  %v16444_v20 = vld [vmem:[#allocation12 + $0x54c] sm:$0xf0]  ;;  %v12053_v33 = vor.u32 %v16440_v18, %v16438_v14  ;;  %8343 = vmatpush.bf16.msrb.mxu2 %v12325_v30 }
 0x353   : > { %v16454_v25 = vld [vmem:[#allocation12 + $0x640] sm:$0xf]  ;;  %v16456_v28 = vld [vmem:[#allocation12 + $0x64c] sm:$0xf0]  ;;  %v12181_v34 = vor.u32 %v16444_v20, %v16442_v19  ;;  %8356 = vmatpush.bf16.msrb.mxu3 %v12453_v31  ;;  %v16566_v31 = vld [vmem:[#allocation2 + $0x78] sm:$0xff] }
 0x354   : > { %v16464_v32 = vld [vmem:[#allocation2 + $0x30] sm:$0xff]  ;;  %v16470_v35 = vld [vmem:[#allocation2] sm:$0xff]  ;;  %v12309_v39 = vor.u32 %v16456_v28, %v16454_v25  ;;  %8318 = vmatpush.bf16.msrb.mxu0 %v12053_v33  ;;  %v4567_v20 = vrot.slane %v16566_v31, 4 }
 0x355   : > { %v4483_v38 = vrot.slane %v16464_v32, 4  ;;  %v16479_v40 = vld [vmem:[#allocation12 + $0x740] sm:$0xf]  ;;  %v16481_v41 = vld [vmem:[#allocation12 + $0x74c] sm:$0xf0]  ;;  %v4489_v47 = vrot.slane %v16470_v35, 4  ;;  %v16572_v57 = vmul.f32 %v16464_v32, %v16464_v32  ;;  %8331 = vmatpush.bf16.msrb.mxu1 %v12181_v34  ;;  %v16584_v33 = vmul.f32 %v16470_v35, %v16470_v35 }
 0x356   : > { %v16483_v42 = vld [vmem:[#allocation12 + $0x420] sm:$0xf]  ;;  %v16485_v43 = vld [vmem:[#allocation12 + $0x42c] sm:$0xf0]  ;;  %v12437_v16 = vor.u32 %v16481_v41, %v16479_v40  ;;  %v16574_v58 = vpop.eup %14711  ;;  %8344 = vmatpush.bf16.msrb.mxu2 %v12309_v39 }
 0x357   : > { %v16487_v44 = vld [vmem:[#allocation2 + $0x50] sm:$0xff]  ;;  %v16496_v50 = vld [vmem:[#allocation12 + $0x520] sm:$0xf]  ;;  %v4484_v55 = vadd.f32 %v4483_v38, %v16464_v32  ;;  %v4490_v61 = vadd.f32 %v4489_v47, %v16470_v35  ;;  %v12037_v11 = vor.u32 %v16485_v43, %v16483_v42  ;;  %v4515_v42 = vrot.slane %v4514_v5, 2 }
 0x358   : > { %v16498_v51 = vld [vmem:[#allocation12 + $0x52c] sm:$0xf0]  ;;  %v16500_v52 = vld [vmem:[#allocation12 + $0x620] sm:$0xf]  ;;  %v4507_v56 = vrot.slane %v16487_v44, 4  ;;  %v4498_v43 = vadd.f32 %v4497_v9, %v4496_v62  ;;  %v4521_v47 = vrot.slane %v4520_v6, 2  ;;  %8357 = vmatpush.bf16.msrb.mxu3 %v12437_v16  ;;  %vm4584_vm0 = vweird.f32 %v16574_v58 }
 0x359   : > { %v16502_v53 = vld [vmem:[#allocation12 + $0x62c] sm:$0xf0]  ;;  %v16510_v59 = vld [vmem:[#allocation12 + $0x720] sm:$0xf]  ;;  %v4485_v3 = vrot.slane %v4484_v55, 2  ;;  %v4491_v26 = vrot.slane %v4490_v61, 2  ;;  %v12165_v23 = vor.u32 %v16498_v51, %v16496_v50  ;;  %v4516_v18 = vadd.f32 %v4515_v42, %v4514_v5  ;;  %8319 = vmatpush.bf16.msrb.mxu0 %v12037_v11 }
 0x35a   : > { %v16512_v60 = vld [vmem:[#allocation12 + $0x72c] sm:$0xf0]  ;;  %v16518_v1 = vld [vmem:[#allocation12 + $0x400] sm:$0xf]  ;;  %v4508_v4 = vadd.f32 %v4507_v56, %v16487_v44  ;;  %v12293_v24 = vor.u32 %v16502_v53, %v16500_v52  ;;  %v4527_v52 = vrot.slane %v4526_v27, 2  ;;  %v16568_v53 = vld [vmem:[#allocation2 + $0x28] sm:$0xff]  ;;  %v4504_v56 = vadd.f32 %v4503_v22, %v4502_v63 }
 0x35b   : > { %v16520_v2 = vld [vmem:[#allocation12 + $0x40c] sm:$0xf0]  ;;  %v16525_v7 = vld [vmem:[#allocation12 + $0x500] sm:$0xf]  ;;  %v4486_v21 = vadd.f32 %v4485_v3, %v4484_v55  ;;  %v12421_v29 = vor.u32 %v16512_v60, %v16510_v59  ;;  %v4492_v30 = vadd.f32 %v4491_v26, %v4490_v61  ;;  %v4499_v60 = vrot.slane %v4498_v43, 1  ;;  %8332 = vmatpush.bf16.msrb.mxu1 %v12165_v23 }
 0x35c   : > { %v16527_v8 = vld [vmem:[#allocation12 + $0x50c] sm:$0xf0]  ;;  %v16534_v17 = vld [vmem:[#allocation12 + $0x600] sm:$0xf]  ;;  %v4509_v41 = vrot.slane %v4508_v4, 2  ;;  %v12021_v48 = vor.u32 %v16520_v2, %v16518_v1  ;;  %v4522_v61 = vadd.f32 %v4521_v47, %v4520_v6  ;;  %v4528_v63 = vadd.f32 %v4527_v52, %v4526_v27  ;;  %8345 = vmatpush.bf16.msrb.mxu2 %v12293_v24 }
 0x35d   : > { %v16536_v15 = vld [vmem:[#allocation12 + $0x60c] sm:$0xf0]  ;;  %v16542_v38 = vld [vmem:[#allocation12 + $0x700] sm:$0xf]  ;;  %v12149_v49 = vor.u32 %v16527_v8, %v16525_v7  ;;  %v4487_v55 = vrot.slane %v4486_v21, 1  ;;  %v4493_v59 = vrot.slane %v4492_v30, 1  ;;  %v4568_v3 = vadd.f32 %v4567_v20, %v16566_v31  ;;  %8358 = vmatpush.bf16.msrb.mxu3 %v12421_v29 }
 0x35e   : > { %v16544_v40 = vld [vmem:[#allocation12 + $0x70c] sm:$0xf0]  ;;  %v12277_v50 = vor.u32 %v16536_v15, %v16534_v17  ;;  %v16557_v51 = vld [vmem:[#allocation2 + $0x60] sm:$0xff]  ;;  %v4510_v14 = vadd.f32 %v4509_v41, %v4508_v4  ;;  %v4573_v25 = vrot.slane %v16568_v53, 4  ;;  %v4505_v34 = vrot.slane %v4504_v56, 1  ;;  %8320 = vmatpush.bf16.msrb.mxu0 %v12021_v48 }
 0x35f   : > { %v12405_v12 = vor.u32 %v16544_v40, %v16542_v38  ;;  %v16564_v13 = vld [vmem:[#allocation2 + $0x70] sm:$0xff]  ;;  %v4555_v62 = vrot.slane %v16557_v51, 4  ;;  %v16590_v28 = vadd.f32 %v4487_v55, %v4486_v21  ;;  %v4580_v0 = vmul.f32 8.0, %v16574_v58  ;;  %8333 = vmatpush.bf16.msrb.mxu1 %v12149_v49 }
 0x360   : > { %v4561_v19 = vrot.slane %v16564_v13, 4  ;;  %v4511_v1 = vrot.slane %v4510_v14, 1  ;;  %v4574_v4 = vadd.f32 %v4573_v25, %v16568_v53  ;;  %v4517_v5 = vrot.slane %v4516_v18, 1  ;;  %8346 = vmatpush.bf16.msrb.mxu2 %v12277_v50 }
 0x361   : > { %v4556_v39 = vadd.f32 %v4555_v62, %v16557_v51  ;;  %v4523_v6 = vrot.slane %v4522_v61, 1  ;;  %v4581_v8 = vsub.f32 1.0, %v4580_v0  ;;  %v4529_v26 = vrot.slane %v4528_v63, 1  ;;  %8359 = vmatpush.bf16.msrb.mxu3 %v12405_v12 }
 0x362   : > { %v4562_v2 = vadd.f32 %v4561_v19, %v16564_v13  ;;  %v4569_v27 = vrot.slane %v4568_v3, 2  ;;  %v4575_v10 = vrot.slane %v4574_v4, 2  ;;  %v4494_v16 = vadd.f32 %v4493_v59, %v4492_v30 }
 0x363   : > { %v4557_v7 = vrot.slane %v4556_v39, 2  ;;  %v4500_v11 = vadd.f32 %v4499_v60, %v4498_v43  ;;  %v4582_v15 = vmul.f32 %v16574_v58, %v4581_v8  ;;  %v4506_v21 = vadd.f32 %v4505_v34, %v4504_v56 }
 0x364   : > { %v4563_v9 = vrot.slane %v4562_v2, 2  ;;  %v4570_v23 = vadd.f32 %v4569_v27, %v4568_v3  ;;  %v4512_v24 = vadd.f32 %v4511_v1, %v4510_v14  ;;  %v4518_v38 = vadd.f32 %v4517_v5, %v4516_v18 }
 0x365   : > { %v4558_v17 = vadd.f32 %v4557_v7, %v4556_v39  ;;  %v4524_v40 = vadd.f32 %v4523_v6, %v4522_v61  ;;  %v4618_v41 = vrot.slane %v16572_v57, 4  ;;  %v16599_v42 = vadd.f32 %v4529_v26, %v4528_v63 }
 0x366   : > { %v4564_v22 = vadd.f32 %v4563_v9, %v4562_v2  ;;  %v4576_v47 = vadd.f32 %v4575_v10, %v4574_v4  ;;  %v4571_v43 = vrot.slane %v4570_v23, 1  ;;  %v4583_v48 = vadd.f32 %v16574_v58, %v4582_v15 }
 0x367   : > { %v4559_v29 = vrot.slane %v4558_v17, 1  ;;  %v4604_v49 = vmul.f32 %v16472_v36, %v16472_v36  ;;  %v4605_v50 = vmul.f32 %v16474_v37, %v16474_v37  ;;  %v4606_v52 = vmul.f32 %v16487_v44, %v16487_v44 }
 0x368   : > { %v4565_v30 = vrot.slane %v4564_v22, 1  ;;  %v4607_v12 = vmul.f32 %v16489_v45, %v16489_v45  ;;  %v4624_v55 = vrot.slane %v16584_v33, 4  ;;  %v4608_v56 = vmul.f32 %v16491_v46, %v16491_v46 }
 0x369   : > { %v4609_v14 = vmul.f32 %v16504_v54, %v16504_v54  ;;  %v4614_v18 = vmul.f32 %v16557_v51, %v16557_v51  ;;  %v4619_v59 = vadd.f32 %v4618_v41, %v16572_v57  ;;  %v4560_v60 = vadd.f32 %v4559_v29, %v4558_v17 }
 0x36a   : > { %v4577_v61 = vrot.slane %v4576_v47, 1  ;;  %v4615_v62 = vmul.f32 %v16564_v13, %v16564_v13  ;;  %v16623_v63 = vmul.f32 %v16566_v31, %v16566_v31  ;;  %v16625_v19 = vadd.f32 %v4565_v30, %v4564_v22 }
 0x36b   : > { %v16627_v20 = vadd.f32 %v4571_v43, %v4570_v23  ;;  %v16632_v25 = vsel %vm4584_vm0, %v16574_v58, %v4583_v48  ;;  %v4617_v51 = vmul.f32 %v16568_v53, %v16568_v53  ;;  %v4625_v57 = vadd.f32 %v4624_v55, %v16584_v33 }
 0x36c   : > { %v4630_v34 = vrot.slane %v4604_v49, 4  ;;  %v4636_v13 = vrot.slane %v4605_v50, 4  ;;  %v4642_v39 = vrot.slane %v4606_v52, 4  ;;  %v4620_v0 = vrot.slane %v4619_v59, 2 }
 0x36d   : > { %v4648_v31 = vrot.slane %v4607_v12, 4  ;;  %v4654_v1 = vrot.slane %v4608_v56, 4  ;;  %v4660_v2 = vrot.slane %v4609_v14, 4  ;;  %v4626_v3 = vrot.slane %v4625_v57, 2 }
 0x36e   : > { %v4631_v4 = vadd.f32 %v4630_v34, %v4604_v49  ;;  %v4637_v5 = vadd.f32 %v4636_v13, %v4605_v50  ;;  %v4643_v6 = vadd.f32 %v4642_v39, %v4606_v52  ;;  %v16637_v7 = vadd.f32 %v4577_v61, %v4576_v47 }
 0x36f   : > { %v4649_v58 = vadd.f32 %v4648_v31, %v4607_v12  ;;  %v4655_v8 = vadd.f32 %v4654_v1, %v4608_v56  ;;  %v4661_v26 = vadd.f32 %v4660_v2, %v4609_v14  ;;  %v16641_v53 = vmul.f32 %v16632_v25, %v16590_v28 }
 0x370   : > { %v4632_v33 = vrot.slane %v4631_v4, 2  ;;  %v4638_v9 = vrot.slane %v4637_v5, 2  ;;  %v4644_v27 = vrot.slane %v4643_v6, 2  ;;  %v4621_v10 = vadd.f32 %v4620_v0, %v4619_v59 }
 0x371   : > { %v4627_v17 = vadd.f32 %v4626_v3, %v4625_v57  ;;  %v4650_v15 = vrot.slane %v4649_v58, 2  ;;  %v4656_v22 = vrot.slane %v4655_v8, 2  ;;  %v16644_v23 = vmul.f32 %v16632_v25, %v4494_v16 }
 0x372   : > { %v16647_v41 = vmul.f32 %v16632_v25, %v4500_v11  ;;  %v16650_v29 = vmul.f32 %v16632_v25, %v4506_v21  ;;  %v4633_v47 = vadd.f32 %v4632_v33, %v4631_v4  ;;  %v4639_v30 = vadd.f32 %v4638_v9, %v4637_v5 }
 0x373   : > { %v4645_v28 = vadd.f32 %v4644_v27, %v4643_v6  ;;  %v4662_v43 = vrot.slane %v4661_v26, 2  ;;  %v4690_v48 = vrot.slane %v4614_v18, 4  ;;  %v16653_v49 = vmul.f32 %v16632_v25, %v4512_v24 }
 0x374   : > { %v16656_v50 = vmul.f32 %v16632_v25, %v4518_v38  ;;  %v16659_v16 = vmul.f32 %v16632_v25, %v4524_v40  ;;  %v4651_v52 = vadd.f32 %v4650_v15, %v4649_v58  ;;  %v4622_v11 = vrot.slane %v4621_v10, 1 }
 0x375   : > { %v4628_v12 = vrot.slane %v4627_v17, 1  ;;  %v4657_v55 = vadd.f32 %v4656_v22, %v4655_v8  ;;  %v4691_v21 = vadd.f32 %v4690_v48, %v4614_v18  ;;  %v16663_v56 = vmul.f32 %v16632_v25, %v16599_v42 }
 0x376   : > { %v16666_v14 = vmul.f32 %v16632_v25, %v4560_v60  ;;  %v4634_v24 = vrot.slane %v4633_v47, 1  ;;  %v4696_v59 = vrot.slane %v4615_v62, 4  ;;  %v4640_v61 = vrot.slane %v4639_v30, 1 }
 0x377   : > { %v4646_v38 = vrot.slane %v4645_v28, 1  ;;  %v4663_v57 = vadd.f32 %v4662_v43, %v4661_v26  ;;  %v4692_v34 = vrot.slane %v4691_v21, 2  ;;  %v4652_v40 = vrot.slane %v4651_v52, 1 }
 0x378   : > { %17778 = vst [vmem:[#allocation26_spill] sm:$0xff] %v16666_v14  ;;  %v4697_v13 = vadd.f32 %v4696_v59, %v4615_v62  ;;  %v4702_v39 = vrot.slane %v16623_v63, 4  ;;  %v4708_v0 = vrot.slane %v4617_v51, 4  ;;  %v4623_v31 = vadd.f32 %v4622_v11, %v4621_v10 }
 0x379   : > { %v4629_v18 = vadd.f32 %v4628_v12, %v4627_v17  ;;  %v4658_v1 = vrot.slane %v4657_v55, 1  ;;  %v4693_v2 = vadd.f32 %v4692_v34, %v4691_v21  ;;  %v4635_v42 = vadd.f32 %v4634_v24, %v4633_v47 }
 0x37a   : > { %v4698_v3 = vrot.slane %v4697_v13, 2  ;;  %v4703_v60 = vadd.f32 %v4702_v39, %v16623_v63  ;;  %v4709_v4 = vadd.f32 %v4708_v0, %v4617_v51  ;;  %v16672_v5 = vmul.f32 %v16632_v25, %v16625_v19 }
 0x37b   : > { %v4641_v6 = vadd.f32 %v4640_v61, %v4639_v30  ;;  %v4647_v58 = vadd.f32 %v4646_v38, %v4645_v28  ;;  %v4664_v8 = vrot.slane %v4663_v57, 1  ;;  %v4653_v62 = vadd.f32 %v4652_v40, %v4651_v52 }
 0x37c   : > { %17779 = vst [vmem:[#allocation27_spill] sm:$0xff] %v16672_v5  ;;  %v4694_v26 = vrot.slane %v4693_v2, 1  ;;  %v4699_v33 = vadd.f32 %v4698_v3, %v4697_v13  ;;  %v4704_v9 = vrot.slane %v4703_v60, 2  ;;  %v4659_v27 = vadd.f32 %v4658_v1, %v4657_v55 }
 0x37d   : > { %v4710_v10 = vrot.slane %v4709_v4, 2  ;;  %v4714_v17 = vmul.f32 %v4623_v31, %v16632_v25  ;;  %v4730_v15 = vmul.f32 %v16641_v53, %v16641_v53  ;;  %v4715_v51 = vmul.f32 %v4629_v18, %v16632_v25 }
 0x37e   : > { %v4705_v63 = vadd.f32 %v4704_v9, %v4703_v60  ;;  %v4716_v19 = vmul.f32 %v4635_v42, %v16632_v25  ;;  %v4731_v22 = vmul.f32 %v16644_v23, %v16644_v23  ;;  %v4700_v47 = vrot.slane %v4699_v33, 1 }
 0x37f   : > { %v4717_v30 = vmul.f32 %v4641_v6, %v16632_v25  ;;  %v4732_v28 = vmul.f32 %v16647_v41, %v16647_v41  ;;  %v4733_v43 = vmul.f32 %v16650_v29, %v16650_v29  ;;  %v4665_v48 = vadd.f32 %v4664_v8, %v4663_v57 }
 0x380   : > { %v4695_v52 = vadd.f32 %v4694_v26, %v4693_v2  ;;  %v4718_v11 = vmul.f32 %v4647_v58, %v16632_v25  ;;  %v4734_v12 = vmul.f32 %v16653_v49, %v16653_v49  ;;  %v4711_v55 = vadd.f32 %v4710_v10, %v4709_v4 }
 0x381   : > { %v4719_v21 = vmul.f32 %v4653_v62, %v16632_v25  ;;  %v4735_v24 = vmul.f32 %v16656_v50, %v16656_v50  ;;  %v4746_v59 = vsub.f32 %v4714_v17, %v4730_v15  ;;  %v4706_v61 = vrot.slane %v4705_v63, 1 }
 0x382   : > { %v4720_v38 = vmul.f32 %v4659_v27, %v16632_v25  ;;  %v4736_v34 = vmul.f32 %v16659_v16, %v16659_v16  ;;  %v4747_v57 = vsub.f32 %v4715_v51, %v4731_v22  ;;  %v16697_v40 = vmul.f32 %v16632_v25, %v16627_v20 }
 0x383   : > { %v4701_v13 = vadd.f32 %v4700_v47, %v4699_v33  ;;  %v4748_v39 = vsub.f32 %v4716_v19, %v4732_v28  ;;  %v4749_v0 = vsub.f32 %v4717_v30, %v4733_v43  ;;  %v4721_v31 = vmul.f32 %v4665_v48, %v16632_v25 }
 0x384   : > { %17780 = vst [vmem:[#allocation28_spill] sm:$0xff] %v16697_v40  ;;  %v4726_v18 = vmul.f32 %v4695_v52, %v16632_v25  ;;  %v4737_v1 = vmul.f32 %v16663_v56, %v16663_v56  ;;  %v4750_v2 = vsub.f32 %v4718_v11, %v4734_v12  ;;  %v4712_v42 = vrot.slane %v4711_v55, 1 }
 0x385   : > { %v4751_v3 = vsub.f32 %v4719_v21, %v4735_v24  ;;  %v16703_v60 = vadd.f32 1e-05, %v4746_v59  ;;  %v16705_v4 = vadd.f32 1e-05, %v4747_v57  ;;  %v4707_v6 = vadd.f32 %v4706_v61, %v4705_v63 }
 0x386   : > { %v4742_v20 = vmul.f32 %v16666_v14, %v16666_v14  ;;  %v4752_v58 = vsub.f32 %v4720_v38, %v4736_v34  ;;  %v16709_v8 = vadd.f32 1e-05, %v4748_v39  ;;  %v4727_v62 = vmul.f32 %v4701_v13, %v16632_v25 }
 0x387   : > { %v4743_v26 = vmul.f32 %v16672_v5, %v16672_v5  ;;  %v16714_v33 = vadd.f32 1e-05, %v4749_v0  ;;  %14713 = vrsqrt.f32 %v16703_v60  ;;  %v4753_v9 = vsub.f32 %v4721_v31, %v4737_v1  ;;  %v17074_v5 = vld [vmem:[#allocation12 + $0xa80] sm:$0xf] }
 0x388   : > { %v16717_v27 = vadd.f32 1e-05, %v4750_v2  ;;  %v16721_v10 = vmul.f32 %v16632_v25, %v16637_v7  ;;  %v16725_v17 = vmul.f32 %v16697_v40, %v16697_v40  ;;  %v16727_v15 = vadd.f32 1e-05, %v4751_v3  ;;  %v17072_v40 = vld [vmem:[#allocation12 + $0x98c] sm:$0xf0] }
 0x389   : > { %14715 = vrsqrt.f32 %v16705_v4  ;;  %v4713_v63 = vadd.f32 %v4712_v42, %v4711_v55  ;;  %v16731_v51 = vmul.f32 %v4707_v6, %v16632_v25  ;;  %v16733_v19 = vadd.f32 1e-05, %v4752_v58 }
 0x38a   : > { %17781 = vst [vmem:[#allocation29_spill] sm:$0xff] %v16721_v10  ;;  %14717 = vrsqrt.f32 %v16709_v8  ;;  %v4758_v22 = vsub.f32 %v4726_v18, %v4742_v20  ;;  %v4759_v47 = vsub.f32 %v4727_v62, %v4743_v26  ;;  %v16737_v7 = vadd.f32 1e-05, %v4753_v9 }
 0x38b   : > { %14719 = vrsqrt.f32 %v16714_v33  ;;  %v16744_v28 = vmul.f32 %v16721_v10, %v16721_v10  ;;  %v16748_v43 = vmul.f32 %v4713_v63, %v16632_v25  ;;  %v4760_v48 = vsub.f32 %v16731_v51, %v16725_v17  ;;  %v17070_v10 = vld [vmem:[#allocation12 + $0x980] sm:$0xf] }
 0x38c   : > { %14721 = vrsqrt.f32 %v16717_v27  ;;  %v16757_v12 = vadd.f32 1e-05, %v4758_v22  ;;  %v16759_v55 = vadd.f32 1e-05, %v4759_v47  ;;  %vm4784_vm1 = vweird.f32 %v16703_v60 }
 0x38d   : > { %v16740_v30 = vpop.eup %14713  ;;  %14723 = vrsqrt.f32 %v16727_v15  ;;  %vm4794_vm2 = vweird.f32 %v16705_v4  ;;  %vm4804_vm3 = vweird.f32 %v16709_v8  ;;  %vm4814_vm4 = vweird.f32 %v16714_v33 }
 0x38e   : > { %v4779_v52 = vmul.f32 %v16740_v30, %v16703_v60  ;;  %14725 = vrsqrt.f32 %v16733_v19  ;;  %vm4824_vm5 = vweird.f32 %v16717_v27  ;;  %vm4834_vm6 = vweird.f32 %v16727_v15 }
 0x38f   : > { %v16755_v11 = vpop.eup %14715  ;;  %14727 = vrsqrt.f32 %v16737_v7  ;;  %vm4785_vm7 = vweird.f32 %v16740_v30  ;;  %vm4844_vm8 = vweird.f32 %v16733_v19 }
 0x390   : > { %v16763_v21 = vpop.eup %14717  ;;  %v4780_v24 = vmul.f32 %v16740_v30, %v4779_v52  ;;  %v4789_v59 = vmul.f32 %v16755_v11, %v16705_v4  ;;  %vm4795_vm9 = vweird.f32 %v16755_v11  ;;  %14729 = vrsqrt.f32 %v16757_v12  ;;  %vm16808_vm12 = vmor %vm4784_vm1, %vm4785_vm7 }
 0x391   : > { %v16770_v61 = vpop.eup %14719  ;;  %v4799_v38 = vmul.f32 %v16763_v21, %v16709_v8  ;;  %vm4805_vm10 = vweird.f32 %v16763_v21  ;;  %vm16818_vm14 = vmor %vm4794_vm2, %vm4795_vm9  ;;  %14731 = vrsqrt.f32 %v16759_v55  ;;  %vm4968_vm9 = vcmask 1040384  }
 0x392   : > { %v16777_v34 = vpop.eup %14721  ;;  %v4790_v57 = vmul.f32 %v16755_v11, %v4789_v59  ;;  %v4809_v13 = vmul.f32 %v16770_v61, %v16714_v33  ;;  %v4781_v1 = vmul.f32 0.5, %v4780_v24  ;;  %vm4815_vm11 = vweird.f32 %v16770_v61  ;;  %vm16830_vm0 = vmor %vm4804_vm3, %vm4805_vm10 }
 0x393   : > { %v16784_v39 = vpop.eup %14723  ;;  %v4800_v0 = vmul.f32 %v16763_v21, %v4799_v38  ;;  %v4819_v31 = vmul.f32 %v16777_v34, %v16717_v27  ;;  %vm4825_vm13 = vweird.f32 %v16777_v34  ;;  %vm16842_vm1 = vmor %vm4814_vm4, %vm4815_vm11  ;;  %vm4972_vm11 = vcmask 1041408  }
 0x394   : > { %v16791_v18 = vpop.eup %14725  ;;  %v4791_v2 = vmul.f32 0.5, %v4790_v57  ;;  %v4810_v42 = vmul.f32 %v16770_v61, %v4809_v13  ;;  %v4829_v3 = vmul.f32 %v16784_v39, %v16727_v15  ;;  %v4782_v59 = vsub.f32 1.5, %v4781_v1  ;;  %vm16854_vm3 = vmor %vm4824_vm5, %vm4825_vm13 }
 0x395   : > { %v4801_v6 = vmul.f32 0.5, %v4800_v0  ;;  %v4820_v20 = vmul.f32 %v16777_v34, %v4819_v31  ;;  %v4839_v58 = vmul.f32 %v16791_v18, %v16733_v19  ;;  %v16800_v62 = vpop.eup %14727  ;;  %vm4835_vm15 = vweird.f32 %v16784_v39 }
 0x396   : > { %v4792_v26 = vsub.f32 1.5, %v4791_v2  ;;  %v4811_v9 = vmul.f32 0.5, %v4810_v42  ;;  %v4830_v63 = vmul.f32 %v16784_v39, %v4829_v3  ;;  %v16823_v13 = vpop.eup %14729  ;;  %v4849_v2 = vmul.f32 %v16800_v62, %v16737_v7  ;;  %vm16870_vm4 = vmor %vm4834_vm6, %vm4835_vm15 }
 0x397   : > { %v4802_v47 = vsub.f32 1.5, %v4801_v6  ;;  %v4821_v52 = vmul.f32 0.5, %v4820_v20  ;;  %v4840_v24 = vmul.f32 %v16791_v18, %v4839_v58  ;;  %17786 = vst [vmem:[#allocation30_spill] sm:$0xff] %v16823_v13  ;;  %vm4845_vm2 = vweird.f32 %v16791_v18  ;;  %v16919_v31 = vpop.eup %14731 }
 0x398   : > { %v4812_v60 = vsub.f32 1.5, %v4811_v9  ;;  %v4831_v57 = vmul.f32 0.5, %v4830_v63  ;;  %v4793_v0 = vmul.f32 %v16755_v11, %v4792_v26  ;;  %v4761_v20 = vsub.f32 %v16748_v43, %v16744_v28  ;;  %vm16881_vm7 = vmor %vm4844_vm8, %vm4845_vm2  ;;  %17799 = vst [vmem:[#allocation31_spill] sm:$0xff] %v16919_v31 }
 0x399   : > { %v4822_v4 = vsub.f32 1.5, %v4821_v52  ;;  %v4841_v1 = vmul.f32 0.5, %v4840_v24  ;;  %v4803_v42 = vmul.f32 %v16763_v21, %v4802_v47  ;;  %v4850_v9 = vmul.f32 %v16800_v62, %v4849_v2 }
 0x39a   : > { %v4813_v3 = vmul.f32 %v16770_v61, %v4812_v60  ;;  %v4832_v8 = vsub.f32 1.5, %v4831_v57  ;;  %v16862_v63 = vadd.f32 1e-05, %v4760_v48  ;;  %v4783_v28 = vmul.f32 %v16740_v30, %v4782_v59 }
 0x39b   : > { %v4823_v58 = vmul.f32 %v16777_v34, %v4822_v4  ;;  %v4842_v33 = vsub.f32 1.5, %v4841_v1  ;;  %vm4854_vm5 = vweird.f32 %v16737_v7  ;;  %v4797_v17 = vsel %vm16818_vm14, %v16755_v11, %v4793_v0 }
 0x39c   : > { %v4833_v43 = vmul.f32 %v16784_v39, %v4832_v8  ;;  %v4851_v47 = vmul.f32 0.5, %v4850_v9  ;;  %vm4855_vm6 = vweird.f32 %v16800_v62  ;;  %v4807_v15 = vsel %vm16830_vm0, %v16763_v21, %v4803_v42  ;;  %v4479_v8 = vld [vmem:[#allocation9] sm:$0xff] }
 0x39d   : > { %v4843_v51 = vmul.f32 %v16791_v18, %v4842_v33  ;;  %v4817_v52 = vsel %vm16842_vm1, %v16770_v61, %v4813_v3  ;;  %v4827_v19 = vsel %vm16854_vm3, %v16777_v34, %v4823_v58  ;;  %vm4970_vm8 = vcmask 1042434   ;;  %vm16907_vm10 = vmor %vm4854_vm5, %vm4855_vm6 }
 0x39e   : > { %v4837_v11 = vsel %vm16870_vm4, %v16784_v39, %v4833_v43  ;;  %v4852_v24 = vsub.f32 1.5, %v4851_v47  ;;  %v4787_v21 = vsel %vm16808_vm12, %v16740_v30, %v4783_v28  ;;  %14733 = vrsqrt.f32 %v16862_v63 }
 0x39f   : > { %v4847_v61 = vsel %vm16881_vm7, %v16791_v18, %v4843_v51  ;;  %v4954_v34 = vrot.slane %v4797_v17, 7  ;;  %v4955_v38 = vrot.slane %v4807_v15, 6  ;;  %v4956_v60 = vrot.slane %v4817_v52, 5 }
 0x3a0   : > { %v4853_v39 = vmul.f32 %v16800_v62, %v4852_v24  ;;  %v4957_v22 = vrot.slane %v4827_v19, 4  ;;  %v4958_v30 = vrot.slane %v4837_v11, 3  ;;  %vm4974_vm12 = vcmask 1044484  }
 0x3a1   : > { %vm4976_vm13 = vcmask 1046534   ;;  %v4899_v18 = vmul.f32 %v16823_v13, %v16757_v12  ;;  %v4959_v57 = vrot.slane %v4847_v61, 2  ;;  %v4969_v0 = vsel %vm4968_vm9, %v4787_v21, %v4954_v34 }
 0x3a2   : > { %v4857_v7 = vsel %vm16907_vm10, %v16800_v62, %v4853_v39  ;;  %v4971_v1 = vsel %vm4970_vm8, %v4955_v38, %v4956_v60  ;;  %v16922_v2 = vadd.f32 1e-05, %v4761_v20  ;;  %v4975_v42 = vsel %vm4974_vm12, %v4957_v22, %v4958_v30 }
 0x3a3   : > { %v4960_v4 = vrot.slane %v4857_v7, 1  ;;  %vm4978_vm14 = vcmask 1045508   ;;  %v4973_v62 = vsel %vm4972_vm11, %v4969_v0, %v4971_v1  ;;  %vm17770_vm15 = vcmask 1043456   ;;  %v16967_v7 = vld [vmem:[#allocation12 + $0x8e0] sm:$0xf] }
 0x3a4   : > { %17800 = vst [vmem:[#allocation32_spill] sm:$0xff] %v16922_v2  ;;  %v16925_v3 = vpop.eup %14733  ;;  %v4900_v58 = vmul.f32 %v16823_v13, %v4899_v18  ;;  %v4909_v26 = vmul.f32 %v16919_v31, %v16759_v55  ;;  %14735 = vrsqrt.f32 %v16922_v2  ;;  %v17111_v13 = vld [vmem:[#allocation12 + $0xb60] sm:$0xf]  ;;  %vm4904_vm0 = vweird.f32 %v16757_v12 }
 0x3a5   : > { %17801 = vst [vmem:[#allocation33_spill] sm:$0xff] %v16925_v3  ;;  %v4977_v6 = vsel %vm4976_vm13, %v4959_v57, %v4960_v4  ;;  %v4919_v20 = vmul.f32 %v16925_v3, %v16862_v63  ;;  %vm4914_vm1 = vweird.f32 %v16759_v55  ;;  %vm4924_vm2 = vweird.f32 %v16862_v63 }
 0x3a6   : > { %v4979_v33 = vsel %vm4978_vm14, %v4975_v42, %v4977_v6  ;;  %v16939_v43 = vmul.f32 0.5, %v4900_v58  ;;  %v4910_v27 = vmul.f32 %v16919_v31, %v4909_v26  ;;  %v16976_v42 = vld [vmem:[#allocation12 + $0x9e0] sm:$0xf]  ;;  %v16984_v26 = vld [vmem:[#allocation12 + $0xaec] sm:$0xf0] }
 0x3a7   : > { %v4981_v9 = vsel %vm17770_vm15, %v4973_v62, %v4979_v33  ;;  %v4920_v15 = vmul.f32 %v16925_v3, %v4919_v20  ;;  %v4481_v62 = vld [vmem:[#allocation10] sm:$0xff]  ;;  %v16982_v58 = vld [vmem:[#allocation12 + $0xae0] sm:$0xf] }
 0x3a8   : > { %v16937_v28 = vmul.f32 %v4981_v9, %v4479_v8  ;;  %17802 = vst [vmem:[#allocation34_spill] sm:$0xff] %v16939_v43  ;;  %v16956_v39 = vmul.f32 0.5, %v4910_v27  ;;  %v17042_v20 = vld [vmem:[#allocation12 + $0x8a0] sm:$0xf]  ;;  %v17044_v33 = vld [vmem:[#allocation12 + $0x8ac] sm:$0xf0] }
 0x3a9   : > { %v16969_v18 = vmul.f32 0.5, %v4920_v15  ;;  %v16990_v15 = vld [vmem:[#allocation12 + $0xbe0] sm:$0xf]  ;;  %v17109_v43 = vld [vmem:[#allocation12 + $0xa6c] sm:$0xf0] }
 0x3aa   : > { %v4995_v17 = vperm.slane %v16937_v28, 0  ;;  %v4996_v51 = vperm.slane %v16937_v28, 1  ;;  %v4997_v48 = vperm.slane %v16937_v28, 2  ;;  %v4998_v47 = vperm.slane %v16937_v28, 3  ;;  %v16954_v34 = vpop.eup %14735  ;;  %17804 = vst [vmem:[#allocation36_spill] sm:$0xff] %v16956_v39 }
 0x3ab   : > { %v4999_v52 = vperm.slane %v16937_v28, 4  ;;  %v5000_v19 = vperm.slane %v16937_v28, 5  ;;  %v5001_v11 = vperm.slane %v16937_v28, 6  ;;  %v17738_v24 = vperm.slane %v16937_v28, 7  ;;  %17803 = vst [vmem:[#allocation35_spill] sm:$0xff] %v16954_v34 }
 0x3ac   : > { %v5027_v21 = vmul.f32 %v4995_v17, %v16641_v53  ;;  %v5028_v61 = vmul.f32 %v4996_v51, %v16644_v23  ;;  %v5029_v59 = vmul.f32 %v4997_v48, %v16647_v41  ;;  %v5030_v38 = vmul.f32 %v4998_v47, %v16650_v29  ;;  %17805 = vst [vmem:[#allocation37_spill] sm:$0xff] %v16969_v18  ;;  %v17097_v18 = vld [vmem:[#allocation2 + $0x40] sm:$0xff] }
 0x3ad   : > { %v5031_v60 = vmul.f32 %v4999_v52, %v16653_v49  ;;  %v5032_v22 = vmul.f32 %v5000_v19, %v16656_v50  ;;  %v5033_v30 = vmul.f32 %v5001_v11, %v16659_v16  ;;  %v5034_v53 = vmul.f32 %v17738_v24, %v16663_v56  ;;  %v16971_v49 = vld [vmem:[#allocation12 + $0x8ec] sm:$0xf0]  ;;  %17807 = vst [vmem:[#allocation38_spill] sm:$0xff] %v17097_v18  ;;  %v17107_v31 = vld [vmem:[#allocation12 + $0xa60] sm:$0xf] }
 0x3ae   : > { %v5059_v23 = vrot.slane %v5028_v61, 7  ;;  %v5060_v41 = vrot.slane %v5029_v59, 6  ;;  %v5061_v57 = vrot.slane %v5030_v38, 5  ;;  %v4929_v50 = vmul.f32 %v16954_v34, %v16922_v2  ;;  %v16978_v56 = vld [vmem:[#allocation12 + $0x9ec] sm:$0xf0] }
 0x3af   : > { %v5062_v29 = vrot.slane %v5031_v60, 4  ;;  %v5063_v0 = vrot.slane %v5032_v22, 3  ;;  %v5064_v4 = vrot.slane %v5033_v30, 2  ;;  %v5065_v16 = vrot.slane %v5034_v53, 1  ;;  %v17000_v22 = vld [vmem:[#allocation12 + $0x8c0] sm:$0xf] }
 0x3b0   : > { %v5073_v1 = vsel %vm4968_vm9, %v5027_v21, %v5059_v23  ;;  %v5074_v6 = vsel %vm4970_vm8, %v5060_v41, %v5061_v57  ;;  %v16992_v21 = vld [vmem:[#allocation12 + $0xbec] sm:$0xf0]  ;;  %v4930_v53 = vmul.f32 %v16954_v34, %v4929_v50  ;;  %v5091_v41 = vmul.f32 %v4995_v17, %v16464_v32  ;;  %v17046_v32 = vld [vmem:[#allocation12 + $0x9a0] sm:$0xf] }
 0x3b1   : > { %v5076_v8 = vsel %vm4974_vm12, %v5062_v29, %v5063_v0  ;;  %v5075_v9 = vsel %vm4972_vm11, %v5073_v1, %v5074_v6  ;;  %v5077_v27 = vsel %vm4976_vm13, %v5064_v4, %v5065_v16  ;;  %v17002_v30 = vld [vmem:[#allocation12 + $0x8cc] sm:$0xf0]  ;;  %v5092_v0 = vmul.f32 %v4996_v51, %v16470_v35  ;;  %v17014_v1 = vld [vmem:[#allocation12 + $0x9c0] sm:$0xf] }
 0x3b2   : > { %v5078_v59 = vsel %vm4978_vm14, %v5076_v8, %v5077_v27  ;;  %v5093_v4 = vmul.f32 %v4997_v48, %v16472_v36  ;;  %v5094_v16 = vmul.f32 %v4998_v47, %v16474_v37  ;;  %v17016_v6 = vld [vmem:[#allocation12 + $0x9cc] sm:$0xf0]  ;;  %v5095_v17 = vmul.f32 %v4999_v52, %v16487_v44  ;;  %v17028_v48 = vld [vmem:[#allocation12 + $0xac0] sm:$0xf] }
 0x3b3   : > { %v5079_v23 = vsel %vm17770_vm15, %v5075_v9, %v5078_v59  ;;  %v17030_v47 = vld [vmem:[#allocation12 + $0xacc] sm:$0xf0]  ;;  %v17032_v8 = vld [vmem:[#allocation12 + $0xbc0] sm:$0xf]  ;;  %v17034_v9 = vmul.f32 0.5, %v4930_v53  ;;  %v17806_v14 = vperm.slane %v16937_v28, 7 }
 0x3b4   : > { %v17009_v29 = vsub.f32 %v4481_v62, %v5079_v23  ;;  %v5097_v62 = vmul.f32 %v5001_v11, %v16491_v46  ;;  %v17038_v46 = vld [vmem:[#allocation12 + $0xbcc] sm:$0xf0]  ;;  %v17050_v50 = vld [vmem:[#allocation12 + $0xaa0] sm:$0xf]  ;;  %v17856_v12 = vld [vmem:[#allocation37_spill] sm:$0xff] }
 0x3b5   : > { %v17048_v53 = vld [vmem:[#allocation12 + $0x9ac] sm:$0xf0]  ;;  %v17054_v57 = vld [vmem:[#allocation12 + $0xba0] sm:$0xf] }
 0x3b6   : > { %v5109_v35 = vperm.slane %v17009_v29, 0  ;;  %v5110_v36 = vperm.slane %v17009_v29, 1  ;;  %v5111_v37 = vperm.slane %v17009_v29, 2  ;;  %v5112_v51 = vperm.slane %v17009_v29, 3  ;;  %v17052_v44 = vld [vmem:[#allocation12 + $0xaac] sm:$0xf0] }
 0x3b7   : > { %v5113_v52 = vperm.slane %v17009_v29, 4  ;;  %v5115_v11 = vperm.slane %v17009_v29, 6  ;;  %v17056_v60 = vld [vmem:[#allocation12 + $0xbac] sm:$0xf0]  ;;  %v17144_v2 = vld [vmem:[#allocation12 + $0xa40] sm:$0xf] }
 0x3b8   : > { %v5141_v27 = vadd.f32 %v5109_v35, %v5091_v41  ;;  %v5142_v59 = vadd.f32 %v5110_v36, %v5092_v0  ;;  %v5143_v23 = vadd.f32 %v5111_v37, %v5093_v4  ;;  %v5144_v61 = vadd.f32 %v5112_v51, %v5094_v16  ;;  %v17058_v41 = vld [vmem:[#allocation12 + $0x880] sm:$0xf]  ;;  %v17060_v0 = vld [vmem:[#allocation12 + $0x88c] sm:$0xf0] }
 0x3b9   : > { %v17062_v4 = vadd.f32 %v5113_v52, %v5095_v17  ;;  %v17064_v16 = vadd.f32 %v5115_v11, %v5097_v62  ;;  %v5096_v35 = vmul.f32 %v5000_v19, %v16489_v45  ;;  %v5114_v36 = vperm.slane %v17009_v29, 5  ;;  %v17076_v17 = vld [vmem:[#allocation12 + $0xa8c] sm:$0xf0]  ;;  %v17082_v19 = vld [vmem:[#allocation12 + $0xb80] sm:$0xf] }
 0x3ba   : > { %v5157_v37 = vmax.f32 %v5141_v27, 0.0  ;;  %v5158_v51 = vmax.f32 %v5142_v59, 0.0  ;;  %v5159_v38 = vmax.f32 %v5143_v23, 0.0  ;;  %v5160_v24 = vmax.f32 %v5144_v61, 0.0  ;;  %v17084_v52 = vld [vmem:[#allocation12 + $0xb8c] sm:$0xf0] }
 0x3bb   : > { %v17086_v11 = vld [vmem:[#allocation12 + $0x860] sm:$0xf]  ;;  %v17088_v61 = vld [vmem:[#allocation12 + $0x86c] sm:$0xf0]  ;;  %v5146_v23 = vadd.f32 %v5114_v36, %v5096_v35  ;;  %v5098_v62 = vmul.f32 %v17806_v14, %v16504_v54  ;;  %v5161_v28 = vmax.f32 %v17062_v4, 0.0  ;;  %v5163_v4 = vmax.f32 %v17064_v16, 0.0 }
 0x3bc   : > { %v17090_v27 = vld [vmem:[#allocation12 + $0x960] sm:$0xf]  ;;  %v17092_v59 = vld [vmem:[#allocation12 + $0x96c] sm:$0xf0]  ;;  %v17099_v45 = vpack.c.bf16 %v5157_v37, %v5157_v37  ;;  %v17101_v34 = vpack.c.bf16 %v5158_v51, %v5158_v51  ;;  %v17103_v39 = vpack.c.bf16 %v5159_v38, %v5159_v38  ;;  %v17105_v3 = vpack.c.bf16 %v5160_v24, %v5160_v24 }
 0x3bd   : > { %v17113_v35 = vld [vmem:[#allocation12 + $0xb6c] sm:$0xf0]  ;;  %v5116_v38 = vperm.slane %v17009_v29, 7  ;;  %v17121_v24 = vld [vmem:[#allocation12 + $0x840] sm:$0xf]  ;;  %v5162_v51 = vmax.f32 %v5146_v23, 0.0  ;;  %v17812_v16 = vor.u32 %v16971_v49, %v16967_v7  ;;  %v17816_v49 = vor.u32 %v16984_v26, %v16982_v58 }
 0x3be   : > { %17808 = vst [vmem:[#allocation39_spill] sm:$0xff] %v17099_v45  ;;  %v17123_v36 = vld [vmem:[#allocation12 + $0x84c] sm:$0xf0]  ;;  %8269 = vmatmul.bf16.vlgmr.msra.gmra.mxu0 %v17099_v45  ;;  %8282 = vmatmul.bf16.vlgmr.msra.gmra.mxu1 %v17101_v34  ;;  %v17134_v29 = vld [vmem:[#allocation12 + $0x940] sm:$0xf]  ;;  %v4531_v7 = vrot.slane %v17097_v18, 4  ;;  %v17183_v58 = vpack.c.bf16 %v5163_v4, %v5163_v4  ;;  %v17821_v4 = vor.u32 %v17002_v30, %v17000_v22 }
 0x3bf   : > { %17809 = vst [vmem:[#allocation40_spill] sm:$0xff] %v17101_v34  ;;  %v17136_v54 = vld [vmem:[#allocation12 + $0x94c] sm:$0xf0]  ;;  %8295 = vmatmul.bf16.vlgmr.msra.gmra.mxu2 %v17103_v39  ;;  %8308 = vmatmul.bf16.vlgmr.msra.gmra.mxu3 %v17105_v3  ;;  %v5148_v45 = vadd.f32 %v5116_v38, %v5098_v62  ;;  %v17160_v23 = vld [vmem:[#allocation12 + $0xb40] sm:$0xf]  ;;  %v17822_v26 = vor.u32 %v17016_v6, %v17014_v1 }
 0x3c0   : > { %17810 = vst [vmem:[#allocation41_spill] sm:$0xff] %v17103_v39  ;;  %v17146_v14 = vld [vmem:[#allocation12 + $0xa4c] sm:$0xf0]  ;;  %8365 = vmatpush.bf16.msra.mxu0 %v17812_v16  ;;  %v17813_v39 = vor.u32 %v16978_v56, %v16976_v42  ;;  %8391 = vmatpush.bf16.msra.mxu2 %v17816_v49  ;;  %v17171_v42 = vpack.c.bf16 %v5161_v28, %v5161_v28  ;;  %v17177_v37 = vld [vmem:[#allocation2 + $0x20] sm:$0xff] }
 0x3c1   : > { %17811 = vst [vmem:[#allocation42_spill] sm:$0xff] %v17105_v3  ;;  %v17162_v38 = vld [vmem:[#allocation12 + $0xb4c] sm:$0xf0]  ;;  %v5164_v62 = vmax.f32 %v5148_v45, 0.0  ;;  %v17181_v3 = vld [vmem:[#allocation2 + $0x38] sm:$0xff]  ;;  %v17191_v28 = vpack.c.bf16 %v5162_v51, %v5162_v51  ;;  %v17824_v22 = vor.u32 %v17038_v46, %v17032_v8  ;;  %v4611_v1 = vmul.f32 %v17177_v37, %v17177_v37 }
 0x3c2   : > { %8378 = vmatpush.bf16.msra.mxu1 %v17813_v39  ;;  %17814 = vst [vmem:[#allocation43_spill] sm:$0xff] %v17160_v23  ;;  %v17817_v39 = vor.u32 %v16992_v21, %v16990_v15  ;;  %v17179_v34 = vld [vmem:[#allocation2 + $0x10] sm:$0xff]  ;;  %v4537_v15 = vrot.slane %v17177_v37, 4  ;;  %v4610_v21 = vmul.f32 %v17097_v18, %v17097_v18  ;;  %v17825_v16 = vor.u32 %v17044_v33, %v17042_v20 }
 0x3c3   : > { %17815 = vst [vmem:[#allocation44_spill] sm:$0xff] %v17162_v38  ;;  %v17193_v45 = vpack.c.bf16 %v5164_v62, %v5164_v62  ;;  %v4543_v51 = vrot.slane %v17179_v34, 4  ;;  %v4549_v62 = vrot.slane %v17181_v3, 4  ;;  %v4612_v6 = vmul.f32 %v17179_v34, %v17179_v34 }
 0x3c4   : > { %8404 = vmatpush.bf16.msra.mxu3 %v17817_v39  ;;  %17818 = vst [vmem:[#allocation45_spill] sm:$0xff] %v17177_v37  ;;  %v4532_v39 = vadd.f32 %v4531_v7, %v17097_v18  ;;  %8366 = vmatpush.bf16.msra.mxu0 %v17821_v4  ;;  %v17823_v7 = vor.u32 %v17030_v47, %v17028_v48  ;;  %v4666_v47 = vrot.slane %v4610_v21, 4  ;;  %v4672_v8 = vrot.slane %v4611_v1, 4 }
 0x3c5   : > { %17819 = vst [vmem:[#allocation46_spill] sm:$0xff] %v17179_v34  ;;  %v4538_v4 = vadd.f32 %v4537_v15, %v17177_v37  ;;  %v4544_v49 = vadd.f32 %v4543_v51, %v17179_v34  ;;  %v4550_v48 = vadd.f32 %v4549_v62, %v17181_v3  ;;  %v4678_v46 = vrot.slane %v4612_v6, 4 }
 0x3c6   : > { %17820 = vst [vmem:[#allocation47_spill] sm:$0xff] %v17181_v3  ;;  %8379 = vmatpush.bf16.msra.mxu1 %v17822_v26  ;;  %8392 = vmatpush.bf16.msra.mxu2 %v17823_v7  ;;  %v4533_v30 = vrot.slane %v4532_v39, 2  ;;  %v4613_v26 = vmul.f32 %v17181_v3, %v17181_v3  ;;  %v17826_v56 = vor.u32 %v17048_v53, %v17046_v32 }
 0x3c7   : > { %v4539_v18 = vrot.slane %v4538_v4, 2  ;;  %v4545_v23 = vrot.slane %v4544_v49, 2  ;;  %v4551_v15 = vrot.slane %v4550_v48, 2  ;;  %v4667_v37 = vadd.f32 %v4666_v47, %v4610_v21 }
 0x3c8   : > { %8405 = vmatpush.bf16.msra.mxu3 %v17824_v22  ;;  %v4534_v7 = vadd.f32 %v4533_v30, %v4532_v39  ;;  %v4684_v22 = vrot.slane %v4613_v26, 4  ;;  %8367 = vmatpush.bf16.msra.mxu0 %v17825_v16  ;;  %v17827_v51 = vor.u32 %v17052_v44, %v17050_v50  ;;  %v17828_v39 = vor.u32 %v17056_v60, %v17054_v57 }
 0x3c9   : > { %v4673_v30 = vadd.f32 %v4672_v8, %v4611_v1  ;;  %v4679_v33 = vadd.f32 %v4678_v46, %v4612_v6  ;;  %v4540_v16 = vadd.f32 %v4539_v18, %v4538_v4  ;;  %v4546_v3 = vadd.f32 %v4545_v23, %v4544_v49  ;;  %v17273_v8 = vld [vmem:[#allocation12 + $0xa20] sm:$0xf]  ;;  %v17275_v46 = vld [vmem:[#allocation12 + $0xa2c] sm:$0xf0] }
 0x3ca   : > { %8380 = vmatpush.bf16.msra.mxu1 %v17826_v56  ;;  %8393 = vmatpush.bf16.msra.mxu2 %v17827_v51  ;;  %v4535_v62 = vrot.slane %v4534_v7, 1  ;;  %v4685_v20 = vadd.f32 %v4684_v22, %v4613_v26  ;;  %v4552_v32 = vadd.f32 %v4551_v15, %v4550_v48  ;;  %v4668_v53 = vrot.slane %v4667_v37, 2 }
 0x3cb   : > { %v4674_v34 = vrot.slane %v4673_v30, 2  ;;  %v4680_v38 = vrot.slane %v4679_v33, 2  ;;  %v17829_v50 = vor.u32 %v17060_v0, %v17058_v41  ;;  %v17830_v60 = vor.u32 %v17072_v40, %v17070_v10  ;;  %v17255_v10 = vld [vmem:[#allocation12 + $0x820] sm:$0xf] }
 0x3cc   : > { %8406 = vmatpush.bf16.msra.mxu3 %v17828_v39  ;;  %v4536_v56 = vadd.f32 %v4535_v62, %v4534_v7  ;;  %v4686_v21 = vrot.slane %v4685_v20, 2  ;;  %v4541_v57 = vrot.slane %v4540_v16, 1  ;;  %v4547_v44 = vrot.slane %v4546_v3, 1  ;;  %v14367_v7 = vld [vmem:[#allocation12 + $0x92c] sm:$0xf0] }
 0x3cd   : > { %8368 = vmatpush.bf16.msra.mxu0 %v17829_v50  ;;  %v4553_v1 = vrot.slane %v4552_v32, 1  ;;  %v4669_v6 = vadd.f32 %v4668_v53, %v4667_v37  ;;  %v4932_v18 = vsub.f32 1.5, %v17034_v9  ;;  %v17831_v23 = vor.u32 %v17076_v17, %v17074_v5  ;;  %v14363_v53 = vld [vmem:[#allocation12 + $0x90c] sm:$0xf0] }
 0x3ce   : > { %8381 = vmatpush.bf16.msra.mxu1 %v17830_v60  ;;  %v17832_v49 = vor.u32 %v17084_v52, %v17082_v19  ;;  %v17250_v41 = vmul.f32 %v16632_v25, %v4536_v56  ;;  %v4675_v0 = vadd.f32 %v4674_v34, %v4673_v30  ;;  %v4681_v40 = vadd.f32 %v4680_v38, %v4679_v33  ;;  %v17260_v34 = vld [vmem:[#allocation12 + $0x82c] sm:$0xf0]  ;;  %v17262_v19 = vld [vmem:[#allocation12 + $0x920] sm:$0xf] }
 0x3cf   : > { %8394 = vmatpush.bf16.msra.mxu2 %v17831_v23  ;;  %8321 = vmatmul.bf16.vlgmr.msrb.gmra.mxu0 %v17171_v42  ;;  %v4542_v37 = vadd.f32 %v4541_v57, %v4540_v16  ;;  %v4548_v5 = vadd.f32 %v4547_v44, %v4546_v3  ;;  %v4554_v17 = vadd.f32 %v4553_v1, %v4552_v32  ;;  %v4670_v26 = vrot.slane %v4669_v6, 1  ;;  %v17304_v32 = vld [vmem:[#allocation12 + $0x900] sm:$0xf] }
 0x3d0   : > { %8407 = vmatpush.bf16.msra.mxu3 %v17832_v49  ;;  %8334 = vmatmul.bf16.vlgmr.msrb.gmra.mxu1 %v17191_v28  ;;  %v4676_v52 = vrot.slane %v4675_v0, 1  ;;  %v4682_v38 = vrot.slane %v4681_v40, 1  ;;  %v4687_v4 = vadd.f32 %v4686_v21, %v4685_v20  ;;  %v4738_v48 = vmul.f32 %v17250_v41, %v17250_v41  ;;  %v17837_v57 = vld [vmem:[#allocation32_spill] sm:$0xff] }
 0x3d1   : > { %8347 = vmatmul.bf16.vlgmr.msrb.gmra.mxu2 %v17183_v58  ;;  %8360 = vmatmul.bf16.vlgmr.msrb.gmra.mxu3 %v17193_v45  ;;  %v17833_v3 = vor.u32 %v17088_v61, %v17086_v11  ;;  %v17834_v47 = vor.u32 %v17092_v59, %v17090_v27  ;;  %v17278_v22 = vmul.f32 %v16632_v25, %v4542_v37  ;;  %v12932_v27 = vld [vmem:[#allocation12 + $0xb20] sm:$0xf]  ;;  %v14431_v59 = vld [vmem:[#allocation12 + $0xb2c] sm:$0xf0]  ;;  %vm4934_vm3 = vweird.f32 %v17837_v57 }
 0x3d2   : > { %v17281_v15 = vmul.f32 %v16632_v25, %v4548_v5  ;;  %v17284_v51 = vmul.f32 %v16632_v25, %v4554_v17  ;;  %v17835_v11 = vor.u32 %v17109_v43, %v17107_v31  ;;  %v17836_v61 = vor.u32 %v17113_v35, %v17111_v13  ;;  %v17300_v13 = vld [vmem:[#allocation12 + $0x800] sm:$0xf]  ;;  %v17302_v35 = vld [vmem:[#allocation12 + $0x80c] sm:$0xf0] }
 0x3d3   : > { %8369 = vmatpush.bf16.msra.mxu0 %v17833_v3  ;;  %8382 = vmatpush.bf16.msra.mxu1 %v17834_v47  ;;  %v4671_v39 = vadd.f32 %v4670_v26, %v4669_v6  ;;  %v4677_v62 = vadd.f32 %v4676_v52, %v4675_v0  ;;  %v4683_v30 = vadd.f32 %v4682_v38, %v4681_v40  ;;  %v4688_v33 = vrot.slane %v4687_v4, 1  ;;  %v12788_v0 = vld [vmem:[#allocation12 + $0xa00] sm:$0xf]  ;;  %v14395_v40 = vld [vmem:[#allocation12 + $0xa0c] sm:$0xf0]  ;;  %v17847_v47 = vld [vmem:[#allocation31_spill] sm:$0xff] }
 0x3d4   : > { %8395 = vmatpush.bf16.msra.mxu2 %v17835_v11  ;;  %8408 = vmatpush.bf16.msra.mxu3 %v17836_v61  ;;  %v12549_v20 = vor.u32 %v17260_v34, %v17255_v10  ;;  %v4739_v16 = vmul.f32 %v17278_v22, %v17278_v22  ;;  %v4740_v31 = vmul.f32 %v17281_v15, %v17281_v15  ;;  %v12916_v10 = vld [vmem:[#allocation12 + $0xb00] sm:$0xf]  ;;  %v17840_v37 = vld [vmem:[#allocation30_spill] sm:$0xff]  ;;  %vm4915_vm5 = vweird.f32 %v17847_v47 }
 0x3d5   : > { %v4741_v43 = vmul.f32 %v17284_v51, %v17284_v51  ;;  %v4689_v56 = vadd.f32 %v4688_v33, %v4687_v4  ;;  %v4722_v21 = vmul.f32 %v4671_v39, %v16632_v25  ;;  %v4723_v50 = vmul.f32 %v4677_v62, %v16632_v25  ;;  %v14487_v26 = vld [vmem:[#allocation12 + $0xcec] sm:$0xf0]  ;;  %v17849_v11 = vld [vmem:[#allocation36_spill] sm:$0xff]  ;;  %vm17360_vm15 = vmor %vm4914_vm1, %vm4915_vm5 }
 0x3d6   : > { %v4724_v60 = vmul.f32 %v4683_v30, %v16632_v25  ;;  %v17838_v44 = vor.u32 %v17123_v36, %v17121_v24  ;;  %v17839_v1 = vor.u32 %v17136_v54, %v17134_v29  ;;  %v12677_v6 = vor.u32 %v14367_v7, %v17262_v19  ;;  %v17842_v24 = vld [vmem:[#allocation44_spill] sm:$0xff]  ;;  %v17843_v36 = vld [vmem:[#allocation43_spill] sm:$0xff]  ;;  %v14427_v54 = vld [vmem:[#allocation12 + $0xb0c] sm:$0xf0] }
 0x3d7   : > { %v12805_v23 = vor.u32 %v17275_v46, %v17273_v8  ;;  %v12933_v49 = vor.u32 %v14431_v59, %v12932_v27  ;;  %vm4905_vm4 = vweird.f32 %v17840_v37  ;;  %v17841_v5 = vor.u32 %v17146_v14, %v17144_v2  ;;  %v13156_v29 = vld [vmem:[#allocation12 + $0xce0] sm:$0xf]  ;;  %v17845_v38 = vld [vmem:[#allocation34_spill] sm:$0xff]  ;;  %v17848_v7 = vld [vmem:[#allocation33_spill] sm:$0xff] }
 0x3d8   : > { %8370 = vmatpush.bf16.msra.mxu0 %v17838_v44  ;;  %8383 = vmatpush.bf16.msra.mxu1 %v17839_v1  ;;  %v17844_v17 = vor.u32 %v17842_v24, %v17843_v36  ;;  %v4725_v34 = vmul.f32 %v4689_v56, %v16632_v25  ;;  %v4754_v19 = vsub.f32 %v4722_v21, %v4738_v48  ;;  %v17846_v4 = vsub.f32 1.5, %v17845_v38  ;;  %v13284_v2 = vld [vmem:[#allocation12 + $0xde0] sm:$0xf]  ;;  %v14519_v14 = vld [vmem:[#allocation12 + $0xdec] sm:$0xf0]  ;;  %v17851_v30 = vld [vmem:[#allocation35_spill] sm:$0xff] }
 0x3d9   : > { %8396 = vmatpush.bf16.msra.mxu2 %v17841_v5  ;;  %v4755_v52 = vsub.f32 %v4723_v50, %v4739_v16  ;;  %vm4925_vm7 = vweird.f32 %v17848_v7  ;;  %v13412_v8 = vld [vmem:[#allocation12 + $0xee0] sm:$0xf]  ;;  %v4756_v46 = vsub.f32 %v4724_v60, %v4740_v31  ;;  %v17850_v61 = vsub.f32 1.5, %v17849_v11  ;;  %v14551_v59 = vld [vmem:[#allocation12 + $0xeec] sm:$0xf0]  ;;  %vm17349_vm10 = vmor %vm4904_vm0, %vm4905_vm4 }
 0x3da   : > { %8409 = vmatpush.bf16.msra.mxu3 %v17844_v17  ;;  %v4903_v3 = vmul.f32 %v17840_v37, %v17846_v4  ;;  %v4757_v39 = vsub.f32 %v4725_v34, %v4741_v43  ;;  %v17335_v48 = vadd.f32 1e-05, %v4754_v19  ;;  %vm4935_vm6 = vweird.f32 %v17851_v30  ;;  %v13540_v31 = vld [vmem:[#allocation12 + $0xfe0] sm:$0xf]  ;;  %v14583_v56 = vld [vmem:[#allocation12 + $0xfec] sm:$0xf0]  ;;  %vm17372_vm0 = vmor %vm4924_vm2, %vm4925_vm7 }
 0x3db   : > { %v4913_v27 = vmul.f32 %v17847_v47, %v17850_v61  ;;  %v17337_v62 = vadd.f32 1e-05, %v4755_v52  ;;  %v12533_v33 = vor.u32 %v17302_v35, %v17300_v13  ;;  %v12661_v16 = vor.u32 %v14363_v53, %v17304_v32  ;;  %vm17384_vm1 = vmor %vm4934_vm3, %vm4935_vm6  ;;  %v13140_v61 = vld [vmem:[#allocation12 + $0xcc0] sm:$0xf] }
 0x3dc   : > { %8371 = vmatpush.bf16.msra.mxu0 %v12549_v20  ;;  %8384 = vmatpush.bf16.msra.mxu1 %v12677_v6  ;;  %v17343_v21 = vadd.f32 1e-05, %v4756_v46  ;;  %v12789_v20 = vor.u32 %v14395_v40, %v12788_v0  ;;  %v12917_v50 = vor.u32 %v14427_v54, %v12916_v10  ;;  %v17353_v60 = vadd.f32 1e-05, %v4757_v39  ;;  %v13492_v46 = vld [vmem:[#allocation12 + $0xf80] sm:$0xf] }
 0x3dd   : > { %8397 = vmatpush.bf16.msra.mxu2 %v12805_v23  ;;  %14737 = vrsqrt.f32 %v17335_v48  ;;  %v17857_v35 = vsub.f32 1.5, %v17856_v12  ;;  %v13157_v53 = vor.u32 %v14487_v26, %v13156_v29  ;;  %v13285_v44 = vor.u32 %v14519_v14, %v13284_v2 }
 0x3de   : > { %8410 = vmatpush.bf16.msra.mxu3 %v12933_v49  ;;  %14739 = vrsqrt.f32 %v17337_v62  ;;  %v4933_v55 = vmul.f32 %v17851_v30, %v4932_v18  ;;  %v13413_v6 = vor.u32 %v14551_v59, %v13412_v8  ;;  %v13541_v23 = vor.u32 %v14583_v56, %v13540_v31  ;;  %v13252_v49 = vld [vmem:[#allocation12 + $0xda0] sm:$0xf]  ;;  %v14535_v56 = vld [vmem:[#allocation12 + $0xe6c] sm:$0xf0] }
 0x3df   : > { %v4923_v32 = vmul.f32 %v17848_v7, %v17857_v35  ;;  %14741 = vrsqrt.f32 %v17343_v21  ;;  %v4907_v63 = vsel %vm17349_vm10, %v17840_v37, %v4903_v3  ;;  %v4917_v9 = vsel %vm17360_vm15, %v17847_v47, %v4913_v27  ;;  %v14483_v27 = vld [vmem:[#allocation12 + $0xccc] sm:$0xf0] }
 0x3e0   : > { %8372 = vmatpush.bf16.msra.mxu0 %v12533_v33  ;;  %8385 = vmatpush.bf16.msra.mxu1 %v12661_v16  ;;  %14743 = vrsqrt.f32 %v17353_v60  ;;  %v4937_v0 = vsel %vm17384_vm1, %v17851_v30, %v4933_v55  ;;  %v4964_v5 = vrot.slane %v4907_v63, 4  ;;  %v4965_v24 = vrot.slane %v4917_v9, 3  ;;  %v13268_v30 = vld [vmem:[#allocation12 + $0xdc0] sm:$0xf]  ;;  %v14515_v33 = vld [vmem:[#allocation12 + $0xdcc] sm:$0xf0] }
 0x3e1   : > { %8398 = vmatpush.bf16.msra.mxu2 %v12789_v20  ;;  %v4927_v57 = vsel %vm17372_vm0, %v17848_v7, %v4923_v32  ;;  %v4967_v29 = vrot.slane %v4937_v0, 1  ;;  %vm4864_vm15 = vweird.f32 %v17335_v48  ;;  %vm4874_vm3 = vweird.f32 %v17337_v62  ;;  %v13396_v20 = vld [vmem:[#allocation12 + $0xec0] sm:$0xf]  ;;  %v14511_v63 = vld [vmem:[#allocation12 + $0xdac] sm:$0xf0] }
 0x3e2   : > { %8411 = vmatpush.bf16.msra.mxu3 %v12917_v50  ;;  %v4966_v54 = vrot.slane %v4927_v57, 2  ;;  %vm4884_vm5 = vweird.f32 %v17343_v21  ;;  %vm4894_vm10 = vweird.f32 %v17353_v60  ;;  %v13269_v43 = vor.u32 %v14515_v33, %v13268_v30  ;;  %v14547_v50 = vld [vmem:[#allocation12 + $0xecc] sm:$0xf0]  ;;  %v13524_v32 = vld [vmem:[#allocation12 + $0xfc0] sm:$0xf] }
 0x3e3   : > { %v17395_v18 = vpop.eup %14737  ;;  %v13397_v35 = vor.u32 %v14547_v50, %v13396_v20  ;;  %v13476_v50 = vld [vmem:[#allocation12 + $0xf60] sm:$0xf] }
 0x3e4   : > { %8417 = vmatpush.bf16.msrb.mxu0 %v13157_v53  ;;  %8430 = vmatpush.bf16.msrb.mxu1 %v13285_v44  ;;  %v17403_v40 = vpop.eup %14739  ;;  %v4859_v10 = vmul.f32 %v17395_v18, %v17335_v48  ;;  %vm4865_vm2 = vweird.f32 %v17395_v18  ;;  %v4986_v13 = vsel %vm4976_vm13, %v4966_v54, %v4967_v29  ;;  %v14579_v53 = vld [vmem:[#allocation12 + $0xfcc] sm:$0xf0]  ;;  %v13124_v44 = vld [vmem:[#allocation12 + $0xca0] sm:$0xf] }
 0x3e5   : > { %8443 = vmatpush.bf16.msrb.mxu2 %v13413_v6  ;;  %v17407_v37 = vpop.eup %14741  ;;  %v4869_v36 = vmul.f32 %v17403_v40, %v17337_v62  ;;  %vm4875_vm4 = vweird.f32 %v17403_v40  ;;  %vm17427_vm6 = vmor %vm4864_vm15, %vm4865_vm2  ;;  %v13141_v62 = vor.u32 %v14483_v27, %v13140_v61  ;;  %v13525_v6 = vor.u32 %v14579_v53, %v13524_v32  ;;  %v13508_v54 = vld [vmem:[#allocation12 + $0xfa0] sm:$0xf]  ;;  %v14575_v29 = vld [vmem:[#allocation12 + $0xfac] sm:$0xf0] }
 0x3e6   : > { %8456 = vmatpush.bf16.msrb.mxu3 %v13541_v23  ;;  %v17411_v17 = vpop.eup %14743  ;;  %v4860_v26 = vmul.f32 %v17395_v18, %v4859_v10  ;;  %v4879_v34 = vmul.f32 %v17407_v37, %v17343_v21  ;;  %vm4885_vm7 = vweird.f32 %v17407_v37  ;;  %vm17433_vm1 = vmor %vm4874_vm3, %vm4875_vm4  ;;  %v4985_v21 = vsel %vm4974_vm12, %v4964_v5, %v4965_v24  ;;  %v14479_v23 = vld [vmem:[#allocation12 + $0xcac] sm:$0xf0] }
 0x3e7   : > { %v4870_v19 = vmul.f32 %v17403_v40, %v4869_v36  ;;  %v4889_v52 = vmul.f32 %v17411_v17, %v17353_v60  ;;  %vm4895_vm0 = vweird.f32 %v17411_v17  ;;  %vm17440_vm15 = vmor %vm4884_vm5, %vm4885_vm7  ;;  %v13125_v0 = vor.u32 %v14479_v23, %v13124_v44  ;;  %v14543_v5 = vld [vmem:[#allocation12 + $0xeac] sm:$0xf0] }
 0x3e8   : > { %v4861_v38 = vmul.f32 0.5, %v4860_v26  ;;  %v4880_v4 = vmul.f32 %v17407_v37, %v4879_v34  ;;  %vm17447_vm2 = vmor %vm4894_vm10, %vm4895_vm0  ;;  %8418 = vmatpush.bf16.msrb.mxu0 %v13141_v62  ;;  %8431 = vmatpush.bf16.msrb.mxu1 %v13269_v43  ;;  %v13253_v10 = vor.u32 %v14511_v63, %v13252_v49  ;;  %v4480_v26 = vld [vmem:[#allocation9 + $0x8] sm:$0xff]  ;;  %v14471_v48 = vld [vmem:[#allocation12 + $0xc6c] sm:$0xf0]  ;;  %vm17870_vm3 = vcmask 1043456  }
 0x3e9   : > { %v4871_v3 = vmul.f32 0.5, %v4870_v19  ;;  %v4890_v47 = vmul.f32 %v17411_v17, %v4889_v52  ;;  %8444 = vmatpush.bf16.msrb.mxu2 %v13397_v35  ;;  %v13108_v52 = vld [vmem:[#allocation12 + $0xc80] sm:$0xf]  ;;  %vm17876_vm4 = vmmov %vm17870_vm3 }
 0x3ea   : > { %v4862_v7 = vsub.f32 1.5, %v4861_v38  ;;  %v4881_v14 = vmul.f32 0.5, %v4880_v4  ;;  %8457 = vmatpush.bf16.msrb.mxu3 %v13525_v6  ;;  %v14475_v38 = vld [vmem:[#allocation12 + $0xc8c] sm:$0xf0]  ;;  %v4987_v4 = vsel %vm4978_vm14, %v4985_v21, %v4986_v13  ;;  %v13220_v62 = vld [vmem:[#allocation12 + $0xd60] sm:$0xf] }
 0x3eb   : > { %v4872_v8 = vsub.f32 1.5, %v4871_v3  ;;  %v4891_v11 = vmul.f32 0.5, %v4890_v47  ;;  %v13109_v3 = vor.u32 %v14475_v38, %v13108_v52  ;;  %v13236_v47 = vld [vmem:[#allocation12 + $0xd80] sm:$0xf]  ;;  %v14567_v21 = vld [vmem:[#allocation12 + $0xf6c] sm:$0xf0] }
 0x3ec   : > { %v4863_v59 = vmul.f32 %v17395_v18, %v4862_v7  ;;  %v4882_v39 = vsub.f32 1.5, %v4881_v14  ;;  %8419 = vmatpush.bf16.msrb.mxu0 %v13125_v0  ;;  %8432 = vmatpush.bf16.msrb.mxu1 %v13253_v10  ;;  %v14507_v7 = vld [vmem:[#allocation12 + $0xd8c] sm:$0xf0]  ;;  %v17872_v10 = vld [vmem:[#allocation27_spill] sm:$0xff] }
 0x3ed   : > { %v4873_v16 = vmul.f32 %v17403_v40, %v4872_v8  ;;  %v4892_v31 = vsub.f32 1.5, %v4891_v11  ;;  %v13237_v14 = vor.u32 %v14507_v7, %v13236_v47  ;;  %v14539_v8 = vld [vmem:[#allocation12 + $0xe8c] sm:$0xf0]  ;;  %v13460_v47 = vld [vmem:[#allocation12 + $0xf40] sm:$0xf] }
 0x3ee   : > { %v4883_v12 = vmul.f32 %v17407_v37, %v4882_v39  ;;  %v4867_v60 = vsel %vm17427_vm6, %v17395_v18, %v4863_v59  ;;  %v13380_v18 = vld [vmem:[#allocation12 + $0xea0] sm:$0xf]  ;;  %v14571_v11 = vld [vmem:[#allocation12 + $0xf8c] sm:$0xf0] }
 0x3ef   : > { %v4877_v1 = vsel %vm17433_vm1, %v17403_v40, %v4873_v16  ;;  %v4893_v55 = vmul.f32 %v17411_v17, %v4892_v31  ;;  %v13381_v36 = vor.u32 %v14543_v5, %v13380_v18  ;;  %v13493_v59 = vor.u32 %v14571_v11, %v13492_v46  ;;  %v13092_v39 = vld [vmem:[#allocation12 + $0xc60] sm:$0xf]  ;;  %v14503_v16 = vld [vmem:[#allocation12 + $0xd6c] sm:$0xf0] }
 0x3f0   : > { %v4887_v9 = vsel %vm17440_vm15, %v17407_v37, %v4883_v12  ;;  %v4961_v57 = vrot.slane %v4877_v1, 7  ;;  %v13509_v37 = vor.u32 %v14575_v29, %v13508_v54  ;;  %8420 = vmatpush.bf16.msrb.mxu0 %v13109_v3  ;;  %v13093_v33 = vor.u32 %v14471_v48, %v13092_v39  ;;  %v13348_v31 = vld [vmem:[#allocation12 + $0xe60] sm:$0xf]  ;;  %8433 = vmatpush.bf16.msrb.mxu1 %v13237_v14  ;;  %v14495_v48 = vld [vmem:[#allocation12 + $0xd2c] sm:$0xf0] }
 0x3f1   : > { %v4897_v40 = vsel %vm17447_vm2, %v17411_v17, %v4893_v55  ;;  %v4962_v24 = vrot.slane %v4887_v9, 6  ;;  %v13364_v17 = vld [vmem:[#allocation12 + $0xe80] sm:$0xf]  ;;  %8445 = vmatpush.bf16.msrb.mxu2 %v13381_v36  ;;  %v13221_v20 = vor.u32 %v14503_v16, %v13220_v62  ;;  %v13349_v13 = vor.u32 %v14535_v56, %v13348_v31  ;;  %v14499_v36 = vld [vmem:[#allocation12 + $0xd4c] sm:$0xf0] }
 0x3f2   : > { %v4963_v34 = vrot.slane %v4897_v40, 5  ;;  %v4982_v19 = vsel %vm4968_vm9, %v4867_v60, %v4961_v57  ;;  %8458 = vmatpush.bf16.msrb.mxu3 %v13509_v37  ;;  %v13365_v27 = vor.u32 %v14539_v8, %v13364_v17  ;;  %v13477_v12 = vor.u32 %v14567_v21, %v13476_v50  ;;  %v17871_v57 = vld [vmem:[#allocation26_spill] sm:$0xff]  ;;  %v17873_v5 = vld [vmem:[#allocation28_spill] sm:$0xff] }
 0x3f3   : > { %v13332_v54 = vld [vmem:[#allocation12 + $0xe40] sm:$0xf]  ;;  %v4482_v37 = vld [vmem:[#allocation10 + $0x8] sm:$0xff]  ;;  %v14463_v8 = vld [vmem:[#allocation12 + $0xc2c] sm:$0xf0] }
 0x3f4   : > { %v4983_v2 = vsel %vm4970_vm8, %v4962_v24, %v4963_v34  ;;  %8421 = vmatpush.bf16.msrb.mxu0 %v13093_v33  ;;  %8434 = vmatpush.bf16.msrb.mxu1 %v13221_v20  ;;  %v13204_v24 = vld [vmem:[#allocation12 + $0xd40] sm:$0xf]  ;;  %v14527_v56 = vld [vmem:[#allocation12 + $0xe2c] sm:$0xf0] }
 0x3f5   : > { %v4984_v61 = vsel %vm4972_vm11, %v4982_v19, %v4983_v2  ;;  %8446 = vmatpush.bf16.msrb.mxu2 %v13365_v27  ;;  %v14531_v19 = vld [vmem:[#allocation12 + $0xe4c] sm:$0xf0]  ;;  %v13060_v14 = vld [vmem:[#allocation12 + $0xc20] sm:$0xf]  ;;  %v13205_v16 = vor.u32 %v14499_v36, %v13204_v24 }
 0x3f6   : > { %v4988_v30 = vsel %vm17870_vm3, %v4984_v61, %v4987_v4  ;;  %8459 = vmatpush.bf16.msrb.mxu3 %v13493_v59  ;;  %v14563_v2 = vld [vmem:[#allocation12 + $0xf4c] sm:$0xf0]  ;;  %v13188_v39 = vld [vmem:[#allocation12 + $0xd20] sm:$0xf]  ;;  %v13333_v31 = vor.u32 %v14531_v19, %v13332_v54 }
 0x3f7   : > { %v17472_v43 = vmul.f32 %v4988_v30, %v4480_v26  ;;  %v17875_v27 = vld [vmem:[#allocation38_spill] sm:$0xff]  ;;  %v13316_v62 = vld [vmem:[#allocation12 + $0xe20] sm:$0xf] }
 0x3f8   : > { %v13444_v20 = vld [vmem:[#allocation12 + $0xf20] sm:$0xf]  ;;  %v14559_v50 = vld [vmem:[#allocation12 + $0xf2c] sm:$0xf0]  ;;  %8435 = vmatpush.bf16.msrb.mxu1 %v13205_v16 }
 0x3f9   : > { %v5003_v35 = vperm.slane %v17472_v43, 0  ;;  %v5004_v32 = vperm.slane %v17472_v43, 1  ;;  %v5005_v53 = vperm.slane %v17472_v43, 2  ;;  %v5006_v44 = vperm.slane %v17472_v43, 3  ;;  %8447 = vmatpush.bf16.msrb.mxu2 %v13349_v13  ;;  %v17877_v13 = vld [vmem:[#allocation46_spill] sm:$0xff] }
 0x3fa   : > { %v5007_v60 = vperm.slane %v17472_v43, 4  ;;  %v5008_v1 = vperm.slane %v17472_v43, 5  ;;  %v5009_v55 = vperm.slane %v17472_v43, 6  ;;  %v5010_v6 = vperm.slane %v17472_v43, 7  ;;  %8460 = vmatpush.bf16.msrb.mxu3 %v13477_v12  ;;  %v14523_v36 = vld [vmem:[#allocation12 + $0xe0c] sm:$0xf0] }
 0x3fb   : > { %v5035_v23 = vmul.f32 %v5003_v35, %v17250_v41  ;;  %v5036_v49 = vmul.f32 %v5004_v32, %v17278_v22  ;;  %v5037_v63 = vmul.f32 %v5005_v53, %v17281_v15  ;;  %v5038_v9 = vmul.f32 %v5006_v44, %v17284_v51  ;;  %v17874_v41 = vld [vmem:[#allocation29_spill] sm:$0xff]  ;;  %v13076_v15 = vld [vmem:[#allocation12 + $0xc40] sm:$0xf]  ;;  %v14467_v51 = vld [vmem:[#allocation12 + $0xc4c] sm:$0xf0] }
 0x3fc   : > { %v5039_v0 = vmul.f32 %v5007_v60, %v17871_v57  ;;  %v5040_v18 = vmul.f32 %v5008_v1, %v17872_v10  ;;  %v5041_v40 = vmul.f32 %v5009_v55, %v17873_v5  ;;  %v5042_v22 = vmul.f32 %v5010_v6, %v17874_v41  ;;  %v13044_v10 = vld [vmem:[#allocation12 + $0xc00] sm:$0xf]  ;;  %v11718_v43 = vld [vmem:[#allocation12 + $0x1b0] sm:$0xf0] }
 0x3fd   : > { %v5066_v29 = vrot.slane %v5036_v49, 7  ;;  %v5067_v26 = vrot.slane %v5037_v63, 6  ;;  %v5068_v34 = vrot.slane %v5038_v9, 5  ;;  %v5099_v59 = vmul.f32 %v5003_v35, %v17875_v27  ;;  %v17879_v35 = vld [vmem:[#allocation47_spill] sm:$0xff]  ;;  %8448 = vmatpush.bf16.msrb.mxu2 %v13333_v31 }
 0x3fe   : > { %v5069_v52 = vrot.slane %v5039_v0, 4  ;;  %v5070_v38 = vrot.slane %v5040_v18, 3  ;;  %v5071_v4 = vrot.slane %v5041_v40, 2  ;;  %v5072_v3 = vrot.slane %v5042_v22, 1  ;;  %v14459_v18 = vld [vmem:[#allocation12 + $0xc0c] sm:$0xf0] }
 0x3ff   : > { %v5080_v7 = vsel %vm4968_vm9, %v5035_v23, %v5066_v29  ;;  %v5081_v17 = vsel %vm4970_vm8, %v5067_v26, %v5068_v34  ;;  %v13077_v33 = vor.u32 %v14467_v51, %v13076_v15  ;;  %v5101_v12 = vmul.f32 %v5005_v53, %v17877_v13  ;;  %v17878_v23 = vld [vmem:[#allocation45_spill] sm:$0xff]  ;;  %v13172_v22 = vld [vmem:[#allocation12 + $0xd00] sm:$0xf]  ;;  %v14491_v15 = vld [vmem:[#allocation12 + $0xd0c] sm:$0xf0] }
 0x400   : > { %v5082_v46 = vsel %vm4972_vm11, %v5080_v7, %v5081_v17  ;;  %v5083_v11 = vsel %vm4974_vm12, %v5069_v52, %v5070_v38  ;;  %v5084_v61 = vsel %vm4976_vm13, %v5071_v4, %v5072_v3  ;;  %v5100_v49 = vmul.f32 %v5004_v32, %v17878_v23  ;;  %v13300_v53 = vld [vmem:[#allocation12 + $0xe00] sm:$0xf]  ;;  %v14555_v52 = vld [vmem:[#allocation12 + $0xf0c] sm:$0xf0]  ;;  %v14101_v38 = vld [vmem:[#allocation12 + $0xe4] sm:$0xf] }
 0x401   : > { %v5085_v30 = vsel %vm4978_vm14, %v5083_v11, %v5084_v61  ;;  %v13461_v63 = vor.u32 %v14563_v2, %v13460_v47  ;;  %v5102_v57 = vmul.f32 %v5006_v44, %v17879_v35  ;;  %8422 = vmatpush.bf16.msrb.mxu0 %v13077_v33  ;;  %v13061_v0 = vor.u32 %v14463_v8, %v13060_v14  ;;  %v13428_v29 = vld [vmem:[#allocation12 + $0xf00] sm:$0xf]  ;;  %v11622_v4 = vld [vmem:[#allocation12 + $0xf0] sm:$0xf0]  ;;  %v14133_v7 = vld [vmem:[#allocation12 + $0x1e4] sm:$0xf] }
 0x402   : > { %v5086_v21 = vsel %vm17876_vm4, %v5082_v46, %v5085_v30  ;;  %v13189_v5 = vor.u32 %v14495_v48, %v13188_v39  ;;  %v13317_v40 = vor.u32 %v14527_v56, %v13316_v62  ;;  %v13445_v41 = vor.u32 %v14559_v50, %v13444_v20  ;;  %v11750_v17 = vld [vmem:[#allocation12 + $0x1f0] sm:$0xf0]  ;;  %v14165_v2 = vld [vmem:[#allocation12 + $0x2e4] sm:$0xf] }
 0x403   : > { %v17508_v9 = vsub.f32 %v4482_v37, %v5086_v21  ;;  %8461 = vmatpush.bf16.msrb.mxu3 %v13461_v63  ;;  %v13045_v54 = vor.u32 %v14459_v18, %v13044_v10  ;;  %v13173_v3 = vor.u32 %v14491_v15, %v13172_v22  ;;  %v13301_v47 = vor.u32 %v14523_v36, %v13300_v53  ;;  %v11878_v61 = vld [vmem:[#allocation12 + $0x2f0] sm:$0xf0]  ;;  %v14197_v39 = vld [vmem:[#allocation12 + $0x3e4] sm:$0xf] }
 0x404   : > { %8436 = vmatpush.bf16.msrb.mxu1 %v13189_v5  ;;  %8449 = vmatpush.bf16.msrb.mxu2 %v13317_v40  ;;  %v13429_v27 = vor.u32 %v14555_v52, %v13428_v29  ;;  %v12006_v48 = vld [vmem:[#allocation12 + $0x3f0] sm:$0xf0]  ;;  %v14753_v62 = vld [vmem:[#allocation2 + $0x60] sm:$0xff]  ;;  %v11753_v21 = vor.u32 %v14133_v7, %v11750_v17  ;;  %v11881_v13 = vor.u32 %v14165_v2, %v11878_v61  ;;  %v14756_v40 = vld [vmem:[#allocation2 + $0x28] sm:$0xff] }
 0x405   : > { %v5117_v32 = vperm.slane %v17508_v9, 0  ;;  %v5119_v51 = vperm.slane %v17508_v9, 2  ;;  %v5118_v24 = vperm.slane %v17508_v9, 1  ;;  %v5120_v44 = vperm.slane %v17508_v9, 3  ;;  %8423 = vmatpush.bf16.msrb.mxu0 %v13061_v0  ;;  %v14097_v50 = vld [vmem:[#allocation12 + $0xc4] sm:$0xf] }
 0x406   : > { %v5103_v30 = vmul.f32 %v14753_v62, %v5007_v60  ;;  %v5121_v33 = vperm.slane %v17508_v9, 4  ;;  %v5123_v23 = vperm.slane %v17508_v9, 6  ;;  %v14129_v63 = vld [vmem:[#allocation12 + $0x1c4] sm:$0xf]  ;;  %v12009_v35 = vor.u32 %v14197_v39, %v12006_v48  ;;  %v11862_v10 = vld [vmem:[#allocation12 + $0x2d0] sm:$0xf0] }
 0x407   : > { %v5149_v26 = vadd.f32 %v5117_v32, %v5099_v59  ;;  %v5151_v34 = vadd.f32 %v5119_v51, %v5101_v12  ;;  %v5150_v19 = vadd.f32 %v5118_v24, %v5100_v49  ;;  %v5152_v37 = vadd.f32 %v5120_v44, %v5102_v57  ;;  %8462 = vmatpush.bf16.msrb.mxu3 %v13445_v41  ;;  %v14754_v12 = vld [vmem:[#allocation2 + $0x78] sm:$0xff]  ;;  %v14161_v0 = vld [vmem:[#allocation12 + $0x2c4] sm:$0xf]  ;;  %v14755_v18 = vld [vmem:[#allocation2 + $0x70] sm:$0xff] }
 0x408   : > { %v11625_v59 = vor.u32 %v14101_v38, %v11622_v4  ;;  %8437 = vmatpush.bf16.msrb.mxu1 %v13173_v3  ;;  %8450 = vmatpush.bf16.msrb.mxu2 %v13301_v47  ;;  %v5105_v60 = vmul.f32 %v14754_v12, %v5009_v55  ;;  %v11606_v49 = vld [vmem:[#allocation12 + $0xd0] sm:$0xf0]  ;;  %v5104_v55 = vmul.f32 %v14755_v18, %v5008_v1  ;;  %v5122_v5 = vperm.slane %v17508_v9, 5  ;;  %v14193_v15 = vld [vmem:[#allocation12 + $0x3c4] sm:$0xf] }
 0x409   : > { %v5165_v14 = vmax.f32 %v5149_v26, 0.0  ;;  %v5167_v8 = vmax.f32 %v5151_v34, 0.0  ;;  %v5166_v46 = vmax.f32 %v5150_v19, 0.0  ;;  %v5168_v11 = vmax.f32 %v5152_v37, 0.0  ;;  %8424 = vmatpush.bf16.msrb.mxu0 %v13045_v54  ;;  %v11734_v57 = vld [vmem:[#allocation12 + $0x1d0] sm:$0xf0] }
 0x40a   : > { %v5106_v41 = vmul.f32 %v14756_v40, %v5010_v6  ;;  %v5124_v22 = vperm.slane %v17508_v9, 7  ;;  %v11990_v53 = vld [vmem:[#allocation12 + $0x3d0] sm:$0xf0]  ;;  %v5153_v32 = vadd.f32 %v5121_v33, %v5103_v30  ;;  %v11609_v51 = vor.u32 %v14097_v50, %v11606_v49  ;;  %v14093_v1 = vld [vmem:[#allocation12 + $0xa4] sm:$0xf] }
 0x40b   : > { %v17518_v16 = vpack.c.bf16 %v5165_v14, %v5165_v14  ;;  %v17520_v31 = vpack.c.bf16 %v5167_v8, %v5167_v8  ;;  %v17522_v56 = vpack.c.bf16 %v5166_v46, %v5166_v46  ;;  %v17524_v20 = vpack.c.bf16 %v5168_v11, %v5168_v11  ;;  %8463 = vmatpush.bf16.msrb.mxu3 %v13429_v27  ;;  %v11590_v54 = vld [vmem:[#allocation12 + $0xb0] sm:$0xf0]  ;;  %v14125_v29 = vld [vmem:[#allocation12 + $0x1a4] sm:$0xf] }
 0x40c   : > { %v5155_v24 = vadd.f32 %v5123_v23, %v5105_v60  ;;  %v11737_v44 = vor.u32 %v14129_v63, %v11734_v57  ;;  %v11865_v36 = vor.u32 %v14161_v0, %v11862_v10  ;;  %v11993_v26 = vor.u32 %v14193_v15, %v11990_v53  ;;  %v14157_v6 = vld [vmem:[#allocation12 + $0x2a4] sm:$0xf]  ;;  %v11846_v34 = vld [vmem:[#allocation12 + $0x2b0] sm:$0xf0] }
 0x40d   : > { %8373 = vmatmul.bf16.vlgmr.msra.gmra.mxu0 %v17518_v16  ;;  %8399 = vmatmul.bf16.vlgmr.msra.gmra.mxu2 %v17520_v31  ;;  %v5154_v9 = vadd.f32 %v5122_v5, %v5104_v55  ;;  %v5156_v19 = vadd.f32 %v5124_v22, %v5106_v41  ;;  %v14189_v37 = vld [vmem:[#allocation12 + $0x3a4] sm:$0xf]  ;;  %v11974_v52 = vld [vmem:[#allocation12 + $0x3b0] sm:$0xf0]  ;;  %v11593_v38 = vor.u32 %v14093_v1, %v11590_v54  ;;  %v5169_v3 = vmax.f32 %v5153_v32, 0.0 }
 0x40e   : > { %8386 = vmatmul.bf16.vlgmr.msra.gmra.mxu1 %v17522_v56  ;;  %8412 = vmatmul.bf16.vlgmr.msra.gmra.mxu3 %v17524_v20  ;;  %v14089_v4 = vld [vmem:[#allocation12 + $0x84] sm:$0xf]  ;;  %v5171_v47 = vmax.f32 %v5155_v24, 0.0  ;;  %v11721_v7 = vor.u32 %v14125_v29, %v11718_v43  ;;  %v11849_v17 = vor.u32 %v14157_v6, %v11846_v34  ;;  %v11574_v2 = vld [vmem:[#allocation12 + $0x90] sm:$0xf0]  ;;  %v11977_v8 = vor.u32 %v14189_v37, %v11974_v52 }
 0x40f   : > { %8469 = vmatpush.bf16.msra.mxu0 %v11625_v59  ;;  %8482 = vmatpush.bf16.msra.mxu1 %v11753_v21  ;;  %v14121_v14 = vld [vmem:[#allocation12 + $0x184] sm:$0xf]  ;;  %v11702_v46 = vld [vmem:[#allocation12 + $0x190] sm:$0xf0]  ;;  %v5170_v27 = vmax.f32 %v5154_v9, 0.0  ;;  %v5172_v59 = vmax.f32 %v5156_v19, 0.0  ;;  %v11577_v39 = vor.u32 %v14089_v4, %v11574_v2  ;;  %v17539_v12 = vpack.c.bf16 %v5169_v3, %v5169_v3 }
 0x410   : > { %8495 = vmatpush.bf16.msra.mxu2 %v11881_v13  ;;  %8508 = vmatpush.bf16.msra.mxu3 %v12009_v35  ;;  %v14153_v11 = vld [vmem:[#allocation12 + $0x284] sm:$0xf]  ;;  %v11830_v61 = vld [vmem:[#allocation12 + $0x290] sm:$0xf0]  ;;  %v11705_v30 = vor.u32 %v14121_v14, %v11702_v46  ;;  %v17541_v60 = vpack.c.bf16 %v5171_v47, %v5171_v47 }
 0x411   : > { %v14185_v48 = vld [vmem:[#allocation12 + $0x384] sm:$0xf]  ;;  %v11958_v62 = vld [vmem:[#allocation12 + $0x390] sm:$0xf0]  ;;  %v11833_v33 = vor.u32 %v14153_v11, %v11830_v61  ;;  %v17543_v35 = vpack.c.bf16 %v5170_v27, %v5170_v27  ;;  %v17545_v57 = vpack.c.bf16 %v5172_v59, %v5172_v59 }
 0x412   : > { %v14085_v50 = vld [vmem:[#allocation12 + $0x64] sm:$0xf]  ;;  %v11558_v21 = vld [vmem:[#allocation12 + $0x70] sm:$0xf0]  ;;  %v11961_v0 = vor.u32 %v14185_v48, %v11958_v62 }
 0x413   : > { %8470 = vmatpush.bf16.msra.mxu0 %v11609_v51  ;;  %8483 = vmatpush.bf16.msra.mxu1 %v11737_v44  ;;  %v14117_v13 = vld [vmem:[#allocation12 + $0x164] sm:$0xf]  ;;  %v11686_v23 = vld [vmem:[#allocation12 + $0x170] sm:$0xf0]  ;;  %v11561_v10 = vor.u32 %v14085_v50, %v11558_v21 }
 0x414   : > { %8496 = vmatpush.bf16.msra.mxu2 %v11865_v36  ;;  %8509 = vmatpush.bf16.msra.mxu3 %v11993_v26  ;;  %v14149_v49 = vld [vmem:[#allocation12 + $0x264] sm:$0xf]  ;;  %v11814_v63 = vld [vmem:[#allocation12 + $0x270] sm:$0xf0]  ;;  %v11689_v5 = vor.u32 %v14117_v13, %v11686_v23 }
 0x415   : > { %v14181_v18 = vld [vmem:[#allocation12 + $0x364] sm:$0xf]  ;;  %v11942_v55 = vld [vmem:[#allocation12 + $0x370] sm:$0xf0]  ;;  %v11817_v40 = vor.u32 %v14149_v49, %v11814_v63 }
 0x416   : > { %v14081_v41 = vld [vmem:[#allocation12 + $0x44] sm:$0xf]  ;;  %v11542_v22 = vld [vmem:[#allocation12 + $0x50] sm:$0xf0]  ;;  %v11945_v24 = vor.u32 %v14181_v18, %v11942_v55 }
 0x417   : > { %8471 = vmatpush.bf16.msra.mxu0 %v11593_v38  ;;  %8484 = vmatpush.bf16.msra.mxu1 %v11721_v7  ;;  %v14113_v15 = vld [vmem:[#allocation12 + $0x144] sm:$0xf]  ;;  %v11670_v53 = vld [vmem:[#allocation12 + $0x150] sm:$0xf0]  ;;  %v11545_v44 = vor.u32 %v14081_v41, %v11542_v22 }
 0x418   : > { %8497 = vmatpush.bf16.msra.mxu2 %v11849_v17  ;;  %8510 = vmatpush.bf16.msra.mxu3 %v11977_v8  ;;  %v14145_v32 = vld [vmem:[#allocation12 + $0x244] sm:$0xf]  ;;  %v11798_v51 = vld [vmem:[#allocation12 + $0x250] sm:$0xf0]  ;;  %v11673_v54 = vor.u32 %v14113_v15, %v11670_v53 }
 0x419   : > { %v14177_v36 = vld [vmem:[#allocation12 + $0x344] sm:$0xf]  ;;  %v11926_v1 = vld [vmem:[#allocation12 + $0x350] sm:$0xf0]  ;;  %v11801_v29 = vor.u32 %v14145_v32, %v11798_v51 }
 0x41a   : > { %v14077_v26 = vld [vmem:[#allocation12 + $0x24] sm:$0xf]  ;;  %v11526_v43 = vld [vmem:[#allocation12 + $0x30] sm:$0xf0]  ;;  %v11929_v37 = vor.u32 %v14177_v36, %v11926_v1 }
 0x41b   : > { %8472 = vmatpush.bf16.msra.mxu0 %v11577_v39  ;;  %8485 = vmatpush.bf16.msra.mxu1 %v11705_v30  ;;  %v14109_v6 = vld [vmem:[#allocation12 + $0x124] sm:$0xf]  ;;  %v11654_v34 = vld [vmem:[#allocation12 + $0x130] sm:$0xf0]  ;;  %v11529_v52 = vor.u32 %v14077_v26, %v11526_v43 }
 0x41c   : > { %8498 = vmatpush.bf16.msra.mxu2 %v11833_v33  ;;  %8511 = vmatpush.bf16.msra.mxu3 %v11961_v0  ;;  %v14141_v9 = vld [vmem:[#allocation12 + $0x224] sm:$0xf]  ;;  %v11782_v19 = vld [vmem:[#allocation12 + $0x230] sm:$0xf0]  ;;  %v11657_v47 = vor.u32 %v14109_v6, %v11654_v34 }
 0x41d   : > { %8425 = vmatmul.bf16.vlgmr.msrb.gmra.mxu0 %v17539_v12  ;;  %8451 = vmatmul.bf16.vlgmr.msrb.gmra.mxu2 %v17541_v60  ;;  %v14173_v38 = vld [vmem:[#allocation12 + $0x324] sm:$0xf]  ;;  %v11910_v4 = vld [vmem:[#allocation12 + $0x330] sm:$0xf0]  ;;  %v11785_v7 = vor.u32 %v14141_v9, %v11782_v19 }
 0x41e   : > { %8438 = vmatmul.bf16.vlgmr.msrb.gmra.mxu1 %v17543_v35  ;;  %8464 = vmatmul.bf16.vlgmr.msrb.gmra.mxu3 %v17545_v57  ;;  %v14073_v3 = vld [vmem:[#allocation12 + $0x4] sm:$0xf]  ;;  %v11510_v17 = vld [vmem:[#allocation12 + $0x10] sm:$0xf0]  ;;  %v11913_v39 = vor.u32 %v14173_v38, %v11910_v4 }
 0x41f   : > { %8473 = vmatpush.bf16.msra.mxu0 %v11561_v10  ;;  %8486 = vmatpush.bf16.msra.mxu1 %v11689_v5  ;;  %v14105_v2 = vld [vmem:[#allocation12 + $0x104] sm:$0xf]  ;;  %v11638_v14 = vld [vmem:[#allocation12 + $0x110] sm:$0xf0]  ;;  %v11513_v48 = vor.u32 %v14073_v3, %v11510_v17 }
 0x420   : > { %8499 = vmatpush.bf16.msra.mxu2 %v11817_v40  ;;  %8512 = vmatpush.bf16.msra.mxu3 %v11945_v24  ;;  %v14137_v8 = vld [vmem:[#allocation12 + $0x204] sm:$0xf]  ;;  %v11766_v46 = vld [vmem:[#allocation12 + $0x210] sm:$0xf0]  ;;  %v11641_v33 = vor.u32 %v14105_v2, %v11638_v14 }
 0x421   : > { %v14229_v11 = vld [vmem:[#allocation12 + $0x4e4] sm:$0xf]  ;;  %v12134_v61 = vld [vmem:[#allocation12 + $0x4f0] sm:$0xf0]  ;;  %v11769_v50 = vor.u32 %v14137_v8, %v11766_v46  ;;  %v17883_v8 = vld [vmem:[#allocation42_spill] sm:$0xff] }
 0x422   : > { %v14261_v27 = vld [vmem:[#allocation12 + $0x5e4] sm:$0xf]  ;;  %v12262_v59 = vld [vmem:[#allocation12 + $0x5f0] sm:$0xf0]  ;;  %v12137_v23 = vor.u32 %v14229_v11, %v12134_v61 }
 0x423   : > { %8474 = vmatpush.bf16.msra.mxu0 %v11545_v44  ;;  %8487 = vmatpush.bf16.msra.mxu1 %v11673_v54  ;;  %v14293_v62 = vld [vmem:[#allocation12 + $0x6e4] sm:$0xf]  ;;  %v12390_v30 = vld [vmem:[#allocation12 + $0x6f0] sm:$0xf0]  ;;  %v12265_v49 = vor.u32 %v14261_v27, %v12262_v59 }
 0x424   : > { %8500 = vmatpush.bf16.msra.mxu2 %v11801_v29  ;;  %8513 = vmatpush.bf16.msra.mxu3 %v11929_v37  ;;  %v14169_v21 = vld [vmem:[#allocation12 + $0x304] sm:$0xf]  ;;  %v11894_v13 = vld [vmem:[#allocation12 + $0x310] sm:$0xf0]  ;;  %v12393_v18 = vor.u32 %v14293_v62, %v12390_v30  ;;  %v17882_v37 = vld [vmem:[#allocation40_spill] sm:$0xff] }
 0x425   : > { %v14325_v63 = vld [vmem:[#allocation12 + $0x7e4] sm:$0xf]  ;;  %v12518_v0 = vld [vmem:[#allocation12 + $0x7f0] sm:$0xf0]  ;;  %v11897_v41 = vor.u32 %v14169_v21, %v11894_v13 }
 0x426   : > { %v14225_v10 = vld [vmem:[#allocation12 + $0x4c4] sm:$0xf]  ;;  %v12118_v55 = vld [vmem:[#allocation12 + $0x4d0] sm:$0xf0]  ;;  %v12521_v53 = vor.u32 %v14325_v63, %v12518_v0 }
 0x427   : > { %8475 = vmatpush.bf16.msra.mxu0 %v11529_v52  ;;  %8488 = vmatpush.bf16.msra.mxu1 %v11657_v47  ;;  %v14257_v5 = vld [vmem:[#allocation12 + $0x5c4] sm:$0xf]  ;;  %v12246_v40 = vld [vmem:[#allocation12 + $0x5d0] sm:$0xf0]  ;;  %v12121_v32 = vor.u32 %v14225_v10, %v12118_v55 }
 0x428   : > { %8501 = vmatpush.bf16.msra.mxu2 %v11785_v7  ;;  %8514 = vmatpush.bf16.msra.mxu3 %v11913_v39  ;;  %v14289_v22 = vld [vmem:[#allocation12 + $0x6c4] sm:$0xf]  ;;  %v12374_v15 = vld [vmem:[#allocation12 + $0x6d0] sm:$0xf0]  ;;  %v12249_v51 = vor.u32 %v14257_v5, %v12246_v40 }
 0x429   : > { %v14321_v24 = vld [vmem:[#allocation12 + $0x7c4] sm:$0xf]  ;;  %v12502_v44 = vld [vmem:[#allocation12 + $0x7d0] sm:$0xf0]  ;;  %v12377_v1 = vor.u32 %v14289_v22, %v12374_v15 }
 0x42a   : > { %v14221_v36 = vld [vmem:[#allocation12 + $0x4a4] sm:$0xf]  ;;  %v12102_v54 = vld [vmem:[#allocation12 + $0x4b0] sm:$0xf0]  ;;  %v12505_v19 = vor.u32 %v14321_v24, %v12502_v44 }
 0x42b   : > { %8476 = vmatpush.bf16.msra.mxu0 %v11513_v48  ;;  %8489 = vmatpush.bf16.msra.mxu1 %v11641_v33  ;;  %v14253_v29 = vld [vmem:[#allocation12 + $0x5a4] sm:$0xf]  ;;  %v12230_v26 = vld [vmem:[#allocation12 + $0x5b0] sm:$0xf0]  ;;  %v12105_v52 = vor.u32 %v14221_v36, %v12102_v54 }
 0x42c   : > { %8502 = vmatpush.bf16.msra.mxu2 %v11769_v50  ;;  %v17880_v43 = vld [vmem:[#allocation39_spill] sm:$0xff]  ;;  %8515 = vmatpush.bf16.msra.mxu3 %v11897_v41  ;;  %v14285_v6 = vld [vmem:[#allocation12 + $0x6a4] sm:$0xf]  ;;  %v12233_v38 = vor.u32 %v14253_v29, %v12230_v26 }
 0x42d   : > { %v12358_v34 = vld [vmem:[#allocation12 + $0x6b0] sm:$0xf0]  ;;  %v17881_v9 = vld [vmem:[#allocation41_spill] sm:$0xff] }
 0x42e   : > { %8477 = vmatmul.bf16.vlgmr.msra.gmra.mxu0 %v17880_v43  ;;  %8490 = vmatmul.bf16.vlgmr.msra.gmra.mxu1 %v17882_v37  ;;  %v14317_v4 = vld [vmem:[#allocation12 + $0x7a4] sm:$0xf]  ;;  %v12486_v3 = vld [vmem:[#allocation12 + $0x7b0] sm:$0xf0]  ;;  %v12361_v7 = vor.u32 %v14285_v6, %v12358_v34 }
 0x42f   : > { %8521 = vmatpush.bf16.msrb.mxu0 %v12137_v23  ;;  %8534 = vmatpush.bf16.msrb.mxu1 %v12265_v49  ;;  %v14217_v47 = vld [vmem:[#allocation12 + $0x484] sm:$0xf]  ;;  %v12086_v17 = vld [vmem:[#allocation12 + $0x490] sm:$0xf0]  ;;  %v12489_v61 = vor.u32 %v14317_v4, %v12486_v3 }
 0x430   : > { %8547 = vmatpush.bf16.msrb.mxu2 %v12393_v18  ;;  %8560 = vmatpush.bf16.msrb.mxu3 %v12521_v53  ;;  %v14249_v2 = vld [vmem:[#allocation12 + $0x584] sm:$0xf]  ;;  %v12214_v14 = vld [vmem:[#allocation12 + $0x590] sm:$0xf0]  ;;  %v12089_v27 = vor.u32 %v14217_v47, %v12086_v17 }
 0x431   : > { %8503 = vmatmul.bf16.vlgmr.msra.gmra.mxu2 %v17881_v9  ;;  %8516 = vmatmul.bf16.vlgmr.msra.gmra.mxu3 %v17883_v8  ;;  %v14281_v46 = vld [vmem:[#allocation12 + $0x684] sm:$0xf]  ;;  %v12342_v11 = vld [vmem:[#allocation12 + $0x690] sm:$0xf0]  ;;  %v12217_v59 = vor.u32 %v14249_v2, %v12214_v14 }
 0x432   : > { %v14313_v39 = vld [vmem:[#allocation12 + $0x784] sm:$0xf]  ;;  %v12470_v48 = vld [vmem:[#allocation12 + $0x790] sm:$0xf0]  ;;  %v12345_v30 = vor.u32 %v14281_v46, %v12342_v11 }
 0x433   : > { %8522 = vmatpush.bf16.msrb.mxu0 %v12121_v32  ;;  %8535 = vmatpush.bf16.msrb.mxu1 %v12249_v51  ;;  %v14213_v62 = vld [vmem:[#allocation12 + $0x464] sm:$0xf]  ;;  %v12070_v33 = vld [vmem:[#allocation12 + $0x470] sm:$0xf0]  ;;  %v12473_v49 = vor.u32 %v14313_v39, %v12470_v48 }
 0x434   : > { %8548 = vmatpush.bf16.msrb.mxu2 %v12377_v1  ;;  %8561 = vmatpush.bf16.msrb.mxu3 %v12505_v19  ;;  %v14245_v50 = vld [vmem:[#allocation12 + $0x564] sm:$0xf]  ;;  %v12198_v21 = vld [vmem:[#allocation12 + $0x570] sm:$0xf0]  ;;  %v12073_v63 = vor.u32 %v14213_v62, %v12070_v33 }
 0x435   : > { %v14277_v13 = vld [vmem:[#allocation12 + $0x664] sm:$0xf]  ;;  %v12326_v23 = vld [vmem:[#allocation12 + $0x670] sm:$0xf0]  ;;  %v12201_v0 = vor.u32 %v14245_v50, %v12198_v21 }
 0x436   : > { %v14309_v10 = vld [vmem:[#allocation12 + $0x764] sm:$0xf]  ;;  %v12454_v18 = vld [vmem:[#allocation12 + $0x770] sm:$0xf0]  ;;  %v12329_v5 = vor.u32 %v14277_v13, %v12326_v23 }
 0x437   : > { %8523 = vmatpush.bf16.msrb.mxu0 %v12105_v52  ;;  %8536 = vmatpush.bf16.msrb.mxu1 %v12233_v38  ;;  %v14209_v55 = vld [vmem:[#allocation12 + $0x444] sm:$0xf]  ;;  %v12054_v40 = vld [vmem:[#allocation12 + $0x450] sm:$0xf0]  ;;  %v12457_v32 = vor.u32 %v14309_v10, %v12454_v18 }
 0x438   : > { %8549 = vmatpush.bf16.msrb.mxu2 %v12361_v7  ;;  %8562 = vmatpush.bf16.msrb.mxu3 %v12489_v61  ;;  %v14241_v41 = vld [vmem:[#allocation12 + $0x544] sm:$0xf]  ;;  %v12182_v22 = vld [vmem:[#allocation12 + $0x550] sm:$0xf0]  ;;  %v12057_v51 = vor.u32 %v14209_v55, %v12054_v40 }
 0x439   : > { %v14273_v15 = vld [vmem:[#allocation12 + $0x644] sm:$0xf]  ;;  %v12310_v53 = vld [vmem:[#allocation12 + $0x650] sm:$0xf0]  ;;  %v12185_v24 = vor.u32 %v14241_v41, %v12182_v22 }
 0x43a   : > { %v14305_v44 = vld [vmem:[#allocation12 + $0x744] sm:$0xf]  ;;  %v12438_v36 = vld [vmem:[#allocation12 + $0x750] sm:$0xf0]  ;;  %v12313_v54 = vor.u32 %v14273_v15, %v12310_v53 }
 0x43b   : > { %8524 = vmatpush.bf16.msrb.mxu0 %v12089_v27  ;;  %8537 = vmatpush.bf16.msrb.mxu1 %v12217_v59  ;;  %v14205_v1 = vld [vmem:[#allocation12 + $0x424] sm:$0xf]  ;;  %v12038_v29 = vld [vmem:[#allocation12 + $0x430] sm:$0xf0]  ;;  %v8270_v52 = vpop.f32.mrf.mxu0  ;;  %v8283_v38 = vpop.f32.mrf.mxu1  ;;  %v12441_v4 = vor.u32 %v14305_v44, %v12438_v36 }
 0x43c   : > { %8550 = vmatpush.bf16.msrb.mxu2 %v12345_v30  ;;  %8563 = vmatpush.bf16.msrb.mxu3 %v12473_v49  ;;  %v14237_v26 = vld [vmem:[#allocation12 + $0x524] sm:$0xf]  ;;  %v12166_v6 = vld [vmem:[#allocation12 + $0x530] sm:$0xf0]  ;;  %v8284_v7 = vadd.f32 %v8283_v38, %v8270_v52  ;;  %v12041_v17 = vor.u32 %v14205_v1, %v12038_v29 }
 0x43d   : > { %v14269_v34 = vld [vmem:[#allocation12 + $0x624] sm:$0xf]  ;;  %v12294_v19 = vld [vmem:[#allocation12 + $0x630] sm:$0xf0]  ;;  %v12169_v2 = vor.u32 %v14237_v26, %v12166_v6 }
 0x43e   : > { %v14301_v3 = vld [vmem:[#allocation12 + $0x724] sm:$0xf]  ;;  %v12422_v47 = vld [vmem:[#allocation12 + $0x730] sm:$0xf0]  ;;  %v12297_v61 = vor.u32 %v14269_v34, %v12294_v19 }
 0x43f   : > { %8525 = vmatpush.bf16.msrb.mxu0 %v12073_v63  ;;  %8538 = vmatpush.bf16.msrb.mxu1 %v12201_v0  ;;  %v14201_v14 = vld [vmem:[#allocation12 + $0x404] sm:$0xf]  ;;  %v12022_v46 = vld [vmem:[#allocation12 + $0x410] sm:$0xf0]  ;;  %v12425_v33 = vor.u32 %v14301_v3, %v12422_v47 }
 0x440   : > { %8551 = vmatpush.bf16.msrb.mxu2 %v12329_v5  ;;  %8564 = vmatpush.bf16.msrb.mxu3 %v12457_v32  ;;  %v14233_v11 = vld [vmem:[#allocation12 + $0x504] sm:$0xf]  ;;  %v12150_v27 = vld [vmem:[#allocation12 + $0x510] sm:$0xf0]  ;;  %v12025_v23 = vor.u32 %v14201_v14, %v12022_v46 }
 0x441   : > { %v14265_v59 = vld [vmem:[#allocation12 + $0x604] sm:$0xf]  ;;  %v12278_v39 = vld [vmem:[#allocation12 + $0x610] sm:$0xf0]  ;;  %v12153_v49 = vor.u32 %v14233_v11, %v12150_v27 }
 0x442   : > { %v14357_v48 = vld [vmem:[#allocation12 + $0x8e4] sm:$0xf]  ;;  %v12646_v62 = vld [vmem:[#allocation12 + $0x8f0] sm:$0xf0]  ;;  %v12281_v10 = vor.u32 %v14265_v59, %v12278_v39  ;;  %v8296_v40 = vpop.f32.mrf.mxu2  ;;  %v8309_v41 = vpop.f32.mrf.mxu3 }
 0x443   : > { %8526 = vmatpush.bf16.msrb.mxu0 %v12057_v51  ;;  %8539 = vmatpush.bf16.msrb.mxu1 %v12185_v24  ;;  %v14389_v30 = vld [vmem:[#allocation12 + $0x9e4] sm:$0xf]  ;;  %v12774_v50 = vld [vmem:[#allocation12 + $0x9f0] sm:$0xf0]  ;;  %v12649_v18 = vor.u32 %v14357_v48, %v12646_v62  ;;  %v8297_v24 = vadd.f32 %v8296_v40, %v8284_v7  ;;  %v8272_v44 = vpop.f32.mrf.mxu0  ;;  %v8285_v36 = vpop.f32.mrf.mxu1 }
 0x444   : > { %8552 = vmatpush.bf16.msrb.mxu2 %v12313_v54  ;;  %8565 = vmatpush.bf16.msrb.mxu3 %v12441_v4  ;;  %v14421_v21 = vld [vmem:[#allocation12 + $0xae4] sm:$0xf]  ;;  %v12902_v13 = vld [vmem:[#allocation12 + $0xaf0] sm:$0xf0]  ;;  %v12777_v22 = vor.u32 %v14389_v30, %v12774_v50 }
 0x445   : > { %v14297_v63 = vld [vmem:[#allocation12 + $0x704] sm:$0xf]  ;;  %v12406_v0 = vld [vmem:[#allocation12 + $0x710] sm:$0xf0]  ;;  %v12905_v15 = vor.u32 %v14421_v21, %v12902_v13  ;;  %v8310_v34 = vadd.f32 %v8309_v41, %v8297_v24 }
 0x446   : > { %v14453_v55 = vld [vmem:[#allocation12 + $0xbe4] sm:$0xf]  ;;  %v13030_v5 = vld [vmem:[#allocation12 + $0xbf0] sm:$0xf0]  ;;  %v12409_v1 = vor.u32 %v14297_v63, %v12406_v0 }
 0x447   : > { %8527 = vmatpush.bf16.msrb.mxu0 %v12041_v17  ;;  %8540 = vmatpush.bf16.msrb.mxu1 %v12169_v2  ;;  %v14353_v53 = vld [vmem:[#allocation12 + $0x8c4] sm:$0xf]  ;;  %v12630_v32 = vld [vmem:[#allocation12 + $0x8d0] sm:$0xf0]  ;;  %v13033_v6 = vor.u32 %v14453_v55, %v13030_v5 }
 0x448   : > { %8553 = vmatpush.bf16.msrb.mxu2 %v12297_v61  ;;  %v14385_v51 = vld [vmem:[#allocation12 + $0x9c4] sm:$0xf]  ;;  %8566 = vmatpush.bf16.msrb.mxu3 %v12425_v33  ;;  %v12758_v54 = vld [vmem:[#allocation12 + $0x9d0] sm:$0xf0]  ;;  %v12633_v19 = vor.u32 %v14353_v53, %v12630_v32 }
 0x449   : > { %v14417_v29 = vld [vmem:[#allocation12 + $0xac4] sm:$0xf]  ;;  %v12886_v26 = vld [vmem:[#allocation12 + $0xad0] sm:$0xf0]  ;;  %v12761_v4 = vor.u32 %v14385_v51, %v12758_v54 }
 0x44a   : > { %v14449_v52 = vld [vmem:[#allocation12 + $0xbc4] sm:$0xf]  ;;  %v13014_v38 = vld [vmem:[#allocation12 + $0xbd0] sm:$0xf0]  ;;  %v12889_v3 = vor.u32 %v14417_v29, %v12886_v26  ;;  %v8298_v39 = vpop.f32.mrf.mxu2  ;;  %v8311_v48 = vpop.f32.mrf.mxu3 }
 0x44b   : > { %8528 = vmatpush.bf16.msrb.mxu0 %v12025_v23  ;;  %8541 = vmatpush.bf16.msrb.mxu1 %v12153_v49  ;;  %v14349_v47 = vld [vmem:[#allocation12 + $0x8a4] sm:$0xf]  ;;  %v12614_v7 = vld [vmem:[#allocation12 + $0x8b0] sm:$0xf0]  ;;  %v13017_v11 = vor.u32 %v14449_v52, %v13014_v38 }
 0x44c   : > { %8554 = vmatpush.bf16.msrb.mxu2 %v12281_v10  ;;  %v14381_v17 = vld [vmem:[#allocation12 + $0x9a4] sm:$0xf]  ;;  %8567 = vmatpush.bf16.msrb.mxu3 %v12409_v1  ;;  %v12742_v2 = vld [vmem:[#allocation12 + $0x9b0] sm:$0xf0]  ;;  %v12617_v61 = vor.u32 %v14349_v47, %v12614_v7  ;;  %v8322_v13 = vpop.f32.mrf.mxu0 }
 0x44d   : > { %v14413_v14 = vld [vmem:[#allocation12 + $0xaa4] sm:$0xf]  ;;  %v12870_v46 = vld [vmem:[#allocation12 + $0xab0] sm:$0xf0]  ;;  %v12745_v62 = vor.u32 %v14381_v17, %v12742_v2  ;;  %v8335_v23 = vpop.f32.mrf.mxu1  ;;  %v8323_v10 = vadd.f32 %v8322_v13, %v8310_v34 }
 0x44e   : > { %8529 = vmatmul.bf16.vlgmr.msrb.gmra.mxu0 %v17171_v42  ;;  %v14445_v27 = vld [vmem:[#allocation12 + $0xba4] sm:$0xf]  ;;  %v12998_v59 = vld [vmem:[#allocation12 + $0xbb0] sm:$0xf0]  ;;  %8542 = vmatmul.bf16.vlgmr.msrb.gmra.mxu1 %v17191_v28  ;;  %v12873_v30 = vor.u32 %v14413_v14, %v12870_v46 }
 0x44f   : > { %8573 = vmatpush.bf16.msra.mxu0 %v12649_v18  ;;  %8586 = vmatpush.bf16.msra.mxu1 %v12777_v22  ;;  %v14345_v33 = vld [vmem:[#allocation12 + $0x884] sm:$0xf]  ;;  %v12598_v50 = vld [vmem:[#allocation12 + $0x890] sm:$0xf0]  ;;  %v13001_v18 = vor.u32 %v14445_v27, %v12998_v59  ;;  %v8336_v41 = vadd.f32 %v8335_v23, %v8323_v10 }
 0x450   : > { %8599 = vmatpush.bf16.msra.mxu2 %v12905_v15  ;;  %8612 = vmatpush.bf16.msra.mxu3 %v13033_v6  ;;  %v14377_v21 = vld [vmem:[#allocation12 + $0x984] sm:$0xf]  ;;  %v12726_v49 = vld [vmem:[#allocation12 + $0x990] sm:$0xf0]  ;;  %v12601_v55 = vor.u32 %v14345_v33, %v12598_v50 }
 0x451   : > { %8555 = vmatmul.bf16.vlgmr.msrb.gmra.mxu2 %v17183_v58  ;;  %8568 = vmatmul.bf16.vlgmr.msrb.gmra.mxu3 %v17193_v45  ;;  %v14409_v63 = vld [vmem:[#allocation12 + $0xa84] sm:$0xf]  ;;  %v12854_v0 = vld [vmem:[#allocation12 + $0xa90] sm:$0xf0]  ;;  %v12729_v22 = vor.u32 %v14377_v21, %v12726_v49 }
 0x452   : > { %v14441_v5 = vld [vmem:[#allocation12 + $0xb84] sm:$0xf]  ;;  %v12982_v40 = vld [vmem:[#allocation12 + $0xb90] sm:$0xf0]  ;;  %v12857_v15 = vor.u32 %v14409_v63, %v12854_v0 }
 0x453   : > { %8574 = vmatpush.bf16.msra.mxu0 %v12633_v19  ;;  %8587 = vmatpush.bf16.msra.mxu1 %v12761_v4  ;;  %v14341_v53 = vld [vmem:[#allocation12 + $0x864] sm:$0xf]  ;;  %v12582_v32 = vld [vmem:[#allocation12 + $0x870] sm:$0xf0]  ;;  %v12985_v1 = vor.u32 %v14441_v5, %v12982_v40 }
 0x454   : > { %8600 = vmatpush.bf16.msra.mxu2 %v12889_v3  ;;  %8613 = vmatpush.bf16.msra.mxu3 %v13017_v11  ;;  %v14373_v51 = vld [vmem:[#allocation12 + $0x964] sm:$0xf]  ;;  %v12710_v24 = vld [vmem:[#allocation12 + $0x970] sm:$0xf0]  ;;  %v12585_v54 = vor.u32 %v14341_v53, %v12582_v32  ;;  %v8348_v6 = vpop.f32.mrf.mxu2  ;;  %v8361_v34 = vpop.f32.mrf.mxu3 }
 0x455   : > { %v14405_v44 = vld [vmem:[#allocation12 + $0xa64] sm:$0xf]  ;;  %v12838_v36 = vld [vmem:[#allocation12 + $0xa70] sm:$0xf0]  ;;  %v12713_v19 = vor.u32 %v14373_v51, %v12710_v24  ;;  %v8349_v47 = vadd.f32 %v8348_v6, %v8336_v41  ;;  %v8324_v7 = vpop.f32.mrf.mxu0  ;;  %v8337_v17 = vpop.f32.mrf.mxu1 }
 0x456   : > { %v14437_v29 = vld [vmem:[#allocation12 + $0xb64] sm:$0xf]  ;;  %v12966_v26 = vld [vmem:[#allocation12 + $0xb70] sm:$0xf0]  ;;  %v12841_v52 = vor.u32 %v14405_v44, %v12838_v36 }
 0x457   : > { %8575 = vmatpush.bf16.msra.mxu0 %v12617_v61  ;;  %8588 = vmatpush.bf16.msra.mxu1 %v12745_v62  ;;  %v14337_v38 = vld [vmem:[#allocation12 + $0x844] sm:$0xf]  ;;  %v12566_v4 = vld [vmem:[#allocation12 + $0x850] sm:$0xf0]  ;;  %v12969_v11 = vor.u32 %v14437_v29, %v12966_v26  ;;  %v17559_v61 = vadd.f32 %v8361_v34, %v8349_v47 }
 0x458   : > { %8601 = vmatpush.bf16.msra.mxu2 %v12873_v30  ;;  %8614 = vmatpush.bf16.msra.mxu3 %v13001_v18  ;;  %v14369_v3 = vld [vmem:[#allocation12 + $0x944] sm:$0xf]  ;;  %v12694_v2 = vld [vmem:[#allocation12 + $0x950] sm:$0xf0]  ;;  %v12569_v27 = vor.u32 %v14337_v38, %v12566_v4 }
 0x459   : > { %v14401_v14 = vld [vmem:[#allocation12 + $0xa44] sm:$0xf]  ;;  %v12822_v46 = vld [vmem:[#allocation12 + $0xa50] sm:$0xf0]  ;;  %v12697_v48 = vor.u32 %v14369_v3, %v12694_v2 }
 0x45a   : > { %v14433_v59 = vld [vmem:[#allocation12 + $0xb44] sm:$0xf]  ;;  %v12950_v39 = vld [vmem:[#allocation12 + $0xb50] sm:$0xf0]  ;;  %v12825_v62 = vor.u32 %v14401_v14, %v12822_v46 }
 0x45b   : > { %8576 = vmatpush.bf16.msra.mxu0 %v12601_v55  ;;  %8589 = vmatpush.bf16.msra.mxu1 %v12729_v22  ;;  %v14333_v30 = vld [vmem:[#allocation12 + $0x824] sm:$0xf]  ;;  %v12550_v33 = vld [vmem:[#allocation12 + $0x830] sm:$0xf0]  ;;  %v12953_v49 = vor.u32 %v14433_v59, %v12950_v39 }
 0x45c   : > { %8602 = vmatpush.bf16.msra.mxu2 %v12857_v15  ;;  %8615 = vmatpush.bf16.msra.mxu3 %v12985_v1  ;;  %v14365_v50 = vld [vmem:[#allocation12 + $0x924] sm:$0xf]  ;;  %v12678_v21 = vld [vmem:[#allocation12 + $0x930] sm:$0xf0]  ;;  %v12553_v0 = vor.u32 %v14333_v30, %v12550_v33  ;;  %v8350_v5 = vpop.f32.mrf.mxu2  ;;  %v8363_v40 = vpop.f32.mrf.mxu3 }
 0x45d   : > { %v14397_v13 = vld [vmem:[#allocation12 + $0xa24] sm:$0xf]  ;;  %v12806_v23 = vld [vmem:[#allocation12 + $0xa30] sm:$0xf0]  ;;  %v12681_v41 = vor.u32 %v14365_v50, %v12678_v21 }
 0x45e   : > { %v14429_v63 = vld [vmem:[#allocation12 + $0xb24] sm:$0xf]  ;;  %v12934_v10 = vld [vmem:[#allocation12 + $0xb30] sm:$0xf0]  ;;  %v12809_v22 = vor.u32 %v14397_v13, %v12806_v23 }
 0x45f   : > { %8577 = vmatpush.bf16.msra.mxu0 %v12585_v54  ;;  %8590 = vmatpush.bf16.msra.mxu1 %v12713_v19  ;;  %v14329_v18 = vld [vmem:[#allocation12 + $0x804] sm:$0xf]  ;;  %v12534_v55 = vld [vmem:[#allocation12 + $0x810] sm:$0xf0]  ;;  %v12937_v36 = vor.u32 %v14429_v63, %v12934_v10 }
 0x460   : > { %8603 = vmatpush.bf16.msra.mxu2 %v12841_v52  ;;  %8616 = vmatpush.bf16.msra.mxu3 %v12969_v11  ;;  %v14361_v15 = vld [vmem:[#allocation12 + $0x904] sm:$0xf]  ;;  %v12662_v53 = vld [vmem:[#allocation12 + $0x910] sm:$0xf0]  ;;  %v12537_v26 = vor.u32 %v14329_v18, %v12534_v55 }
 0x461   : > { %v14393_v32 = vld [vmem:[#allocation12 + $0xa04] sm:$0xf]  ;;  %v12790_v51 = vld [vmem:[#allocation12 + $0xa10] sm:$0xf0]  ;;  %v12665_v52 = vor.u32 %v14361_v15, %v12662_v53 }
 0x462   : > { %v14425_v24 = vld [vmem:[#allocation12 + $0xb04] sm:$0xf]  ;;  %v13158_v1 = vld [vmem:[#allocation12 + $0xcf0] sm:$0xf0]  ;;  %v12793_v38 = vor.u32 %v14393_v32, %v12790_v51 }
 0x463   : > { %8578 = vmatpush.bf16.msra.mxu0 %v12569_v27  ;;  %8591 = vmatpush.bf16.msra.mxu1 %v12697_v48  ;;  %v14485_v44 = vld [vmem:[#allocation12 + $0xce4] sm:$0xf]  ;;  %v13286_v29 = vld [vmem:[#allocation12 + $0xdf0] sm:$0xf0] }
 0x464   : > { %8604 = vmatpush.bf16.msra.mxu2 %v12825_v62  ;;  %8617 = vmatpush.bf16.msra.mxu3 %v12953_v49  ;;  %v14517_v54 = vld [vmem:[#allocation12 + $0xde4] sm:$0xf]  ;;  %v12918_v6 = vld [vmem:[#allocation12 + $0xb10] sm:$0xf0]  ;;  %v13161_v47 = vor.u32 %v14485_v44, %v13158_v1 }
 0x465   : > { %v14549_v34 = vld [vmem:[#allocation12 + $0xee4] sm:$0xf]  ;;  %v13414_v19 = vld [vmem:[#allocation12 + $0xef0] sm:$0xf0]  ;;  %v13289_v7 = vor.u32 %v14517_v54, %v13286_v29  ;;  %v12921_v17 = vor.u32 %v14425_v24, %v12918_v6 }
 0x466   : > { %v14581_v4 = vld [vmem:[#allocation12 + $0xfe4] sm:$0xf]  ;;  %v13542_v3 = vld [vmem:[#allocation12 + $0xff0] sm:$0xf0]  ;;  %v13417_v2 = vor.u32 %v14549_v34, %v13414_v19 }
 0x467   : > { %8579 = vmatpush.bf16.msra.mxu0 %v12553_v0  ;;  %8592 = vmatpush.bf16.msra.mxu1 %v12681_v41  ;;  %v14481_v14 = vld [vmem:[#allocation12 + $0xcc4] sm:$0xf]  ;;  %v13142_v46 = vld [vmem:[#allocation12 + $0xcd0] sm:$0xf0]  ;;  %v13545_v27 = vor.u32 %v14581_v4, %v13542_v3 }
 0x468   : > { %8605 = vmatpush.bf16.msra.mxu2 %v12809_v22  ;;  %8618 = vmatpush.bf16.msra.mxu3 %v12937_v36  ;;  %v14513_v11 = vld [vmem:[#allocation12 + $0xdc4] sm:$0xf]  ;;  %v13270_v59 = vld [vmem:[#allocation12 + $0xdd0] sm:$0xf0]  ;;  %v13145_v33 = vor.u32 %v14481_v14, %v13142_v46 }
 0x469   : > { %v14545_v39 = vld [vmem:[#allocation12 + $0xec4] sm:$0xf]  ;;  %v13398_v48 = vld [vmem:[#allocation12 + $0xed0] sm:$0xf0]  ;;  %v13273_v50 = vor.u32 %v14513_v11, %v13270_v59 }
 0x46a   : > { %v14577_v62 = vld [vmem:[#allocation12 + $0xfc4] sm:$0xf]  ;;  %v13526_v30 = vld [vmem:[#allocation12 + $0xfd0] sm:$0xf0]  ;;  %v13401_v21 = vor.u32 %v14545_v39, %v13398_v48 }
 0x46b   : > { %8580 = vmatpush.bf16.msra.mxu0 %v12537_v26  ;;  %8593 = vmatpush.bf16.msra.mxu1 %v12665_v52  ;;  %v14477_v13 = vld [vmem:[#allocation12 + $0xca4] sm:$0xf]  ;;  %v13126_v23 = vld [vmem:[#allocation12 + $0xcb0] sm:$0xf0]  ;;  %v13529_v63 = vor.u32 %v14577_v62, %v13526_v30 }
 0x46c   : > { %8606 = vmatpush.bf16.msra.mxu2 %v12793_v38  ;;  %8619 = vmatpush.bf16.msra.mxu3 %v12921_v17  ;;  %v14509_v49 = vld [vmem:[#allocation12 + $0xda4] sm:$0xf]  ;;  %v13254_v0 = vld [vmem:[#allocation12 + $0xdb0] sm:$0xf0]  ;;  %v13129_v40 = vor.u32 %v14477_v13, %v13126_v23 }
 0x46d   : > { %v14541_v10 = vld [vmem:[#allocation12 + $0xea4] sm:$0xf]  ;;  %v13382_v18 = vld [vmem:[#allocation12 + $0xeb0] sm:$0xf0]  ;;  %v13257_v41 = vor.u32 %v14509_v49, %v13254_v0 }
 0x46e   : > { %8581 = vmatmul.bf16.vlgmr.msra.gmra.mxu0 %v17518_v16  ;;  %8594 = vmatmul.bf16.vlgmr.msra.gmra.mxu1 %v17522_v56  ;;  %v14573_v55 = vld [vmem:[#allocation12 + $0xfa4] sm:$0xf]  ;;  %v13510_v5 = vld [vmem:[#allocation12 + $0xfb0] sm:$0xf0]  ;;  %v13385_v22 = vor.u32 %v14541_v10, %v13382_v18 }
 0x46f   : > { %8625 = vmatpush.bf16.msrb.mxu0 %v13161_v47  ;;  %8638 = vmatpush.bf16.msrb.mxu1 %v13289_v7  ;;  %v14473_v15 = vld [vmem:[#allocation12 + $0xc84] sm:$0xf]  ;;  %v13110_v53 = vld [vmem:[#allocation12 + $0xc90] sm:$0xf0]  ;;  %v13513_v51 = vor.u32 %v14573_v55, %v13510_v5 }
 0x470   : > { %8651 = vmatpush.bf16.msrb.mxu2 %v13417_v2  ;;  %8664 = vmatpush.bf16.msrb.mxu3 %v13545_v27  ;;  %v14505_v32 = vld [vmem:[#allocation12 + $0xd84] sm:$0xf]  ;;  %v13238_v24 = vld [vmem:[#allocation12 + $0xd90] sm:$0xf0]  ;;  %v13113_v29 = vor.u32 %v14473_v15, %v13110_v53 }
 0x471   : > { %8607 = vmatmul.bf16.vlgmr.msra.gmra.mxu2 %v17520_v31  ;;  %8620 = vmatmul.bf16.vlgmr.msra.gmra.mxu3 %v17524_v20  ;;  %v14537_v44 = vld [vmem:[#allocation12 + $0xe84] sm:$0xf]  ;;  %v13366_v36 = vld [vmem:[#allocation12 + $0xe90] sm:$0xf0]  ;;  %v13241_v26 = vor.u32 %v14505_v32, %v13238_v24 }
 0x472   : > { %v14569_v1 = vld [vmem:[#allocation12 + $0xf84] sm:$0xf]  ;;  %v13494_v54 = vld [vmem:[#allocation12 + $0xf90] sm:$0xf0]  ;;  %v13369_v6 = vor.u32 %v14537_v44, %v13366_v36 }
 0x473   : > { %8626 = vmatpush.bf16.msrb.mxu0 %v13145_v33  ;;  %8639 = vmatpush.bf16.msrb.mxu1 %v13273_v50  ;;  %v14469_v34 = vld [vmem:[#allocation12 + $0xc64] sm:$0xf]  ;;  %v13094_v19 = vld [vmem:[#allocation12 + $0xc70] sm:$0xf0]  ;;  %v13497_v38 = vor.u32 %v14569_v1, %v13494_v54 }
 0x474   : > { %8652 = vmatpush.bf16.msrb.mxu2 %v13401_v21  ;;  %8665 = vmatpush.bf16.msrb.mxu3 %v13529_v63  ;;  %v14501_v52 = vld [vmem:[#allocation12 + $0xd64] sm:$0xf]  ;;  %v13222_v4 = vld [vmem:[#allocation12 + $0xd70] sm:$0xf0]  ;;  %v13097_v2 = vor.u32 %v14469_v34, %v13094_v19  ;;  %v14104_v34 = vld [vmem:[#allocation12 + $0xf4] sm:$0xf0] }
 0x475   : > { %v14533_v3 = vld [vmem:[#allocation12 + $0xe64] sm:$0xf]  ;;  %v13350_v47 = vld [vmem:[#allocation12 + $0xe70] sm:$0xf0]  ;;  %v13225_v14 = vor.u32 %v14501_v52, %v13222_v4  ;;  %v11756_v19 = vld [vmem:[#allocation12 + $0x1e8] sm:$0xf] }
 0x476   : > { %v14565_v7 = vld [vmem:[#allocation12 + $0xf64] sm:$0xf]  ;;  %v13478_v17 = vld [vmem:[#allocation12 + $0xf70] sm:$0xf0]  ;;  %v13353_v46 = vor.u32 %v14533_v3, %v13350_v47  ;;  %v11884_v4 = vld [vmem:[#allocation12 + $0x2e8] sm:$0xf] }
 0x477   : > { %8627 = vmatpush.bf16.msrb.mxu0 %v13129_v40  ;;  %8640 = vmatpush.bf16.msrb.mxu1 %v13257_v41  ;;  %v14465_v11 = vld [vmem:[#allocation12 + $0xc44] sm:$0xf]  ;;  %v13078_v27 = vld [vmem:[#allocation12 + $0xc50] sm:$0xf0]  ;;  %v13481_v39 = vor.u32 %v14565_v7, %v13478_v17  ;;  %v14168_v3 = vld [vmem:[#allocation12 + $0x2f4] sm:$0xf0] }
 0x478   : > { %8653 = vmatpush.bf16.msrb.mxu2 %v13385_v22  ;;  %8666 = vmatpush.bf16.msrb.mxu3 %v13513_v51  ;;  %v14497_v59 = vld [vmem:[#allocation12 + $0xd44] sm:$0xf]  ;;  %v13206_v48 = vld [vmem:[#allocation12 + $0xd50] sm:$0xf0]  ;;  %v13081_v21 = vor.u32 %v14465_v11, %v13078_v27  ;;  %v12012_v17 = vld [vmem:[#allocation12 + $0x3e8] sm:$0xf]  ;;  %v11885_v27 = vor.u32 %v14168_v3, %v11884_v4 }
 0x479   : > { %v14529_v62 = vld [vmem:[#allocation12 + $0xe44] sm:$0xf]  ;;  %v13334_v30 = vld [vmem:[#allocation12 + $0xe50] sm:$0xf0]  ;;  %v13209_v13 = vor.u32 %v14497_v59, %v13206_v48  ;;  %v11612_v59 = vld [vmem:[#allocation12 + $0xc8] sm:$0xf] }
 0x47a   : > { %v14561_v33 = vld [vmem:[#allocation12 + $0xf44] sm:$0xf]  ;;  %v13462_v50 = vld [vmem:[#allocation12 + $0xf50] sm:$0xf0]  ;;  %v13337_v23 = vor.u32 %v14529_v62, %v13334_v30  ;;  %v11740_v48 = vld [vmem:[#allocation12 + $0x1c8] sm:$0xf] }
 0x47b   : > { %8628 = vmatpush.bf16.msrb.mxu0 %v13113_v29  ;;  %8641 = vmatpush.bf16.msrb.mxu1 %v13241_v26  ;;  %v14461_v49 = vld [vmem:[#allocation12 + $0xc24] sm:$0xf]  ;;  %v13062_v63 = vld [vmem:[#allocation12 + $0xc30] sm:$0xf0]  ;;  %v13465_v10 = vor.u32 %v14561_v33, %v13462_v50  ;;  %v14132_v30 = vld [vmem:[#allocation12 + $0x1d4] sm:$0xf0] }
 0x47c   : > { %8654 = vmatpush.bf16.msrb.mxu2 %v13369_v6  ;;  %8667 = vmatpush.bf16.msrb.mxu3 %v13497_v38  ;;  %v14493_v0 = vld [vmem:[#allocation12 + $0xd24] sm:$0xf]  ;;  %v13190_v18 = vld [vmem:[#allocation12 + $0xd30] sm:$0xf0]  ;;  %v13065_v22 = vor.u32 %v14461_v49, %v13062_v63  ;;  %v11628_v6 = vld [vmem:[#allocation12 + $0xe8] sm:$0xf]  ;;  %v11741_v49 = vor.u32 %v14132_v30, %v11740_v48 }
 0x47d   : > { %v14525_v55 = vld [vmem:[#allocation12 + $0xe24] sm:$0xf]  ;;  %v13318_v5 = vld [vmem:[#allocation12 + $0xe30] sm:$0xf0]  ;;  %v13193_v32 = vor.u32 %v14493_v0, %v13190_v18  ;;  %v14136_v38 = vld [vmem:[#allocation12 + $0x1f4] sm:$0xf0] }
 0x47e   : > { %v14557_v40 = vld [vmem:[#allocation12 + $0xf24] sm:$0xf]  ;;  %v13446_v41 = vld [vmem:[#allocation12 + $0xf30] sm:$0xf0]  ;;  %v13321_v51 = vor.u32 %v14525_v55, %v13318_v5  ;;  %v11757_v11 = vor.u32 %v14136_v38, %v11756_v19  ;;  %v11868_v33 = vld [vmem:[#allocation12 + $0x2c8] sm:$0xf] }
 0x47f   : > { %8629 = vmatpush.bf16.msrb.mxu0 %v13097_v2  ;;  %8642 = vmatpush.bf16.msrb.mxu1 %v13225_v14  ;;  %v14457_v15 = vld [vmem:[#allocation12 + $0xc04] sm:$0xf]  ;;  %v13046_v53 = vld [vmem:[#allocation12 + $0xc10] sm:$0xf0]  ;;  %v13449_v1 = vor.u32 %v14557_v40, %v13446_v41  ;;  %v14200_v2 = vld [vmem:[#allocation12 + $0x3f4] sm:$0xf0] }
 0x480   : > { %8655 = vmatpush.bf16.msrb.mxu2 %v13353_v46  ;;  %8668 = vmatpush.bf16.msrb.mxu3 %v13481_v39  ;;  %v14489_v24 = vld [vmem:[#allocation12 + $0xd04] sm:$0xf]  ;;  %v13174_v44 = vld [vmem:[#allocation12 + $0xd10] sm:$0xf0]  ;;  %v13049_v52 = vor.u32 %v14457_v15, %v13046_v53  ;;  %v11629_v46 = vor.u32 %v14104_v34, %v11628_v6  ;;  %v14100_v39 = vld [vmem:[#allocation12 + $0xd4] sm:$0xf0]  ;;  %v12013_v62 = vor.u32 %v14200_v2, %v12012_v17 }
 0x481   : > { %v14521_v36 = vld [vmem:[#allocation12 + $0xe04] sm:$0xf]  ;;  %v13302_v54 = vld [vmem:[#allocation12 + $0xe10] sm:$0xf0]  ;;  %v13177_v47 = vor.u32 %v14489_v24, %v13174_v44  ;;  %v14164_v50 = vld [vmem:[#allocation12 + $0x2d4] sm:$0xf0] }
 0x482   : > { %v14553_v29 = vld [vmem:[#allocation12 + $0xf04] sm:$0xf]  ;;  %v13430_v26 = vld [vmem:[#allocation12 + $0xf10] sm:$0xf0]  ;;  %v13305_v7 = vor.u32 %v14521_v36, %v13302_v54  ;;  %v11869_v63 = vor.u32 %v14164_v50, %v11868_v33  ;;  %v11596_v0 = vld [vmem:[#allocation12 + $0xa8] sm:$0xf] }
 0x483   : > { %8630 = vmatpush.bf16.msrb.mxu0 %v13081_v21  ;;  %8643 = vmatpush.bf16.msrb.mxu1 %v13209_v13  ;;  %v13433_v14 = vor.u32 %v14553_v29, %v13430_v26  ;;  %v11996_v21 = vld [vmem:[#allocation12 + $0x3c8] sm:$0xf]  ;;  %v14196_v13 = vld [vmem:[#allocation12 + $0x3d4] sm:$0xf0] }
 0x484   : > { %8656 = vmatpush.bf16.msrb.mxu2 %v13337_v23  ;;  %8669 = vmatpush.bf16.msrb.mxu3 %v13465_v10  ;;  %v11613_v23 = vor.u32 %v14100_v39, %v11612_v59  ;;  %v14096_v10 = vld [vmem:[#allocation12 + $0xb4] sm:$0xf0]  ;;  %v11724_v18 = vld [vmem:[#allocation12 + $0x1a8] sm:$0xf]  ;;  %v11997_v55 = vor.u32 %v14196_v13, %v11996_v21 }
 0x485   : > { %v14128_v5 = vld [vmem:[#allocation12 + $0x1b4] sm:$0xf0]  ;;  %v11852_v40 = vld [vmem:[#allocation12 + $0x2a8] sm:$0xf] }
 0x486   : > { %v14160_v41 = vld [vmem:[#allocation12 + $0x2b4] sm:$0xf0]  ;;  %v11725_v44 = vor.u32 %v14128_v5, %v11724_v18  ;;  %v11708_v29 = vld [vmem:[#allocation12 + $0x188] sm:$0xf] }
 0x487   : > { %8631 = vmatpush.bf16.msrb.mxu0 %v13065_v22  ;;  %8644 = vmatpush.bf16.msrb.mxu1 %v13193_v32  ;;  %v11980_v22 = vld [vmem:[#allocation12 + $0x3a8] sm:$0xf]  ;;  %v14192_v15 = vld [vmem:[#allocation12 + $0x3b4] sm:$0xf0]  ;;  %v11597_v32 = vor.u32 %v14096_v10, %v11596_v0  ;;  %v11853_v36 = vor.u32 %v14160_v41, %v11852_v40 }
 0x488   : > { %8657 = vmatpush.bf16.msrb.mxu2 %v13321_v51  ;;  %8670 = vmatpush.bf16.msrb.mxu3 %v13449_v1  ;;  %v11580_v1 = vld [vmem:[#allocation12 + $0x88] sm:$0xf]  ;;  %v14092_v54 = vld [vmem:[#allocation12 + $0x94] sm:$0xf0]  ;;  %v11981_v26 = vor.u32 %v14192_v15, %v11980_v22 }
 0x489   : > { %v14124_v6 = vld [vmem:[#allocation12 + $0x194] sm:$0xf0]  ;;  %v11836_v34 = vld [vmem:[#allocation12 + $0x288] sm:$0xf]  ;;  %v11581_v3 = vor.u32 %v14092_v54, %v11580_v1 }
 0x48a   : > { %v8374_v53 = vpop.f32.mrf.mxu0  ;;  %v14156_v19 = vld [vmem:[#allocation12 + $0x294] sm:$0xf0]  ;;  %v11964_v38 = vld [vmem:[#allocation12 + $0x388] sm:$0xf] }
 0x48b   : > { %8632 = vmatpush.bf16.msrb.mxu0 %v13049_v52  ;;  %8645 = vmatpush.bf16.msrb.mxu1 %v13177_v47  ;;  %v8375_v51 = vadd.f32 %v8374_v53, %v17559_v61  ;;  %v8387_v24 = vpop.f32.mrf.mxu1  ;;  %v14188_v4 = vld [vmem:[#allocation12 + $0x394] sm:$0xf0]  ;;  %v11709_v61 = vor.u32 %v14124_v6, %v11708_v29  ;;  %v11837_v47 = vor.u32 %v14156_v19, %v11836_v34  ;;  %v11692_v2 = vld [vmem:[#allocation12 + $0x168] sm:$0xf] }
 0x48c   : > { %8658 = vmatpush.bf16.msrb.mxu2 %v13305_v7  ;;  %8671 = vmatpush.bf16.msrb.mxu3 %v13433_v14  ;;  %v11564_v7 = vld [vmem:[#allocation12 + $0x68] sm:$0xf]  ;;  %v14088_v17 = vld [vmem:[#allocation12 + $0x74] sm:$0xf0] }
 0x48d   : > { %v8388_v52 = vadd.f32 %v8387_v24, %v8375_v51  ;;  %v14152_v59 = vld [vmem:[#allocation12 + $0x274] sm:$0xf0]  ;;  %v11565_v50 = vor.u32 %v14088_v17, %v11564_v7  ;;  %v11676_v10 = vld [vmem:[#allocation12 + $0x148] sm:$0xf] }
 0x48e   : > { %8633 = vmatmul.bf16.vlgmr.msrb.gmra.mxu0 %v17539_v12  ;;  %8646 = vmatmul.bf16.vlgmr.msrb.gmra.mxu1 %v17543_v35  ;;  %v14184_v30 = vld [vmem:[#allocation12 + $0x374] sm:$0xf0]  ;;  %v11804_v5 = vld [vmem:[#allocation12 + $0x248] sm:$0xf] }
 0x48f   : > { %8677 = vmatpush.bf16.msra.mxu0 %v11629_v46  ;;  %8690 = vmatpush.bf16.msra.mxu1 %v11757_v11  ;;  %v11965_v46 = vor.u32 %v14188_v4, %v11964_v38  ;;  %v14120_v11 = vld [vmem:[#allocation12 + $0x174] sm:$0xf0]  ;;  %v11932_v41 = vld [vmem:[#allocation12 + $0x348] sm:$0xf] }
 0x490   : > { %8703 = vmatpush.bf16.msra.mxu2 %v11885_v27  ;;  %8716 = vmatpush.bf16.msra.mxu3 %v12013_v62  ;;  %v8400_v14 = vpop.f32.mrf.mxu2  ;;  %v11820_v27 = vld [vmem:[#allocation12 + $0x268] sm:$0xf]  ;;  %v14084_v0 = vld [vmem:[#allocation12 + $0x54] sm:$0xf0] }
 0x491   : > { %8659 = vmatmul.bf16.vlgmr.msrb.gmra.mxu2 %v17541_v60  ;;  %8672 = vmatmul.bf16.vlgmr.msrb.gmra.mxu3 %v17545_v57  ;;  %v8401_v39 = vadd.f32 %v8400_v14, %v8388_v52  ;;  %v8413_v48 = vpop.f32.mrf.mxu3  ;;  %v11948_v62 = vld [vmem:[#allocation12 + $0x368] sm:$0xf]  ;;  %v14148_v40 = vld [vmem:[#allocation12 + $0x254] sm:$0xf0] }
 0x492   : > { %v8376_v33 = vpop.f32.mrf.mxu0  ;;  %v11949_v18 = vor.u32 %v14184_v30, %v11948_v62  ;;  %v14180_v22 = vld [vmem:[#allocation12 + $0x354] sm:$0xf0]  ;;  %v11532_v51 = vld [vmem:[#allocation12 + $0x28] sm:$0xf] }
 0x493   : > { %8678 = vmatpush.bf16.msra.mxu0 %v11613_v23  ;;  %8691 = vmatpush.bf16.msra.mxu1 %v11741_v49  ;;  %v8414_v21 = vadd.f32 %v8413_v48, %v8401_v39  ;;  %v8389_v13 = vpop.f32.mrf.mxu1  ;;  %v11693_v23 = vor.u32 %v14120_v11, %v11692_v2  ;;  %v11821_v49 = vor.u32 %v14152_v59, %v11820_v27  ;;  %v14080_v24 = vld [vmem:[#allocation12 + $0x34] sm:$0xf0]  ;;  %v11788_v29 = vld [vmem:[#allocation12 + $0x228] sm:$0xf] }
 0x494   : > { %8704 = vmatpush.bf16.msra.mxu2 %v11869_v63  ;;  %8717 = vmatpush.bf16.msra.mxu3 %v11997_v55  ;;  %v11548_v63 = vld [vmem:[#allocation12 + $0x48] sm:$0xf]  ;;  %v14116_v55 = vld [vmem:[#allocation12 + $0x154] sm:$0xf0]  ;;  %v11933_v1 = vor.u32 %v14180_v22, %v11932_v41  ;;  %v11533_v38 = vor.u32 %v14080_v24, %v11532_v51 }
 0x495   : > { %v11549_v15 = vor.u32 %v14084_v0, %v11548_v63  ;;  %v11677_v53 = vor.u32 %v14116_v55, %v11676_v10  ;;  %v14112_v54 = vld [vmem:[#allocation12 + $0x134] sm:$0xf0]  ;;  %v11916_v34 = vld [vmem:[#allocation12 + $0x328] sm:$0xf] }
 0x496   : > { %v14176_v19 = vld [vmem:[#allocation12 + $0x334] sm:$0xf0]  ;;  %v11516_v4 = vld [vmem:[#allocation12 + $0x8] sm:$0xf] }
 0x497   : > { %8679 = vmatpush.bf16.msra.mxu0 %v11597_v32  ;;  %8692 = vmatpush.bf16.msra.mxu1 %v11725_v44  ;;  %v11805_v32 = vor.u32 %v14148_v40, %v11804_v5  ;;  %v11660_v44 = vld [vmem:[#allocation12 + $0x128] sm:$0xf]  ;;  %v14108_v14 = vld [vmem:[#allocation12 + $0x114] sm:$0xf0]  ;;  %v11917_v11 = vor.u32 %v14176_v19, %v11916_v34 }
 0x498   : > { %8705 = vmatpush.bf16.msra.mxu2 %v11853_v36  ;;  %8718 = vmatpush.bf16.msra.mxu3 %v11981_v26  ;;  %v8402_v36 = vpop.f32.mrf.mxu2  ;;  %v14144_v26 = vld [vmem:[#allocation12 + $0x234] sm:$0xf0]  ;;  %v11661_v7 = vor.u32 %v14112_v54, %v11660_v44  ;;  %v11644_v2 = vld [vmem:[#allocation12 + $0x108] sm:$0xf] }
 0x499   : > { %v8415_v6 = vpop.f32.mrf.mxu3  ;;  %v11789_v17 = vor.u32 %v14144_v26, %v11788_v29  ;;  %v14140_v27 = vld [vmem:[#allocation12 + $0x214] sm:$0xf0]  ;;  %v11900_v59 = vld [vmem:[#allocation12 + $0x308] sm:$0xf] }
 0x49a   : > { %v8426_v52 = vpop.f32.mrf.mxu0  ;;  %v14172_v39 = vld [vmem:[#allocation12 + $0x314] sm:$0xf0]  ;;  %v12140_v62 = vld [vmem:[#allocation12 + $0x4e8] sm:$0xf] }
 0x49b   : > { %8680 = vmatpush.bf16.msra.mxu0 %v11581_v3  ;;  %8693 = vmatpush.bf16.msra.mxu1 %v11709_v61  ;;  %v14076_v3 = vld [vmem:[#allocation12 + $0x14] sm:$0xf0]  ;;  %v8427_v61 = vadd.f32 %v8426_v52, %v8414_v21  ;;  %v12268_v33 = vld [vmem:[#allocation12 + $0x5e8] sm:$0xf]  ;;  %v11901_v55 = vor.u32 %v14172_v39, %v11900_v59 }
 0x49c   : > { %8706 = vmatpush.bf16.msra.mxu2 %v11837_v47  ;;  %8719 = vmatpush.bf16.msra.mxu3 %v11965_v46  ;;  %v8439_v47 = vpop.f32.mrf.mxu1  ;;  %v11772_v46 = vld [vmem:[#allocation12 + $0x208] sm:$0xf]  ;;  %v14232_v30 = vld [vmem:[#allocation12 + $0x4f4] sm:$0xf0] }
 0x49d   : > { %v8440_v48 = vadd.f32 %v8439_v47, %v8427_v61  ;;  %v14264_v21 = vld [vmem:[#allocation12 + $0x5f4] sm:$0xf0]  ;;  %v12396_v13 = vld [vmem:[#allocation12 + $0x6e8] sm:$0xf]  ;;  %v11773_v63 = vor.u32 %v14140_v27, %v11772_v46  ;;  %v12141_v5 = vor.u32 %v14232_v30, %v12140_v62 }
 0x49e   : > { %v12524_v0 = vld [vmem:[#allocation12 + $0x7e8] sm:$0xf]  ;;  %v14328_v10 = vld [vmem:[#allocation12 + $0x7f4] sm:$0xf0]  ;;  %v12269_v22 = vor.u32 %v14264_v21, %v12268_v33 }
 0x49f   : > { %8681 = vmatpush.bf16.msra.mxu0 %v11565_v50  ;;  %8694 = vmatpush.bf16.msra.mxu1 %v11693_v23  ;;  %v11517_v50 = vor.u32 %v14076_v3, %v11516_v4  ;;  %v14296_v23 = vld [vmem:[#allocation12 + $0x6f4] sm:$0xf0]  ;;  %v12252_v51 = vld [vmem:[#allocation12 + $0x5c8] sm:$0xf]  ;;  %v12525_v24 = vor.u32 %v14328_v10, %v12524_v0 }
 0x4a0   : > { %8707 = vmatpush.bf16.msra.mxu2 %v11821_v49  ;;  %8720 = vmatpush.bf16.msra.mxu3 %v11949_v18  ;;  %v11645_v49 = vor.u32 %v14108_v14, %v11644_v2  ;;  %v8452_v18 = vpop.f32.mrf.mxu2  ;;  %v14260_v44 = vld [vmem:[#allocation12 + $0x5d4] sm:$0xf0]  ;;  %v12380_v36 = vld [vmem:[#allocation12 + $0x6c8] sm:$0xf] }
 0x4a1   : > { %v8453_v40 = vadd.f32 %v8452_v18, %v8440_v48  ;;  %v8465_v41 = vpop.f32.mrf.mxu3  ;;  %v12508_v26 = vld [vmem:[#allocation12 + $0x7c8] sm:$0xf]  ;;  %v14324_v6 = vld [vmem:[#allocation12 + $0x7d4] sm:$0xf0]  ;;  %v12253_v52 = vor.u32 %v14260_v44, %v12252_v51 }
 0x4a2   : > { %v8428_v54 = vpop.f32.mrf.mxu0  ;;  %v12108_v4 = vld [vmem:[#allocation12 + $0x4a8] sm:$0xf]  ;;  %v14224_v3 = vld [vmem:[#allocation12 + $0x4b4] sm:$0xf0]  ;;  %v12509_v47 = vor.u32 %v14324_v6, %v12508_v26 }
 0x4a3   : > { %8682 = vmatpush.bf16.msra.mxu0 %v11549_v15  ;;  %8695 = vmatpush.bf16.msra.mxu1 %v11677_v53  ;;  %v12397_v15 = vor.u32 %v14296_v23, %v12396_v13  ;;  %v12124_v53 = vld [vmem:[#allocation12 + $0x4c8] sm:$0xf]  ;;  %v17570_v29 = vadd.f32 %v8465_v41, %v8453_v40  ;;  %v14288_v2 = vld [vmem:[#allocation12 + $0x6b4] sm:$0xf0] }
 0x4a4   : > { %8708 = vmatpush.bf16.msra.mxu2 %v11805_v32  ;;  %8721 = vmatpush.bf16.msra.mxu3 %v11933_v1  ;;  %v14228_v32 = vld [vmem:[#allocation12 + $0x4d4] sm:$0xf0]  ;;  %v8441_v34 = vpop.f32.mrf.mxu1  ;;  %v12236_v61 = vld [vmem:[#allocation12 + $0x5a8] sm:$0xf] }
 0x4a5   : > { %v14292_v1 = vld [vmem:[#allocation12 + $0x6d4] sm:$0xf0]  ;;  %v12125_v19 = vor.u32 %v14228_v32, %v12124_v53  ;;  %v12492_v14 = vld [vmem:[#allocation12 + $0x7a8] sm:$0xf] }
 0x4a6   : > { %v14320_v46 = vld [vmem:[#allocation12 + $0x7b4] sm:$0xf0]  ;;  %v12092_v48 = vld [vmem:[#allocation12 + $0x488] sm:$0xf] }
 0x4a7   : > { %8683 = vmatpush.bf16.msra.mxu0 %v11533_v38  ;;  %8696 = vmatpush.bf16.msra.mxu1 %v11661_v7  ;;  %v12381_v38 = vor.u32 %v14292_v1, %v12380_v36  ;;  %v14256_v7 = vld [vmem:[#allocation12 + $0x5b4] sm:$0xf0]  ;;  %v12220_v30 = vld [vmem:[#allocation12 + $0x588] sm:$0xf] }
 0x4a8   : > { %8709 = vmatpush.bf16.msra.mxu2 %v11789_v17  ;;  %8722 = vmatpush.bf16.msra.mxu3 %v11917_v11  ;;  %v12364_v17 = vld [vmem:[#allocation12 + $0x6a8] sm:$0xf]  ;;  %v12109_v11 = vor.u32 %v14224_v3, %v12108_v4  ;;  %v8454_v27 = vpop.f32.mrf.mxu2  ;;  %v12237_v59 = vor.u32 %v14256_v7, %v12236_v61  ;;  %v14220_v62 = vld [vmem:[#allocation12 + $0x494] sm:$0xf0] }
 0x4a9   : > { %v12365_v39 = vor.u32 %v14288_v2, %v12364_v17  ;;  %v8467_v33 = vpop.f32.mrf.mxu3  ;;  %v14252_v21 = vld [vmem:[#allocation12 + $0x594] sm:$0xf0]  ;;  %v12348_v13 = vld [vmem:[#allocation12 + $0x688] sm:$0xf]  ;;  %v12093_v10 = vor.u32 %v14220_v62, %v12092_v48 }
 0x4aa   : > { %v14284_v23 = vld [vmem:[#allocation12 + $0x694] sm:$0xf0]  ;;  %v12221_v18 = vor.u32 %v14252_v21, %v12220_v30  ;;  %v12204_v41 = vld [vmem:[#allocation12 + $0x568] sm:$0xf] }
 0x4ab   : > { %8684 = vmatpush.bf16.msra.mxu0 %v11517_v50  ;;  %8697 = vmatpush.bf16.msra.mxu1 %v11645_v49  ;;  %v12493_v50 = vor.u32 %v14320_v46, %v12492_v14  ;;  %v12476_v49 = vld [vmem:[#allocation12 + $0x788] sm:$0xf]  ;;  %v8478_v0 = vpop.f32.mrf.mxu0  ;;  %v14216_v40 = vld [vmem:[#allocation12 + $0x474] sm:$0xf0] }
 0x4ac   : > { %8710 = vmatpush.bf16.msra.mxu2 %v11773_v63  ;;  %8723 = vmatpush.bf16.msra.mxu3 %v11901_v55  ;;  %v14316_v63 = vld [vmem:[#allocation12 + $0x794] sm:$0xf0]  ;;  %v12349_v55 = vor.u32 %v14284_v23, %v12348_v13  ;;  %v12332_v32 = vld [vmem:[#allocation12 + $0x668] sm:$0xf] }
 0x4ad   : > { %v14248_v53 = vld [vmem:[#allocation12 + $0x574] sm:$0xf0]  ;;  %v12460_v44 = vld [vmem:[#allocation12 + $0x768] sm:$0xf] }
 0x4ae   : > { %8685 = vmatmul.bf16.vlgmr.msra.gmra.mxu0 %v17880_v43  ;;  %8698 = vmatmul.bf16.vlgmr.msra.gmra.mxu1 %v17882_v37  ;;  %v14280_v51 = vld [vmem:[#allocation12 + $0x674] sm:$0xf0]  ;;  %v12205_v54 = vor.u32 %v14248_v53, %v12204_v41  ;;  %v12060_v6 = vld [vmem:[#allocation12 + $0x448] sm:$0xf] }
 0x4af   : > { %8729 = vmatpush.bf16.msrb.mxu0 %v12141_v5  ;;  %8742 = vmatpush.bf16.msrb.mxu1 %v12269_v22  ;;  %v12076_v5 = vld [vmem:[#allocation12 + $0x468] sm:$0xf]  ;;  %v8491_v22 = vpop.f32.mrf.mxu1  ;;  %v14312_v36 = vld [vmem:[#allocation12 + $0x774] sm:$0xf0]  ;;  %v12333_v26 = vor.u32 %v14280_v51, %v12332_v32 }
 0x4b0   : > { %8755 = vmatpush.bf16.msrb.mxu2 %v12397_v15  ;;  %8768 = vmatpush.bf16.msrb.mxu3 %v12525_v24  ;;  %v12477_v15 = vor.u32 %v14316_v63, %v12476_v49  ;;  %v8492_v24 = vadd.f32 %v8491_v22, %v8478_v0  ;;  %v12077_v1 = vor.u32 %v14216_v40, %v12076_v5  ;;  %v14212_v34 = vld [vmem:[#allocation12 + $0x454] sm:$0xf0]  ;;  %v12316_v4 = vld [vmem:[#allocation12 + $0x648] sm:$0xf] }
 0x4b1   : > { %8711 = vmatmul.bf16.vlgmr.msra.gmra.mxu2 %v17881_v9  ;;  %8724 = vmatmul.bf16.vlgmr.msra.gmra.mxu3 %v17883_v8  ;;  %v14276_v3 = vld [vmem:[#allocation12 + $0x654] sm:$0xf0]  ;;  %v12061_v2 = vor.u32 %v14212_v34, %v12060_v6  ;;  %v12044_v27 = vld [vmem:[#allocation12 + $0x428] sm:$0xf] }
 0x4b2   : > { %v14308_v7 = vld [vmem:[#allocation12 + $0x754] sm:$0xf0]  ;;  %v12428_v23 = vld [vmem:[#allocation12 + $0x728] sm:$0xf] }
 0x4b3   : > { %8730 = vmatpush.bf16.msrb.mxu0 %v12125_v19  ;;  %8743 = vmatpush.bf16.msrb.mxu1 %v12253_v52  ;;  %v12188_v19 = vld [vmem:[#allocation12 + $0x548] sm:$0xf]  ;;  %v12461_v52 = vor.u32 %v14312_v36, %v12460_v44  ;;  %v8480_v17 = vpop.f32.mrf.mxu0  ;;  %v14240_v33 = vld [vmem:[#allocation12 + $0x534] sm:$0xf0] }
 0x4b4   : > { %8756 = vmatpush.bf16.msrb.mxu2 %v12381_v38  ;;  %8769 = vmatpush.bf16.msrb.mxu3 %v12509_v47  ;;  %v14244_v38 = vld [vmem:[#allocation12 + $0x554] sm:$0xf0]  ;;  %v8504_v61 = vpop.f32.mrf.mxu2  ;;  %v12444_v47 = vld [vmem:[#allocation12 + $0x748] sm:$0xf]  ;;  %v8517_v48 = vpop.f32.mrf.mxu3 }
 0x4b5   : > { %v8505_v14 = vadd.f32 %v8504_v61, %v8492_v24  ;;  %v12189_v46 = vor.u32 %v14244_v38, %v12188_v19  ;;  %v12445_v30 = vor.u32 %v14308_v7, %v12444_v47  ;;  %v14272_v21 = vld [vmem:[#allocation12 + $0x634] sm:$0xf0]  ;;  %v12028_v0 = vld [vmem:[#allocation12 + $0x408] sm:$0xf] }
 0x4b6   : > { %v14304_v49 = vld [vmem:[#allocation12 + $0x734] sm:$0xf0]  ;;  %v12156_v5 = vld [vmem:[#allocation12 + $0x508] sm:$0xf] }
 0x4b7   : > { %8731 = vmatpush.bf16.msrb.mxu0 %v12109_v11  ;;  %8744 = vmatpush.bf16.msrb.mxu1 %v12237_v59  ;;  %v12317_v11 = vor.u32 %v14276_v3, %v12316_v4  ;;  %v14208_v59 = vld [vmem:[#allocation12 + $0x434] sm:$0xf0]  ;;  %v8493_v62 = vpop.f32.mrf.mxu1  ;;  %v17576_v13 = vadd.f32 %v8517_v48, %v8505_v14  ;;  %v12284_v41 = vld [vmem:[#allocation12 + $0x608] sm:$0xf]  ;;  %v12429_v22 = vor.u32 %v14304_v49, %v12428_v23 }
 0x4b8   : > { %8757 = vmatpush.bf16.msrb.mxu2 %v12365_v39  ;;  %8770 = vmatpush.bf16.msrb.mxu3 %v12493_v50  ;;  %v12172_v39 = vld [vmem:[#allocation12 + $0x528] sm:$0xf]  ;;  %v12045_v63 = vor.u32 %v14208_v59, %v12044_v27  ;;  %v14236_v40 = vld [vmem:[#allocation12 + $0x514] sm:$0xf0] }
 0x4b9   : > { %v12300_v50 = vld [vmem:[#allocation12 + $0x628] sm:$0xf]  ;;  %v14300_v32 = vld [vmem:[#allocation12 + $0x714] sm:$0xf0]  ;;  %v12157_v34 = vor.u32 %v14236_v40, %v12156_v5 }
 0x4ba   : > { %v12412_v53 = vld [vmem:[#allocation12 + $0x708] sm:$0xf]  ;;  %v14360_v44 = vld [vmem:[#allocation12 + $0x8f4] sm:$0xf0] }
 0x4bb   : > { %8732 = vmatpush.bf16.msrb.mxu0 %v12093_v10  ;;  %8745 = vmatpush.bf16.msrb.mxu1 %v12221_v18  ;;  %v14204_v10 = vld [vmem:[#allocation12 + $0x414] sm:$0xf0]  ;;  %v12173_v18 = vor.u32 %v14240_v33, %v12172_v39  ;;  %v12652_v24 = vld [vmem:[#allocation12 + $0x8e8] sm:$0xf]  ;;  %v12413_v3 = vor.u32 %v14300_v32, %v12412_v53 }
 0x4bc   : > { %8758 = vmatpush.bf16.msrb.mxu2 %v12349_v55  ;;  %8771 = vmatpush.bf16.msrb.mxu3 %v12477_v15  ;;  %v12301_v55 = vor.u32 %v14272_v21, %v12300_v50  ;;  %v14268_v15 = vld [vmem:[#allocation12 + $0x614] sm:$0xf0]  ;;  %v8506_v51 = vpop.f32.mrf.mxu2  ;;  %v12780_v36 = vld [vmem:[#allocation12 + $0x9e8] sm:$0xf]  ;;  %v8519_v4 = vpop.f32.mrf.mxu3  ;;  %v12653_v61 = vor.u32 %v14360_v44, %v12652_v24 }
 0x4bd   : > { %v14424_v6 = vld [vmem:[#allocation12 + $0xaf4] sm:$0xf0]  ;;  %v12285_v19 = vor.u32 %v14268_v15, %v12284_v41  ;;  %v12636_v17 = vld [vmem:[#allocation12 + $0x8c8] sm:$0xf] }
 0x4be   : > { %v14456_v38 = vld [vmem:[#allocation12 + $0xbf4] sm:$0xf0]  ;;  %v12764_v14 = vld [vmem:[#allocation12 + $0x9c8] sm:$0xf] }
 0x4bf   : > { %8733 = vmatpush.bf16.msrb.mxu0 %v12077_v1  ;;  %8746 = vmatpush.bf16.msrb.mxu1 %v12205_v54  ;;  %v12029_v1 = vor.u32 %v14204_v10, %v12028_v0  ;;  %v14392_v54 = vld [vmem:[#allocation12 + $0x9f4] sm:$0xf0]  ;;  %v12892_v27 = vld [vmem:[#allocation12 + $0xac8] sm:$0xf] }
 0x4c0   : > { %8759 = vmatpush.bf16.msrb.mxu2 %v12333_v26  ;;  %8772 = vmatpush.bf16.msrb.mxu3 %v12461_v52  ;;  %v12908_v26 = vld [vmem:[#allocation12 + $0xae8] sm:$0xf]  ;;  %v12781_v47 = vor.u32 %v14392_v54, %v12780_v36  ;;  %v14420_v59 = vld [vmem:[#allocation12 + $0xad4] sm:$0xf0] }
 0x4c1   : > { %v13036_v52 = vld [vmem:[#allocation12 + $0xbe8] sm:$0xf]  ;;  %v12909_v7 = vor.u32 %v14424_v6, %v12908_v26  ;;  %v14452_v48 = vld [vmem:[#allocation12 + $0xbd4] sm:$0xf0]  ;;  %v12893_v33 = vor.u32 %v14420_v59, %v12892_v27 }
 0x4c2   : > { %v13020_v39 = vld [vmem:[#allocation12 + $0xbc8] sm:$0xf]  ;;  %v14352_v21 = vld [vmem:[#allocation12 + $0x8b4] sm:$0xf0] }
 0x4c3   : > { %8734 = vmatpush.bf16.msrb.mxu0 %v12061_v2  ;;  %8747 = vmatpush.bf16.msrb.mxu1 %v12189_v46  ;;  %v14356_v2 = vld [vmem:[#allocation12 + $0x8d4] sm:$0xf0]  ;;  %v13037_v46 = vor.u32 %v14456_v38, %v13036_v52  ;;  %v12620_v50 = vld [vmem:[#allocation12 + $0x8a8] sm:$0xf]  ;;  %v13021_v49 = vor.u32 %v14452_v48, %v13020_v39 }
 0x4c4   : > { %8760 = vmatpush.bf16.msrb.mxu2 %v12317_v11  ;;  %8773 = vmatpush.bf16.msrb.mxu3 %v12445_v30  ;;  %v14388_v11 = vld [vmem:[#allocation12 + $0x9d4] sm:$0xf0]  ;;  %v12637_v62 = vor.u32 %v14356_v2, %v12636_v17  ;;  %v12748_v23 = vld [vmem:[#allocation12 + $0x9a8] sm:$0xf]  ;;  %v12621_v5 = vor.u32 %v14352_v21, %v12620_v50 }
 0x4c5   : > { %v12765_v30 = vor.u32 %v14388_v11, %v12764_v14  ;;  %v12876_v0 = vld [vmem:[#allocation12 + $0xaa8] sm:$0xf]  ;;  %v14416_v10 = vld [vmem:[#allocation12 + $0xab4] sm:$0xf0] }
 0x4c6   : > { %v12877_v41 = vor.u32 %v14416_v10, %v12876_v0  ;;  %v14348_v15 = vld [vmem:[#allocation12 + $0x894] sm:$0xf0]  ;;  %v12732_v53 = vld [vmem:[#allocation12 + $0x988] sm:$0xf] }
 0x4c7   : > { %8735 = vmatpush.bf16.msrb.mxu0 %v12045_v63  ;;  %8748 = vmatpush.bf16.msrb.mxu1 %v12173_v18  ;;  %v14384_v63 = vld [vmem:[#allocation12 + $0x9b4] sm:$0xf0]  ;;  %v13004_v18 = vld [vmem:[#allocation12 + $0xba8] sm:$0xf] }
 0x4c8   : > { %8761 = vmatpush.bf16.msrb.mxu2 %v12301_v55  ;;  %8774 = vmatpush.bf16.msrb.mxu3 %v12429_v22  ;;  %v14448_v55 = vld [vmem:[#allocation12 + $0xbb4] sm:$0xf0]  ;;  %v12749_v40 = vor.u32 %v14384_v63, %v12748_v23  ;;  %v12604_v22 = vld [vmem:[#allocation12 + $0x888] sm:$0xf] }
 0x4c9   : > { %v13005_v32 = vor.u32 %v14448_v55, %v13004_v18  ;;  %v14380_v51 = vld [vmem:[#allocation12 + $0x994] sm:$0xf0]  ;;  %v12860_v24 = vld [vmem:[#allocation12 + $0xa88] sm:$0xf]  ;;  %v12605_v26 = vor.u32 %v14348_v15, %v12604_v22 }
 0x4ca   : > { %v14412_v44 = vld [vmem:[#allocation12 + $0xa94] sm:$0xf0]  ;;  %v12988_v36 = vld [vmem:[#allocation12 + $0xb88] sm:$0xf] }
 0x4cb   : > { %8736 = vmatpush.bf16.msrb.mxu0 %v12029_v1  ;;  %8749 = vmatpush.bf16.msrb.mxu1 %v12157_v34  ;;  %v14444_v1 = vld [vmem:[#allocation12 + $0xb94] sm:$0xf0]  ;;  %v8530_v54 = vpop.f32.mrf.mxu0  ;;  %v12733_v34 = vor.u32 %v14380_v51, %v12732_v53  ;;  %v12588_v52 = vld [vmem:[#allocation12 + $0x868] sm:$0xf] }
 0x4cc   : > { %8762 = vmatpush.bf16.msrb.mxu2 %v12285_v19  ;;  %8775 = vmatpush.bf16.msrb.mxu3 %v12413_v3  ;;  %v8531_v6 = vadd.f32 %v8530_v54, %v17576_v13  ;;  %v12861_v19 = vor.u32 %v14412_v44, %v12860_v24  ;;  %v14344_v38 = vld [vmem:[#allocation12 + $0x874] sm:$0xf0]  ;;  %v12716_v4 = vld [vmem:[#allocation12 + $0x968] sm:$0xf]  ;;  %v8543_v3 = vpop.f32.mrf.mxu1 }
 0x4cd   : > { %v14408_v17 = vld [vmem:[#allocation12 + $0xa74] sm:$0xf0]  ;;  %v12972_v14 = vld [vmem:[#allocation12 + $0xb68] sm:$0xf]  ;;  %v12589_v11 = vor.u32 %v14344_v38, %v12588_v52 }
 0x4ce   : > { %8737 = vmatmul.bf16.vlgmr.msrb.gmra.mxu0 %v17171_v42  ;;  %8750 = vmatmul.bf16.vlgmr.msrb.gmra.mxu1 %v17191_v28  ;;  %v8544_v2 = vadd.f32 %v8543_v3, %v8531_v6  ;;  %v12572_v59 = vld [vmem:[#allocation12 + $0x848] sm:$0xf]  ;;  %v14340_v39 = vld [vmem:[#allocation12 + $0x854] sm:$0xf0] }
 0x4cf   : > { %8781 = vmatpush.bf16.msra.mxu0 %v12653_v61  ;;  %8794 = vmatpush.bf16.msra.mxu1 %v12781_v47  ;;  %v12989_v61 = vor.u32 %v14444_v1, %v12988_v36  ;;  %v14376_v47 = vld [vmem:[#allocation12 + $0x974] sm:$0xf0]  ;;  %v12700_v48 = vld [vmem:[#allocation12 + $0x948] sm:$0xf]  ;;  %v12573_v10 = vor.u32 %v14340_v39, %v12572_v59 }
 0x4d0   : > { %8807 = vmatpush.bf16.msra.mxu2 %v12909_v7  ;;  %8820 = vmatpush.bf16.msra.mxu3 %v13037_v46  ;;  %v12844_v7 = vld [vmem:[#allocation12 + $0xa68] sm:$0xf]  ;;  %v14440_v46 = vld [vmem:[#allocation12 + $0xb74] sm:$0xf0]  ;;  %v12717_v13 = vor.u32 %v14376_v47, %v12716_v4 }
 0x4d1   : > { %8763 = vmatmul.bf16.vlgmr.msrb.gmra.mxu2 %v17183_v58  ;;  %8776 = vmatmul.bf16.vlgmr.msrb.gmra.mxu3 %v17193_v45  ;;  %v12845_v27 = vor.u32 %v14408_v17, %v12844_v7  ;;  %v14404_v50 = vld [vmem:[#allocation12 + $0xa54] sm:$0xf0]  ;;  %v12956_v23 = vld [vmem:[#allocation12 + $0xb48] sm:$0xf] }
 0x4d2   : > { %v12684_v22 = vld [vmem:[#allocation12 + $0x928] sm:$0xf]  ;;  %v14368_v51 = vld [vmem:[#allocation12 + $0x934] sm:$0xf0] }
 0x4d3   : > { %8782 = vmatpush.bf16.msra.mxu0 %v12637_v62  ;;  %8795 = vmatpush.bf16.msra.mxu1 %v12765_v30  ;;  %v12973_v62 = vor.u32 %v14440_v46, %v12972_v14  ;;  %v14372_v30 = vld [vmem:[#allocation12 + $0x954] sm:$0xf0]  ;;  %v8532_v0 = vpop.f32.mrf.mxu0  ;;  %v12812_v24 = vld [vmem:[#allocation12 + $0xa28] sm:$0xf] }
 0x4d4   : > { %8808 = vmatpush.bf16.msra.mxu2 %v12893_v33  ;;  %8821 = vmatpush.bf16.msra.mxu3 %v13021_v49  ;;  %v12828_v33 = vld [vmem:[#allocation12 + $0xa48] sm:$0xf]  ;;  %v8556_v21 = vpop.f32.mrf.mxu2  ;;  %v14436_v49 = vld [vmem:[#allocation12 + $0xb54] sm:$0xf0]  ;;  %v12701_v18 = vor.u32 %v14372_v30, %v12700_v48  ;;  %v8545_v15 = vpop.f32.mrf.mxu1 }
 0x4d5   : > { %v8557_v63 = vadd.f32 %v8556_v21, %v8544_v2  ;;  %v12829_v55 = vor.u32 %v14404_v50, %v12828_v33  ;;  %v12957_v53 = vor.u32 %v14436_v49, %v12956_v23  ;;  %v14400_v44 = vld [vmem:[#allocation12 + $0xa34] sm:$0xf0]  ;;  %v12940_v36 = vld [vmem:[#allocation12 + $0xb28] sm:$0xf] }
 0x4d6   : > { %v14432_v1 = vld [vmem:[#allocation12 + $0xb34] sm:$0xf0]  ;;  %v12668_v52 = vld [vmem:[#allocation12 + $0x908] sm:$0xf] }
 0x4d7   : > { %8783 = vmatpush.bf16.msra.mxu0 %v12621_v5  ;;  %8796 = vmatpush.bf16.msra.mxu1 %v12749_v40  ;;  %v8569_v5 = vpop.f32.mrf.mxu3  ;;  %v12556_v40 = vld [vmem:[#allocation12 + $0x828] sm:$0xf]  ;;  %v14332_v6 = vld [vmem:[#allocation12 + $0x814] sm:$0xf0]  ;;  %v12941_v3 = vor.u32 %v14432_v1, %v12940_v36 }
 0x4d8   : > { %8809 = vmatpush.bf16.msra.mxu2 %v12877_v41  ;;  %8822 = vmatpush.bf16.msra.mxu3 %v13005_v32  ;;  %v14336_v41 = vld [vmem:[#allocation12 + $0x834] sm:$0xf0]  ;;  %v17583_v32 = vadd.f32 %v8569_v5, %v8557_v63  ;;  %v12796_v4 = vld [vmem:[#allocation12 + $0xa08] sm:$0xf] }
 0x4d9   : > { %v12557_v54 = vor.u32 %v14336_v41, %v12556_v40  ;;  %v14364_v38 = vld [vmem:[#allocation12 + $0x914] sm:$0xf0]  ;;  %v12924_v47 = vld [vmem:[#allocation12 + $0xb08] sm:$0xf] }
 0x4da   : > { %v14428_v7 = vld [vmem:[#allocation12 + $0xb14] sm:$0xf0]  ;;  %v13164_v2 = vld [vmem:[#allocation12 + $0xce8] sm:$0xf]  ;;  %v12669_v39 = vor.u32 %v14364_v38, %v12668_v52 }
 0x4db   : > { %8784 = vmatpush.bf16.msra.mxu0 %v12605_v26  ;;  %8797 = vmatpush.bf16.msra.mxu1 %v12733_v34  ;;  %v12540_v26 = vld [vmem:[#allocation12 + $0x808] sm:$0xf]  ;;  %v12685_v34 = vor.u32 %v14368_v51, %v12684_v22  ;;  %v14488_v14 = vld [vmem:[#allocation12 + $0xcf4] sm:$0xf0]  ;;  %v12925_v50 = vor.u32 %v14428_v7, %v12924_v47 }
 0x4dc   : > { %8810 = vmatpush.bf16.msra.mxu2 %v12861_v19  ;;  %8823 = vmatpush.bf16.msra.mxu3 %v12989_v61  ;;  %v12813_v19 = vor.u32 %v14400_v44, %v12812_v24  ;;  %v14396_v61 = vld [vmem:[#allocation12 + $0xa14] sm:$0xf0]  ;;  %v8558_v17 = vpop.f32.mrf.mxu2  ;;  %v13292_v46 = vld [vmem:[#allocation12 + $0xde8] sm:$0xf]  ;;  %v13165_v21 = vor.u32 %v14488_v14, %v13164_v2 }
 0x4dd   : > { %v14552_v59 = vld [vmem:[#allocation12 + $0xef4] sm:$0xf0]  ;;  %v12797_v48 = vor.u32 %v14396_v61, %v12796_v4  ;;  %v13148_v63 = vld [vmem:[#allocation12 + $0xcc8] sm:$0xf] }
 0x4de   : > { %v14584_v30 = vld [vmem:[#allocation12 + $0xff4] sm:$0xf0]  ;;  %v13404_v5 = vld [vmem:[#allocation12 + $0xec8] sm:$0xf] }
 0x4df   : > { %8785 = vmatpush.bf16.msra.mxu0 %v12589_v11  ;;  %8798 = vmatpush.bf16.msra.mxu1 %v12717_v13  ;;  %v12541_v11 = vor.u32 %v14332_v6, %v12540_v26  ;;  %v14520_v13 = vld [vmem:[#allocation12 + $0xdf4] sm:$0xf0]  ;;  %v8571_v33 = vpop.f32.mrf.mxu3  ;;  %v13532_v41 = vld [vmem:[#allocation12 + $0xfc8] sm:$0xf] }
 0x4e0   : > { %8811 = vmatpush.bf16.msra.mxu2 %v12845_v27  ;;  %8824 = vmatpush.bf16.msra.mxu3 %v12973_v62  ;;  %v13420_v27 = vld [vmem:[#allocation12 + $0xee8] sm:$0xf]  ;;  %v13293_v23 = vor.u32 %v14520_v13, %v13292_v46  ;;  %v14484_v0 = vld [vmem:[#allocation12 + $0xcd4] sm:$0xf0] }
 0x4e1   : > { %v13548_v62 = vld [vmem:[#allocation12 + $0xfe8] sm:$0xf]  ;;  %v13421_v49 = vor.u32 %v14552_v59, %v13420_v27  ;;  %v14548_v40 = vld [vmem:[#allocation12 + $0xed4] sm:$0xf0]  ;;  %v13149_v15 = vor.u32 %v14484_v0, %v13148_v63 }
 0x4e2   : > { %v14580_v22 = vld [vmem:[#allocation12 + $0xfd4] sm:$0xf0]  ;;  %v13405_v51 = vor.u32 %v14548_v40, %v13404_v5  ;;  %v13132_v24 = vld [vmem:[#allocation12 + $0xca8] sm:$0xf] }
 0x4e3   : > { %8786 = vmatpush.bf16.msra.mxu0 %v12573_v10  ;;  %8799 = vmatpush.bf16.msra.mxu1 %v12701_v18  ;;  %v13276_v10 = vld [vmem:[#allocation12 + $0xdc8] sm:$0xf]  ;;  %v13549_v18 = vor.u32 %v14584_v30, %v13548_v62  ;;  %v14480_v44 = vld [vmem:[#allocation12 + $0xcb4] sm:$0xf0]  ;;  %v13533_v1 = vor.u32 %v14580_v22, %v13532_v41 }
 0x4e4   : > { %8812 = vmatpush.bf16.msra.mxu2 %v12829_v55  ;;  %8825 = vmatpush.bf16.msra.mxu3 %v12957_v53  ;;  %v14516_v55 = vld [vmem:[#allocation12 + $0xdd4] sm:$0xf0]  ;;  %v13260_v36 = vld [vmem:[#allocation12 + $0xda8] sm:$0xf]  ;;  %v13133_v52 = vor.u32 %v14480_v44, %v13132_v24 }
 0x4e5   : > { %v13277_v53 = vor.u32 %v14516_v55, %v13276_v10  ;;  %v13388_v26 = vld [vmem:[#allocation12 + $0xea8] sm:$0xf]  ;;  %v14544_v6 = vld [vmem:[#allocation12 + $0xeb4] sm:$0xf0] }
 0x4e6   : > { %v13389_v4 = vor.u32 %v14544_v6, %v13388_v26  ;;  %v14476_v61 = vld [vmem:[#allocation12 + $0xc94] sm:$0xf0]  ;;  %v13244_v47 = vld [vmem:[#allocation12 + $0xd88] sm:$0xf] }
 0x4e7   : > { %8787 = vmatpush.bf16.msra.mxu0 %v12557_v54  ;;  %8800 = vmatpush.bf16.msra.mxu1 %v12685_v34  ;;  %v14512_v54 = vld [vmem:[#allocation12 + $0xdb4] sm:$0xf0]  ;;  %v13516_v34 = vld [vmem:[#allocation12 + $0xfa8] sm:$0xf] }
 0x4e8   : > { %8813 = vmatpush.bf16.msra.mxu2 %v12813_v19  ;;  %8826 = vmatpush.bf16.msra.mxu3 %v12941_v3  ;;  %v14576_v19 = vld [vmem:[#allocation12 + $0xfb4] sm:$0xf0]  ;;  %v13261_v38 = vor.u32 %v14512_v54, %v13260_v36  ;;  %v13116_v3 = vld [vmem:[#allocation12 + $0xc88] sm:$0xf] }
 0x4e9   : > { %v13517_v7 = vor.u32 %v14576_v19, %v13516_v34  ;;  %v14508_v17 = vld [vmem:[#allocation12 + $0xd94] sm:$0xf0]  ;;  %v13372_v2 = vld [vmem:[#allocation12 + $0xe88] sm:$0xf]  ;;  %v13117_v59 = vor.u32 %v14476_v61, %v13116_v3 }
 0x4ea   : > { %v14540_v14 = vld [vmem:[#allocation12 + $0xe94] sm:$0xf0]  ;;  %v13100_v30 = vld [vmem:[#allocation12 + $0xc68] sm:$0xf] }
 0x4eb   : > { %8788 = vmatpush.bf16.msra.mxu0 %v12541_v11  ;;  %8801 = vmatpush.bf16.msra.mxu1 %v12669_v39  ;;  %v8582_v46 = vpop.f32.mrf.mxu0  ;;  %v13500_v11 = vld [vmem:[#allocation12 + $0xf88] sm:$0xf]  ;;  %v14572_v13 = vld [vmem:[#allocation12 + $0xf94] sm:$0xf0]  ;;  %v8595_v39 = vpop.f32.mrf.mxu1  ;;  %v13373_v62 = vor.u32 %v14540_v14, %v13372_v2 }
 0x4ec   : > { %8814 = vmatpush.bf16.msra.mxu2 %v12797_v48  ;;  %8827 = vmatpush.bf16.msra.mxu3 %v12925_v50  ;;  %v8583_v27 = vadd.f32 %v8582_v46, %v17583_v32  ;;  %v13245_v48 = vor.u32 %v14508_v17, %v13244_v47  ;;  %v14472_v33 = vld [vmem:[#allocation12 + $0xc74] sm:$0xf0]  ;;  %v13228_v50 = vld [vmem:[#allocation12 + $0xd68] sm:$0xf] }
 0x4ed   : > { %v13356_v63 = vld [vmem:[#allocation12 + $0xe68] sm:$0xf]  ;;  %v14536_v0 = vld [vmem:[#allocation12 + $0xe74] sm:$0xf0]  ;;  %v13101_v55 = vor.u32 %v14472_v33, %v13100_v30 }
 0x4ee   : > { %8789 = vmatmul.bf16.vlgmr.msra.gmra.mxu0 %v17518_v16  ;;  %8802 = vmatmul.bf16.vlgmr.msra.gmra.mxu1 %v17522_v56  ;;  %v13484_v10 = vld [vmem:[#allocation12 + $0xf68] sm:$0xf]  ;;  %v13357_v5 = vor.u32 %v14536_v0, %v13356_v63  ;;  %v14468_v41 = vld [vmem:[#allocation12 + $0xc54] sm:$0xf0] }
 0x4ef   : > { %8833 = vmatpush.bf16.msrb.mxu0 %v13165_v21  ;;  %8846 = vmatpush.bf16.msrb.mxu1 %v13293_v23  ;;  %v13501_v21 = vor.u32 %v14572_v13, %v13500_v11  ;;  %v8596_v23 = vadd.f32 %v8595_v39, %v8583_v27  ;;  %v13084_v40 = vld [vmem:[#allocation12 + $0xc48] sm:$0xf]  ;;  %v14532_v44 = vld [vmem:[#allocation12 + $0xe54] sm:$0xf0]  ;;  %v9095_v13 = vrot.slane %v17570_v29, 4 }
 0x4f0   : > { %8859 = vmatpush.bf16.msrb.mxu2 %v13421_v49  ;;  %8872 = vmatpush.bf16.msrb.mxu3 %v13549_v18  ;;  %v14504_v49 = vld [vmem:[#allocation12 + $0xd74] sm:$0xf0]  ;;  %v13212_v22 = vld [vmem:[#allocation12 + $0xd48] sm:$0xf]  ;;  %v13085_v34 = vor.u32 %v14468_v41, %v13084_v40  ;;  %v11758_v41 = vld [vmem:[#allocation12 + $0x1f8] sm:$0xf0] }
 0x4f1   : > { %8815 = vmatmul.bf16.vlgmr.msra.gmra.mxu2 %v17520_v31  ;;  %8828 = vmatmul.bf16.vlgmr.msra.gmra.mxu3 %v17524_v20  ;;  %v14568_v18 = vld [vmem:[#allocation12 + $0xf74] sm:$0xf0]  ;;  %v13229_v32 = vor.u32 %v14504_v49, %v13228_v50  ;;  %v13340_v24 = vld [vmem:[#allocation12 + $0xe48] sm:$0xf] }
 0x4f2   : > { %v13468_v54 = vld [vmem:[#allocation12 + $0xf48] sm:$0xf]  ;;  %v14564_v26 = vld [vmem:[#allocation12 + $0xf54] sm:$0xf0] }
 0x4f3   : > { %8834 = vmatpush.bf16.msrb.mxu0 %v13149_v15  ;;  %8847 = vmatpush.bf16.msrb.mxu1 %v13277_v53  ;;  %v13485_v15 = vor.u32 %v14568_v18, %v13484_v10  ;;  %v8584_v6 = vpop.f32.mrf.mxu0  ;;  %v8597_v19 = vpop.f32.mrf.mxu1  ;;  %v13068_v3 = vld [vmem:[#allocation12 + $0xc28] sm:$0xf]  ;;  %v14464_v61 = vld [vmem:[#allocation12 + $0xc34] sm:$0xf0]  ;;  %v14102_v18 = vld [vmem:[#allocation12 + $0xec] sm:$0xf] }
 0x4f4   : > { %8860 = vmatpush.bf16.msrb.mxu2 %v13405_v51  ;;  %8873 = vmatpush.bf16.msrb.mxu3 %v13533_v1  ;;  %v8608_v53 = vpop.f32.mrf.mxu2  ;;  %v14500_v51 = vld [vmem:[#allocation12 + $0xd54] sm:$0xf0]  ;;  %v8621_v1 = vpop.f32.mrf.mxu3  ;;  %v13196_v47 = vld [vmem:[#allocation12 + $0xd28] sm:$0xf]  ;;  %v13069_v27 = vor.u32 %v14464_v61, %v13068_v3  ;;  %v14098_v19 = vld [vmem:[#allocation12 + $0xcc] sm:$0xf] }
 0x4f5   : > { %v8609_v36 = vadd.f32 %v8608_v53, %v8596_v23  ;;  %v14496_v17 = vld [vmem:[#allocation12 + $0xd34] sm:$0xf0]  ;;  %v13324_v2 = vld [vmem:[#allocation12 + $0xe28] sm:$0xf]  ;;  %v11742_v61 = vld [vmem:[#allocation12 + $0x1d8] sm:$0xf0] }
 0x4f6   : > { %v14528_v14 = vld [vmem:[#allocation12 + $0xe34] sm:$0xf0]  ;;  %v13452_v46 = vld [vmem:[#allocation12 + $0xf28] sm:$0xf] }
 0x4f7   : > { %8835 = vmatpush.bf16.msrb.mxu0 %v13133_v52  ;;  %8848 = vmatpush.bf16.msrb.mxu1 %v13261_v38  ;;  %v17590_v52 = vadd.f32 %v8621_v1, %v8609_v36  ;;  %v13213_v38 = vor.u32 %v14500_v51, %v13212_v22  ;;  %v14560_v11 = vld [vmem:[#allocation12 + $0xf34] sm:$0xf0]  ;;  %v13180_v30 = vld [vmem:[#allocation12 + $0xd08] sm:$0xf]  ;;  %v14166_v22 = vld [vmem:[#allocation12 + $0x2ec] sm:$0xf]  ;;  %v9096_v36 = vadd.f32 %v9095_v13, %v17570_v29 }
 0x4f8   : > { %8861 = vmatpush.bf16.msrb.mxu2 %v13389_v4  ;;  %8874 = vmatpush.bf16.msrb.mxu3 %v13517_v7  ;;  %v13341_v4 = vor.u32 %v14532_v44, %v13340_v24  ;;  %v13469_v7 = vor.u32 %v14564_v26, %v13468_v54  ;;  %v14460_v39 = vld [vmem:[#allocation12 + $0xc14] sm:$0xf0]  ;;  %v13308_v50 = vld [vmem:[#allocation12 + $0xe08] sm:$0xf]  ;;  %v13453_v23 = vor.u32 %v14560_v11, %v13452_v46  ;;  %v14198_v24 = vld [vmem:[#allocation12 + $0x3ec] sm:$0xf] }
 0x4f9   : > { %v14492_v33 = vld [vmem:[#allocation12 + $0xd14] sm:$0xf0]  ;;  %v13436_v63 = vld [vmem:[#allocation12 + $0xf08] sm:$0xf]  ;;  %v12014_v44 = vld [vmem:[#allocation12 + $0x3f8] sm:$0xf0] }
 0x4fa   : > { %v14524_v49 = vld [vmem:[#allocation12 + $0xe14] sm:$0xf0]  ;;  %v13181_v53 = vor.u32 %v14492_v33, %v13180_v30  ;;  %v12017_v3 = vor.u32 %v14198_v24, %v12014_v44  ;;  %v11726_v30 = vld [vmem:[#allocation12 + $0x1b8] sm:$0xf0]  ;;  %v14158_v33 = vld [vmem:[#allocation12 + $0x2ac] sm:$0xf] }
 0x4fb   : > { %8836 = vmatpush.bf16.msrb.mxu0 %v13117_v59  ;;  %8849 = vmatpush.bf16.msrb.mxu1 %v13245_v48  ;;  %v13052_v59 = vld [vmem:[#allocation12 + $0xc08] sm:$0xf]  ;;  %v13197_v48 = vor.u32 %v14496_v17, %v13196_v47  ;;  %v14556_v0 = vld [vmem:[#allocation12 + $0xf14] sm:$0xf0]  ;;  %v13309_v51 = vor.u32 %v14524_v49, %v13308_v50  ;;  %v14162_v47 = vld [vmem:[#allocation12 + $0x2cc] sm:$0xf] }
 0x4fc   : > { %8862 = vmatpush.bf16.msrb.mxu2 %v13373_v62  ;;  %8875 = vmatpush.bf16.msrb.mxu3 %v13501_v21  ;;  %v13325_v62 = vor.u32 %v14528_v14, %v13324_v2  ;;  %v9123_v21 = vmul.f32 %v17570_v29, %v17570_v29  ;;  %v8610_v10 = vpop.f32.mrf.mxu2  ;;  %v13053_v40 = vor.u32 %v14460_v39, %v13052_v59  ;;  %v14194_v17 = vld [vmem:[#allocation12 + $0x3cc] sm:$0xf]  ;;  %v11998_v2 = vld [vmem:[#allocation12 + $0x3d8] sm:$0xf0]  ;;  %v9097_v14 = vrot.slane %v9096_v36, 2 }
 0x4fd   : > { %v13437_v54 = vor.u32 %v14556_v0, %v13436_v63  ;;  %v14094_v59 = vld [vmem:[#allocation12 + $0xac] sm:$0xf]  ;;  %v11598_v39 = vld [vmem:[#allocation12 + $0xb8] sm:$0xf0] }
 0x4fe   : > { %v9127_v1 = vrot.slane %v9123_v21, 4  ;;  %v11854_v50 = vld [vmem:[#allocation12 + $0x2b8] sm:$0xf0]  ;;  %v9098_v49 = vadd.f32 %v9097_v14, %v9096_v36  ;;  %v11601_v0 = vor.u32 %v14094_v59, %v11598_v39  ;;  %v14082_v59 = vld [vmem:[#allocation12 + $0x4c] sm:$0xf] }
 0x4ff   : > { %8837 = vmatpush.bf16.msrb.mxu0 %v13101_v55  ;;  %8850 = vmatpush.bf16.msrb.mxu1 %v13229_v32  ;;  %v11630_v55 = vld [vmem:[#allocation12 + $0xf8] sm:$0xf0]  ;;  %v14134_v32 = vld [vmem:[#allocation12 + $0x1ec] sm:$0xf] }
 0x500   : > { %8863 = vmatpush.bf16.msrb.mxu2 %v13357_v5  ;;  %8876 = vmatpush.bf16.msrb.mxu3 %v13485_v15  ;;  %v8623_v5 = vpop.f32.mrf.mxu3  ;;  %v11886_v15 = vld [vmem:[#allocation12 + $0x2f8] sm:$0xf0]  ;;  %v11633_v26 = vor.u32 %v14102_v18, %v11630_v55  ;;  %v11761_v6 = vor.u32 %v14134_v32, %v11758_v41  ;;  %v9128_v46 = vadd.f32 %v9127_v1, %v9123_v21  ;;  %v14190_v21 = vld [vmem:[#allocation12 + $0x3ac] sm:$0xf]  ;;  %v9099_v44 = vrot.slane %v9098_v49, 1 }
 0x501   : > { %v11857_v18 = vor.u32 %v14158_v33, %v11854_v50  ;;  %v14090_v55 = vld [vmem:[#allocation12 + $0x8c] sm:$0xf]  ;;  %v11582_v32 = vld [vmem:[#allocation12 + $0x98] sm:$0xf0] }
 0x502   : > { %v9129_v63 = vrot.slane %v9128_v46, 2  ;;  %v14122_v5 = vld [vmem:[#allocation12 + $0x18c] sm:$0xf]  ;;  %v11710_v41 = vld [vmem:[#allocation12 + $0x198] sm:$0xf0] }
 0x503   : > { %8838 = vmatpush.bf16.msrb.mxu0 %v13085_v34  ;;  %8851 = vmatpush.bf16.msrb.mxu1 %v13213_v38  ;;  %v11889_v34 = vor.u32 %v14166_v22, %v11886_v15  ;;  %v11614_v38 = vld [vmem:[#allocation12 + $0xd8] sm:$0xf0]  ;;  %v14154_v22 = vld [vmem:[#allocation12 + $0x28c] sm:$0xf] }
 0x504   : > { %8864 = vmatpush.bf16.msrb.mxu2 %v13341_v4  ;;  %8877 = vmatpush.bf16.msrb.mxu3 %v13469_v7  ;;  %v14130_v4 = vld [vmem:[#allocation12 + $0x1cc] sm:$0xf]  ;;  %v11870_v7 = vld [vmem:[#allocation12 + $0x2d8] sm:$0xf0]  ;;  %v11617_v11 = vor.u32 %v14098_v19, %v11614_v38  ;;  %v9130_v36 = vadd.f32 %v9129_v63, %v9128_v46  ;;  %v9100_v46 = vadd.f32 %v9099_v44, %v9098_v49 }
 0x505   : > { %v11745_v13 = vor.u32 %v14130_v4, %v11742_v61  ;;  %v11838_v15 = vld [vmem:[#allocation12 + $0x298] sm:$0xf0]  ;;  %v14086_v19 = vld [vmem:[#allocation12 + $0x6c] sm:$0xf] }
 0x506   : > { %v11966_v24 = vld [vmem:[#allocation12 + $0x398] sm:$0xf0]  ;;  %v14118_v4 = vld [vmem:[#allocation12 + $0x16c] sm:$0xf] }
 0x507   : > { %8839 = vmatpush.bf16.msrb.mxu0 %v13069_v27  ;;  %8852 = vmatpush.bf16.msrb.mxu1 %v13197_v48  ;;  %v11873_v27 = vor.u32 %v14162_v47, %v11870_v7  ;;  %v14126_v48 = vld [vmem:[#allocation12 + $0x1ac] sm:$0xf]  ;;  %v11566_v38 = vld [vmem:[#allocation12 + $0x78] sm:$0xf0] }
 0x508   : > { %8865 = vmatpush.bf16.msrb.mxu2 %v13325_v62  ;;  %8878 = vmatpush.bf16.msrb.mxu3 %v13453_v23  ;;  %v12001_v62 = vor.u32 %v14194_v17, %v11998_v2  ;;  %v11982_v23 = vld [vmem:[#allocation12 + $0x3b8] sm:$0xf0]  ;;  %v11729_v10 = vor.u32 %v14126_v48, %v11726_v30  ;;  %v14150_v7 = vld [vmem:[#allocation12 + $0x26c] sm:$0xf] }
 0x509   : > { %v11694_v47 = vld [vmem:[#allocation12 + $0x178] sm:$0xf0]  ;;  %v14182_v2 = vld [vmem:[#allocation12 + $0x36c] sm:$0xf] }
 0x50a   : > { %v11822_v17 = vld [vmem:[#allocation12 + $0x278] sm:$0xf0]  ;;  %v14114_v48 = vld [vmem:[#allocation12 + $0x14c] sm:$0xf] }
 0x50b   : > { %8840 = vmatpush.bf16.msrb.mxu0 %v13053_v40  ;;  %8853 = vmatpush.bf16.msrb.mxu1 %v13181_v53  ;;  %v11985_v40 = vor.u32 %v14190_v21, %v11982_v23  ;;  %v8634_v53 = vpop.f32.mrf.mxu0  ;;  %v11950_v14 = vld [vmem:[#allocation12 + $0x378] sm:$0xf0]  ;;  %v14146_v50 = vld [vmem:[#allocation12 + $0x24c] sm:$0xf] }
 0x50c   : > { %8866 = vmatpush.bf16.msrb.mxu2 %v13309_v51  ;;  %8879 = vmatpush.bf16.msrb.mxu3 %v13437_v54  ;;  %v14186_v51 = vld [vmem:[#allocation12 + $0x38c] sm:$0xf]  ;;  %v8635_v1 = vadd.f32 %v8634_v53, %v17590_v52  ;;  %v11585_v54 = vor.u32 %v14090_v55, %v11582_v32  ;;  %v11569_v52 = vor.u32 %v14086_v19, %v11566_v38  ;;  %v11550_v39 = vld [vmem:[#allocation12 + $0x58] sm:$0xf0] }
 0x50d   : > { %v11678_v33 = vld [vmem:[#allocation12 + $0x158] sm:$0xf0]  ;;  %v11553_v32 = vor.u32 %v14082_v59, %v11550_v39  ;;  %v14074_v19 = vld [vmem:[#allocation12 + $0xc] sm:$0xf] }
 0x50e   : > { %8841 = vmatmul.bf16.vlgmr.msrb.gmra.mxu0 %v17539_v12  ;;  %8854 = vmatmul.bf16.vlgmr.msrb.gmra.mxu1 %v17543_v35  ;;  %v11806_v21 = vld [vmem:[#allocation12 + $0x258] sm:$0xf0]  ;;  %v14230_v39 = vld [vmem:[#allocation12 + $0x4ec] sm:$0xf] }
 0x50f   : > { %8885 = vmatpush.bf16.msra.mxu0 %v11633_v26  ;;  %8898 = vmatpush.bf16.msra.mxu1 %v11761_v6  ;;  %v8647_v26 = vpop.f32.mrf.mxu1  ;;  %v11713_v6 = vor.u32 %v14122_v5, %v11710_v41  ;;  %v11934_v49 = vld [vmem:[#allocation12 + $0x358] sm:$0xf0]  ;;  %v14078_v5 = vld [vmem:[#allocation12 + $0x2c] sm:$0xf] }
 0x510   : > { %8911 = vmatpush.bf16.msra.mxu2 %v11889_v34  ;;  %8924 = vmatpush.bf16.msra.mxu3 %v12017_v3  ;;  %v11841_v34 = vor.u32 %v14154_v22, %v11838_v15  ;;  %v11969_v3 = vor.u32 %v14186_v51, %v11966_v24  ;;  %v8648_v61 = vadd.f32 %v8647_v26, %v8635_v1  ;;  %v11534_v53 = vld [vmem:[#allocation12 + $0x38] sm:$0xf0]  ;;  %v14110_v51 = vld [vmem:[#allocation12 + $0x12c] sm:$0xf] }
 0x511   : > { %8867 = vmatmul.bf16.vlgmr.msrb.gmra.mxu2 %v17541_v60  ;;  %8880 = vmatmul.bf16.vlgmr.msrb.gmra.mxu3 %v17545_v57  ;;  %v11681_v22 = vor.u32 %v14114_v48, %v11678_v33  ;;  %v11809_v15 = vor.u32 %v14146_v50, %v11806_v21  ;;  %v11662_v24 = vld [vmem:[#allocation12 + $0x138] sm:$0xf0]  ;;  %v14142_v1 = vld [vmem:[#allocation12 + $0x22c] sm:$0xf] }
 0x512   : > { %v14174_v26 = vld [vmem:[#allocation12 + $0x32c] sm:$0xf]  ;;  %v11902_v59 = vld [vmem:[#allocation12 + $0x318] sm:$0xf0] }
 0x513   : > { %8886 = vmatpush.bf16.msra.mxu0 %v11617_v11  ;;  %8899 = vmatpush.bf16.msra.mxu1 %v11745_v13  ;;  %v9131_v11 = vrot.slane %v9130_v36, 1  ;;  %v11697_v13 = vor.u32 %v14118_v4, %v11694_v47  ;;  %v14106_v47 = vld [vmem:[#allocation12 + $0x10c] sm:$0xf]  ;;  %v12142_v33 = vld [vmem:[#allocation12 + $0x4f8] sm:$0xf0] }
 0x514   : > { %8912 = vmatpush.bf16.msra.mxu2 %v11873_v27  ;;  %8925 = vmatpush.bf16.msra.mxu3 %v12001_v62  ;;  %v11825_v27 = vor.u32 %v14150_v7, %v11822_v17  ;;  %v11953_v62 = vor.u32 %v14182_v2, %v11950_v14  ;;  %v8660_v30 = vpop.f32.mrf.mxu2  ;;  %v8673_v63 = vpop.f32.mrf.mxu3  ;;  %v11646_v7 = vld [vmem:[#allocation12 + $0x118] sm:$0xf0]  ;;  %v11665_v14 = vor.u32 %v14110_v51, %v11662_v24  ;;  %v14262_v50 = vld [vmem:[#allocation12 + $0x5ec] sm:$0xf] }
 0x515   : > { %v8661_v23 = vadd.f32 %v8660_v30, %v8648_v61  ;;  %v9132_v55 = vadd.f32 %v9131_v11, %v9130_v36  ;;  %v11518_v61 = vld [vmem:[#allocation12 + $0x18] sm:$0xf0]  ;;  %v14138_v11 = vld [vmem:[#allocation12 + $0x20c] sm:$0xf]  ;;  %v12145_v51 = vor.u32 %v14230_v39, %v12142_v33 }
 0x516   : > { %v14226_v24 = vld [vmem:[#allocation12 + $0x4cc] sm:$0xf] }
 0x517   : > { %8887 = vmatpush.bf16.msra.mxu0 %v11601_v0  ;;  %8900 = vmatpush.bf16.msra.mxu1 %v11729_v10  ;;  %v14178_v0 = vld [vmem:[#allocation12 + $0x34c] sm:$0xf]  ;;  %v8636_v10 = vpop.f32.mrf.mxu0  ;;  %v17604_v41 = vadd.f32 %v8673_v63, %v8661_v23  ;;  %v9151_v38 = vmul.f32 %v9132_v55, %v16632_v25  ;;  %v11521_v63 = vor.u32 %v14074_v19, %v11518_v61 }
 0x518   : > { %8913 = vmatpush.bf16.msra.mxu2 %v11857_v18  ;;  %8926 = vmatpush.bf16.msra.mxu3 %v11985_v40  ;;  %v17602_v18 = vmul.f32 %v9100_v46, %v16632_v25  ;;  %v8649_v40 = vpop.f32.mrf.mxu1  ;;  %v11937_v44 = vor.u32 %v14178_v0, %v11934_v49  ;;  %v12270_v0 = vld [vmem:[#allocation12 + $0x5f8] sm:$0xf0]  ;;  %v14294_v49 = vld [vmem:[#allocation12 + $0x6ec] sm:$0xf] }
 0x519   : > { %v9101_v36 = vrot.slane %v17604_v41, 4  ;;  %v12398_v10 = vld [vmem:[#allocation12 + $0x6f8] sm:$0xf0] }
 0x51a   : > { %v9155_v4 = vmul.f32 %v17602_v18, %v17602_v18 }
 0x51b   : > { %8888 = vmatpush.bf16.msra.mxu0 %v11585_v54  ;;  %8901 = vmatpush.bf16.msra.mxu1 %v11713_v6  ;;  %v11790_v54 = vld [vmem:[#allocation12 + $0x238] sm:$0xf0]  ;;  %v9124_v6 = vmul.f32 %v17604_v41, %v17604_v41  ;;  %v9102_v17 = vadd.f32 %v9101_v36, %v17604_v41  ;;  %v12401_v36 = vor.u32 %v14294_v49, %v12398_v10  ;;  %v14218_v10 = vld [vmem:[#allocation12 + $0x48c] sm:$0xf] }
 0x51c   : > { %8914 = vmatpush.bf16.msra.mxu2 %v11841_v34  ;;  %8927 = vmatpush.bf16.msra.mxu3 %v11969_v3  ;;  %v11918_v34 = vld [vmem:[#allocation12 + $0x338] sm:$0xf0]  ;;  %v11537_v3 = vor.u32 %v14078_v5, %v11534_v53  ;;  %v11793_v46 = vor.u32 %v14142_v1, %v11790_v54  ;;  %v8662_v48 = vpop.f32.mrf.mxu2  ;;  %v8675_v21 = vpop.f32.mrf.mxu3  ;;  %v9159_v23 = vsub.f32 %v9151_v38, %v9155_v4  ;;  %v14290_v4 = vld [vmem:[#allocation12 + $0x6cc] sm:$0xf] }
 0x51d   : > { %v9133_v2 = vrot.slane %v9124_v6, 4  ;;  %v11649_v5 = vor.u32 %v14106_v47, %v11646_v7  ;;  %v14322_v7 = vld [vmem:[#allocation12 + $0x7cc] sm:$0xf]  ;;  %v12238_v48 = vld [vmem:[#allocation12 + $0x5b8] sm:$0xf0] }
 0x51e   : > { %v17613_v19 = vadd.f32 1e-05, %v9159_v23  ;;  %v14318_v21 = vld [vmem:[#allocation12 + $0x7ac] sm:$0xf]  ;;  %v12494_v23 = vld [vmem:[#allocation12 + $0x7b8] sm:$0xf0] }
 0x51f   : > { %8889 = vmatpush.bf16.msra.mxu0 %v11569_v52  ;;  %8902 = vmatpush.bf16.msra.mxu1 %v11697_v13  ;;  %v11774_v52 = vld [vmem:[#allocation12 + $0x218] sm:$0xf0]  ;;  %v11921_v13 = vor.u32 %v14174_v26, %v11918_v34  ;;  %v9134_v30 = vadd.f32 %v9133_v2, %v9124_v6  ;;  %v12273_v26 = vor.u32 %v14262_v50, %v12270_v0  ;;  %v14258_v6 = vld [vmem:[#allocation12 + $0x5cc] sm:$0xf] }
 0x520   : > { %8915 = vmatpush.bf16.msra.mxu2 %v11825_v27  ;;  %8928 = vmatpush.bf16.msra.mxu3 %v11953_v62  ;;  %v14170_v27 = vld [vmem:[#allocation12 + $0x30c] sm:$0xf]  ;;  %v9103_v62 = vrot.slane %v9102_v17, 2  ;;  %v11777_v40 = vor.u32 %v14138_v11, %v11774_v52  ;;  %v12254_v34 = vld [vmem:[#allocation12 + $0x5d8] sm:$0xf0]  ;;  %14745 = vrsqrt.f32 %v17613_v19  ;;  %vm9173_vm7 = vweird.f32 %v17613_v19 }
 0x521   : > { %v11905_v53 = vor.u32 %v14170_v27, %v11902_v59  ;;  %v12110_v27 = vld [vmem:[#allocation12 + $0x4b8] sm:$0xf0]  ;;  %v14254_v59 = vld [vmem:[#allocation12 + $0x5ac] sm:$0xf] }
 0x522   : > { %v9104_v55 = vadd.f32 %v9103_v62, %v9102_v17  ;;  %v12510_v17 = vld [vmem:[#allocation12 + $0x7d8] sm:$0xf0]  ;;  %v14286_v62 = vld [vmem:[#allocation12 + $0x6ac] sm:$0xf] }
 0x523   : > { %8890 = vmatpush.bf16.msra.mxu0 %v11553_v32  ;;  %8903 = vmatpush.bf16.msra.mxu1 %v11681_v22  ;;  %v9135_v32 = vrot.slane %v9134_v30, 2  ;;  %v14326_v22 = vld [vmem:[#allocation12 + $0x7ec] sm:$0xf]  ;;  %v12513_v39 = vor.u32 %v14322_v7, %v12510_v17  ;;  %v12462_v7 = vld [vmem:[#allocation12 + $0x778] sm:$0xf0] }
 0x524   : > { %8916 = vmatpush.bf16.msra.mxu2 %v11809_v15  ;;  %8929 = vmatpush.bf16.msra.mxu3 %v11937_v44  ;;  %v12526_v15 = vld [vmem:[#allocation12 + $0x7f8] sm:$0xf0]  ;;  %v9105_v1 = vrot.slane %v9104_v55, 1 }
 0x525   : > { %v12126_v44 = vld [vmem:[#allocation12 + $0x4d8] sm:$0xf0]  ;;  %v9136_v54 = vadd.f32 %v9135_v32, %v9134_v30  ;;  %v12529_v38 = vor.u32 %v14326_v22, %v12526_v15  ;;  %v14250_v32 = vld [vmem:[#allocation12 + $0x58c] sm:$0xf] }
 0x526   : > { %v9106_v61 = vadd.f32 %v9105_v1, %v9104_v55  ;;  %v12129_v2 = vor.u32 %v14226_v24, %v12126_v44  ;;  %v12366_v30 = vld [vmem:[#allocation12 + $0x6b8] sm:$0xf0]  ;;  %v14282_v22 = vld [vmem:[#allocation12 + $0x68c] sm:$0xf]  ;;  %v17628_v24 = vpop.eup %14745 }
 0x527   : > { %8891 = vmatpush.bf16.msra.mxu0 %v11537_v3  ;;  %8904 = vmatpush.bf16.msra.mxu1 %v11665_v14  ;;  %v12382_v3 = vld [vmem:[#allocation12 + $0x6d8] sm:$0xf0]  ;;  %v9137_v47 = vrot.slane %v9136_v54, 1  ;;  %v12257_v14 = vor.u32 %v14258_v6, %v12254_v34  ;;  %v12369_v49 = vor.u32 %v14286_v62, %v12366_v30  ;;  %v9168_v17 = vmul.f32 %v17628_v24, %v17613_v19  ;;  %v14274_v62 = vld [vmem:[#allocation12 + $0x64c] sm:$0xf] }
 0x528   : > { %8917 = vmatpush.bf16.msra.mxu2 %v11793_v46  ;;  %8930 = vmatpush.bf16.msra.mxu3 %v11921_v13  ;;  %v17616_v46 = vmul.f32 %v9106_v61, %v16632_v25  ;;  %v12385_v52 = vor.u32 %v14290_v4, %v12382_v3  ;;  %v14222_v13 = vld [vmem:[#allocation12 + $0x4ac] sm:$0xf]  ;;  %v12094_v55 = vld [vmem:[#allocation12 + $0x498] sm:$0xf0]  ;;  %vm9174_vm5 = vweird.f32 %v17628_v24 }
 0x529   : > { %v9138_v11 = vadd.f32 %v9137_v47, %v9136_v54  ;;  %v12350_v15 = vld [vmem:[#allocation12 + $0x698] sm:$0xf0]  ;;  %v14214_v54 = vld [vmem:[#allocation12 + $0x46c] sm:$0xf]  ;;  %vm9175_vm6 = vmor %vm9173_vm7, %vm9174_vm5 }
 0x52a   : > { %v9156_v50 = vmul.f32 %v17616_v46, %v17616_v46  ;;  %v12353_v1 = vor.u32 %v14282_v22, %v12350_v15  ;;  %v14278_v4 = vld [vmem:[#allocation12 + $0x66c] sm:$0xf]  ;;  %v12334_v3 = vld [vmem:[#allocation12 + $0x678] sm:$0xf0] }
 0x52b   : > { %8892 = vmatpush.bf16.msra.mxu0 %v11521_v63  ;;  %8905 = vmatpush.bf16.msra.mxu1 %v11649_v5  ;;  %v9152_v33 = vmul.f32 %v9138_v11, %v16632_v25  ;;  %v12113_v63 = vor.u32 %v14222_v13, %v12110_v27  ;;  %v12497_v5 = vor.u32 %v14318_v21, %v12494_v23  ;;  %v8699_v6 = vpop.f32.mrf.mxu1  ;;  %v14310_v47 = vld [vmem:[#allocation12 + $0x76c] sm:$0xf]  ;;  %v12062_v13 = vld [vmem:[#allocation12 + $0x458] sm:$0xf0] }
 0x52c   : > { %8918 = vmatpush.bf16.msra.mxu2 %v11777_v40  ;;  %8931 = vmatpush.bf16.msra.mxu3 %v11905_v53  ;;  %v12222_v40 = vld [vmem:[#allocation12 + $0x598] sm:$0xf0]  ;;  %v12337_v11 = vor.u32 %v14278_v4, %v12334_v3  ;;  %v14242_v27 = vld [vmem:[#allocation12 + $0x54c] sm:$0xf] }
 0x52d   : > { %v9160_v0 = vsub.f32 %v9152_v33, %v9156_v50  ;;  %v12478_v53 = vld [vmem:[#allocation12 + $0x798] sm:$0xf0]  ;;  %v12225_v44 = vor.u32 %v14250_v32, %v12222_v40  ;;  %v14306_v23 = vld [vmem:[#allocation12 + $0x74c] sm:$0xf] }
 0x52e   : > { %8893 = vmatmul.bf16.vlgmr.msra.gmra.mxu0 %v17880_v43  ;;  %8906 = vmatmul.bf16.vlgmr.msra.gmra.mxu1 %v17882_v37  ;;  %v8686_v37 = vpop.f32.mrf.mxu0  ;;  %v12318_v30 = vld [vmem:[#allocation12 + $0x658] sm:$0xf0]  ;;  %v14206_v40 = vld [vmem:[#allocation12 + $0x42c] sm:$0xf] }
 0x52f   : > { %8937 = vmatpush.bf16.msrb.mxu0 %v12145_v51  ;;  %8950 = vmatpush.bf16.msrb.mxu1 %v12273_v26  ;;  %v17626_v43 = vadd.f32 1e-05, %v9160_v0  ;;  %v12097_v51 = vor.u32 %v14218_v10, %v12094_v55  ;;  %v12078_v26 = vld [vmem:[#allocation12 + $0x478] sm:$0xf0]  ;;  %v8700_v61 = vadd.f32 %v8699_v6, %v8686_v37  ;;  %v9169_v0 = vmul.f32 %v17628_v24, %v9168_v17  ;;  %v14238_v15 = vld [vmem:[#allocation12 + $0x52c] sm:$0xf] }
 0x530   : > { %8963 = vmatpush.bf16.msrb.mxu2 %v12401_v36  ;;  %8976 = vmatpush.bf16.msrb.mxu3 %v12529_v38  ;;  %v14246_v36 = vld [vmem:[#allocation12 + $0x56c] sm:$0xf]  ;;  %v12206_v38 = vld [vmem:[#allocation12 + $0x578] sm:$0xf0] }
 0x531   : > { %8919 = vmatmul.bf16.vlgmr.msra.gmra.mxu2 %v17881_v9  ;;  %8932 = vmatmul.bf16.vlgmr.msra.gmra.mxu3 %v17883_v8  ;;  %v12241_v9 = vor.u32 %v14254_v59, %v12238_v48  ;;  %v14314_v8 = vld [vmem:[#allocation12 + $0x78c] sm:$0xf]  ;;  %14747 = vrsqrt.f32 %v17626_v43  ;;  %v12190_v48 = vld [vmem:[#allocation12 + $0x558] sm:$0xf0]  ;;  %v17641_v6 = vmul.f32 0.5, %v9169_v0  ;;  %vm9183_vm13 = vweird.f32 %v17626_v43 }
 0x532   : > { %v12481_v34 = vor.u32 %v14314_v8, %v12478_v53  ;;  %v12193_v32 = vor.u32 %v14242_v27, %v12190_v48  ;;  %v12046_v22 = vld [vmem:[#allocation12 + $0x438] sm:$0xf0]  ;;  %v14234_v3 = vld [vmem:[#allocation12 + $0x50c] sm:$0xf] }
 0x533   : > { %8938 = vmatpush.bf16.msrb.mxu0 %v12129_v2  ;;  %8951 = vmatpush.bf16.msrb.mxu1 %v12257_v14  ;;  %v12081_v2 = vor.u32 %v14214_v54, %v12078_v26  ;;  %v12209_v14 = vor.u32 %v14246_v36, %v12206_v38  ;;  %v8701_v8 = vpop.f32.mrf.mxu1  ;;  %v12174_v37 = vld [vmem:[#allocation12 + $0x538] sm:$0xf0]  ;;  %v14302_v54 = vld [vmem:[#allocation12 + $0x72c] sm:$0xf]  ;;  %v12049_v38 = vor.u32 %v14206_v40, %v12046_v22 }
 0x534   : > { %8964 = vmatpush.bf16.msrb.mxu2 %v12385_v52  ;;  %8977 = vmatpush.bf16.msrb.mxu3 %v12513_v39  ;;  %v14210_v52 = vld [vmem:[#allocation12 + $0x44c] sm:$0xf]  ;;  %v8712_v59 = vpop.f32.mrf.mxu2  ;;  %v12465_v39 = vor.u32 %v14310_v47, %v12462_v7  ;;  %v8725_v50 = vpop.f32.mrf.mxu3  ;;  %v12430_v26 = vld [vmem:[#allocation12 + $0x738] sm:$0xf0] }
 0x535   : > { %v8713_v33 = vadd.f32 %v8712_v59, %v8700_v61  ;;  %v14202_v36 = vld [vmem:[#allocation12 + $0x40c] sm:$0xf]  ;;  %v12030_v4 = vld [vmem:[#allocation12 + $0x418] sm:$0xf0]  ;;  %v12177_v61 = vor.u32 %v14238_v15, %v12174_v37 }
 0x536   : > { %v8688_v55 = vpop.f32.mrf.mxu0  ;;  %v12158_v7 = vld [vmem:[#allocation12 + $0x518] sm:$0xf0]  ;;  %v14266_v17 = vld [vmem:[#allocation12 + $0x60c] sm:$0xf] }
 0x537   : > { %8939 = vmatpush.bf16.msrb.mxu0 %v12113_v63  ;;  %8952 = vmatpush.bf16.msrb.mxu1 %v12241_v9  ;;  %v17633_v21 = vpop.eup %14747  ;;  %v12446_v63 = vld [vmem:[#allocation12 + $0x758] sm:$0xf0]  ;;  %v17638_v10 = vadd.f32 %v8725_v50, %v8713_v33  ;;  %v14358_v27 = vld [vmem:[#allocation12 + $0x8ec] sm:$0xf]  ;;  %v12033_v33 = vor.u32 %v14202_v36, %v12030_v4  ;;  %v9171_v55 = vsub.f32 1.5, %v17641_v6 }
 0x538   : > { %8965 = vmatpush.bf16.msrb.mxu2 %v12369_v49  ;;  %8978 = vmatpush.bf16.msrb.mxu3 %v12497_v5  ;;  %v9178_v9 = vmul.f32 %v17633_v21, %v17626_v43  ;;  %v12065_v49 = vor.u32 %v14210_v52, %v12062_v13  ;;  %v12321_v5 = vor.u32 %v14274_v62, %v12318_v30  ;;  %v14298_v52 = vld [vmem:[#allocation12 + $0x70c] sm:$0xf]  ;;  %v12414_v13 = vld [vmem:[#allocation12 + $0x718] sm:$0xf0]  ;;  %vm9184_vm12 = vweird.f32 %v17633_v21 }
 0x539   : > { %v14390_v48 = vld [vmem:[#allocation12 + $0x9ec] sm:$0xf]  ;;  %v12782_v62 = vld [vmem:[#allocation12 + $0x9f8] sm:$0xf0]  ;;  %vm17649_vm14 = vmor %vm9183_vm13, %vm9184_vm12 }
 0x53a   : > { %v9179_v53 = vmul.f32 %v17633_v21, %v9178_v9  ;;  %v14422_v50 = vld [vmem:[#allocation12 + $0xaec] sm:$0xf]  ;;  %v12785_v40 = vor.u32 %v14390_v48, %v12782_v62  ;;  %v12638_v8 = vld [vmem:[#allocation12 + $0x8d8] sm:$0xf0] }
 0x53b   : > { %8940 = vmatpush.bf16.msrb.mxu0 %v12097_v51  ;;  %8953 = vmatpush.bf16.msrb.mxu1 %v12225_v44  ;;  %v12449_v51 = vor.u32 %v14306_v23, %v12446_v63  ;;  %v14270_v44 = vld [vmem:[#allocation12 + $0x62c] sm:$0xf]  ;;  %v12910_v23 = vld [vmem:[#allocation12 + $0xaf8] sm:$0xf0]  ;;  %v12161_v63 = vor.u32 %v14234_v3, %v12158_v7 }
 0x53c   : > { %8966 = vmatpush.bf16.msrb.mxu2 %v12353_v1  ;;  %8979 = vmatpush.bf16.msrb.mxu3 %v12481_v34  ;;  %v12302_v1 = vld [vmem:[#allocation12 + $0x638] sm:$0xf0]  ;;  %v9180_v34 = vmul.f32 0.5, %v9179_v53  ;;  %v8727_v59 = vpop.f32.mrf.mxu3  ;;  %v14454_v9 = vld [vmem:[#allocation12 + $0xbec] sm:$0xf]  ;;  %v12913_v22 = vor.u32 %v14422_v50, %v12910_v23 }
 0x53d   : > { %v12305_v47 = vor.u32 %v14270_v44, %v12302_v1  ;;  %v14354_v15 = vld [vmem:[#allocation12 + $0x8cc] sm:$0xf]  ;;  %v12766_v44 = vld [vmem:[#allocation12 + $0x9d8] sm:$0xf0] }
 0x53e   : > { %v9181_v30 = vsub.f32 1.5, %v9180_v34  ;;  %v14386_v53 = vld [vmem:[#allocation12 + $0x9cc] sm:$0xf]  ;;  %v13022_v36 = vld [vmem:[#allocation12 + $0xbd8] sm:$0xf0]  ;;  %v12641_v6 = vor.u32 %v14354_v15, %v12638_v8 }
 0x53f   : > { %8941 = vmatpush.bf16.msrb.mxu0 %v12081_v2  ;;  %8954 = vmatpush.bf16.msrb.mxu1 %v12209_v14  ;;  %v12286_v2 = vld [vmem:[#allocation12 + $0x618] sm:$0xf0]  ;;  %v8714_v14 = vpop.f32.mrf.mxu2  ;;  %v14418_v1 = vld [vmem:[#allocation12 + $0xacc] sm:$0xf]  ;;  %v12769_v4 = vor.u32 %v14386_v53, %v12766_v44 }
 0x540   : > { %8967 = vmatpush.bf16.msrb.mxu2 %v12337_v11  ;;  %8980 = vmatpush.bf16.msrb.mxu3 %v12465_v39  ;;  %v12433_v11 = vor.u32 %v14302_v54, %v12430_v26  ;;  %v12654_v39 = vld [vmem:[#allocation12 + $0x8f8] sm:$0xf0]  ;;  %v12289_v0 = vor.u32 %v14266_v17, %v12286_v2  ;;  %v14450_v26 = vld [vmem:[#allocation12 + $0xbcc] sm:$0xf]  ;;  %v9172_v14 = vmul.f32 %v17628_v24, %v9171_v55 }
 0x541   : > { %v12894_v54 = vld [vmem:[#allocation12 + $0xad8] sm:$0xf0]  ;;  %v14350_v34 = vld [vmem:[#allocation12 + $0x8ac] sm:$0xf]  ;;  %v13025_v7 = vor.u32 %v14450_v26, %v13022_v36 }
 0x542   : > { %v12897_v3 = vor.u32 %v14418_v1, %v12894_v54  ;;  %v12750_v43 = vld [vmem:[#allocation12 + $0x9b8] sm:$0xf0]  ;;  %v14414_v17 = vld [vmem:[#allocation12 + $0xaac] sm:$0xf] }
 0x543   : > { %8942 = vmatpush.bf16.msrb.mxu0 %v12065_v49  ;;  %8955 = vmatpush.bf16.msrb.mxu1 %v12193_v32  ;;  %v13038_v49 = vld [vmem:[#allocation12 + $0xbf8] sm:$0xf0]  ;;  %v12417_v32 = vor.u32 %v14298_v52, %v12414_v13  ;;  %v14446_v52 = vld [vmem:[#allocation12 + $0xbac] sm:$0xf] }
 0x544   : > { %8968 = vmatpush.bf16.msrb.mxu2 %v12321_v5  ;;  %8981 = vmatpush.bf16.msrb.mxu3 %v12449_v51  ;;  %v12657_v5 = vor.u32 %v14358_v27, %v12654_v39  ;;  %v9182_v51 = vmul.f32 %v17633_v21, %v9181_v30  ;;  %v13041_v37 = vor.u32 %v14454_v9, %v13038_v49  ;;  %v12878_v2 = vld [vmem:[#allocation12 + $0xab8] sm:$0xf0]  ;;  %v14346_v27 = vld [vmem:[#allocation12 + $0x88c] sm:$0xf] }
 0x545   : > { %v13006_v13 = vld [vmem:[#allocation12 + $0xbb8] sm:$0xf0]  ;;  %v12881_v39 = vor.u32 %v14414_v17, %v12878_v2  ;;  %v14378_v62 = vld [vmem:[#allocation12 + $0x98c] sm:$0xf] }
 0x546   : > { %v12606_v48 = vld [vmem:[#allocation12 + $0x898] sm:$0xf0]  ;;  %v14410_v30 = vld [vmem:[#allocation12 + $0xa8c] sm:$0xf] }
 0x547   : > { %8943 = vmatpush.bf16.msrb.mxu0 %v12049_v38  ;;  %8956 = vmatpush.bf16.msrb.mxu1 %v12177_v61  ;;  %v12622_v61 = vld [vmem:[#allocation12 + $0x8b8] sm:$0xf0]  ;;  %v14442_v50 = vld [vmem:[#allocation12 + $0xb8c] sm:$0xf] }
 0x548   : > { %8969 = vmatpush.bf16.msrb.mxu2 %v12305_v47  ;;  %8982 = vmatpush.bf16.msrb.mxu3 %v12433_v11  ;;  %v14382_v47 = vld [vmem:[#allocation12 + $0x9ac] sm:$0xf]  ;;  %v9186_v11 = vsel %vm17649_vm14, %v17633_v21, %v9182_v51  ;;  %v12734_v21 = vld [vmem:[#allocation12 + $0x998] sm:$0xf0] }
 0x549   : > { %v12753_v59 = vor.u32 %v14382_v47, %v12750_v43  ;;  %v12862_v19 = vld [vmem:[#allocation12 + $0xa98] sm:$0xf0]  ;;  %v12737_v9 = vor.u32 %v14378_v62, %v12734_v21  ;;  %v14342_v55 = vld [vmem:[#allocation12 + $0x86c] sm:$0xf] }
 0x54a   : > { %v12865_v49 = vor.u32 %v14410_v30, %v12862_v19  ;;  %v12718_v15 = vld [vmem:[#allocation12 + $0x978] sm:$0xf0]  ;;  %v14406_v8 = vld [vmem:[#allocation12 + $0xa6c] sm:$0xf] }
 0x54b   : > { %8944 = vmatpush.bf16.msrb.mxu0 %v12033_v33  ;;  %8957 = vmatpush.bf16.msrb.mxu1 %v12161_v63  ;;  %v9176_v33 = vsel %vm9175_vm6, %v17628_v24, %v9172_v14  ;;  %v12609_v63 = vor.u32 %v14346_v27, %v12606_v48  ;;  %v12846_v53 = vld [vmem:[#allocation12 + $0xa78] sm:$0xf0]  ;;  %v14438_v51 = vld [vmem:[#allocation12 + $0xb6c] sm:$0xf] }
 0x54c   : > { %8970 = vmatpush.bf16.msrb.mxu2 %v12289_v0  ;;  %8983 = vmatpush.bf16.msrb.mxu3 %v12417_v32  ;;  %v8738_v0 = vpop.f32.mrf.mxu0  ;;  %v12590_v32 = vld [vmem:[#allocation12 + $0x878] sm:$0xf0]  ;;  %v12849_v26 = vor.u32 %v14406_v8, %v12846_v53  ;;  %v14338_v36 = vld [vmem:[#allocation12 + $0x84c] sm:$0xf] }
 0x54d   : > { %v12593_v1 = vor.u32 %v14342_v55, %v12590_v32  ;;  %v14434_v43 = vld [vmem:[#allocation12 + $0xb4c] sm:$0xf]  ;;  %v12958_v17 = vld [vmem:[#allocation12 + $0xb58] sm:$0xf0] }
 0x54e   : > { %8945 = vmatmul.bf16.vlgmr.msrb.gmra.mxu0 %v17171_v42  ;;  %8958 = vmatmul.bf16.vlgmr.msrb.gmra.mxu1 %v17191_v28  ;;  %v9211_v42 = vrot.slane %v9186_v11, 7  ;;  %v12990_v28 = vld [vmem:[#allocation12 + $0xb98] sm:$0xf0]  ;;  %v12961_v48 = vor.u32 %v14434_v43, %v12958_v17  ;;  %v14430_v21 = vld [vmem:[#allocation12 + $0xb2c] sm:$0xf] }
 0x54f   : > { %8989 = vmatpush.bf16.msra.mxu0 %v12657_v5  ;;  %9002 = vmatpush.bf16.msra.mxu1 %v12785_v40  ;;  %v14374_v5 = vld [vmem:[#allocation12 + $0x96c] sm:$0xf]  ;;  %v8739_v40 = vadd.f32 %v8738_v0, %v17638_v10  ;;  %v12993_v24 = vor.u32 %v14442_v50, %v12990_v28  ;;  %v12558_v27 = vld [vmem:[#allocation12 + $0x838] sm:$0xf0] }
 0x550   : > { %9015 = vmatpush.bf16.msra.mxu2 %v12913_v22  ;;  %9028 = vmatpush.bf16.msra.mxu3 %v13041_v37  ;;  %v17667_v23 = vsel %vm4968_vm9, %v9176_v33, %v9211_v42  ;;  %v8751_v22 = vpop.f32.mrf.mxu1  ;;  %v12974_v37 = vld [vmem:[#allocation12 + $0xb78] sm:$0xf0]  ;;  %v12721_v54 = vor.u32 %v14374_v5, %v12718_v15  ;;  %v14398_v42 = vld [vmem:[#allocation12 + $0xa2c] sm:$0xf] }
 0x551   : > { %8971 = vmatmul.bf16.vlgmr.msrb.gmra.mxu2 %v17183_v58  ;;  %8984 = vmatmul.bf16.vlgmr.msrb.gmra.mxu3 %v17193_v45  ;;  %v12625_v58 = vor.u32 %v14350_v34, %v12622_v61  ;;  %v13009_v45 = vor.u32 %v14446_v52, %v13006_v13  ;;  %v8752_v44 = vadd.f32 %v8751_v22, %v8739_v40  ;;  %v14370_v34 = vld [vmem:[#allocation12 + $0x94c] sm:$0xf]  ;;  %v12830_v61 = vld [vmem:[#allocation12 + $0xa58] sm:$0xf0] }
 0x552   : > { %v12977_v10 = vor.u32 %v14438_v51, %v12974_v37  ;;  %v12686_v62 = vld [vmem:[#allocation12 + $0x938] sm:$0xf0]  ;;  %v14330_v33 = vld [vmem:[#allocation12 + $0x80c] sm:$0xf] }
 0x553   : > { %8990 = vmatpush.bf16.msra.mxu0 %v12641_v6  ;;  %9003 = vmatpush.bf16.msra.mxu1 %v12769_v4  ;;  %v12574_v6 = vld [vmem:[#allocation12 + $0x858] sm:$0xf0]  ;;  %v14362_v0 = vld [vmem:[#allocation12 + $0x90c] sm:$0xf] }
 0x554   : > { %9016 = vmatpush.bf16.msra.mxu2 %v12897_v3  ;;  %9029 = vmatpush.bf16.msra.mxu3 %v13025_v7  ;;  %v8764_v38 = vpop.f32.mrf.mxu2  ;;  %v12702_v4 = vld [vmem:[#allocation12 + $0x958] sm:$0xf0]  ;;  %v14402_v3 = vld [vmem:[#allocation12 + $0xa4c] sm:$0xf]  ;;  %v8777_v7 = vpop.f32.mrf.mxu3  ;;  %v12577_v2 = vor.u32 %v14338_v36, %v12574_v6 }
 0x555   : > { %v8765_v47 = vadd.f32 %v8764_v38, %v8752_v44  ;;  %v8740_v11 = vpop.f32.mrf.mxu0  ;;  %v12705_v52 = vor.u32 %v14370_v34, %v12702_v4  ;;  %v12833_v13 = vor.u32 %v14402_v3, %v12830_v61  ;;  %v12942_v30 = vld [vmem:[#allocation12 + $0xb38] sm:$0xf0]  ;;  %v14426_v40 = vld [vmem:[#allocation12 + $0xb0c] sm:$0xf] }
 0x556   : > { %v12542_v50 = vld [vmem:[#allocation12 + $0x818] sm:$0xf0]  ;;  %v12945_v32 = vor.u32 %v14430_v21, %v12942_v30  ;;  %v14486_v15 = vld [vmem:[#allocation12 + $0xcec] sm:$0xf] }
 0x557   : > { %8991 = vmatpush.bf16.msra.mxu0 %v12625_v58  ;;  %9004 = vmatpush.bf16.msra.mxu1 %v12753_v59  ;;  %v17670_v14 = vadd.f32 %v8777_v7, %v8765_v47  ;;  %v14334_v58 = vld [vmem:[#allocation12 + $0x82c] sm:$0xf]  ;;  %v12798_v5 = vld [vmem:[#allocation12 + $0xa18] sm:$0xf0]  ;;  %v12545_v51 = vor.u32 %v14330_v33, %v12542_v50 }
 0x558   : > { %9017 = vmatpush.bf16.msra.mxu2 %v12881_v39  ;;  %9030 = vmatpush.bf16.msra.mxu3 %v13009_v45  ;;  %v14366_v59 = vld [vmem:[#allocation12 + $0x92c] sm:$0xf]  ;;  %v8753_v39 = vpop.f32.mrf.mxu1  ;;  %v12814_v45 = vld [vmem:[#allocation12 + $0xa38] sm:$0xf0]  ;;  %v12561_v19 = vor.u32 %v14334_v58, %v12558_v27 }
 0x559   : > { %v12689_v28 = vor.u32 %v14366_v59, %v12686_v62  ;;  %v12926_v22 = vld [vmem:[#allocation12 + $0xb18] sm:$0xf0]  ;;  %v14518_v53 = vld [vmem:[#allocation12 + $0xdec] sm:$0xf] }
 0x55a   : > { %v13166_v8 = vld [vmem:[#allocation12 + $0xcf8] sm:$0xf0]  ;;  %v14550_v44 = vld [vmem:[#allocation12 + $0xeec] sm:$0xf]  ;;  %v12929_v34 = vor.u32 %v14426_v40, %v12926_v22 }
 0x55b   : > { %8992 = vmatpush.bf16.msra.mxu0 %v12609_v63  ;;  %9005 = vmatpush.bf16.msra.mxu1 %v12737_v9  ;;  %v12817_v63 = vor.u32 %v14398_v42, %v12814_v45  ;;  %v12670_v9 = vld [vmem:[#allocation12 + $0x918] sm:$0xf0]  ;;  %v14582_v36 = vld [vmem:[#allocation12 + $0xfec] sm:$0xf]  ;;  %v13169_v38 = vor.u32 %v14486_v15, %v13166_v8 }
 0x55c   : > { %9018 = vmatpush.bf16.msra.mxu2 %v12865_v49  ;;  %9031 = vmatpush.bf16.msra.mxu3 %v12993_v24  ;;  %v14394_v49 = vld [vmem:[#allocation12 + $0xa0c] sm:$0xf]  ;;  %v8766_v55 = vpop.f32.mrf.mxu2  ;;  %v8779_v24 = vpop.f32.mrf.mxu3  ;;  %v13294_v37 = vld [vmem:[#allocation12 + $0xdf8] sm:$0xf0] }
 0x55d   : > { %v13550_v6 = vld [vmem:[#allocation12 + $0xff8] sm:$0xf0]  ;;  %v14482_v3 = vld [vmem:[#allocation12 + $0xccc] sm:$0xf] }
 0x55e   : > { %v13150_v61 = vld [vmem:[#allocation12 + $0xcd8] sm:$0xf0]  ;;  %v14514_v47 = vld [vmem:[#allocation12 + $0xdcc] sm:$0xf]  ;;  %v13553_v7 = vor.u32 %v14582_v36, %v13550_v6 }
 0x55f   : > { %8993 = vmatpush.bf16.msra.mxu0 %v12593_v1  ;;  %9006 = vmatpush.bf16.msra.mxu1 %v12721_v54  ;;  %v13422_v1 = vld [vmem:[#allocation12 + $0xef8] sm:$0xf0]  ;;  %v12673_v54 = vor.u32 %v14362_v0, %v12670_v9  ;;  %v14546_v17 = vld [vmem:[#allocation12 + $0xecc] sm:$0xf] }
 0x560   : > { %9019 = vmatpush.bf16.msra.mxu2 %v12849_v26  ;;  %9032 = vmatpush.bf16.msra.mxu3 %v12977_v10  ;;  %v12801_v26 = vor.u32 %v14394_v49, %v12798_v5  ;;  %v13297_v10 = vor.u32 %v14518_v53, %v13294_v37  ;;  %v13425_v4 = vor.u32 %v14550_v44, %v13422_v1  ;;  %v13278_v43 = vld [vmem:[#allocation12 + $0xdd8] sm:$0xf0]  ;;  %v14578_v11 = vld [vmem:[#allocation12 + $0xfcc] sm:$0xf] }
 0x561   : > { %v13281_v58 = vor.u32 %v14514_v47, %v13278_v43  ;;  %v14478_v59 = vld [vmem:[#allocation12 + $0xcac] sm:$0xf]  ;;  %v13134_v39 = vld [vmem:[#allocation12 + $0xcb8] sm:$0xf0] }
 0x562   : > { %v13262_v42 = vld [vmem:[#allocation12 + $0xdb8] sm:$0xf0]  ;;  %v14542_v45 = vld [vmem:[#allocation12 + $0xeac] sm:$0xf]  ;;  %v13137_v33 = vor.u32 %v14478_v59, %v13134_v39 }
 0x563   : > { %8994 = vmatpush.bf16.msra.mxu0 %v12577_v2  ;;  %9007 = vmatpush.bf16.msra.mxu1 %v12705_v52  ;;  %v13406_v2 = vld [vmem:[#allocation12 + $0xed8] sm:$0xf0]  ;;  %v14574_v30 = vld [vmem:[#allocation12 + $0xfac] sm:$0xf] }
 0x564   : > { %9020 = vmatpush.bf16.msra.mxu2 %v12833_v13  ;;  %9033 = vmatpush.bf16.msra.mxu3 %v12961_v48  ;;  %v13534_v52 = vld [vmem:[#allocation12 + $0xfd8] sm:$0xf0]  ;;  %v13153_v13 = vor.u32 %v14482_v3, %v13150_v61  ;;  %v13409_v27 = vor.u32 %v14546_v17, %v13406_v2  ;;  %v14510_v48 = vld [vmem:[#allocation12 + $0xdac] sm:$0xf] }
 0x565   : > { %v13537_v62 = vor.u32 %v14578_v11, %v13534_v52  ;;  %v13390_v21 = vld [vmem:[#allocation12 + $0xeb8] sm:$0xf0]  ;;  %v13265_v50 = vor.u32 %v14510_v48, %v13262_v42  ;;  %v14506_v0 = vld [vmem:[#allocation12 + $0xd8c] sm:$0xf] }
 0x566   : > { %v13246_v49 = vld [vmem:[#allocation12 + $0xd98] sm:$0xf0]  ;;  %v14538_v55 = vld [vmem:[#allocation12 + $0xe8c] sm:$0xf] }
 0x567   : > { %8995 = vmatpush.bf16.msra.mxu0 %v12561_v19  ;;  %9008 = vmatpush.bf16.msra.mxu1 %v12689_v28  ;;  %v13518_v19 = vld [vmem:[#allocation12 + $0xfb8] sm:$0xf0]  ;;  %v13393_v28 = vor.u32 %v14542_v45, %v13390_v21  ;;  %v13249_v24 = vor.u32 %v14506_v0, %v13246_v49  ;;  %v14470_v8 = vld [vmem:[#allocation12 + $0xc6c] sm:$0xf] }
 0x568   : > { %9021 = vmatpush.bf16.msra.mxu2 %v12817_v63  ;;  %9034 = vmatpush.bf16.msra.mxu3 %v12945_v32  ;;  %v14474_v63 = vld [vmem:[#allocation12 + $0xc8c] sm:$0xf]  ;;  %v13521_v9 = vor.u32 %v14574_v30, %v13518_v19  ;;  %v13502_v5 = vld [vmem:[#allocation12 + $0xf98] sm:$0xf0] }
 0x569   : > { %v13102_v53 = vld [vmem:[#allocation12 + $0xc78] sm:$0xf0]  ;;  %v14566_v36 = vld [vmem:[#allocation12 + $0xf6c] sm:$0xf] }
 0x56a   : > { %v13230_v1 = vld [vmem:[#allocation12 + $0xd78] sm:$0xf0]  ;;  %v14498_v3 = vld [vmem:[#allocation12 + $0xd4c] sm:$0xf] }
 0x56b   : > { %8996 = vmatpush.bf16.msra.mxu0 %v12545_v51  ;;  %9009 = vmatpush.bf16.msra.mxu1 %v12673_v54  ;;  %v8790_v32 = vpop.f32.mrf.mxu0  ;;  %v8803_v22 = vpop.f32.mrf.mxu1  ;;  %v14502_v51 = vld [vmem:[#allocation12 + $0xd6c] sm:$0xf]  ;;  %v13486_v6 = vld [vmem:[#allocation12 + $0xf78] sm:$0xf0] }
 0x56c   : > { %9022 = vmatpush.bf16.msra.mxu2 %v12801_v26  ;;  %9035 = vmatpush.bf16.msra.mxu3 %v12929_v34  ;;  %v14534_v54 = vld [vmem:[#allocation12 + $0xe6c] sm:$0xf]  ;;  %v13358_v26 = vld [vmem:[#allocation12 + $0xe78] sm:$0xf0]  ;;  %v13105_v34 = vor.u32 %v14470_v8, %v13102_v53  ;;  %v13489_v61 = vor.u32 %v14566_v36, %v13486_v6 }
 0x56d   : > { %v14530_v43 = vld [vmem:[#allocation12 + $0xe4c] sm:$0xf]  ;;  %v13342_v17 = vld [vmem:[#allocation12 + $0xe58] sm:$0xf0] }
 0x56e   : > { %8997 = vmatmul.bf16.vlgmr.msra.gmra.mxu0 %v17518_v16  ;;  %9010 = vmatmul.bf16.vlgmr.msra.gmra.mxu1 %v17522_v56  ;;  %v13118_v16 = vld [vmem:[#allocation12 + $0xc98] sm:$0xf0]  ;;  %v14570_v56 = vld [vmem:[#allocation12 + $0xf8c] sm:$0xf] }
 0x56f   : > { %9041 = vmatpush.bf16.msrb.mxu0 %v13169_v38  ;;  %9054 = vmatpush.bf16.msrb.mxu1 %v13297_v10  ;;  %v13121_v40 = vor.u32 %v14474_v63, %v13118_v16  ;;  %v13505_v37 = vor.u32 %v14570_v56, %v13502_v5  ;;  %v13361_v38 = vor.u32 %v14534_v54, %v13358_v26  ;;  %v14466_v10 = vld [vmem:[#allocation12 + $0xc4c] sm:$0xf]  ;;  %v13070_v45 = vld [vmem:[#allocation12 + $0xc38] sm:$0xf0] }
 0x570   : > { %9067 = vmatpush.bf16.msrb.mxu2 %v13425_v4  ;;  %9080 = vmatpush.bf16.msrb.mxu3 %v13553_v7  ;;  %v13086_v4 = vld [vmem:[#allocation12 + $0xc58] sm:$0xf0]  ;;  %v14562_v52 = vld [vmem:[#allocation12 + $0xf4c] sm:$0xf] }
 0x571   : > { %9023 = vmatmul.bf16.vlgmr.msra.gmra.mxu2 %v17520_v31  ;;  %9036 = vmatmul.bf16.vlgmr.msra.gmra.mxu3 %v17524_v20  ;;  %v13374_v31 = vld [vmem:[#allocation12 + $0xe98] sm:$0xf0]  ;;  %v8791_v20 = vadd.f32 %v8790_v32, %v17670_v14  ;;  %v13233_v14 = vor.u32 %v14502_v51, %v13230_v1  ;;  %v14462_v42 = vld [vmem:[#allocation12 + $0xc2c] sm:$0xf] }
 0x572   : > { %v13377_v15 = vor.u32 %v14538_v55, %v13374_v31  ;;  %v13214_v7 = vld [vmem:[#allocation12 + $0xd58] sm:$0xf0]  ;;  %v14494_v21 = vld [vmem:[#allocation12 + $0xd2c] sm:$0xf]  ;;  %v13073_v16 = vor.u32 %v14462_v42, %v13070_v45 }
 0x573   : > { %9042 = vmatpush.bf16.msrb.mxu0 %v13153_v13  ;;  %9055 = vmatpush.bf16.msrb.mxu1 %v13281_v58  ;;  %v8804_v44 = vadd.f32 %v8803_v22, %v8791_v20  ;;  %v13470_v13 = vld [vmem:[#allocation12 + $0xf58] sm:$0xf0]  ;;  %v8792_v58 = vpop.f32.mrf.mxu0  ;;  %v8805_v59 = vpop.f32.mrf.mxu1  ;;  %v13217_v48 = vor.u32 %v14498_v3, %v13214_v7  ;;  %v14458_v49 = vld [vmem:[#allocation12 + $0xc0c] sm:$0xf] }
 0x574   : > { %9068 = vmatpush.bf16.msrb.mxu2 %v13409_v27  ;;  %9081 = vmatpush.bf16.msrb.mxu3 %v13537_v62  ;;  %v8816_v47 = vpop.f32.mrf.mxu2  ;;  %v8829_v11 = vpop.f32.mrf.mxu3  ;;  %v13089_v27 = vor.u32 %v14466_v10, %v13086_v4  ;;  %v13345_v62 = vor.u32 %v14530_v43, %v13342_v17  ;;  %v13473_v30 = vor.u32 %v14562_v52, %v13470_v13  ;;  %v13198_v19 = vld [vmem:[#allocation12 + $0xd38] sm:$0xf0]  ;;  %v14490_v31 = vld [vmem:[#allocation12 + $0xd0c] sm:$0xf] }
 0x575   : > { %v8817_v2 = vadd.f32 %v8816_v47, %v8804_v44  ;;  %v13454_v63 = vld [vmem:[#allocation12 + $0xf38] sm:$0xf0]  ;;  %v13201_v0 = vor.u32 %v14494_v21, %v13198_v19  ;;  %v14522_v5 = vld [vmem:[#allocation12 + $0xe0c] sm:$0xf] }
 0x576   : > { %v13054_v55 = vld [vmem:[#allocation12 + $0xc18] sm:$0xf0]  ;;  %v14554_v22 = vld [vmem:[#allocation12 + $0xf0c] sm:$0xf] }
 0x577   : > { %9043 = vmatpush.bf16.msrb.mxu0 %v13137_v33  ;;  %9056 = vmatpush.bf16.msrb.mxu1 %v13265_v50  ;;  %v8830_v39 = vadd.f32 %v8829_v11, %v8817_v2  ;;  %v14526_v33 = vld [vmem:[#allocation12 + $0xe2c] sm:$0xf]  ;;  %v13326_v50 = vld [vmem:[#allocation12 + $0xe38] sm:$0xf0]  ;;  %v13057_v8 = vor.u32 %v14458_v49, %v13054_v55 }
 0x578   : > { %9069 = vmatpush.bf16.msrb.mxu2 %v13393_v28  ;;  %9082 = vmatpush.bf16.msrb.mxu3 %v13521_v9  ;;  %v14558_v28 = vld [vmem:[#allocation12 + $0xf2c] sm:$0xf]  ;;  %v13329_v9 = vor.u32 %v14526_v33, %v13326_v50  ;;  %v13182_v56 = vld [vmem:[#allocation12 + $0xd18] sm:$0xf0] }
 0x579   : > { %v13457_v32 = vor.u32 %v14558_v28, %v13454_v63  ;;  %v13310_v20 = vld [vmem:[#allocation12 + $0xe18] sm:$0xf0]  ;;  %v13185_v53 = vor.u32 %v14490_v31, %v13182_v56 }
 0x57a   : > { %v13313_v51 = vor.u32 %v14522_v5, %v13310_v20 }
 0x57b   : > { %9044 = vmatpush.bf16.msrb.mxu0 %v13121_v40  ;;  %9057 = vmatpush.bf16.msrb.mxu1 %v13249_v24  ;;  %v13438_v24 = vld [vmem:[#allocation12 + $0xf18] sm:$0xf0] }
 0x57c   : > { %9070 = vmatpush.bf16.msrb.mxu2 %v13377_v15  ;;  %9083 = vmatpush.bf16.msrb.mxu3 %v13505_v37  ;;  %v8818_v40 = vpop.f32.mrf.mxu2  ;;  %v8831_v15 = vpop.f32.mrf.mxu3  ;;  %v13441_v37 = vor.u32 %v14554_v22, %v13438_v24 }
 0x57f   : > { %9045 = vmatpush.bf16.msrb.mxu0 %v13105_v34  ;;  %9058 = vmatpush.bf16.msrb.mxu1 %v13233_v14 }
 0x580   : > { %9071 = vmatpush.bf16.msrb.mxu2 %v13361_v38  ;;  %9084 = vmatpush.bf16.msrb.mxu3 %v13489_v61 }
 0x583   : > { %9046 = vmatpush.bf16.msrb.mxu0 %v13089_v27  ;;  %9059 = vmatpush.bf16.msrb.mxu1 %v13217_v48 }
 0x584   : > { %9072 = vmatpush.bf16.msrb.mxu2 %v13345_v62  ;;  %9085 = vmatpush.bf16.msrb.mxu3 %v13473_v30 }
 0x587   : > { %9047 = vmatpush.bf16.msrb.mxu0 %v13073_v16  ;;  %9060 = vmatpush.bf16.msrb.mxu1 %v13201_v0 }
 0x588   : > { %9073 = vmatpush.bf16.msrb.mxu2 %v13329_v9  ;;  %9086 = vmatpush.bf16.msrb.mxu3 %v13457_v32 }
 0x58b   : > { %9048 = vmatpush.bf16.msrb.mxu0 %v13057_v8  ;;  %9061 = vmatpush.bf16.msrb.mxu1 %v13185_v53  ;;  %v8842_v44 = vpop.f32.mrf.mxu0  ;;  %v8855_v54 = vpop.f32.mrf.mxu1 }
 0x58c   : > { %9074 = vmatpush.bf16.msrb.mxu2 %v13313_v51  ;;  %9087 = vmatpush.bf16.msrb.mxu3 %v13441_v37  ;;  %v8843_v1 = vadd.f32 %v8842_v44, %v8830_v39 }
 0x58e   : > { %9049 = vmatmul.bf16.vlgmr.msrb.gmra.mxu0 %v17539_v12  ;;  %9062 = vmatmul.bf16.vlgmr.msrb.gmra.mxu1 %v17543_v35  ;;  %v8856_v26 = vadd.f32 %v8855_v54, %v8843_v1 }
 0x58f   : > { %9075 = vmatmul.bf16.vlgmr.msrb.gmra.mxu2 %v17541_v60  ;;  %9088 = vmatmul.bf16.vlgmr.msrb.gmra.mxu3 %v17545_v57 }
 0x593   : > { %v8844_v14 = vpop.f32.mrf.mxu0  ;;  %v8857_v38 = vpop.f32.mrf.mxu1 }
 0x594   : > { %v8868_v36 = vpop.f32.mrf.mxu2  ;;  %v8881_v34 = vpop.f32.mrf.mxu3 }
 0x595   : > { %v8869_v6 = vadd.f32 %v8868_v36, %v8856_v26 }
 0x597   : > { %v17681_v10 = vadd.f32 %v8881_v34, %v8869_v6 }
 0x599   : > { %v9107_v30 = vrot.slane %v17681_v10, 4  ;;  %v9125_v19 = vmul.f32 %v17681_v10, %v17681_v10 }
 0x59b   : > { %v9108_v0 = vadd.f32 %v9107_v30, %v17681_v10  ;;  %v9139_v9 = vrot.slane %v9125_v19, 4 }
 0x59c   : > { %v8870_v4 = vpop.f32.mrf.mxu2  ;;  %v8883_v3 = vpop.f32.mrf.mxu3 }
 0x59d   : > { %v9109_v55 = vrot.slane %v9108_v0, 2  ;;  %v9140_v31 = vadd.f32 %v9139_v9, %v9125_v19 }
 0x59f   : > { %v9110_v20 = vadd.f32 %v9109_v55, %v9108_v0  ;;  %v9141_v40 = vrot.slane %v9140_v31, 2 }
 0x5a1   : > { %v9111_v24 = vrot.slane %v9110_v20, 1  ;;  %v9142_v15 = vadd.f32 %v9141_v40, %v9140_v31 }
 0x5a3   : > { %v9112_v51 = vadd.f32 %v9111_v24, %v9110_v20  ;;  %v9143_v37 = vrot.slane %v9142_v15, 1 }
 0x5a5   : > { %v9144_v26 = vadd.f32 %v9143_v37, %v9142_v15  ;;  %v17688_v6 = vmul.f32 %v9112_v51, %v16632_v25  ;;  %v9093_v15 = vld [vmem:[#allocation13] sm:$0xf] }
 0x5a7   : > { %v9153_v34 = vmul.f32 %v9144_v26, %v16632_v25  ;;  %v9157_v38 = vmul.f32 %v17688_v6, %v17688_v6 }
 0x5ab   : > { %v8894_v12 = vpop.f32.mrf.mxu0  ;;  %v8907_v61 = vpop.f32.mrf.mxu1 }
 0x5ac   : > { %v8908_v35 = vadd.f32 %v8907_v61, %v8894_v12 }
 0x5b3   : > { %v8896_v43 = vpop.f32.mrf.mxu0  ;;  %v8909_v17 = vpop.f32.mrf.mxu1 }
 0x5b4   : > { %v8920_v47 = vpop.f32.mrf.mxu2  ;;  %v8933_v7 = vpop.f32.mrf.mxu3 }
 0x5b5   : > { %v8921_v60 = vadd.f32 %v8920_v47, %v8908_v35 }
 0x5b7   : > { %v8934_v57 = vadd.f32 %v8933_v7, %v8921_v60  ;;  %v9161_v60 = vsub.f32 %v9153_v34, %v9157_v38 }
 0x5bc   : > { %v8922_v2 = vpop.f32.mrf.mxu2  ;;  %v8935_v11 = vpop.f32.mrf.mxu3 }
 0x5bd   : > { %v9165_v2 = vadd.f32 1e-05, %v9161_v60  ;;  %v9094_v60 = vld [vmem:[#allocation15] sm:$0xf] }
 0x5bf   : > { %14749 = vrsqrt.f32 %v9165_v2  ;;  %vm9193_vm0 = vweird.f32 %v9165_v2 }
 0x5cb   : > { %v8946_v52 = vpop.f32.mrf.mxu0  ;;  %v8959_v13 = vpop.f32.mrf.mxu1 }
 0x5cc   : > { %v8947_v21 = vadd.f32 %v8946_v52, %v8934_v57 }
 0x5ce   : > { %v8960_v63 = vadd.f32 %v8959_v13, %v8947_v21 }
 0x5d3   : > { %v8948_v59 = vpop.f32.mrf.mxu0  ;;  %v8961_v39 = vpop.f32.mrf.mxu1 }
 0x5d4   : > { %v8972_v58 = vpop.f32.mrf.mxu2  ;;  %v8985_v27 = vpop.f32.mrf.mxu3 }
 0x5d5   : > { %v8973_v49 = vadd.f32 %v8972_v58, %v8960_v63 }
 0x5d7   : > { %v8986_v5 = vadd.f32 %v8985_v27, %v8973_v49 }
 0x5dc   : > { %v8974_v48 = vpop.f32.mrf.mxu2  ;;  %v8987_v62 = vpop.f32.mrf.mxu3 }
 0x5eb   : > { %v8998_v42 = vpop.f32.mrf.mxu0  ;;  %v9011_v45 = vpop.f32.mrf.mxu1 }
 0x5ec   : > { %v8999_v22 = vadd.f32 %v8998_v42, %v8986_v5 }
 0x5ee   : > { %v9012_v8 = vadd.f32 %v9011_v45, %v8999_v22  ;;  %v14750_v45 = vpop.eup %14749 }
 0x5ef   : > { %vm9194_vm10 = vweird.f32 %v14750_v45 }
 0x5f0   : > { %vm9195_vm15 = vmor %vm9193_vm0, %vm9194_vm10 }
 0x5f3   : > { %v9000_v28 = vpop.f32.mrf.mxu0  ;;  %v9013_v16 = vpop.f32.mrf.mxu1 }
 0x5f4   : > { %v9024_v33 = vpop.f32.mrf.mxu2  ;;  %v9037_v50 = vpop.f32.mrf.mxu3 }
 0x5f5   : > { %v9025_v53 = vadd.f32 %v9024_v33, %v9012_v8 }
 0x5f7   : > { %v9038_v44 = vadd.f32 %v9037_v50, %v9025_v53  ;;  %v9188_v50 = vmul.f32 %v14750_v45, %v9165_v2 }
 0x5f9   : > { %v9189_v16 = vmul.f32 %v14750_v45, %v9188_v50 }
 0x5fb   : > { %v9190_v0 = vmul.f32 0.5, %v9189_v16 }
 0x5fc   : > { %v9026_v32 = vpop.f32.mrf.mxu2  ;;  %v9039_v56 = vpop.f32.mrf.mxu3 }
 0x5fd   : > { %v9191_v49 = vsub.f32 1.5, %v9190_v0 }
 0x5ff   : > { %v9192_v32 = vmul.f32 %v14750_v45, %v9191_v49 }
 0x601   : > { %v9196_v20 = vsel %vm9195_vm15, %v14750_v45, %v9192_v32 }
 0x602   : > { %v9212_v22 = vrot.slane %v9196_v20, 6 }
 0x60b   : > { %v9050_v1 = vpop.f32.mrf.mxu0  ;;  %v9063_v54 = vpop.f32.mrf.mxu1 }
 0x60c   : > { %v9051_v36 = vadd.f32 %v9050_v1, %v9038_v44 }
 0x60e   : > { %v9064_v14 = vadd.f32 %v9063_v54, %v9051_v36 }
 0x612   : > { %v9076_v4 = vpop.f32.mrf.mxu2  ;;  %v9089_v12 = vpop.f32.mrf.mxu3 }
 0x613   : > { %v9077_v3 = vadd.f32 %v9076_v4, %v9064_v14  ;;  %v9052_v61 = vpop.f32.mrf.mxu0  ;;  %v9065_v35 = vpop.f32.mrf.mxu1 }
 0x615   : > { %v9090_v47 = vadd.f32 %v9089_v12, %v9077_v3 }
 0x617   : > { %v9113_v7 = vrot.slane %v9090_v47, 4  ;;  %v9126_v57 = vmul.f32 %v9090_v47, %v9090_v47 }
 0x619   : > { %v9114_v43 = vadd.f32 %v9113_v7, %v9090_v47  ;;  %v9145_v17 = vrot.slane %v9126_v57, 4 }
 0x61a   : > { %v9078_v11 = vpop.f32.mrf.mxu2  ;;  %v9091_v58 = vpop.f32.mrf.mxu3 }
 0x61b   : > { %v9115_v52 = vrot.slane %v9114_v43, 2  ;;  %v9146_v13 = vadd.f32 %v9145_v17, %v9126_v57 }
 0x61d   : > { %v9116_v27 = vadd.f32 %v9115_v52, %v9114_v43  ;;  %v9147_v59 = vrot.slane %v9146_v13, 2 }
 0x61f   : > { %v9117_v39 = vrot.slane %v9116_v27, 1  ;;  %v9148_v48 = vadd.f32 %v9147_v59, %v9146_v13 }
 0x621   : > { %v9118_v62 = vadd.f32 %v9117_v39, %v9116_v27  ;;  %v9149_v42 = vrot.slane %v9148_v48, 1 }
 0x623   : > { %v9150_v21 = vadd.f32 %v9149_v42, %v9148_v48  ;;  %v9122_v30 = vmul.f32 %v9118_v62, %v16632_v25 }
 0x625   : > { %v9154_v19 = vmul.f32 %v9150_v21, %v16632_v25  ;;  %v9158_v33 = vmul.f32 %v9122_v30, %v9122_v30 }
 0x627   : > { %v9162_v28 = vsub.f32 %v9154_v19, %v9158_v33 }
 0x629   : > { %v9166_v63 = vadd.f32 1e-05, %v9162_v28  ;;  %v14710_v28 = vld [vmem:[#allocation3] ss:$0 sm:$0xff] }
 0x62b   : > { %14751 = vrsqrt.f32 %v9166_v63  ;;  %vm9203_vm2 = vweird.f32 %v9166_v63 }
 0x631   : > { %v14752_v9 = vpop.eup %14751 }
 0x632   : > { %v9198_v55 = vmul.f32 %v14752_v9, %v9166_v63  ;;  %vm9204_vm1 = vweird.f32 %v14752_v9 }
 0x633   : > { %vm9205_vm3 = vmor %vm9203_vm2, %vm9204_vm1 }
 0x634   : > { %v9199_v31 = vmul.f32 %v14752_v9, %v9198_v55 }
 0x636   : > { %v9200_v56 = vmul.f32 0.5, %v9199_v31 }
 0x638   : > { %v9201_v5 = vsub.f32 1.5, %v9200_v56 }
 0x63a   : > { %v9202_v25 = vmul.f32 %v14752_v9, %v9201_v5 }
 0x63c   : > { %v9206_v40 = vsel %vm9205_vm3, %v14752_v9, %v9202_v25 }
 0x63d   : > { %v9213_v24 = vrot.slane %v9206_v40, 5 }
 0x63f   : > { %v9215_v8 = vsel %vm4970_vm8, %v9212_v22, %v9213_v24 }
 0x640   : > { %v9216_v53 = vsel %vm4972_vm11, %v17667_v23, %v9215_v8 }
 0x641   : > { %v9218_v51 = vmul.f32 %v9216_v53, %v9093_v15 }
 0x643   : > { %v9220_v37 = vperm.slane %v9218_v51, 0  ;;  %v9221_v44 = vperm.slane %v9218_v51, 1  ;;  %v9222_v1 = vperm.slane %v9218_v51, 2  ;;  %v9223_v54 = vperm.slane %v9218_v51, 3 }
 0x645   : > { %v9228_v26 = vmul.f32 %v9220_v37, %v17602_v18  ;;  %v9229_v36 = vmul.f32 %v9221_v44, %v17616_v46  ;;  %v9230_v34 = vmul.f32 %v9222_v1, %v17688_v6  ;;  %v9231_v14 = vmul.f32 %v9223_v54, %v9122_v30  ;;  %v9269_v6 = vld [vmem:[#allocation16] sm:$0xf] }
 0x646   : > { %v9244_v38 = vmul.f32 %v9220_v37, %v17570_v29  ;;  %v9245_v4 = vmul.f32 %v9221_v44, %v17604_v41  ;;  %v9246_v3 = vmul.f32 %v9222_v1, %v17681_v10  ;;  %v9247_v12 = vmul.f32 %v9223_v54, %v9090_v47 }
 0x647   : > { %v9236_v23 = vrot.slane %v9229_v36, 7  ;;  %v9237_v61 = vrot.slane %v9230_v34, 6  ;;  %v9238_v35 = vrot.slane %v9231_v14, 5  ;;  %v9271_v41 = vperm.slane %v9269_v6, 0 }
 0x648   : > { %v9272_v11 = vperm.slane %v9269_v6, 1  ;;  %v9273_v39 = vperm.slane %v9269_v6, 2  ;;  %v9274_v62 = vperm.slane %v9269_v6, 3 }
 0x649   : > { %v9239_v7 = vsel %vm4968_vm9, %v9228_v26, %v9236_v23  ;;  %v9240_v18 = vsel %vm4970_vm8, %v9237_v61, %v9238_v35  ;;  %vm9293_vm9 = vcmask 7168  }
 0x64a   : > { %v9241_v46 = vsel %vm4972_vm11, %v9239_v7, %v9240_v18 }
 0x64b   : > { %v9243_v57 = vsub.f32 %v9094_v60, %v9241_v46 }
 0x64d   : > { %v9249_v43 = vperm.slane %v9243_v57, 0  ;;  %v9250_v17 = vperm.slane %v9243_v57, 1  ;;  %v9251_v29 = vperm.slane %v9243_v57, 2  ;;  %v9252_v2 = vperm.slane %v9243_v57, 3 }
 0x64f   : > { %v9257_v10 = vadd.f32 %v9249_v43, %v9244_v38  ;;  %v9258_v47 = vadd.f32 %v9250_v17, %v9245_v4  ;;  %v9259_v52 = vadd.f32 %v9251_v29, %v9246_v3  ;;  %v9260_v13 = vadd.f32 %v9252_v2, %v9247_v12 }
 0x651   : > { %v9261_v58 = vmax.f32 %v9257_v10, 0.0  ;;  %v9262_v27 = vmax.f32 %v9258_v47, 0.0  ;;  %v9263_v59 = vmax.f32 %v9259_v52, 0.0  ;;  %v9264_v48 = vmax.f32 %v9260_v13, 0.0 }
 0x653   : > { %9265 = vst [vmem:[#allocation18] sm:$0xff] %v9261_v58  ;;  %v9279_v42 = vmul.f32 %v9271_v41, %v9261_v58  ;;  %v9280_v45 = vmul.f32 %v9272_v11, %v9262_v27  ;;  %v9281_v21 = vmul.f32 %v9273_v39, %v9263_v59  ;;  %v9282_v19 = vmul.f32 %v9274_v62, %v9264_v48 }
 0x654   : > { %9266 = vst [vmem:[#allocation18 + $0x8] sm:$0xff] %v9262_v27 }
 0x655   : > { %9267 = vst [vmem:[#allocation18 + $0x10] sm:$0xff] %v9263_v59  ;;  %v9283_v30 = vadd.f32 %v9280_v45, %v9279_v42 }
 0x656   : > { %9268 = vst [vmem:[#allocation18 + $0x18] sm:$0xff] %v9264_v48 }
 0x657   : > { %v9284_v33 = vadd.f32 %v9283_v30, %v9281_v21 }
 0x659   : > { %v9285_v50 = vadd.f32 %v9284_v33, %v9282_v19 }
 0x65b   : > { %9286 = vadd.xlane.f32.xlu0 %v9285_v50 }
 0x6ce   : > { %v9287_v63 = vpop.xlane.xlu0 %9286 }
 0x6cf   : > { %v9292_v16 = vadd.f32 %v14710_v28, %v9287_v63 }
 0x6d1   : > { %9294 = vst.msk [vmem:[%s17736_s9] sm:$0xff] %vm9293_vm9, %v9292_v16 }
 0x6d2 PF: > { %p14660_p3 = scmp.eq.s32.totalorder %s15183_s21, 1  ;;  %s15100_s14 = smov [#allocation18]  }
 0x6d3   : > { %s9304_s8 = sshll.u32 %s15100_s14, 4  ;;  %s9306_s11 = sshll.u32 %s17737_s10, 4  ;;  %s9305_s8 = int_to_ptr.vmem [resolvable:$true] %s9304_s8  ;;  %s9307_s11 = int_to_ptr.hbm [resolvable:$true] %s9306_s11 }
 0x6d4   : > { %14616 = dma.vmem_to_hbm [thread:$0]  (%p14660_p3), %s9305_s8, 512, %s9307_s11, [#allocation6]  }
 0x6d5   : > { %15066 = dma.done.wait (%p14660_p3), [#allocation6], 512  }
 0x6d6   : > { %15068 = vsyncadd (%p14660_p3), [#allocation6], 4294966784 }
 0x6d7 PF: > { %p28_p4 = scmp.ge.s32.totalorder %s15234_s30, 4   ;;  %s17886_s15 = smov %s15075_s16 }
 0x6d8   : > { %s17887_s16 = smov %s15079_s17  ;;  %s17888_s17 = smov %s15245_s23 }
 0x6d9   : > { %s17889_s18 = smov %s15234_s30  ;;  %30 = sbr.rel (!%p28_p4) target bundleno = 11 (0xb), region = 139 }
 0x6de   :  { %9323 = vsyncpa [#allocation5], 1 }
 0x6df   :  { %9325 = vsyncpa [#allocation5 + $0x1], 1 }
 0x6e0   :  { %9326 = vsyncpa [#allocation8], 1 }
 0x6e1   :  { %9328 = vsyncpa [#allocation8 + $0x1], 1 }
 0x6e2   :  { %9329 = vsyncpa [#allocation11], 1 }
 0x6e3   :  { %9330 = vsyncpa [#allocation14], 1 }
 0x6e4   :  { %9331 = vsyncpa [#allocation17], 1 }
 0x6e5   :  { %9332 = vsyncpa [#allocation6], 1 }
 0x6e6   :  { %9334 = vsyncpa [#allocation6 + $0x1], 1 }

</bundles_post_ra>
